<compile_context>
chip_gen: v5e
topology: v5e:2x2
jax: 0.10.0
libtpu: 0.0.40
codegen_flags: <defaults>
</compile_context>

<pallas_src>
import functools
import math

import jax
import jax.numpy as jnp
from jax.experimental import pallas as pl
from jax.experimental.pallas import tpu as pltpu

F32 = jnp.float32
BF16 = jnp.bfloat16

# NOTE: -1e9 instead of -inf so fully-masked rows give a uniform softmax
# instead of NaN (deliberate, documented deviation from PyTorch).
_NEG_INF = -1e9

_COMPILER_PARAMS = pltpu.CompilerParams(
    dimension_semantics=("parallel",),      # batch grid axis -> megacore sharding
    vmem_limit_bytes=48 * 1024 * 1024,      # explicit budget; fits v7x (64 MiB VMEM)
)


# ----------------------- in-kernel building blocks -----------------------

def _layer_norm(y, g, b):
    mu = jnp.mean(y, axis=-1, keepdims=True)
    var = jnp.mean((y - mu) ** 2, axis=-1, keepdims=True)
    return (y - mu) * jax.lax.rsqrt(var + 1e-5) * g + b


def _attention(xq, xkv, add_mask, wq, bq, wk, bk, wv, bv, wo, bo,
               *, nhead, need_weights):
    """Multi-head attention (bf16 MXU matmuls, f32 accumulation / softmax).

    xq: (Tq, E) f32, xkv: (Tk, E) f32, add_mask broadcastable to (Tq, Tk).
    Returns (out (Tq, E) f32, head-averaged weights (Tq, Tk) f32 or None).
    """
    tq, e = xq.shape
    tk = xkv.shape[0]
    dh = e // nhead
    scale = 1.0 / math.sqrt(dh)

    xqb = xq.astype(BF16)
    xkb = xkv.astype(BF16)
    # Separate Q/K/V weights: q/k/v are born in their own tiles (no
    # lane-unaligned splits of a fused (E, 3E) matmul result).
    q = jnp.dot(xqb, wq, preferred_element_type=F32) + bq          # (Tq, E)
    k = jnp.dot(xkb, wk, preferred_element_type=F32) + bk          # (Tk, E)
    v = jnp.dot(xkb, wv, preferred_element_type=F32) + bv          # (Tk, E)

    # Head-major layout -> one batched MXU matmul for QK^T and one for PV
    # (no per-head lane-slice loop on the VPU/XLU path).
    qh = jnp.swapaxes(q.reshape(tq, nhead, dh), 0, 1)              # (H, Tq, dh)
    kh = jnp.swapaxes(k.reshape(tk, nhead, dh), 0, 1)              # (H, Tk, dh)
    vh = jnp.swapaxes(v.reshape(tk, nhead, dh), 0, 1)              # (H, Tk, dh)

    s = jnp.einsum('hqd,hkd->hqk', qh.astype(BF16), kh.astype(BF16),
                   preferred_element_type=F32) * scale
    s = s + add_mask                                               # (H, Tq, Tk)
    s = s - jnp.max(s, axis=-1, keepdims=True)
    p = jnp.exp(s)
    # Exact normalization (returned attention weights must sum to 1 per row).
    p = p / jnp.sum(p, axis=-1, keepdims=True)

    o = jnp.einsum('hqk,hkd->hqd', p.astype(BF16), vh.astype(BF16),
                   preferred_element_type=F32)                     # (H, Tq, dh)
    o = jnp.swapaxes(o, 0, 1).reshape(tq, e)      # concat heads in VMEM -> (Tq, E)
    # Single output projection with K = E (not nhead tiny K=dh matmuls).
    y = jnp.dot(o.astype(BF16), wo, preferred_element_type=F32) + bo
    w = jnp.mean(p, axis=0) if need_weights else None
    return y, w


def _ffn(x, w1, b1, w2, b2):
    h = jnp.dot(x.astype(BF16), w1, preferred_element_type=F32) + b1
    h = jnp.maximum(h, 0.0)                       # ReLU (nn.Transformer default)
    return jnp.dot(h.astype(BF16), w2, preferred_element_type=F32) + b2


# ------------------------------ stack kernels ------------------------------

def _encoder_kernel(x_ref, pad_ref,
                    wq, bq, wk, bk, wv, bv, wo, bo, ln1g, ln1b,
                    w1, b1, w2, b2, ln2g, ln2b,
                    fng, fnb, out_ref, *, nhead, num_layers):
    """Whole encoder stack for one batch element (post-LN layers + final LN)."""
    x = x_ref[...].astype(F32)                    # (S, E) residual stream
    add_mask = pad_ref[...]                       # (1, S) additive key padding
    for l in range(num_layers):                   # static unroll over layers
        y, _ = _attention(x, x, add_mask,
                          wq[l], bq[l], wk[l], bk[l], wv[l], bv[l],
                          wo[l], bo[l], nhead=nhead, need_weights=False)
        x = _layer_norm(x + y, ln1g[l], ln1b[l])
        y = _ffn(x, w1[l], b1[l], w2[l], b2[l])
        x = _layer_norm(x + y, ln2g[l], ln2b[l])
    x = _layer_norm(x, fng[...], fnb[...])        # final encoder LayerNorm
    out_ref[...] = x.astype(out_ref.dtype)


def _decoder_kernel(x_ref, mem_ref, tmask_ref, tpad_ref, mpad_ref,
                    s_wq, s_bq, s_wk, s_bk, s_wv, s_bv, s_wo, s_bo, ln1g, ln1b,
                    c_wq, c_bq, c_wk, c_bk, c_wv, c_bv, c_wo, c_bo, ln2g, ln2b,
                    w1, b1, w2, b2, ln3g, ln3b,
                    fng, fnb, fcw, fcb,
                    logits_ref, attnw_ref, *, nhead, num_layers):
    """Whole decoder stack + final LN + (lane-padded) vocab projection."""
    x = x_ref[...].astype(F32)                    # (T, E)
    mem = mem_ref[...].astype(F32)                # (S, E)
    self_mask = tmask_ref[...] + tpad_ref[...]    # (T, T) user mask + key padding
    cross_mask = mpad_ref[...]                    # (1, S) memory key padding
    for l in range(num_layers):
        y, _ = _attention(x, x, self_mask,
                          s_wq[l], s_bq[l], s_wk[l], s_bk[l],
                          s_wv[l], s_bv[l], s_wo[l], s_bo[l],
                          nhead=nhead, need_weights=False)
        x = _layer_norm(x + y, ln1g[l], ln1b[l])
        y, w = _attention(x, mem, cross_mask,
                          c_wq[l], c_bq[l], c_wk[l], c_bk[l],
                          c_wv[l], c_bv[l], c_wo[l], c_bo[l],
                          nhead=nhead, need_weights=True)
        attnw_ref[l] = w.astype(attnw_ref.dtype)  # head-averaged (T, S)
        x = _layer_norm(x + y, ln2g[l], ln2b[l])
        y = _ffn(x, w1[l], b1[l], w2[l], b2[l])
        x = _layer_norm(x + y, ln3g[l], ln3b[l])
    x = _layer_norm(x, fng[...], fnb[...])        # final decoder LayerNorm
    logits_ref[...] = (jnp.dot(x.astype(BF16), fcw[...],
                               preferred_element_type=F32)
                       + fcb[...]).astype(logits_ref.dtype)


# ------------------------------ call wrappers ------------------------------

def _full_spec(arr):
    """Whole-array block, same block every grid step (weights / biases)."""
    nd = arr.ndim
    return pl.BlockSpec(arr.shape, lambda b, _nd=nd: (0,) * _nd)


def encoder_forward(src_x, src_pad, ep, enc_g, enc_b, *, nhead):
    """src_x: (B, S, E) bf16, src_pad: (B, 1, S) f32 additive."""
    B, S, E = src_x.shape
    num_layers = ep['wq'].shape[0]
    weights = [ep['wq'], ep['bq'], ep['wk'], ep['bk'], ep['wv'], ep['bv'],
               ep['wo'], ep['bo'], ep['ln1_g'], ep['ln1_b'],
               ep['w1'], ep['b1'], ep['w2'], ep['b2'],
               ep['ln2_g'], ep['ln2_b'], enc_g, enc_b]
    in_specs = [pl.BlockSpec((None, S, E), lambda b: (b, 0, 0)),
                pl.BlockSpec((None, 1, S), lambda b: (b, 0, 0))]
    in_specs += [_full_spec(a) for a in weights]
    kernel = functools.partial(_encoder_kernel, nhead=nhead,
                               num_layers=num_layers)
    return pl.pallas_call(
        kernel,
        out_shape=jax.ShapeDtypeStruct((B, S, E), BF16),
        grid=(B,),
        in_specs=in_specs,
        out_specs=pl.BlockSpec((None, S, E), lambda b: (b, 0, 0)),
        compiler_params=_COMPILER_PARAMS,
    )(src_x, src_pad, *weights)


def decoder_forward(tgt_x, memory, tgt_mask2d, tgt_pad, mem_pad, dp,
                    dec_g, dec_b, fc_w, fc_b, *, nhead):
    """tgt_x: (B, T, E) bf16, memory: (B, S, E) bf16, tgt_mask2d: (T, T) f32,
    tgt_pad: (B, 1, T) f32, mem_pad: (B, 1, S) f32."""
    B, T, E = tgt_x.shape
    S = memory.shape[1]
    num_layers = dp['s_wq'].shape[0]
    Vp = fc_w.shape[1]
    weights = [dp['s_wq'], dp['s_bq'], dp['s_wk'], dp['s_bk'],
               dp['s_wv'], dp['s_bv'], dp['s_wo'], dp['s_bo'],
               dp['ln1_g'], dp['ln1_b'],
               dp['c_wq'], dp['c_bq'], dp['c_wk'], dp['c_bk'],
               dp['c_wv'], dp['c_bv'], dp['c_wo'], dp['c_bo'],
               dp['ln2_g'], dp['ln2_b'],
               dp['w1'], dp['b1'], dp['w2'], dp['b2'],
               dp['ln3_g'], dp['ln3_b'],
               dec_g, dec_b, fc_w, fc_b]
    in_specs = [pl.BlockSpec((None, T, E), lambda b: (b, 0, 0)),   # tgt
                pl.BlockSpec((None, S, E), lambda b: (b, 0, 0)),   # memory
                pl.BlockSpec((T, T), lambda b: (0, 0)),            # tgt_mask
                pl.BlockSpec((None, 1, T), lambda b: (b, 0, 0)),   # tgt key pad
                pl.BlockSpec((None, 1, S), lambda b: (b, 0, 0))]   # mem key pad
    in_specs += [_full_spec(a) for a in weights]
    kernel = functools.partial(_decoder_kernel, nhead=nhead,
                               num_layers=num_layers)
    return pl.pallas_call(
        kernel,
        out_shape=(jax.ShapeDtypeStruct((B, T, Vp), F32),
                   jax.ShapeDtypeStruct((B, num_layers, T, S), F32)),
        grid=(B,),
        in_specs=in_specs,
        out_specs=(pl.BlockSpec((None, T, Vp), lambda b: (b, 0, 0)),
                   pl.BlockSpec((None, num_layers, T, S),
                                lambda b: (b, 0, 0, 0))),
        compiler_params=_COMPILER_PARAMS,
    )(tgt_x, memory, tgt_mask2d, tgt_pad, mem_pad, *weights)


# --------------------------------- helpers ---------------------------------

def make_positional_encoding(max_len, d_model):
    position = jnp.arange(max_len, dtype=F32)[:, None]
    div_term = jnp.exp(jnp.arange(0, d_model, 2, dtype=F32)
                       * (-math.log(10000.0) / d_model))
    pe = jnp.zeros((max_len, d_model), F32)
    pe = pe.at[:, 0::2].set(jnp.sin(position * div_term))
    pe = pe.at[:, 1::2].set(jnp.cos(position * div_term))
    return pe                                              # (max_len, E)


# ------------------------------ full forward ------------------------------

@functools.partial(jax.jit, static_argnames=("d_model", "nhead"))
def score_transformer_forward(params, src_tok, tgt_tok,
                              src_key_padding_mask, tgt_key_padding_mask,
                              memory_key_padding_mask, tgt_mask,
                              *, d_model, nhead):
    N, S = src_tok.shape
    T = tgt_tok.shape[1]
    vocab_size = params['embedding'].shape[0]

    emb = params['embedding']
    pe = params['pe']
    scale = math.sqrt(d_model)
    # batch-first (N, T, E) layout (equivalent to PyTorch's seq-first);
    # bf16 activations between the two pallas_calls (v5e HBM-BW friendly).
    src_x = (jnp.take(emb, src_tok, axis=0) * scale + pe[:S][None]).astype(BF16)
    tgt_x = (jnp.take(emb, tgt_tok, axis=0) * scale + pe[:T][None]).astype(BF16)
    # pos_dropout / trans_dropout: identity (inference)

    # Key-padding masks become tiny additive (B, 1, Tk) rows; the (B, Tq, Tk)
    # masks are never materialized — they're broadcast inside the kernels.
    src_pad = jnp.where(src_key_padding_mask, _NEG_INF, 0.0).astype(F32)[:, None, :]
    tgt_pad = jnp.where(tgt_key_padding_mask, _NEG_INF, 0.0).astype(F32)[:, None, :]
    mem_pad = jnp.where(memory_key_padding_mask, _NEG_INF, 0.0).astype(F32)[:, None, :]
    tmask = tgt_mask[0].astype(F32)                        # (T, T) additive

    # Encoder stack: ONE pallas_call.
    memory = encoder_forward(src_x, src_pad, params['enc'],
                             params['enc_norm_g'], params['enc_norm_b'],
                             nhead=nhead)

    # Decoder stack + final LN + vocab head: ONE pallas_call.
    logits_pad, attention_weight = decoder_forward(
        tgt_x, memory, tmask, tgt_pad, mem_pad, params['dec'],
        params['dec_norm_g'], params['dec_norm_b'],
        params['fc_w'], params['fc_b'], nhead=nhead)

    # vocab projection is lane-padded to a multiple of 128 inside the kernel;
    # slice back to the true vocab size here.
    logits = logits_pad[..., :vocab_size]
    return logits, attention_weight                        # (N,T,V), (N,L,T,S)


# ---------------------------- parameter init ----------------------------

def init_params(key, vocab_size, d_model, nhead, num_enc, num_dec,
                dim_ff, max_seq_length):
    E, FF = d_model, dim_ff
    keys = iter(jax.random.split(key, 64))

    def w(shape, dtype=BF16):
        # matmul weights stored in bf16 (MXU-native); biases / LN params f32
        return (0.02 * jax.random.normal(next(keys), shape, F32)).astype(dtype)

    def stack_attn(L, prefix=""):
        return {
            prefix + 'wq': w((L, E, E)), prefix + 'bq': jnp.zeros((L, 1, E), F32),
            prefix + 'wk': w((L, E, E)), prefix + 'bk': jnp.zeros((L, 1, E), F32),
            prefix + 'wv': w((L, E, E)), prefix + 'bv': jnp.zeros((L, 1, E), F32),
            prefix + 'wo': w((L, E, E)), prefix + 'bo': jnp.zeros((L, 1, E), F32),
        }

    def stack_ffn(L):
        return {'w1': w((L, E, FF)), 'b1': jnp.zeros((L, 1, FF), F32),
                'w2': w((L, FF, E)), 'b2': jnp.zeros((L, 1, E), F32)}

    def stack_ln(L, name):
        return {name + '_g': jnp.ones((L, 1, E), F32),
                name + '_b': jnp.zeros((L, 1, E), F32)}

    enc = {}
    enc.update(stack_attn(num_enc))
    enc.update(stack_ln(num_enc, 'ln1'))
    enc.update(stack_ffn(num_enc))
    enc.update(stack_ln(num_enc, 'ln2'))

    dec = {}
    dec.update(stack_attn(num_dec, 's_'))
    dec.update(stack_ln(num_dec, 'ln1'))
    dec.update(stack_attn(num_dec, 'c_'))
    dec.update(stack_ln(num_dec, 'ln2'))
    dec.update(stack_ffn(num_dec))
    dec.update(stack_ln(num_dec, 'ln3'))

    # vocab projection padded to a multiple of 128 lanes (dense vst stores);
    # padded columns are zero and are sliced off wrapper-side.
    vpad = ((vocab_size + 127) // 128) * 128
    fc_w = jnp.zeros((E, vpad), F32).at[:, :vocab_size].set(
        0.02 * jax.random.normal(next(keys), (E, vocab_size), F32)).astype(BF16)
    fc_b = jnp.zeros((1, vpad), F32)

    return dict(
        embedding=0.02 * jax.random.normal(next(keys), (vocab_size, E), F32),
        pe=make_positional_encoding(max_seq_length, E),
        enc=enc, dec=dec,
        enc_norm_g=jnp.ones((1, E), F32), enc_norm_b=jnp.zeros((1, E), F32),
        dec_norm_g=jnp.ones((1, E), F32), dec_norm_b=jnp.zeros((1, E), F32),
        fc_w=fc_w, fc_b=fc_b,
    )


# --------------------------------- main ---------------------------------

if __name__ == "__main__":
    vocab_size = 50
    d_model = 32
    nhead = 4
    num_encoder_layers = 2
    num_decoder_layers = 2
    dim_feedforward = 64
    max_seq_length = 100

    N, S, T = 2, 8, 8                     # batch, src len, tgt len

    key = jax.random.PRNGKey(0)
    kp, ks, kt = jax.random.split(key, 3)

    params = init_params(kp, vocab_size, d_model, nhead,
                         num_encoder_layers, num_decoder_layers,
                         dim_feedforward, max_seq_length)

    src = jax.random.randint(ks, (N, S), 0, vocab_size, dtype=jnp.int32)
    tgt = jax.random.randint(kt, (N, T), 0, vocab_size, dtype=jnp.int32)

    # key padding masks: True == ignore this position (pad last src pos of batch 1)
    src_key_padding_mask = jnp.zeros((N, S), bool).at[1, S - 1].set(True)
    tgt_key_padding_mask = jnp.zeros((N, T), bool)
    memory_key_padding_mask = src_key_padding_mask

    # causal (square subsequent) additive mask, 1-batch stack -> forward uses [0]
    causal = jnp.where(jnp.triu(jnp.ones((T, T), bool), k=1),
                       _NEG_INF, 0.0).astype(F32)
    tgt_mask = causal[None]

    logits, attn_w = score_transformer_forward(
        params, src, tgt,
        src_key_padding_mask, tgt_key_padding_mask,
        memory_key_padding_mask, tgt_mask,
        d_model=d_model, nhead=nhead)

    logits, attn_w = jax.block_until_ready((logits, attn_w))

    assert logits.shape == (N, T, vocab_size), logits.shape
    assert attn_w.shape == (N, num_decoder_layers, T, S), attn_w.shape
    assert bool(jnp.all(jnp.isfinite(logits)))
    assert bool(jnp.all(jnp.isfinite(attn_w)))
    # cross-attention rows must sum to ~1 (exact softmax normalization)
    row_sums = jnp.sum(attn_w, axis=-1)
    assert bool(jnp.all(jnp.abs(row_sums - 1.0) < 1e-3)), row_sums

    print("KERNEL_OK")
</pallas_src>

<mosaic_0001>
module attributes {stable_mosaic.version = 11 : i64} {
  func.func @_encoder_kernel(%arg0: i32, %arg1: memref<1x8x32xbf16, #tpu.memory_space<vmem>>, %arg2: memref<1x1x8xf32, #tpu.memory_space<vmem>>, %arg3: memref<2x32x32xbf16, #tpu.memory_space<vmem>>, %arg4: memref<2x1x32xf32, #tpu.memory_space<vmem>>, %arg5: memref<2x32x32xbf16, #tpu.memory_space<vmem>>, %arg6: memref<2x1x32xf32, #tpu.memory_space<vmem>>, %arg7: memref<2x32x32xbf16, #tpu.memory_space<vmem>>, %arg8: memref<2x1x32xf32, #tpu.memory_space<vmem>>, %arg9: memref<2x32x32xbf16, #tpu.memory_space<vmem>>, %arg10: memref<2x1x32xf32, #tpu.memory_space<vmem>>, %arg11: memref<2x1x32xf32, #tpu.memory_space<vmem>>, %arg12: memref<2x1x32xf32, #tpu.memory_space<vmem>>, %arg13: memref<2x32x64xbf16, #tpu.memory_space<vmem>>, %arg14: memref<2x1x64xf32, #tpu.memory_space<vmem>>, %arg15: memref<2x64x32xbf16, #tpu.memory_space<vmem>>, %arg16: memref<2x1x32xf32, #tpu.memory_space<vmem>>, %arg17: memref<2x1x32xf32, #tpu.memory_space<vmem>>, %arg18: memref<2x1x32xf32, #tpu.memory_space<vmem>>, %arg19: memref<1x32xf32, #tpu.memory_space<vmem>>, %arg20: memref<1x32xf32, #tpu.memory_space<vmem>>, %arg21: memref<1x8x32xbf16, #tpu.memory_space<vmem>>) attributes {dimension_semantics = [#tpu.dimension_semantics<parallel>], iteration_bounds = array<i64: 2>, scalar_prefetch = 0 : i64, scratch_operands = 0 : i64, tpu.core_type = #tpu.core_type<tc>, window_params = [{transform_indices = @transform_0, window_bounds = array<i64: 1, 8, 32>}, {transform_indices = @transform_1, window_bounds = array<i64: 1, 1, 8>}, {pipeline_mode = #tpu.pipeline_mode<synchronous>, transform_indices = @transform_2, window_bounds = array<i64: 2, 32, 32>}, {pipeline_mode = #tpu.pipeline_mode<synchronous>, transform_indices = @transform_3, window_bounds = array<i64: 2, 1, 32>}, {pipeline_mode = #tpu.pipeline_mode<synchronous>, transform_indices = @transform_4, window_bounds = array<i64: 2, 32, 32>}, {pipeline_mode = #tpu.pipeline_mode<synchronous>, transform_indices = @transform_5, window_bounds = array<i64: 2, 1, 32>}, {pipeline_mode = #tpu.pipeline_mode<synchronous>, transform_indices = @transform_6, window_bounds = array<i64: 2, 32, 32>}, {pipeline_mode = #tpu.pipeline_mode<synchronous>, transform_indices = @transform_7, window_bounds = array<i64: 2, 1, 32>}, {pipeline_mode = #tpu.pipeline_mode<synchronous>, transform_indices = @transform_8, window_bounds = array<i64: 2, 32, 32>}, {pipeline_mode = #tpu.pipeline_mode<synchronous>, transform_indices = @transform_9, window_bounds = array<i64: 2, 1, 32>}, {pipeline_mode = #tpu.pipeline_mode<synchronous>, transform_indices = @transform_10, window_bounds = array<i64: 2, 1, 32>}, {pipeline_mode = #tpu.pipeline_mode<synchronous>, transform_indices = @transform_11, window_bounds = array<i64: 2, 1, 32>}, {pipeline_mode = #tpu.pipeline_mode<synchronous>, transform_indices = @transform_12, window_bounds = array<i64: 2, 32, 64>}, {pipeline_mode = #tpu.pipeline_mode<synchronous>, transform_indices = @transform_13, window_bounds = array<i64: 2, 1, 64>}, {pipeline_mode = #tpu.pipeline_mode<synchronous>, transform_indices = @transform_14, window_bounds = array<i64: 2, 64, 32>}, {pipeline_mode = #tpu.pipeline_mode<synchronous>, transform_indices = @transform_15, window_bounds = array<i64: 2, 1, 32>}, {pipeline_mode = #tpu.pipeline_mode<synchronous>, transform_indices = @transform_16, window_bounds = array<i64: 2, 1, 32>}, {pipeline_mode = #tpu.pipeline_mode<synchronous>, transform_indices = @transform_17, window_bounds = array<i64: 2, 1, 32>}, {pipeline_mode = #tpu.pipeline_mode<synchronous>, transform_indices = @transform_18, window_bounds = array<i64: 1, 32>}, {pipeline_mode = #tpu.pipeline_mode<synchronous>, transform_indices = @transform_19, window_bounds = array<i64: 1, 32>}, {transform_indices = @transform_20, window_bounds = array<i64: 1, 8, 32>}]} {
    %c0 = arith.constant 0 : index
    %c0_0 = arith.constant 0 : index
    %c0_1 = arith.constant 0 : index
    %0 = vector.load %arg1[%c0, %c0_0, %c0_1] : memref<1x8x32xbf16, #tpu.memory_space<vmem>>, vector<1x8x32xbf16>
    %1 = vector.shape_cast %0 : vector<1x8x32xbf16> to vector<8x32xbf16>
    %2 = arith.extf %1 : vector<8x32xbf16> to vector<8x32xf32>
    %c0_2 = arith.constant 0 : index
    %c0_3 = arith.constant 0 : index
    %c0_4 = arith.constant 0 : index
    %3 = vector.load %arg2[%c0_2, %c0_3, %c0_4] : memref<1x1x8xf32, #tpu.memory_space<vmem>>, vector<1x1x8xf32>
    %4 = vector.shape_cast %3 : vector<1x1x8xf32> to vector<1x8xf32>
    %c0_5 = arith.constant 0 : index
    %c0_6 = arith.constant 0 : index
    %c0_7 = arith.constant 0 : index
    %5 = vector.load %arg3[%c0_5, %c0_6, %c0_7] : memref<2x32x32xbf16, #tpu.memory_space<vmem>>, vector<1x32x32xbf16>
    %6 = vector.shape_cast %5 : vector<1x32x32xbf16> to vector<32x32xbf16>
    %c0_8 = arith.constant 0 : index
    %c0_9 = arith.constant 0 : index
    %c0_10 = arith.constant 0 : index
    %7 = vector.load %arg4[%c0_8, %c0_9, %c0_10] : memref<2x1x32xf32, #tpu.memory_space<vmem>>, vector<1x1x32xf32>
    %8 = vector.shape_cast %7 : vector<1x1x32xf32> to vector<1x32xf32>
    %c0_11 = arith.constant 0 : index
    %c0_12 = arith.constant 0 : index
    %c0_13 = arith.constant 0 : index
    %9 = vector.load %arg5[%c0_11, %c0_12, %c0_13] : memref<2x32x32xbf16, #tpu.memory_space<vmem>>, vector<1x32x32xbf16>
    %10 = vector.shape_cast %9 : vector<1x32x32xbf16> to vector<32x32xbf16>
    %c0_14 = arith.constant 0 : index
    %c0_15 = arith.constant 0 : index
    %c0_16 = arith.constant 0 : index
    %11 = vector.load %arg6[%c0_14, %c0_15, %c0_16] : memref<2x1x32xf32, #tpu.memory_space<vmem>>, vector<1x1x32xf32>
    %12 = vector.shape_cast %11 : vector<1x1x32xf32> to vector<1x32xf32>
    %c0_17 = arith.constant 0 : index
    %c0_18 = arith.constant 0 : index
    %c0_19 = arith.constant 0 : index
    %13 = vector.load %arg7[%c0_17, %c0_18, %c0_19] : memref<2x32x32xbf16, #tpu.memory_space<vmem>>, vector<1x32x32xbf16>
    %14 = vector.shape_cast %13 : vector<1x32x32xbf16> to vector<32x32xbf16>
    %c0_20 = arith.constant 0 : index
    %c0_21 = arith.constant 0 : index
    %c0_22 = arith.constant 0 : index
    %15 = vector.load %arg8[%c0_20, %c0_21, %c0_22] : memref<2x1x32xf32, #tpu.memory_space<vmem>>, vector<1x1x32xf32>
    %16 = vector.shape_cast %15 : vector<1x1x32xf32> to vector<1x32xf32>
    %c0_23 = arith.constant 0 : index
    %c0_24 = arith.constant 0 : index
    %c0_25 = arith.constant 0 : index
    %17 = vector.load %arg9[%c0_23, %c0_24, %c0_25] : memref<2x32x32xbf16, #tpu.memory_space<vmem>>, vector<1x32x32xbf16>
    %18 = vector.shape_cast %17 : vector<1x32x32xbf16> to vector<32x32xbf16>
    %c0_26 = arith.constant 0 : index
    %c0_27 = arith.constant 0 : index
    %c0_28 = arith.constant 0 : index
    %19 = vector.load %arg10[%c0_26, %c0_27, %c0_28] : memref<2x1x32xf32, #tpu.memory_space<vmem>>, vector<1x1x32xf32>
    %20 = vector.shape_cast %19 : vector<1x1x32xf32> to vector<1x32xf32>
    %21 = arith.truncf %2 : vector<8x32xf32> to vector<8x32xbf16>
    %22 = arith.truncf %2 : vector<8x32xf32> to vector<8x32xbf16>
    %cst = arith.constant dense<0.000000e+00> : vector<8x32xf32>
    %23 = tpu.matmul %21, %6, %cst {dimension_numbers = #tpu.dot_dimension_numbers<[1], [0], [0], [1], [0, 0, 1, 1], [], []>} : vector<8x32xbf16>, vector<32x32xbf16>, vector<8x32xf32> -> vector<8x32xf32>
    %24 = vector.broadcast %8 : vector<1x32xf32> to vector<8x32xf32>
    %25 = arith.addf %23, %24 : vector<8x32xf32>
    %cst_29 = arith.constant dense<0.000000e+00> : vector<8x32xf32>
    %26 = tpu.matmul %22, %10, %cst_29 {dimension_numbers = #tpu.dot_dimension_numbers<[1], [0], [0], [1], [0, 0, 1, 1], [], []>} : vector<8x32xbf16>, vector<32x32xbf16>, vector<8x32xf32> -> vector<8x32xf32>
    %27 = vector.broadcast %12 : vector<1x32xf32> to vector<8x32xf32>
    %28 = arith.addf %26, %27 : vector<8x32xf32>
    %cst_30 = arith.constant dense<0.000000e+00> : vector<8x32xf32>
    %29 = tpu.matmul %22, %14, %cst_30 {dimension_numbers = #tpu.dot_dimension_numbers<[1], [0], [0], [1], [0, 0, 1, 1], [], []>} : vector<8x32xbf16>, vector<32x32xbf16>, vector<8x32xf32> -> vector<8x32xf32>
    %30 = vector.broadcast %16 : vector<1x32xf32> to vector<8x32xf32>
    %31 = arith.addf %29, %30 : vector<8x32xf32>
    %32 = vector.shape_cast %25 : vector<8x32xf32> to vector<8x4x8xf32>
    %33 = tpu.transpose %32, [1, 0, 2] : vector<8x4x8xf32> -> vector<4x8x8xf32>
    %34 = vector.shape_cast %28 : vector<8x32xf32> to vector<8x4x8xf32>
    %35 = tpu.transpose %34, [1, 0, 2] : vector<8x4x8xf32> -> vector<4x8x8xf32>
    %36 = vector.shape_cast %31 : vector<8x32xf32> to vector<8x4x8xf32>
    %37 = tpu.transpose %36, [1, 0, 2] : vector<8x4x8xf32> -> vector<4x8x8xf32>
    %38 = arith.truncf %33 : vector<4x8x8xf32> to vector<4x8x8xbf16>
    %39 = arith.truncf %35 : vector<4x8x8xf32> to vector<4x8x8xbf16>
    "tpu.trace_start"() <{level = 10 : i32, message = "hqd,hkd->hqk"}> : () -> ()
    %cst_31 = arith.constant dense<0.000000e+00> : vector<4x8x8xf32>
    %40 = tpu.matmul %38, %39, %cst_31 {dimension_numbers = #tpu.dot_dimension_numbers<[2], [2], [1], [1], [0, 0, 0, 1, 1, 1], [0], [0]>} : vector<4x8x8xbf16>, vector<4x8x8xbf16>, vector<4x8x8xf32> -> vector<4x8x8xf32>
    "tpu.trace_stop"() : () -> ()
    %cst_32 = arith.constant 0.353553385 : f32
    %41 = vector.broadcast %cst_32 : f32 to vector<4x8x8xf32>
    %42 = arith.mulf %40, %41 : vector<4x8x8xf32>
    %43 = vector.shape_cast %4 : vector<1x8xf32> to vector<1x1x8xf32>
    %44 = vector.broadcast %43 : vector<1x1x8xf32> to vector<4x8x8xf32>
    %45 = arith.addf %42, %44 : vector<4x8x8xf32>
    %cst_33 = arith.constant dense<0xFF800000> : vector<4x8xf32>
    %46 = vector.multi_reduction <maximumf>, %45, %cst_33 [2] : vector<4x8x8xf32> to vector<4x8xf32>
    %47 = vector.shape_cast %46 : vector<4x8xf32> to vector<4x8x1xf32>
    %48 = vector.broadcast %47 : vector<4x8x1xf32> to vector<4x8x8xf32>
    %49 = arith.subf %45, %48 : vector<4x8x8xf32>
    %50 = math.exp %49 : vector<4x8x8xf32>
    %cst_34 = arith.constant dense<0.000000e+00> : vector<4x8xf32>
    %51 = vector.multi_reduction <add>, %50, %cst_34 [2] : vector<4x8x8xf32> to vector<4x8xf32>
    %52 = vector.shape_cast %51 : vector<4x8xf32> to vector<4x8x1xf32>
    %53 = vector.broadcast %52 : vector<4x8x1xf32> to vector<4x8x8xf32>
    %54 = arith.divf %50, %53 : vector<4x8x8xf32>
    %55 = arith.truncf %54 : vector<4x8x8xf32> to vector<4x8x8xbf16>
    %56 = arith.truncf %37 : vector<4x8x8xf32> to vector<4x8x8xbf16>
    "tpu.trace_start"() <{level = 10 : i32, message = "hqk,hkd->hqd"}> : () -> ()
    %cst_35 = arith.constant dense<0.000000e+00> : vector<4x8x8xf32>
    %57 = tpu.matmul %55, %56, %cst_35 {dimension_numbers = #tpu.dot_dimension_numbers<[2], [1], [1], [2], [0, 0, 0, 1, 1, 2], [0], [0]>} : vector<4x8x8xbf16>, vector<4x8x8xbf16>, vector<4x8x8xf32> -> vector<4x8x8xf32>
    "tpu.trace_stop"() : () -> ()
    %58 = tpu.transpose %57, [1, 0, 2] : vector<4x8x8xf32> -> vector<8x4x8xf32>
    %59 = vector.shape_cast %58 : vector<8x4x8xf32> to vector<8x32xf32>
    %60 = arith.truncf %59 : vector<8x32xf32> to vector<8x32xbf16>
    %cst_36 = arith.constant dense<0.000000e+00> : vector<8x32xf32>
    %61 = tpu.matmul %60, %18, %cst_36 {dimension_numbers = #tpu.dot_dimension_numbers<[1], [0], [0], [1], [0, 0, 1, 1], [], []>} : vector<8x32xbf16>, vector<32x32xbf16>, vector<8x32xf32> -> vector<8x32xf32>
    %62 = vector.broadcast %20 : vector<1x32xf32> to vector<8x32xf32>
    %63 = arith.addf %61, %62 : vector<8x32xf32>
    %64 = arith.addf %2, %63 : vector<8x32xf32>
    %c0_37 = arith.constant 0 : index
    %c0_38 = arith.constant 0 : index
    %c0_39 = arith.constant 0 : index
    %65 = vector.load %arg11[%c0_37, %c0_38, %c0_39] : memref<2x1x32xf32, #tpu.memory_space<vmem>>, vector<1x1x32xf32>
    %66 = vector.shape_cast %65 : vector<1x1x32xf32> to vector<1x32xf32>
    %c0_40 = arith.constant 0 : index
    %c0_41 = arith.constant 0 : index
    %c0_42 = arith.constant 0 : index
    %67 = vector.load %arg12[%c0_40, %c0_41, %c0_42] : memref<2x1x32xf32, #tpu.memory_space<vmem>>, vector<1x1x32xf32>
    %68 = vector.shape_cast %67 : vector<1x1x32xf32> to vector<1x32xf32>
    %cst_43 = arith.constant dense<0.000000e+00> : vector<8xf32>
    %69 = vector.multi_reduction <add>, %64, %cst_43 [1] : vector<8x32xf32> to vector<8xf32>
    %70 = vector.shape_cast %69 : vector<8xf32> to vector<8x1xf32>
    %cst_44 = arith.constant 3.200000e+01 : f32
    %71 = vector.broadcast %cst_44 : f32 to vector<8x1xf32>
    %72 = arith.divf %70, %71 : vector<8x1xf32>
    %73 = vector.broadcast %72 : vector<8x1xf32> to vector<8x32xf32>
    %74 = arith.subf %64, %73 : vector<8x32xf32>
    %75 = arith.mulf %74, %74 : vector<8x32xf32>
    %cst_45 = arith.constant dense<0.000000e+00> : vector<8xf32>
    %76 = vector.multi_reduction <add>, %75, %cst_45 [1] : vector<8x32xf32> to vector<8xf32>
    %77 = vector.shape_cast %76 : vector<8xf32> to vector<8x1xf32>
    %cst_46 = arith.constant 3.200000e+01 : f32
    %78 = vector.broadcast %cst_46 : f32 to vector<8x1xf32>
    %79 = arith.divf %77, %78 : vector<8x1xf32>
    %80 = vector.broadcast %72 : vector<8x1xf32> to vector<8x32xf32>
    %81 = arith.subf %64, %80 : vector<8x32xf32>
    %cst_47 = arith.constant 9.99999974E-6 : f32
    %82 = vector.broadcast %cst_47 : f32 to vector<8x1xf32>
    %83 = arith.addf %79, %82 : vector<8x1xf32>
    %84 = math.rsqrt %83 : vector<8x1xf32>
    %85 = vector.broadcast %84 : vector<8x1xf32> to vector<8x32xf32>
    %86 = arith.mulf %81, %85 : vector<8x32xf32>
    %87 = vector.broadcast %66 : vector<1x32xf32> to vector<8x32xf32>
    %88 = arith.mulf %86, %87 : vector<8x32xf32>
    %89 = vector.broadcast %68 : vector<1x32xf32> to vector<8x32xf32>
    %90 = arith.addf %88, %89 : vector<8x32xf32>
    %c0_48 = arith.constant 0 : index
    %c0_49 = arith.constant 0 : index
    %c0_50 = arith.constant 0 : index
    %91 = vector.load %arg13[%c0_48, %c0_49, %c0_50] : memref<2x32x64xbf16, #tpu.memory_space<vmem>>, vector<1x32x64xbf16>
    %92 = vector.shape_cast %91 : vector<1x32x64xbf16> to vector<32x64xbf16>
    %c0_51 = arith.constant 0 : index
    %c0_52 = arith.constant 0 : index
    %c0_53 = arith.constant 0 : index
    %93 = vector.load %arg14[%c0_51, %c0_52, %c0_53] : memref<2x1x64xf32, #tpu.memory_space<vmem>>, vector<1x1x64xf32>
    %94 = vector.shape_cast %93 : vector<1x1x64xf32> to vector<1x64xf32>
    %c0_54 = arith.constant 0 : index
    %c0_55 = arith.constant 0 : index
    %c0_56 = arith.constant 0 : index
    %95 = vector.load %arg15[%c0_54, %c0_55, %c0_56] : memref<2x64x32xbf16, #tpu.memory_space<vmem>>, vector<1x64x32xbf16>
    %96 = vector.shape_cast %95 : vector<1x64x32xbf16> to vector<64x32xbf16>
    %c0_57 = arith.constant 0 : index
    %c0_58 = arith.constant 0 : index
    %c0_59 = arith.constant 0 : index
    %97 = vector.load %arg16[%c0_57, %c0_58, %c0_59] : memref<2x1x32xf32, #tpu.memory_space<vmem>>, vector<1x1x32xf32>
    %98 = vector.shape_cast %97 : vector<1x1x32xf32> to vector<1x32xf32>
    %99 = arith.truncf %90 : vector<8x32xf32> to vector<8x32xbf16>
    %cst_60 = arith.constant dense<0.000000e+00> : vector<8x64xf32>
    %100 = tpu.matmul %99, %92, %cst_60 {dimension_numbers = #tpu.dot_dimension_numbers<[1], [0], [0], [1], [0, 0, 1, 1], [], []>} : vector<8x32xbf16>, vector<32x64xbf16>, vector<8x64xf32> -> vector<8x64xf32>
    %101 = vector.broadcast %94 : vector<1x64xf32> to vector<8x64xf32>
    %102 = arith.addf %100, %101 : vector<8x64xf32>
    %cst_61 = arith.constant 0.000000e+00 : f32
    %103 = vector.broadcast %cst_61 : f32 to vector<8x64xf32>
    %104 = arith.maximumf %102, %103 : vector<8x64xf32>
    %105 = arith.truncf %104 : vector<8x64xf32> to vector<8x64xbf16>
    %cst_62 = arith.constant dense<0.000000e+00> : vector<8x32xf32>
    %106 = tpu.matmul %105, %96, %cst_62 {dimension_numbers = #tpu.dot_dimension_numbers<[1], [0], [0], [1], [0, 0, 1, 1], [], []>} : vector<8x64xbf16>, vector<64x32xbf16>, vector<8x32xf32> -> vector<8x32xf32>
    %107 = vector.broadcast %98 : vector<1x32xf32> to vector<8x32xf32>
    %108 = arith.addf %106, %107 : vector<8x32xf32>
    %109 = arith.addf %90, %108 : vector<8x32xf32>
    %c0_63 = arith.constant 0 : index
    %c0_64 = arith.constant 0 : index
    %c0_65 = arith.constant 0 : index
    %110 = vector.load %arg17[%c0_63, %c0_64, %c0_65] : memref<2x1x32xf32, #tpu.memory_space<vmem>>, vector<1x1x32xf32>
    %111 = vector.shape_cast %110 : vector<1x1x32xf32> to vector<1x32xf32>
    %c0_66 = arith.constant 0 : index
    %c0_67 = arith.constant 0 : index
    %c0_68 = arith.constant 0 : index
    %112 = vector.load %arg18[%c0_66, %c0_67, %c0_68] : memref<2x1x32xf32, #tpu.memory_space<vmem>>, vector<1x1x32xf32>
    %113 = vector.shape_cast %112 : vector<1x1x32xf32> to vector<1x32xf32>
    %cst_69 = arith.constant dense<0.000000e+00> : vector<8xf32>
    %114 = vector.multi_reduction <add>, %109, %cst_69 [1] : vector<8x32xf32> to vector<8xf32>
    %115 = vector.shape_cast %114 : vector<8xf32> to vector<8x1xf32>
    %cst_70 = arith.constant 3.200000e+01 : f32
    %116 = vector.broadcast %cst_70 : f32 to vector<8x1xf32>
    %117 = arith.divf %115, %116 : vector<8x1xf32>
    %118 = vector.broadcast %117 : vector<8x1xf32> to vector<8x32xf32>
    %119 = arith.subf %109, %118 : vector<8x32xf32>
    %120 = arith.mulf %119, %119 : vector<8x32xf32>
    %cst_71 = arith.constant dense<0.000000e+00> : vector<8xf32>
    %121 = vector.multi_reduction <add>, %120, %cst_71 [1] : vector<8x32xf32> to vector<8xf32>
    %122 = vector.shape_cast %121 : vector<8xf32> to vector<8x1xf32>
    %cst_72 = arith.constant 3.200000e+01 : f32
    %123 = vector.broadcast %cst_72 : f32 to vector<8x1xf32>
    %124 = arith.divf %122, %123 : vector<8x1xf32>
    %125 = vector.broadcast %117 : vector<8x1xf32> to vector<8x32xf32>
    %126 = arith.subf %109, %125 : vector<8x32xf32>
    %cst_73 = arith.constant 9.99999974E-6 : f32
    %127 = vector.broadcast %cst_73 : f32 to vector<8x1xf32>
    %128 = arith.addf %124, %127 : vector<8x1xf32>
    %129 = math.rsqrt %128 : vector<8x1xf32>
    %130 = vector.broadcast %129 : vector<8x1xf32> to vector<8x32xf32>
    %131 = arith.mulf %126, %130 : vector<8x32xf32>
    %132 = vector.broadcast %111 : vector<1x32xf32> to vector<8x32xf32>
    %133 = arith.mulf %131, %132 : vector<8x32xf32>
    %134 = vector.broadcast %113 : vector<1x32xf32> to vector<8x32xf32>
    %135 = arith.addf %133, %134 : vector<8x32xf32>
    %c1 = arith.constant 1 : index
    %c0_74 = arith.constant 0 : index
    %c0_75 = arith.constant 0 : index
    %136 = vector.load %arg3[%c1, %c0_74, %c0_75] : memref<2x32x32xbf16, #tpu.memory_space<vmem>>, vector<1x32x32xbf16>
    %137 = vector.shape_cast %136 : vector<1x32x32xbf16> to vector<32x32xbf16>
    %c1_76 = arith.constant 1 : index
    %c0_77 = arith.constant 0 : index
    %c0_78 = arith.constant 0 : index
    %138 = vector.load %arg4[%c1_76, %c0_77, %c0_78] : memref<2x1x32xf32, #tpu.memory_space<vmem>>, vector<1x1x32xf32>
    %139 = vector.shape_cast %138 : vector<1x1x32xf32> to vector<1x32xf32>
    %c1_79 = arith.constant 1 : index
    %c0_80 = arith.constant 0 : index
    %c0_81 = arith.constant 0 : index
    %140 = vector.load %arg5[%c1_79, %c0_80, %c0_81] : memref<2x32x32xbf16, #tpu.memory_space<vmem>>, vector<1x32x32xbf16>
    %141 = vector.shape_cast %140 : vector<1x32x32xbf16> to vector<32x32xbf16>
    %c1_82 = arith.constant 1 : index
    %c0_83 = arith.constant 0 : index
    %c0_84 = arith.constant 0 : index
    %142 = vector.load %arg6[%c1_82, %c0_83, %c0_84] : memref<2x1x32xf32, #tpu.memory_space<vmem>>, vector<1x1x32xf32>
    %143 = vector.shape_cast %142 : vector<1x1x32xf32> to vector<1x32xf32>
    %c1_85 = arith.constant 1 : index
    %c0_86 = arith.constant 0 : index
    %c0_87 = arith.constant 0 : index
    %144 = vector.load %arg7[%c1_85, %c0_86, %c0_87] : memref<2x32x32xbf16, #tpu.memory_space<vmem>>, vector<1x32x32xbf16>
    %145 = vector.shape_cast %144 : vector<1x32x32xbf16> to vector<32x32xbf16>
    %c1_88 = arith.constant 1 : index
    %c0_89 = arith.constant 0 : index
    %c0_90 = arith.constant 0 : index
    %146 = vector.load %arg8[%c1_88, %c0_89, %c0_90] : memref<2x1x32xf32, #tpu.memory_space<vmem>>, vector<1x1x32xf32>
    %147 = vector.shape_cast %146 : vector<1x1x32xf32> to vector<1x32xf32>
    %c1_91 = arith.constant 1 : index
    %c0_92 = arith.constant 0 : index
    %c0_93 = arith.constant 0 : index
    %148 = vector.load %arg9[%c1_91, %c0_92, %c0_93] : memref<2x32x32xbf16, #tpu.memory_space<vmem>>, vector<1x32x32xbf16>
    %149 = vector.shape_cast %148 : vector<1x32x32xbf16> to vector<32x32xbf16>
    %c1_94 = arith.constant 1 : index
    %c0_95 = arith.constant 0 : index
    %c0_96 = arith.constant 0 : index
    %150 = vector.load %arg10[%c1_94, %c0_95, %c0_96] : memref<2x1x32xf32, #tpu.memory_space<vmem>>, vector<1x1x32xf32>
    %151 = vector.shape_cast %150 : vector<1x1x32xf32> to vector<1x32xf32>
    %152 = arith.truncf %135 : vector<8x32xf32> to vector<8x32xbf16>
    %153 = arith.truncf %135 : vector<8x32xf32> to vector<8x32xbf16>
    %cst_97 = arith.constant dense<0.000000e+00> : vector<8x32xf32>
    %154 = tpu.matmul %152, %137, %cst_97 {dimension_numbers = #tpu.dot_dimension_numbers<[1], [0], [0], [1], [0, 0, 1, 1], [], []>} : vector<8x32xbf16>, vector<32x32xbf16>, vector<8x32xf32> -> vector<8x32xf32>
    %155 = vector.broadcast %139 : vector<1x32xf32> to vector<8x32xf32>
    %156 = arith.addf %154, %155 : vector<8x32xf32>
    %cst_98 = arith.constant dense<0.000000e+00> : vector<8x32xf32>
    %157 = tpu.matmul %153, %141, %cst_98 {dimension_numbers = #tpu.dot_dimension_numbers<[1], [0], [0], [1], [0, 0, 1, 1], [], []>} : vector<8x32xbf16>, vector<32x32xbf16>, vector<8x32xf32> -> vector<8x32xf32>
    %158 = vector.broadcast %143 : vector<1x32xf32> to vector<8x32xf32>
    %159 = arith.addf %157, %158 : vector<8x32xf32>
    %cst_99 = arith.constant dense<0.000000e+00> : vector<8x32xf32>
    %160 = tpu.matmul %153, %145, %cst_99 {dimension_numbers = #tpu.dot_dimension_numbers<[1], [0], [0], [1], [0, 0, 1, 1], [], []>} : vector<8x32xbf16>, vector<32x32xbf16>, vector<8x32xf32> -> vector<8x32xf32>
    %161 = vector.broadcast %147 : vector<1x32xf32> to vector<8x32xf32>
    %162 = arith.addf %160, %161 : vector<8x32xf32>
    %163 = vector.shape_cast %156 : vector<8x32xf32> to vector<8x4x8xf32>
    %164 = tpu.transpose %163, [1, 0, 2] : vector<8x4x8xf32> -> vector<4x8x8xf32>
    %165 = vector.shape_cast %159 : vector<8x32xf32> to vector<8x4x8xf32>
    %166 = tpu.transpose %165, [1, 0, 2] : vector<8x4x8xf32> -> vector<4x8x8xf32>
    %167 = vector.shape_cast %162 : vector<8x32xf32> to vector<8x4x8xf32>
    %168 = tpu.transpose %167, [1, 0, 2] : vector<8x4x8xf32> -> vector<4x8x8xf32>
    %169 = arith.truncf %164 : vector<4x8x8xf32> to vector<4x8x8xbf16>
    %170 = arith.truncf %166 : vector<4x8x8xf32> to vector<4x8x8xbf16>
    "tpu.trace_start"() <{level = 10 : i32, message = "hqd,hkd->hqk"}> : () -> ()
    %cst_100 = arith.constant dense<0.000000e+00> : vector<4x8x8xf32>
    %171 = tpu.matmul %169, %170, %cst_100 {dimension_numbers = #tpu.dot_dimension_numbers<[2], [2], [1], [1], [0, 0, 0, 1, 1, 1], [0], [0]>} : vector<4x8x8xbf16>, vector<4x8x8xbf16>, vector<4x8x8xf32> -> vector<4x8x8xf32>
    "tpu.trace_stop"() : () -> ()
    %cst_101 = arith.constant 0.353553385 : f32
    %172 = vector.broadcast %cst_101 : f32 to vector<4x8x8xf32>
    %173 = arith.mulf %171, %172 : vector<4x8x8xf32>
    %174 = vector.shape_cast %4 : vector<1x8xf32> to vector<1x1x8xf32>
    %175 = vector.broadcast %174 : vector<1x1x8xf32> to vector<4x8x8xf32>
    %176 = arith.addf %173, %175 : vector<4x8x8xf32>
    %cst_102 = arith.constant dense<0xFF800000> : vector<4x8xf32>
    %177 = vector.multi_reduction <maximumf>, %176, %cst_102 [2] : vector<4x8x8xf32> to vector<4x8xf32>
    %178 = vector.shape_cast %177 : vector<4x8xf32> to vector<4x8x1xf32>
    %179 = vector.broadcast %178 : vector<4x8x1xf32> to vector<4x8x8xf32>
    %180 = arith.subf %176, %179 : vector<4x8x8xf32>
    %181 = math.exp %180 : vector<4x8x8xf32>
    %cst_103 = arith.constant dense<0.000000e+00> : vector<4x8xf32>
    %182 = vector.multi_reduction <add>, %181, %cst_103 [2] : vector<4x8x8xf32> to vector<4x8xf32>
    %183 = vector.shape_cast %182 : vector<4x8xf32> to vector<4x8x1xf32>
    %184 = vector.broadcast %183 : vector<4x8x1xf32> to vector<4x8x8xf32>
    %185 = arith.divf %181, %184 : vector<4x8x8xf32>
    %186 = arith.truncf %185 : vector<4x8x8xf32> to vector<4x8x8xbf16>
    %187 = arith.truncf %168 : vector<4x8x8xf32> to vector<4x8x8xbf16>
    "tpu.trace_start"() <{level = 10 : i32, message = "hqk,hkd->hqd"}> : () -> ()
    %cst_104 = arith.constant dense<0.000000e+00> : vector<4x8x8xf32>
    %188 = tpu.matmul %186, %187, %cst_104 {dimension_numbers = #tpu.dot_dimension_numbers<[2], [1], [1], [2], [0, 0, 0, 1, 1, 2], [0], [0]>} : vector<4x8x8xbf16>, vector<4x8x8xbf16>, vector<4x8x8xf32> -> vector<4x8x8xf32>
    "tpu.trace_stop"() : () -> ()
    %189 = tpu.transpose %188, [1, 0, 2] : vector<4x8x8xf32> -> vector<8x4x8xf32>
    %190 = vector.shape_cast %189 : vector<8x4x8xf32> to vector<8x32xf32>
    %191 = arith.truncf %190 : vector<8x32xf32> to vector<8x32xbf16>
    %cst_105 = arith.constant dense<0.000000e+00> : vector<8x32xf32>
    %192 = tpu.matmul %191, %149, %cst_105 {dimension_numbers = #tpu.dot_dimension_numbers<[1], [0], [0], [1], [0, 0, 1, 1], [], []>} : vector<8x32xbf16>, vector<32x32xbf16>, vector<8x32xf32> -> vector<8x32xf32>
    %193 = vector.broadcast %151 : vector<1x32xf32> to vector<8x32xf32>
    %194 = arith.addf %192, %193 : vector<8x32xf32>
    %195 = arith.addf %135, %194 : vector<8x32xf32>
    %c1_106 = arith.constant 1 : index
    %c0_107 = arith.constant 0 : index
    %c0_108 = arith.constant 0 : index
    %196 = vector.load %arg11[%c1_106, %c0_107, %c0_108] : memref<2x1x32xf32, #tpu.memory_space<vmem>>, vector<1x1x32xf32>
    %197 = vector.shape_cast %196 : vector<1x1x32xf32> to vector<1x32xf32>
    %c1_109 = arith.constant 1 : index
    %c0_110 = arith.constant 0 : index
    %c0_111 = arith.constant 0 : index
    %198 = vector.load %arg12[%c1_109, %c0_110, %c0_111] : memref<2x1x32xf32, #tpu.memory_space<vmem>>, vector<1x1x32xf32>
    %199 = vector.shape_cast %198 : vector<1x1x32xf32> to vector<1x32xf32>
    %cst_112 = arith.constant dense<0.000000e+00> : vector<8xf32>
    %200 = vector.multi_reduction <add>, %195, %cst_112 [1] : vector<8x32xf32> to vector<8xf32>
    %201 = vector.shape_cast %200 : vector<8xf32> to vector<8x1xf32>
    %cst_113 = arith.constant 3.200000e+01 : f32
    %202 = vector.broadcast %cst_113 : f32 to vector<8x1xf32>
    %203 = arith.divf %201, %202 : vector<8x1xf32>
    %204 = vector.broadcast %203 : vector<8x1xf32> to vector<8x32xf32>
    %205 = arith.subf %195, %204 : vector<8x32xf32>
    %206 = arith.mulf %205, %205 : vector<8x32xf32>
    %cst_114 = arith.constant dense<0.000000e+00> : vector<8xf32>
    %207 = vector.multi_reduction <add>, %206, %cst_114 [1] : vector<8x32xf32> to vector<8xf32>
    %208 = vector.shape_cast %207 : vector<8xf32> to vector<8x1xf32>
    %cst_115 = arith.constant 3.200000e+01 : f32
    %209 = vector.broadcast %cst_115 : f32 to vector<8x1xf32>
    %210 = arith.divf %208, %209 : vector<8x1xf32>
    %211 = vector.broadcast %203 : vector<8x1xf32> to vector<8x32xf32>
    %212 = arith.subf %195, %211 : vector<8x32xf32>
    %cst_116 = arith.constant 9.99999974E-6 : f32
    %213 = vector.broadcast %cst_116 : f32 to vector<8x1xf32>
    %214 = arith.addf %210, %213 : vector<8x1xf32>
    %215 = math.rsqrt %214 : vector<8x1xf32>
    %216 = vector.broadcast %215 : vector<8x1xf32> to vector<8x32xf32>
    %217 = arith.mulf %212, %216 : vector<8x32xf32>
    %218 = vector.broadcast %197 : vector<1x32xf32> to vector<8x32xf32>
    %219 = arith.mulf %217, %218 : vector<8x32xf32>
    %220 = vector.broadcast %199 : vector<1x32xf32> to vector<8x32xf32>
    %221 = arith.addf %219, %220 : vector<8x32xf32>
    %c1_117 = arith.constant 1 : index
    %c0_118 = arith.constant 0 : index
    %c0_119 = arith.constant 0 : index
    %222 = vector.load %arg13[%c1_117, %c0_118, %c0_119] : memref<2x32x64xbf16, #tpu.memory_space<vmem>>, vector<1x32x64xbf16>
    %223 = vector.shape_cast %222 : vector<1x32x64xbf16> to vector<32x64xbf16>
    %c1_120 = arith.constant 1 : index
    %c0_121 = arith.constant 0 : index
    %c0_122 = arith.constant 0 : index
    %224 = vector.load %arg14[%c1_120, %c0_121, %c0_122] : memref<2x1x64xf32, #tpu.memory_space<vmem>>, vector<1x1x64xf32>
    %225 = vector.shape_cast %224 : vector<1x1x64xf32> to vector<1x64xf32>
    %c1_123 = arith.constant 1 : index
    %c0_124 = arith.constant 0 : index
    %c0_125 = arith.constant 0 : index
    %226 = vector.load %arg15[%c1_123, %c0_124, %c0_125] : memref<2x64x32xbf16, #tpu.memory_space<vmem>>, vector<1x64x32xbf16>
    %227 = vector.shape_cast %226 : vector<1x64x32xbf16> to vector<64x32xbf16>
    %c1_126 = arith.constant 1 : index
    %c0_127 = arith.constant 0 : index
    %c0_128 = arith.constant 0 : index
    %228 = vector.load %arg16[%c1_126, %c0_127, %c0_128] : memref<2x1x32xf32, #tpu.memory_space<vmem>>, vector<1x1x32xf32>
    %229 = vector.shape_cast %228 : vector<1x1x32xf32> to vector<1x32xf32>
    %230 = arith.truncf %221 : vector<8x32xf32> to vector<8x32xbf16>
    %cst_129 = arith.constant dense<0.000000e+00> : vector<8x64xf32>
    %231 = tpu.matmul %230, %223, %cst_129 {dimension_numbers = #tpu.dot_dimension_numbers<[1], [0], [0], [1], [0, 0, 1, 1], [], []>} : vector<8x32xbf16>, vector<32x64xbf16>, vector<8x64xf32> -> vector<8x64xf32>
    %232 = vector.broadcast %225 : vector<1x64xf32> to vector<8x64xf32>
    %233 = arith.addf %231, %232 : vector<8x64xf32>
    %cst_130 = arith.constant 0.000000e+00 : f32
    %234 = vector.broadcast %cst_130 : f32 to vector<8x64xf32>
    %235 = arith.maximumf %233, %234 : vector<8x64xf32>
    %236 = arith.truncf %235 : vector<8x64xf32> to vector<8x64xbf16>
    %cst_131 = arith.constant dense<0.000000e+00> : vector<8x32xf32>
    %237 = tpu.matmul %236, %227, %cst_131 {dimension_numbers = #tpu.dot_dimension_numbers<[1], [0], [0], [1], [0, 0, 1, 1], [], []>} : vector<8x64xbf16>, vector<64x32xbf16>, vector<8x32xf32> -> vector<8x32xf32>
    %238 = vector.broadcast %229 : vector<1x32xf32> to vector<8x32xf32>
    %239 = arith.addf %237, %238 : vector<8x32xf32>
    %240 = arith.addf %221, %239 : vector<8x32xf32>
    %c1_132 = arith.constant 1 : index
    %c0_133 = arith.constant 0 : index
    %c0_134 = arith.constant 0 : index
    %241 = vector.load %arg17[%c1_132, %c0_133, %c0_134] : memref<2x1x32xf32, #tpu.memory_space<vmem>>, vector<1x1x32xf32>
    %242 = vector.shape_cast %241 : vector<1x1x32xf32> to vector<1x32xf32>
    %c1_135 = arith.constant 1 : index
    %c0_136 = arith.constant 0 : index
    %c0_137 = arith.constant 0 : index
    %243 = vector.load %arg18[%c1_135, %c0_136, %c0_137] : memref<2x1x32xf32, #tpu.memory_space<vmem>>, vector<1x1x32xf32>
    %244 = vector.shape_cast %243 : vector<1x1x32xf32> to vector<1x32xf32>
    %cst_138 = arith.constant dense<0.000000e+00> : vector<8xf32>
    %245 = vector.multi_reduction <add>, %240, %cst_138 [1] : vector<8x32xf32> to vector<8xf32>
    %246 = vector.shape_cast %245 : vector<8xf32> to vector<8x1xf32>
    %cst_139 = arith.constant 3.200000e+01 : f32
    %247 = vector.broadcast %cst_139 : f32 to vector<8x1xf32>
    %248 = arith.divf %246, %247 : vector<8x1xf32>
    %249 = vector.broadcast %248 : vector<8x1xf32> to vector<8x32xf32>
    %250 = arith.subf %240, %249 : vector<8x32xf32>
    %251 = arith.mulf %250, %250 : vector<8x32xf32>
    %cst_140 = arith.constant dense<0.000000e+00> : vector<8xf32>
    %252 = vector.multi_reduction <add>, %251, %cst_140 [1] : vector<8x32xf32> to vector<8xf32>
    %253 = vector.shape_cast %252 : vector<8xf32> to vector<8x1xf32>
    %cst_141 = arith.constant 3.200000e+01 : f32
    %254 = vector.broadcast %cst_141 : f32 to vector<8x1xf32>
    %255 = arith.divf %253, %254 : vector<8x1xf32>
    %256 = vector.broadcast %248 : vector<8x1xf32> to vector<8x32xf32>
    %257 = arith.subf %240, %256 : vector<8x32xf32>
    %cst_142 = arith.constant 9.99999974E-6 : f32
    %258 = vector.broadcast %cst_142 : f32 to vector<8x1xf32>
    %259 = arith.addf %255, %258 : vector<8x1xf32>
    %260 = math.rsqrt %259 : vector<8x1xf32>
    %261 = vector.broadcast %260 : vector<8x1xf32> to vector<8x32xf32>
    %262 = arith.mulf %257, %261 : vector<8x32xf32>
    %263 = vector.broadcast %242 : vector<1x32xf32> to vector<8x32xf32>
    %264 = arith.mulf %262, %263 : vector<8x32xf32>
    %265 = vector.broadcast %244 : vector<1x32xf32> to vector<8x32xf32>
    %266 = arith.addf %264, %265 : vector<8x32xf32>
    %c0_143 = arith.constant 0 : index
    %c0_144 = arith.constant 0 : index
    %267 = vector.load %arg19[%c0_143, %c0_144] : memref<1x32xf32, #tpu.memory_space<vmem>>, vector<1x32xf32>
    %c0_145 = arith.constant 0 : index
    %c0_146 = arith.constant 0 : index
    %268 = vector.load %arg20[%c0_145, %c0_146] : memref<1x32xf32, #tpu.memory_space<vmem>>, vector<1x32xf32>
    %cst_147 = arith.constant dense<0.000000e+00> : vector<8xf32>
    %269 = vector.multi_reduction <add>, %266, %cst_147 [1] : vector<8x32xf32> to vector<8xf32>
    %270 = vector.shape_cast %269 : vector<8xf32> to vector<8x1xf32>
    %cst_148 = arith.constant 3.200000e+01 : f32
    %271 = vector.broadcast %cst_148 : f32 to vector<8x1xf32>
    %272 = arith.divf %270, %271 : vector<8x1xf32>
    %273 = vector.broadcast %272 : vector<8x1xf32> to vector<8x32xf32>
    %274 = arith.subf %266, %273 : vector<8x32xf32>
    %275 = arith.mulf %274, %274 : vector<8x32xf32>
    %cst_149 = arith.constant dense<0.000000e+00> : vector<8xf32>
    %276 = vector.multi_reduction <add>, %275, %cst_149 [1] : vector<8x32xf32> to vector<8xf32>
    %277 = vector.shape_cast %276 : vector<8xf32> to vector<8x1xf32>
    %cst_150 = arith.constant 3.200000e+01 : f32
    %278 = vector.broadcast %cst_150 : f32 to vector<8x1xf32>
    %279 = arith.divf %277, %278 : vector<8x1xf32>
    %280 = vector.broadcast %272 : vector<8x1xf32> to vector<8x32xf32>
    %281 = arith.subf %266, %280 : vector<8x32xf32>
    %cst_151 = arith.constant 9.99999974E-6 : f32
    %282 = vector.broadcast %cst_151 : f32 to vector<8x1xf32>
    %283 = arith.addf %279, %282 : vector<8x1xf32>
    %284 = math.rsqrt %283 : vector<8x1xf32>
    %285 = vector.broadcast %284 : vector<8x1xf32> to vector<8x32xf32>
    %286 = arith.mulf %281, %285 : vector<8x32xf32>
    %287 = vector.broadcast %267 : vector<1x32xf32> to vector<8x32xf32>
    %288 = arith.mulf %286, %287 : vector<8x32xf32>
    %289 = vector.broadcast %268 : vector<1x32xf32> to vector<8x32xf32>
    %290 = arith.addf %288, %289 : vector<8x32xf32>
    %291 = arith.truncf %290 : vector<8x32xf32> to vector<8x32xbf16>
    %c0_152 = arith.constant 0 : index
    %c0_153 = arith.constant 0 : index
    %c0_154 = arith.constant 0 : index
    %292 = vector.load %arg21[%c0_152, %c0_153, %c0_154] : memref<1x8x32xbf16, #tpu.memory_space<vmem>>, vector<1x8x32xbf16>
    %293 = vector.shape_cast %292 : vector<1x8x32xbf16> to vector<8x32xbf16>
    %294 = vector.shape_cast %291 : vector<8x32xbf16> to vector<1x8x32xbf16>
    tpu.vector_store %arg21[%c0_152, %c0_153, %c0_154], %294 {strides = array<i32>} : memref<1x8x32xbf16, #tpu.memory_space<vmem>>, vector<1x8x32xbf16>,
    return
  }
  func.func @transform_0(%arg0: i32) -> (i32, i32, i32) {
    %c0_i32 = arith.constant 0 : i32
    %c0_i32_0 = arith.constant 0 : i32
    %c0_i32_1 = arith.constant 0 : i32
    return %arg0, %c0_i32, %c0_i32_0 : i32, i32, i32
  }
  func.func @transform_1(%arg0: i32) -> (i32, i32, i32) {
    %c0_i32 = arith.constant 0 : i32
    %c0_i32_0 = arith.constant 0 : i32
    %c0_i32_1 = arith.constant 0 : i32
    return %arg0, %c0_i32, %c0_i32_0 : i32, i32, i32
  }
  func.func @transform_2(%arg0: i32) -> (i32, i32, i32) {
    %c0_i32 = arith.constant 0 : i32
    %c0_i32_0 = arith.constant 0 : i32
    %c0_i32_1 = arith.constant 0 : i32
    %c0_i32_2 = arith.constant 0 : i32
    return %c0_i32, %c0_i32_0, %c0_i32_1 : i32, i32, i32
  }
  func.func @transform_3(%arg0: i32) -> (i32, i32, i32) {
    %c0_i32 = arith.constant 0 : i32
    %c0_i32_0 = arith.constant 0 : i32
    %c0_i32_1 = arith.constant 0 : i32
    %c0_i32_2 = arith.constant 0 : i32
    return %c0_i32, %c0_i32_0, %c0_i32_1 : i32, i32, i32
  }
  func.func @transform_4(%arg0: i32) -> (i32, i32, i32) {
    %c0_i32 = arith.constant 0 : i32
    %c0_i32_0 = arith.constant 0 : i32
    %c0_i32_1 = arith.constant 0 : i32
    %c0_i32_2 = arith.constant 0 : i32
    return %c0_i32, %c0_i32_0, %c0_i32_1 : i32, i32, i32
  }
  func.func @transform_5(%arg0: i32) -> (i32, i32, i32) {
    %c0_i32 = arith.constant 0 : i32
    %c0_i32_0 = arith.constant 0 : i32
    %c0_i32_1 = arith.constant 0 : i32
    %c0_i32_2 = arith.constant 0 : i32
    return %c0_i32, %c0_i32_0, %c0_i32_1 : i32, i32, i32
  }
  func.func @transform_6(%arg0: i32) -> (i32, i32, i32) {
    %c0_i32 = arith.constant 0 : i32
    %c0_i32_0 = arith.constant 0 : i32
    %c0_i32_1 = arith.constant 0 : i32
    %c0_i32_2 = arith.constant 0 : i32
    return %c0_i32, %c0_i32_0, %c0_i32_1 : i32, i32, i32
  }
  func.func @transform_7(%arg0: i32) -> (i32, i32, i32) {
    %c0_i32 = arith.constant 0 : i32
    %c0_i32_0 = arith.constant 0 : i32
    %c0_i32_1 = arith.constant 0 : i32
    %c0_i32_2 = arith.constant 0 : i32
    return %c0_i32, %c0_i32_0, %c0_i32_1 : i32, i32, i32
  }
  func.func @transform_8(%arg0: i32) -> (i32, i32, i32) {
    %c0_i32 = arith.constant 0 : i32
    %c0_i32_0 = arith.constant 0 : i32
    %c0_i32_1 = arith.constant 0 : i32
    %c0_i32_2 = arith.constant 0 : i32
    return %c0_i32, %c0_i32_0, %c0_i32_1 : i32, i32, i32
  }
  func.func @transform_9(%arg0: i32) -> (i32, i32, i32) {
    %c0_i32 = arith.constant 0 : i32
    %c0_i32_0 = arith.constant 0 : i32
    %c0_i32_1 = arith.constant 0 : i32
    %c0_i32_2 = arith.constant 0 : i32
    return %c0_i32, %c0_i32_0, %c0_i32_1 : i32, i32, i32
  }
  func.func @transform_10(%arg0: i32) -> (i32, i32, i32) {
    %c0_i32 = arith.constant 0 : i32
    %c0_i32_0 = arith.constant 0 : i32
    %c0_i32_1 = arith.constant 0 : i32
    %c0_i32_2 = arith.constant 0 : i32
    return %c0_i32, %c0_i32_0, %c0_i32_1 : i32, i32, i32
  }
  func.func @transform_11(%arg0: i32) -> (i32, i32, i32) {
    %c0_i32 = arith.constant 0 : i32
    %c0_i32_0 = arith.constant 0 : i32
    %c0_i32_1 = arith.constant 0 : i32
    %c0_i32_2 = arith.constant 0 : i32
    return %c0_i32, %c0_i32_0, %c0_i32_1 : i32, i32, i32
  }
  func.func @transform_12(%arg0: i32) -> (i32, i32, i32) {
    %c0_i32 = arith.constant 0 : i32
    %c0_i32_0 = arith.constant 0 : i32
    %c0_i32_1 = arith.constant 0 : i32
    %c0_i32_2 = arith.constant 0 : i32
    return %c0_i32, %c0_i32_0, %c0_i32_1 : i32, i32, i32
  }
  func.func @transform_13(%arg0: i32) -> (i32, i32, i32) {
    %c0_i32 = arith.constant 0 : i32
    %c0_i32_0 = arith.constant 0 : i32
    %c0_i32_1 = arith.constant 0 : i32
    %c0_i32_2 = arith.constant 0 : i32
    return %c0_i32, %c0_i32_0, %c0_i32_1 : i32, i32, i32
  }
  func.func @transform_14(%arg0: i32) -> (i32, i32, i32) {
    %c0_i32 = arith.constant 0 : i32
    %c0_i32_0 = arith.constant 0 : i32
    %c0_i32_1 = arith.constant 0 : i32
    %c0_i32_2 = arith.constant 0 : i32
    return %c0_i32, %c0_i32_0, %c0_i32_1 : i32, i32, i32
  }
  func.func @transform_15(%arg0: i32) -> (i32, i32, i32) {
    %c0_i32 = arith.constant 0 : i32
    %c0_i32_0 = arith.constant 0 : i32
    %c0_i32_1 = arith.constant 0 : i32
    %c0_i32_2 = arith.constant 0 : i32
    return %c0_i32, %c0_i32_0, %c0_i32_1 : i32, i32, i32
  }
  func.func @transform_16(%arg0: i32) -> (i32, i32, i32) {
    %c0_i32 = arith.constant 0 : i32
    %c0_i32_0 = arith.constant 0 : i32
    %c0_i32_1 = arith.constant 0 : i32
    %c0_i32_2 = arith.constant 0 : i32
    return %c0_i32, %c0_i32_0, %c0_i32_1 : i32, i32, i32
  }
  func.func @transform_17(%arg0: i32) -> (i32, i32, i32) {
    %c0_i32 = arith.constant 0 : i32
    %c0_i32_0 = arith.constant 0 : i32
    %c0_i32_1 = arith.constant 0 : i32
    %c0_i32_2 = arith.constant 0 : i32
    return %c0_i32, %c0_i32_0, %c0_i32_1 : i32, i32, i32
  }
  func.func @transform_18(%arg0: i32) -> (i32, i32) {
    %c0_i32 = arith.constant 0 : i32
    %c0_i32_0 = arith.constant 0 : i32
    %c0_i32_1 = arith.constant 0 : i32
    return %c0_i32, %c0_i32_0 : i32, i32
  }
  func.func @transform_19(%arg0: i32) -> (i32, i32) {
    %c0_i32 = arith.constant 0 : i32
    %c0_i32_0 = arith.constant 0 : i32
    %c0_i32_1 = arith.constant 0 : i32
    return %c0_i32, %c0_i32_0 : i32, i32
  }
  func.func @transform_20(%arg0: i32) -> (i32, i32, i32) {
    %c0_i32 = arith.constant 0 : i32
    %c0_i32_0 = arith.constant 0 : i32
    %c0_i32_1 = arith.constant 0 : i32
    return %arg0, %c0_i32, %c0_i32_0 : i32, i32, i32
  }
}

module attributes {stable_mosaic.version = 11 : i64} {
  func.func @_decoder_kernel(%arg0: i32, %arg1: memref<1x8x32xbf16, #tpu.memory_space<vmem>>, %arg2: memref<1x8x32xbf16, #tpu.memory_space<vmem>>, %arg3: memref<8x8xf32, #tpu.memory_space<vmem>>, %arg4: memref<1x1x8xf32, #tpu.memory_space<vmem>>, %arg5: memref<1x1x8xf32, #tpu.memory_space<vmem>>, %arg6: memref<2x32x32xbf16, #tpu.memory_space<vmem>>, %arg7: memref<2x1x32xf32, #tpu.memory_space<vmem>>, %arg8: memref<2x32x32xbf16, #tpu.memory_space<vmem>>, %arg9: memref<2x1x32xf32, #tpu.memory_space<vmem>>, %arg10: memref<2x32x32xbf16, #tpu.memory_space<vmem>>, %arg11: memref<2x1x32xf32, #tpu.memory_space<vmem>>, %arg12: memref<2x32x32xbf16, #tpu.memory_space<vmem>>, %arg13: memref<2x1x32xf32, #tpu.memory_space<vmem>>, %arg14: memref<2x1x32xf32, #tpu.memory_space<vmem>>, %arg15: memref<2x1x32xf32, #tpu.memory_space<vmem>>, %arg16: memref<2x32x32xbf16, #tpu.memory_space<vmem>>, %arg17: memref<2x1x32xf32, #tpu.memory_space<vmem>>, %arg18: memref<2x32x32xbf16, #tpu.memory_space<vmem>>, %arg19: memref<2x1x32xf32, #tpu.memory_space<vmem>>, %arg20: memref<2x32x32xbf16, #tpu.memory_space<vmem>>, %arg21: memref<2x1x32xf32, #tpu.memory_space<vmem>>, %arg22: memref<2x32x32xbf16, #tpu.memory_space<vmem>>, %arg23: memref<2x1x32xf32, #tpu.memory_space<vmem>>, %arg24: memref<2x1x32xf32, #tpu.memory_space<vmem>>, %arg25: memref<2x1x32xf32, #tpu.memory_space<vmem>>, %arg26: memref<2x32x64xbf16, #tpu.memory_space<vmem>>, %arg27: memref<2x1x64xf32, #tpu.memory_space<vmem>>, %arg28: memref<2x64x32xbf16, #tpu.memory_space<vmem>>, %arg29: memref<2x1x32xf32, #tpu.memory_space<vmem>>, %arg30: memref<2x1x32xf32, #tpu.memory_space<vmem>>, %arg31: memref<2x1x32xf32, #tpu.memory_space<vmem>>, %arg32: memref<1x32xf32, #tpu.memory_space<vmem>>, %arg33: memref<1x32xf32, #tpu.memory_space<vmem>>, %arg34: memref<32x128xbf16, #tpu.memory_space<vmem>>, %arg35: memref<1x128xf32, #tpu.memory_space<vmem>>, %arg36: memref<1x8x128xf32, #tpu.memory_space<vmem>>, %arg37: memref<1x2x8x8xf32, #tpu.memory_space<vmem>>) attributes {dimension_semantics = [#tpu.dimension_semantics<parallel>], iteration_bounds = array<i64: 2>, scalar_prefetch = 0 : i64, scratch_operands = 0 : i64, tpu.core_type = #tpu.core_type<tc>, window_params = [{transform_indices = @transform_0, window_bounds = array<i64: 1, 8, 32>}, {transform_indices = @transform_1, window_bounds = array<i64: 1, 8, 32>}, {pipeline_mode = #tpu.pipeline_mode<synchronous>, transform_indices = @transform_2, window_bounds = array<i64: 8, 8>}, {transform_indices = @transform_3, window_bounds = array<i64: 1, 1, 8>}, {transform_indices = @transform_4, window_bounds = array<i64: 1, 1, 8>}, {pipeline_mode = #tpu.pipeline_mode<synchronous>, transform_indices = @transform_5, window_bounds = array<i64: 2, 32, 32>}, {pipeline_mode = #tpu.pipeline_mode<synchronous>, transform_indices = @transform_6, window_bounds = array<i64: 2, 1, 32>}, {pipeline_mode = #tpu.pipeline_mode<synchronous>, transform_indices = @transform_7, window_bounds = array<i64: 2, 32, 32>}, {pipeline_mode = #tpu.pipeline_mode<synchronous>, transform_indices = @transform_8, window_bounds = array<i64: 2, 1, 32>}, {pipeline_mode = #tpu.pipeline_mode<synchronous>, transform_indices = @transform_9, window_bounds = array<i64: 2, 32, 32>}, {pipeline_mode = #tpu.pipeline_mode<synchronous>, transform_indices = @transform_10, window_bounds = array<i64: 2, 1, 32>}, {pipeline_mode = #tpu.pipeline_mode<synchronous>, transform_indices = @transform_11, window_bounds = array<i64: 2, 32, 32>}, {pipeline_mode = #tpu.pipeline_mode<synchronous>, transform_indices = @transform_12, window_bounds = array<i64: 2, 1, 32>}, {pipeline_mode = #tpu.pipeline_mode<synchronous>, transform_indices = @transform_13, window_bounds = array<i64: 2, 1, 32>}, {pipeline_mode = #tpu.pipeline_mode<synchronous>, transform_indices = @transform_14, window_bounds = array<i64: 2, 1, 32>}, {pipeline_mode = #tpu.pipeline_mode<synchronous>, transform_indices = @transform_15, window_bounds = array<i64: 2, 32, 32>}, {pipeline_mode = #tpu.pipeline_mode<synchronous>, transform_indices = @transform_16, window_bounds = array<i64: 2, 1, 32>}, {pipeline_mode = #tpu.pipeline_mode<synchronous>, transform_indices = @transform_17, window_bounds = array<i64: 2, 32, 32>}, {pipeline_mode = #tpu.pipeline_mode<synchronous>, transform_indices = @transform_18, window_bounds = array<i64: 2, 1, 32>}, {pipeline_mode = #tpu.pipeline_mode<synchronous>, transform_indices = @transform_19, window_bounds = array<i64: 2, 32, 32>}, {pipeline_mode = #tpu.pipeline_mode<synchronous>, transform_indices = @transform_20, window_bounds = array<i64: 2, 1, 32>}, {pipeline_mode = #tpu.pipeline_mode<synchronous>, transform_indices = @transform_21, window_bounds = array<i64: 2, 32, 32>}, {pipeline_mode = #tpu.pipeline_mode<synchronous>, transform_indices = @transform_22, window_bounds = array<i64: 2, 1, 32>}, {pipeline_mode = #tpu.pipeline_mode<synchronous>, transform_indices = @transform_23, window_bounds = array<i64: 2, 1, 32>}, {pipeline_mode = #tpu.pipeline_mode<synchronous>, transform_indices = @transform_24, window_bounds = array<i64: 2, 1, 32>}, {pipeline_mode = #tpu.pipeline_mode<synchronous>, transform_indices = @transform_25, window_bounds = array<i64: 2, 32, 64>}, {pipeline_mode = #tpu.pipeline_mode<synchronous>, transform_indices = @transform_26, window_bounds = array<i64: 2, 1, 64>}, {pipeline_mode = #tpu.pipeline_mode<synchronous>, transform_indices = @transform_27, window_bounds = array<i64: 2, 64, 32>}, {pipeline_mode = #tpu.pipeline_mode<synchronous>, transform_indices = @transform_28, window_bounds = array<i64: 2, 1, 32>}, {pipeline_mode = #tpu.pipeline_mode<synchronous>, transform_indices = @transform_29, window_bounds = array<i64: 2, 1, 32>}, {pipeline_mode = #tpu.pipeline_mode<synchronous>, transform_indices = @transform_30, window_bounds = array<i64: 2, 1, 32>}, {pipeline_mode = #tpu.pipeline_mode<synchronous>, transform_indices = @transform_31, window_bounds = array<i64: 1, 32>}, {pipeline_mode = #tpu.pipeline_mode<synchronous>, transform_indices = @transform_32, window_bounds = array<i64: 1, 32>}, {pipeline_mode = #tpu.pipeline_mode<synchronous>, transform_indices = @transform_33, window_bounds = array<i64: 32, 128>}, {pipeline_mode = #tpu.pipeline_mode<synchronous>, transform_indices = @transform_34, window_bounds = array<i64: 1, 128>}, {transform_indices = @transform_35, window_bounds = array<i64: 1, 8, 128>}, {transform_indices = @transform_36, window_bounds = array<i64: 1, 2, 8, 8>}]} {
    %c0 = arith.constant 0 : index
    %c0_0 = arith.constant 0 : index
    %c0_1 = arith.constant 0 : index
    %0 = vector.load %arg1[%c0, %c0_0, %c0_1] : memref<1x8x32xbf16, #tpu.memory_space<vmem>>, vector<1x8x32xbf16>
    %1 = vector.shape_cast %0 : vector<1x8x32xbf16> to vector<8x32xbf16>
    %2 = arith.extf %1 : vector<8x32xbf16> to vector<8x32xf32>
    %c0_2 = arith.constant 0 : index
    %c0_3 = arith.constant 0 : index
    %c0_4 = arith.constant 0 : index
    %3 = vector.load %arg2[%c0_2, %c0_3, %c0_4] : memref<1x8x32xbf16, #tpu.memory_space<vmem>>, vector<1x8x32xbf16>
    %4 = vector.shape_cast %3 : vector<1x8x32xbf16> to vector<8x32xbf16>
    %5 = arith.extf %4 : vector<8x32xbf16> to vector<8x32xf32>
    %c0_5 = arith.constant 0 : index
    %c0_6 = arith.constant 0 : index
    %6 = vector.load %arg3[%c0_5, %c0_6] : memref<8x8xf32, #tpu.memory_space<vmem>>, vector<8x8xf32>
    %c0_7 = arith.constant 0 : index
    %c0_8 = arith.constant 0 : index
    %c0_9 = arith.constant 0 : index
    %7 = vector.load %arg4[%c0_7, %c0_8, %c0_9] : memref<1x1x8xf32, #tpu.memory_space<vmem>>, vector<1x1x8xf32>
    %8 = vector.shape_cast %7 : vector<1x1x8xf32> to vector<1x8xf32>
    %9 = vector.broadcast %8 : vector<1x8xf32> to vector<8x8xf32>
    %10 = arith.addf %6, %9 : vector<8x8xf32>
    %c0_10 = arith.constant 0 : index
    %c0_11 = arith.constant 0 : index
    %c0_12 = arith.constant 0 : index
    %11 = vector.load %arg5[%c0_10, %c0_11, %c0_12] : memref<1x1x8xf32, #tpu.memory_space<vmem>>, vector<1x1x8xf32>
    %12 = vector.shape_cast %11 : vector<1x1x8xf32> to vector<1x8xf32>
    %c0_13 = arith.constant 0 : index
    %c0_14 = arith.constant 0 : index
    %c0_15 = arith.constant 0 : index
    %13 = vector.load %arg6[%c0_13, %c0_14, %c0_15] : memref<2x32x32xbf16, #tpu.memory_space<vmem>>, vector<1x32x32xbf16>
    %14 = vector.shape_cast %13 : vector<1x32x32xbf16> to vector<32x32xbf16>
    %c0_16 = arith.constant 0 : index
    %c0_17 = arith.constant 0 : index
    %c0_18 = arith.constant 0 : index
    %15 = vector.load %arg7[%c0_16, %c0_17, %c0_18] : memref<2x1x32xf32, #tpu.memory_space<vmem>>, vector<1x1x32xf32>
    %16 = vector.shape_cast %15 : vector<1x1x32xf32> to vector<1x32xf32>
    %c0_19 = arith.constant 0 : index
    %c0_20 = arith.constant 0 : index
    %c0_21 = arith.constant 0 : index
    %17 = vector.load %arg8[%c0_19, %c0_20, %c0_21] : memref<2x32x32xbf16, #tpu.memory_space<vmem>>, vector<1x32x32xbf16>
    %18 = vector.shape_cast %17 : vector<1x32x32xbf16> to vector<32x32xbf16>
    %c0_22 = arith.constant 0 : index
    %c0_23 = arith.constant 0 : index
    %c0_24 = arith.constant 0 : index
    %19 = vector.load %arg9[%c0_22, %c0_23, %c0_24] : memref<2x1x32xf32, #tpu.memory_space<vmem>>, vector<1x1x32xf32>
    %20 = vector.shape_cast %19 : vector<1x1x32xf32> to vector<1x32xf32>
    %c0_25 = arith.constant 0 : index
    %c0_26 = arith.constant 0 : index
    %c0_27 = arith.constant 0 : index
    %21 = vector.load %arg10[%c0_25, %c0_26, %c0_27] : memref<2x32x32xbf16, #tpu.memory_space<vmem>>, vector<1x32x32xbf16>
    %22 = vector.shape_cast %21 : vector<1x32x32xbf16> to vector<32x32xbf16>
    %c0_28 = arith.constant 0 : index
    %c0_29 = arith.constant 0 : index
    %c0_30 = arith.constant 0 : index
    %23 = vector.load %arg11[%c0_28, %c0_29, %c0_30] : memref<2x1x32xf32, #tpu.memory_space<vmem>>, vector<1x1x32xf32>
    %24 = vector.shape_cast %23 : vector<1x1x32xf32> to vector<1x32xf32>
    %c0_31 = arith.constant 0 : index
    %c0_32 = arith.constant 0 : index
    %c0_33 = arith.constant 0 : index
    %25 = vector.load %arg12[%c0_31, %c0_32, %c0_33] : memref<2x32x32xbf16, #tpu.memory_space<vmem>>, vector<1x32x32xbf16>
    %26 = vector.shape_cast %25 : vector<1x32x32xbf16> to vector<32x32xbf16>
    %c0_34 = arith.constant 0 : index
    %c0_35 = arith.constant 0 : index
    %c0_36 = arith.constant 0 : index
    %27 = vector.load %arg13[%c0_34, %c0_35, %c0_36] : memref<2x1x32xf32, #tpu.memory_space<vmem>>, vector<1x1x32xf32>
    %28 = vector.shape_cast %27 : vector<1x1x32xf32> to vector<1x32xf32>
    %29 = arith.truncf %2 : vector<8x32xf32> to vector<8x32xbf16>
    %30 = arith.truncf %2 : vector<8x32xf32> to vector<8x32xbf16>
    %cst = arith.constant dense<0.000000e+00> : vector<8x32xf32>
    %31 = tpu.matmul %29, %14, %cst {dimension_numbers = #tpu.dot_dimension_numbers<[1], [0], [0], [1], [0, 0, 1, 1], [], []>} : vector<8x32xbf16>, vector<32x32xbf16>, vector<8x32xf32> -> vector<8x32xf32>
    %32 = vector.broadcast %16 : vector<1x32xf32> to vector<8x32xf32>
    %33 = arith.addf %31, %32 : vector<8x32xf32>
    %cst_37 = arith.constant dense<0.000000e+00> : vector<8x32xf32>
    %34 = tpu.matmul %30, %18, %cst_37 {dimension_numbers = #tpu.dot_dimension_numbers<[1], [0], [0], [1], [0, 0, 1, 1], [], []>} : vector<8x32xbf16>, vector<32x32xbf16>, vector<8x32xf32> -> vector<8x32xf32>
    %35 = vector.broadcast %20 : vector<1x32xf32> to vector<8x32xf32>
    %36 = arith.addf %34, %35 : vector<8x32xf32>
    %cst_38 = arith.constant dense<0.000000e+00> : vector<8x32xf32>
    %37 = tpu.matmul %30, %22, %cst_38 {dimension_numbers = #tpu.dot_dimension_numbers<[1], [0], [0], [1], [0, 0, 1, 1], [], []>} : vector<8x32xbf16>, vector<32x32xbf16>, vector<8x32xf32> -> vector<8x32xf32>
    %38 = vector.broadcast %24 : vector<1x32xf32> to vector<8x32xf32>
    %39 = arith.addf %37, %38 : vector<8x32xf32>
    %40 = vector.shape_cast %33 : vector<8x32xf32> to vector<8x4x8xf32>
    %41 = tpu.transpose %40, [1, 0, 2] : vector<8x4x8xf32> -> vector<4x8x8xf32>
    %42 = vector.shape_cast %36 : vector<8x32xf32> to vector<8x4x8xf32>
    %43 = tpu.transpose %42, [1, 0, 2] : vector<8x4x8xf32> -> vector<4x8x8xf32>
    %44 = vector.shape_cast %39 : vector<8x32xf32> to vector<8x4x8xf32>
    %45 = tpu.transpose %44, [1, 0, 2] : vector<8x4x8xf32> -> vector<4x8x8xf32>
    %46 = arith.truncf %41 : vector<4x8x8xf32> to vector<4x8x8xbf16>
    %47 = arith.truncf %43 : vector<4x8x8xf32> to vector<4x8x8xbf16>
    "tpu.trace_start"() <{level = 10 : i32, message = "hqd,hkd->hqk"}> : () -> ()
    %cst_39 = arith.constant dense<0.000000e+00> : vector<4x8x8xf32>
    %48 = tpu.matmul %46, %47, %cst_39 {dimension_numbers = #tpu.dot_dimension_numbers<[2], [2], [1], [1], [0, 0, 0, 1, 1, 1], [0], [0]>} : vector<4x8x8xbf16>, vector<4x8x8xbf16>, vector<4x8x8xf32> -> vector<4x8x8xf32>
    "tpu.trace_stop"() : () -> ()
    %cst_40 = arith.constant 0.353553385 : f32
    %49 = vector.broadcast %cst_40 : f32 to vector<4x8x8xf32>
    %50 = arith.mulf %48, %49 : vector<4x8x8xf32>
    %51 = vector.shape_cast %10 : vector<8x8xf32> to vector<1x8x8xf32>
    %52 = vector.broadcast %51 : vector<1x8x8xf32> to vector<4x8x8xf32>
    %53 = arith.addf %50, %52 : vector<4x8x8xf32>
    %cst_41 = arith.constant dense<0xFF800000> : vector<4x8xf32>
    %54 = vector.multi_reduction <maximumf>, %53, %cst_41 [2] : vector<4x8x8xf32> to vector<4x8xf32>
    %55 = vector.shape_cast %54 : vector<4x8xf32> to vector<4x8x1xf32>
    %56 = vector.broadcast %55 : vector<4x8x1xf32> to vector<4x8x8xf32>
    %57 = arith.subf %53, %56 : vector<4x8x8xf32>
    %58 = math.exp %57 : vector<4x8x8xf32>
    %cst_42 = arith.constant dense<0.000000e+00> : vector<4x8xf32>
    %59 = vector.multi_reduction <add>, %58, %cst_42 [2] : vector<4x8x8xf32> to vector<4x8xf32>
    %60 = vector.shape_cast %59 : vector<4x8xf32> to vector<4x8x1xf32>
    %61 = vector.broadcast %60 : vector<4x8x1xf32> to vector<4x8x8xf32>
    %62 = arith.divf %58, %61 : vector<4x8x8xf32>
    %63 = arith.truncf %62 : vector<4x8x8xf32> to vector<4x8x8xbf16>
    %64 = arith.truncf %45 : vector<4x8x8xf32> to vector<4x8x8xbf16>
    "tpu.trace_start"() <{level = 10 : i32, message = "hqk,hkd->hqd"}> : () -> ()
    %cst_43 = arith.constant dense<0.000000e+00> : vector<4x8x8xf32>
    %65 = tpu.matmul %63, %64, %cst_43 {dimension_numbers = #tpu.dot_dimension_numbers<[2], [1], [1], [2], [0, 0, 0, 1, 1, 2], [0], [0]>} : vector<4x8x8xbf16>, vector<4x8x8xbf16>, vector<4x8x8xf32> -> vector<4x8x8xf32>
    "tpu.trace_stop"() : () -> ()
    %66 = tpu.transpose %65, [1, 0, 2] : vector<4x8x8xf32> -> vector<8x4x8xf32>
    %67 = vector.shape_cast %66 : vector<8x4x8xf32> to vector<8x32xf32>
    %68 = arith.truncf %67 : vector<8x32xf32> to vector<8x32xbf16>
    %cst_44 = arith.constant dense<0.000000e+00> : vector<8x32xf32>
    %69 = tpu.matmul %68, %26, %cst_44 {dimension_numbers = #tpu.dot_dimension_numbers<[1], [0], [0], [1], [0, 0, 1, 1], [], []>} : vector<8x32xbf16>, vector<32x32xbf16>, vector<8x32xf32> -> vector<8x32xf32>
    %70 = vector.broadcast %28 : vector<1x32xf32> to vector<8x32xf32>
    %71 = arith.addf %69, %70 : vector<8x32xf32>
    %72 = arith.addf %2, %71 : vector<8x32xf32>
    %c0_45 = arith.constant 0 : index
    %c0_46 = arith.constant 0 : index
    %c0_47 = arith.constant 0 : index
    %73 = vector.load %arg14[%c0_45, %c0_46, %c0_47] : memref<2x1x32xf32, #tpu.memory_space<vmem>>, vector<1x1x32xf32>
    %74 = vector.shape_cast %73 : vector<1x1x32xf32> to vector<1x32xf32>
    %c0_48 = arith.constant 0 : index
    %c0_49 = arith.constant 0 : index
    %c0_50 = arith.constant 0 : index
    %75 = vector.load %arg15[%c0_48, %c0_49, %c0_50] : memref<2x1x32xf32, #tpu.memory_space<vmem>>, vector<1x1x32xf32>
    %76 = vector.shape_cast %75 : vector<1x1x32xf32> to vector<1x32xf32>
    %cst_51 = arith.constant dense<0.000000e+00> : vector<8xf32>
    %77 = vector.multi_reduction <add>, %72, %cst_51 [1] : vector<8x32xf32> to vector<8xf32>
    %78 = vector.shape_cast %77 : vector<8xf32> to vector<8x1xf32>
    %cst_52 = arith.constant 3.200000e+01 : f32
    %79 = vector.broadcast %cst_52 : f32 to vector<8x1xf32>
    %80 = arith.divf %78, %79 : vector<8x1xf32>
    %81 = vector.broadcast %80 : vector<8x1xf32> to vector<8x32xf32>
    %82 = arith.subf %72, %81 : vector<8x32xf32>
    %83 = arith.mulf %82, %82 : vector<8x32xf32>
    %cst_53 = arith.constant dense<0.000000e+00> : vector<8xf32>
    %84 = vector.multi_reduction <add>, %83, %cst_53 [1] : vector<8x32xf32> to vector<8xf32>
    %85 = vector.shape_cast %84 : vector<8xf32> to vector<8x1xf32>
    %cst_54 = arith.constant 3.200000e+01 : f32
    %86 = vector.broadcast %cst_54 : f32 to vector<8x1xf32>
    %87 = arith.divf %85, %86 : vector<8x1xf32>
    %88 = vector.broadcast %80 : vector<8x1xf32> to vector<8x32xf32>
    %89 = arith.subf %72, %88 : vector<8x32xf32>
    %cst_55 = arith.constant 9.99999974E-6 : f32
    %90 = vector.broadcast %cst_55 : f32 to vector<8x1xf32>
    %91 = arith.addf %87, %90 : vector<8x1xf32>
    %92 = math.rsqrt %91 : vector<8x1xf32>
    %93 = vector.broadcast %92 : vector<8x1xf32> to vector<8x32xf32>
    %94 = arith.mulf %89, %93 : vector<8x32xf32>
    %95 = vector.broadcast %74 : vector<1x32xf32> to vector<8x32xf32>
    %96 = arith.mulf %94, %95 : vector<8x32xf32>
    %97 = vector.broadcast %76 : vector<1x32xf32> to vector<8x32xf32>
    %98 = arith.addf %96, %97 : vector<8x32xf32>
    %c0_56 = arith.constant 0 : index
    %c0_57 = arith.constant 0 : index
    %c0_58 = arith.constant 0 : index
    %99 = vector.load %arg16[%c0_56, %c0_57, %c0_58] : memref<2x32x32xbf16, #tpu.memory_space<vmem>>, vector<1x32x32xbf16>
    %100 = vector.shape_cast %99 : vector<1x32x32xbf16> to vector<32x32xbf16>
    %c0_59 = arith.constant 0 : index
    %c0_60 = arith.constant 0 : index
    %c0_61 = arith.constant 0 : index
    %101 = vector.load %arg17[%c0_59, %c0_60, %c0_61] : memref<2x1x32xf32, #tpu.memory_space<vmem>>, vector<1x1x32xf32>
    %102 = vector.shape_cast %101 : vector<1x1x32xf32> to vector<1x32xf32>
    %c0_62 = arith.constant 0 : index
    %c0_63 = arith.constant 0 : index
    %c0_64 = arith.constant 0 : index
    %103 = vector.load %arg18[%c0_62, %c0_63, %c0_64] : memref<2x32x32xbf16, #tpu.memory_space<vmem>>, vector<1x32x32xbf16>
    %104 = vector.shape_cast %103 : vector<1x32x32xbf16> to vector<32x32xbf16>
    %c0_65 = arith.constant 0 : index
    %c0_66 = arith.constant 0 : index
    %c0_67 = arith.constant 0 : index
    %105 = vector.load %arg19[%c0_65, %c0_66, %c0_67] : memref<2x1x32xf32, #tpu.memory_space<vmem>>, vector<1x1x32xf32>
    %106 = vector.shape_cast %105 : vector<1x1x32xf32> to vector<1x32xf32>
    %c0_68 = arith.constant 0 : index
    %c0_69 = arith.constant 0 : index
    %c0_70 = arith.constant 0 : index
    %107 = vector.load %arg20[%c0_68, %c0_69, %c0_70] : memref<2x32x32xbf16, #tpu.memory_space<vmem>>, vector<1x32x32xbf16>
    %108 = vector.shape_cast %107 : vector<1x32x32xbf16> to vector<32x32xbf16>
    %c0_71 = arith.constant 0 : index
    %c0_72 = arith.constant 0 : index
    %c0_73 = arith.constant 0 : index
    %109 = vector.load %arg21[%c0_71, %c0_72, %c0_73] : memref<2x1x32xf32, #tpu.memory_space<vmem>>, vector<1x1x32xf32>
    %110 = vector.shape_cast %109 : vector<1x1x32xf32> to vector<1x32xf32>
    %c0_74 = arith.constant 0 : index
    %c0_75 = arith.constant 0 : index
    %c0_76 = arith.constant 0 : index
    %111 = vector.load %arg22[%c0_74, %c0_75, %c0_76] : memref<2x32x32xbf16, #tpu.memory_space<vmem>>, vector<1x32x32xbf16>
    %112 = vector.shape_cast %111 : vector<1x32x32xbf16> to vector<32x32xbf16>
    %c0_77 = arith.constant 0 : index
    %c0_78 = arith.constant 0 : index
    %c0_79 = arith.constant 0 : index
    %113 = vector.load %arg23[%c0_77, %c0_78, %c0_79] : memref<2x1x32xf32, #tpu.memory_space<vmem>>, vector<1x1x32xf32>
    %114 = vector.shape_cast %113 : vector<1x1x32xf32> to vector<1x32xf32>
    %115 = arith.truncf %98 : vector<8x32xf32> to vector<8x32xbf16>
    %116 = arith.truncf %5 : vector<8x32xf32> to vector<8x32xbf16>
    %cst_80 = arith.constant dense<0.000000e+00> : vector<8x32xf32>
    %117 = tpu.matmul %115, %100, %cst_80 {dimension_numbers = #tpu.dot_dimension_numbers<[1], [0], [0], [1], [0, 0, 1, 1], [], []>} : vector<8x32xbf16>, vector<32x32xbf16>, vector<8x32xf32> -> vector<8x32xf32>
    %118 = vector.broadcast %102 : vector<1x32xf32> to vector<8x32xf32>
    %119 = arith.addf %117, %118 : vector<8x32xf32>
    %cst_81 = arith.constant dense<0.000000e+00> : vector<8x32xf32>
    %120 = tpu.matmul %116, %104, %cst_81 {dimension_numbers = #tpu.dot_dimension_numbers<[1], [0], [0], [1], [0, 0, 1, 1], [], []>} : vector<8x32xbf16>, vector<32x32xbf16>, vector<8x32xf32> -> vector<8x32xf32>
    %121 = vector.broadcast %106 : vector<1x32xf32> to vector<8x32xf32>
    %122 = arith.addf %120, %121 : vector<8x32xf32>
    %cst_82 = arith.constant dense<0.000000e+00> : vector<8x32xf32>
    %123 = tpu.matmul %116, %108, %cst_82 {dimension_numbers = #tpu.dot_dimension_numbers<[1], [0], [0], [1], [0, 0, 1, 1], [], []>} : vector<8x32xbf16>, vector<32x32xbf16>, vector<8x32xf32> -> vector<8x32xf32>
    %124 = vector.broadcast %110 : vector<1x32xf32> to vector<8x32xf32>
    %125 = arith.addf %123, %124 : vector<8x32xf32>
    %126 = vector.shape_cast %119 : vector<8x32xf32> to vector<8x4x8xf32>
    %127 = tpu.transpose %126, [1, 0, 2] : vector<8x4x8xf32> -> vector<4x8x8xf32>
    %128 = vector.shape_cast %122 : vector<8x32xf32> to vector<8x4x8xf32>
    %129 = tpu.transpose %128, [1, 0, 2] : vector<8x4x8xf32> -> vector<4x8x8xf32>
    %130 = vector.shape_cast %125 : vector<8x32xf32> to vector<8x4x8xf32>
    %131 = tpu.transpose %130, [1, 0, 2] : vector<8x4x8xf32> -> vector<4x8x8xf32>
    %132 = arith.truncf %127 : vector<4x8x8xf32> to vector<4x8x8xbf16>
    %133 = arith.truncf %129 : vector<4x8x8xf32> to vector<4x8x8xbf16>
    "tpu.trace_start"() <{level = 10 : i32, message = "hqd,hkd->hqk"}> : () -> ()
    %cst_83 = arith.constant dense<0.000000e+00> : vector<4x8x8xf32>
    %134 = tpu.matmul %132, %133, %cst_83 {dimension_numbers = #tpu.dot_dimension_numbers<[2], [2], [1], [1], [0, 0, 0, 1, 1, 1], [0], [0]>} : vector<4x8x8xbf16>, vector<4x8x8xbf16>, vector<4x8x8xf32> -> vector<4x8x8xf32>
    "tpu.trace_stop"() : () -> ()
    %cst_84 = arith.constant 0.353553385 : f32
    %135 = vector.broadcast %cst_84 : f32 to vector<4x8x8xf32>
    %136 = arith.mulf %134, %135 : vector<4x8x8xf32>
    %137 = vector.shape_cast %12 : vector<1x8xf32> to vector<1x1x8xf32>
    %138 = vector.broadcast %137 : vector<1x1x8xf32> to vector<4x8x8xf32>
    %139 = arith.addf %136, %138 : vector<4x8x8xf32>
    %cst_85 = arith.constant dense<0xFF800000> : vector<4x8xf32>
    %140 = vector.multi_reduction <maximumf>, %139, %cst_85 [2] : vector<4x8x8xf32> to vector<4x8xf32>
    %141 = vector.shape_cast %140 : vector<4x8xf32> to vector<4x8x1xf32>
    %142 = vector.broadcast %141 : vector<4x8x1xf32> to vector<4x8x8xf32>
    %143 = arith.subf %139, %142 : vector<4x8x8xf32>
    %144 = math.exp %143 : vector<4x8x8xf32>
    %cst_86 = arith.constant dense<0.000000e+00> : vector<4x8xf32>
    %145 = vector.multi_reduction <add>, %144, %cst_86 [2] : vector<4x8x8xf32> to vector<4x8xf32>
    %146 = vector.shape_cast %145 : vector<4x8xf32> to vector<4x8x1xf32>
    %147 = vector.broadcast %146 : vector<4x8x1xf32> to vector<4x8x8xf32>
    %148 = arith.divf %144, %147 : vector<4x8x8xf32>
    %149 = arith.truncf %148 : vector<4x8x8xf32> to vector<4x8x8xbf16>
    %150 = arith.truncf %131 : vector<4x8x8xf32> to vector<4x8x8xbf16>
    "tpu.trace_start"() <{level = 10 : i32, message = "hqk,hkd->hqd"}> : () -> ()
    %cst_87 = arith.constant dense<0.000000e+00> : vector<4x8x8xf32>
    %151 = tpu.matmul %149, %150, %cst_87 {dimension_numbers = #tpu.dot_dimension_numbers<[2], [1], [1], [2], [0, 0, 0, 1, 1, 2], [0], [0]>} : vector<4x8x8xbf16>, vector<4x8x8xbf16>, vector<4x8x8xf32> -> vector<4x8x8xf32>
    "tpu.trace_stop"() : () -> ()
    %152 = tpu.transpose %151, [1, 0, 2] : vector<4x8x8xf32> -> vector<8x4x8xf32>
    %153 = vector.shape_cast %152 : vector<8x4x8xf32> to vector<8x32xf32>
    %154 = arith.truncf %153 : vector<8x32xf32> to vector<8x32xbf16>
    %cst_88 = arith.constant dense<0.000000e+00> : vector<8x32xf32>
    %155 = tpu.matmul %154, %112, %cst_88 {dimension_numbers = #tpu.dot_dimension_numbers<[1], [0], [0], [1], [0, 0, 1, 1], [], []>} : vector<8x32xbf16>, vector<32x32xbf16>, vector<8x32xf32> -> vector<8x32xf32>
    %156 = vector.broadcast %114 : vector<1x32xf32> to vector<8x32xf32>
    %157 = arith.addf %155, %156 : vector<8x32xf32>
    %cst_89 = arith.constant dense<0.000000e+00> : vector<8x8xf32>
    %158 = vector.multi_reduction <add>, %148, %cst_89 [0] : vector<4x8x8xf32> to vector<8x8xf32>
    %cst_90 = arith.constant 4.000000e+00 : f32
    %159 = vector.broadcast %cst_90 : f32 to vector<8x8xf32>
    %160 = arith.divf %158, %159 : vector<8x8xf32>
    %c0_91 = arith.constant 0 : index
    %c0_92 = arith.constant 0 : index
    %c0_93 = arith.constant 0 : index
    %c0_94 = arith.constant 0 : index
    %161 = vector.load %arg37[%c0_91, %c0_92, %c0_93, %c0_94] : memref<1x2x8x8xf32, #tpu.memory_space<vmem>>, vector<1x1x8x8xf32>
    %162 = vector.shape_cast %161 : vector<1x1x8x8xf32> to vector<8x8xf32>
    %163 = vector.shape_cast %160 : vector<8x8xf32> to vector<1x1x8x8xf32>
    tpu.vector_store %arg37[%c0_91, %c0_92, %c0_93, %c0_94], %163 {strides = array<i32>} : memref<1x2x8x8xf32, #tpu.memory_space<vmem>>, vector<1x1x8x8xf32>,
    %164 = arith.addf %98, %157 : vector<8x32xf32>
    %c0_95 = arith.constant 0 : index
    %c0_96 = arith.constant 0 : index
    %c0_97 = arith.constant 0 : index
    %165 = vector.load %arg24[%c0_95, %c0_96, %c0_97] : memref<2x1x32xf32, #tpu.memory_space<vmem>>, vector<1x1x32xf32>
    %166 = vector.shape_cast %165 : vector<1x1x32xf32> to vector<1x32xf32>
    %c0_98 = arith.constant 0 : index
    %c0_99 = arith.constant 0 : index
    %c0_100 = arith.constant 0 : index
    %167 = vector.load %arg25[%c0_98, %c0_99, %c0_100] : memref<2x1x32xf32, #tpu.memory_space<vmem>>, vector<1x1x32xf32>
    %168 = vector.shape_cast %167 : vector<1x1x32xf32> to vector<1x32xf32>
    %cst_101 = arith.constant dense<0.000000e+00> : vector<8xf32>
    %169 = vector.multi_reduction <add>, %164, %cst_101 [1] : vector<8x32xf32> to vector<8xf32>
    %170 = vector.shape_cast %169 : vector<8xf32> to vector<8x1xf32>
    %cst_102 = arith.constant 3.200000e+01 : f32
    %171 = vector.broadcast %cst_102 : f32 to vector<8x1xf32>
    %172 = arith.divf %170, %171 : vector<8x1xf32>
    %173 = vector.broadcast %172 : vector<8x1xf32> to vector<8x32xf32>
    %174 = arith.subf %164, %173 : vector<8x32xf32>
    %175 = arith.mulf %174, %174 : vector<8x32xf32>
    %cst_103 = arith.constant dense<0.000000e+00> : vector<8xf32>
    %176 = vector.multi_reduction <add>, %175, %cst_103 [1] : vector<8x32xf32> to vector<8xf32>
    %177 = vector.shape_cast %176 : vector<8xf32> to vector<8x1xf32>
    %cst_104 = arith.constant 3.200000e+01 : f32
    %178 = vector.broadcast %cst_104 : f32 to vector<8x1xf32>
    %179 = arith.divf %177, %178 : vector<8x1xf32>
    %180 = vector.broadcast %172 : vector<8x1xf32> to vector<8x32xf32>
    %181 = arith.subf %164, %180 : vector<8x32xf32>
    %cst_105 = arith.constant 9.99999974E-6 : f32
    %182 = vector.broadcast %cst_105 : f32 to vector<8x1xf32>
    %183 = arith.addf %179, %182 : vector<8x1xf32>
    %184 = math.rsqrt %183 : vector<8x1xf32>
    %185 = vector.broadcast %184 : vector<8x1xf32> to vector<8x32xf32>
    %186 = arith.mulf %181, %185 : vector<8x32xf32>
    %187 = vector.broadcast %166 : vector<1x32xf32> to vector<8x32xf32>
    %188 = arith.mulf %186, %187 : vector<8x32xf32>
    %189 = vector.broadcast %168 : vector<1x32xf32> to vector<8x32xf32>
    %190 = arith.addf %188, %189 : vector<8x32xf32>
    %c0_106 = arith.constant 0 : index
    %c0_107 = arith.constant 0 : index
    %c0_108 = arith.constant 0 : index
    %191 = vector.load %arg26[%c0_106, %c0_107, %c0_108] : memref<2x32x64xbf16, #tpu.memory_space<vmem>>, vector<1x32x64xbf16>
    %192 = vector.shape_cast %191 : vector<1x32x64xbf16> to vector<32x64xbf16>
    %c0_109 = arith.constant 0 : index
    %c0_110 = arith.constant 0 : index
    %c0_111 = arith.constant 0 : index
    %193 = vector.load %arg27[%c0_109, %c0_110, %c0_111] : memref<2x1x64xf32, #tpu.memory_space<vmem>>, vector<1x1x64xf32>
    %194 = vector.shape_cast %193 : vector<1x1x64xf32> to vector<1x64xf32>
    %c0_112 = arith.constant 0 : index
    %c0_113 = arith.constant 0 : index
    %c0_114 = arith.constant 0 : index
    %195 = vector.load %arg28[%c0_112, %c0_113, %c0_114] : memref<2x64x32xbf16, #tpu.memory_space<vmem>>, vector<1x64x32xbf16>
    %196 = vector.shape_cast %195 : vector<1x64x32xbf16> to vector<64x32xbf16>
    %c0_115 = arith.constant 0 : index
    %c0_116 = arith.constant 0 : index
    %c0_117 = arith.constant 0 : index
    %197 = vector.load %arg29[%c0_115, %c0_116, %c0_117] : memref<2x1x32xf32, #tpu.memory_space<vmem>>, vector<1x1x32xf32>
    %198 = vector.shape_cast %197 : vector<1x1x32xf32> to vector<1x32xf32>
    %199 = arith.truncf %190 : vector<8x32xf32> to vector<8x32xbf16>
    %cst_118 = arith.constant dense<0.000000e+00> : vector<8x64xf32>
    %200 = tpu.matmul %199, %192, %cst_118 {dimension_numbers = #tpu.dot_dimension_numbers<[1], [0], [0], [1], [0, 0, 1, 1], [], []>} : vector<8x32xbf16>, vector<32x64xbf16>, vector<8x64xf32> -> vector<8x64xf32>
    %201 = vector.broadcast %194 : vector<1x64xf32> to vector<8x64xf32>
    %202 = arith.addf %200, %201 : vector<8x64xf32>
    %cst_119 = arith.constant 0.000000e+00 : f32
    %203 = vector.broadcast %cst_119 : f32 to vector<8x64xf32>
    %204 = arith.maximumf %202, %203 : vector<8x64xf32>
    %205 = arith.truncf %204 : vector<8x64xf32> to vector<8x64xbf16>
    %cst_120 = arith.constant dense<0.000000e+00> : vector<8x32xf32>
    %206 = tpu.matmul %205, %196, %cst_120 {dimension_numbers = #tpu.dot_dimension_numbers<[1], [0], [0], [1], [0, 0, 1, 1], [], []>} : vector<8x64xbf16>, vector<64x32xbf16>, vector<8x32xf32> -> vector<8x32xf32>
    %207 = vector.broadcast %198 : vector<1x32xf32> to vector<8x32xf32>
    %208 = arith.addf %206, %207 : vector<8x32xf32>
    %209 = arith.addf %190, %208 : vector<8x32xf32>
    %c0_121 = arith.constant 0 : index
    %c0_122 = arith.constant 0 : index
    %c0_123 = arith.constant 0 : index
    %210 = vector.load %arg30[%c0_121, %c0_122, %c0_123] : memref<2x1x32xf32, #tpu.memory_space<vmem>>, vector<1x1x32xf32>
    %211 = vector.shape_cast %210 : vector<1x1x32xf32> to vector<1x32xf32>
    %c0_124 = arith.constant 0 : index
    %c0_125 = arith.constant 0 : index
    %c0_126 = arith.constant 0 : index
    %212 = vector.load %arg31[%c0_124, %c0_125, %c0_126] : memref<2x1x32xf32, #tpu.memory_space<vmem>>, vector<1x1x32xf32>
    %213 = vector.shape_cast %212 : vector<1x1x32xf32> to vector<1x32xf32>
    %cst_127 = arith.constant dense<0.000000e+00> : vector<8xf32>
    %214 = vector.multi_reduction <add>, %209, %cst_127 [1] : vector<8x32xf32> to vector<8xf32>
    %215 = vector.shape_cast %214 : vector<8xf32> to vector<8x1xf32>
    %cst_128 = arith.constant 3.200000e+01 : f32
    %216 = vector.broadcast %cst_128 : f32 to vector<8x1xf32>
    %217 = arith.divf %215, %216 : vector<8x1xf32>
    %218 = vector.broadcast %217 : vector<8x1xf32> to vector<8x32xf32>
    %219 = arith.subf %209, %218 : vector<8x32xf32>
    %220 = arith.mulf %219, %219 : vector<8x32xf32>
    %cst_129 = arith.constant dense<0.000000e+00> : vector<8xf32>
    %221 = vector.multi_reduction <add>, %220, %cst_129 [1] : vector<8x32xf32> to vector<8xf32>
    %222 = vector.shape_cast %221 : vector<8xf32> to vector<8x1xf32>
    %cst_130 = arith.constant 3.200000e+01 : f32
    %223 = vector.broadcast %cst_130 : f32 to vector<8x1xf32>
    %224 = arith.divf %222, %223 : vector<8x1xf32>
    %225 = vector.broadcast %217 : vector<8x1xf32> to vector<8x32xf32>
    %226 = arith.subf %209, %225 : vector<8x32xf32>
    %cst_131 = arith.constant 9.99999974E-6 : f32
    %227 = vector.broadcast %cst_131 : f32 to vector<8x1xf32>
    %228 = arith.addf %224, %227 : vector<8x1xf32>
    %229 = math.rsqrt %228 : vector<8x1xf32>
    %230 = vector.broadcast %229 : vector<8x1xf32> to vector<8x32xf32>
    %231 = arith.mulf %226, %230 : vector<8x32xf32>
    %232 = vector.broadcast %211 : vector<1x32xf32> to vector<8x32xf32>
    %233 = arith.mulf %231, %232 : vector<8x32xf32>
    %234 = vector.broadcast %213 : vector<1x32xf32> to vector<8x32xf32>
    %235 = arith.addf %233, %234 : vector<8x32xf32>
    %c1 = arith.constant 1 : index
    %c0_132 = arith.constant 0 : index
    %c0_133 = arith.constant 0 : index
    %236 = vector.load %arg6[%c1, %c0_132, %c0_133] : memref<2x32x32xbf16, #tpu.memory_space<vmem>>, vector<1x32x32xbf16>
    %237 = vector.shape_cast %236 : vector<1x32x32xbf16> to vector<32x32xbf16>
    %c1_134 = arith.constant 1 : index
    %c0_135 = arith.constant 0 : index
    %c0_136 = arith.constant 0 : index
    %238 = vector.load %arg7[%c1_134, %c0_135, %c0_136] : memref<2x1x32xf32, #tpu.memory_space<vmem>>, vector<1x1x32xf32>
    %239 = vector.shape_cast %238 : vector<1x1x32xf32> to vector<1x32xf32>
    %c1_137 = arith.constant 1 : index
    %c0_138 = arith.constant 0 : index
    %c0_139 = arith.constant 0 : index
    %240 = vector.load %arg8[%c1_137, %c0_138, %c0_139] : memref<2x32x32xbf16, #tpu.memory_space<vmem>>, vector<1x32x32xbf16>
    %241 = vector.shape_cast %240 : vector<1x32x32xbf16> to vector<32x32xbf16>
    %c1_140 = arith.constant 1 : index
    %c0_141 = arith.constant 0 : index
    %c0_142 = arith.constant 0 : index
    %242 = vector.load %arg9[%c1_140, %c0_141, %c0_142] : memref<2x1x32xf32, #tpu.memory_space<vmem>>, vector<1x1x32xf32>
    %243 = vector.shape_cast %242 : vector<1x1x32xf32> to vector<1x32xf32>
    %c1_143 = arith.constant 1 : index
    %c0_144 = arith.constant 0 : index
    %c0_145 = arith.constant 0 : index
    %244 = vector.load %arg10[%c1_143, %c0_144, %c0_145] : memref<2x32x32xbf16, #tpu.memory_space<vmem>>, vector<1x32x32xbf16>
    %245 = vector.shape_cast %244 : vector<1x32x32xbf16> to vector<32x32xbf16>
    %c1_146 = arith.constant 1 : index
    %c0_147 = arith.constant 0 : index
    %c0_148 = arith.constant 0 : index
    %246 = vector.load %arg11[%c1_146, %c0_147, %c0_148] : memref<2x1x32xf32, #tpu.memory_space<vmem>>, vector<1x1x32xf32>
    %247 = vector.shape_cast %246 : vector<1x1x32xf32> to vector<1x32xf32>
    %c1_149 = arith.constant 1 : index
    %c0_150 = arith.constant 0 : index
    %c0_151 = arith.constant 0 : index
    %248 = vector.load %arg12[%c1_149, %c0_150, %c0_151] : memref<2x32x32xbf16, #tpu.memory_space<vmem>>, vector<1x32x32xbf16>
    %249 = vector.shape_cast %248 : vector<1x32x32xbf16> to vector<32x32xbf16>
    %c1_152 = arith.constant 1 : index
    %c0_153 = arith.constant 0 : index
    %c0_154 = arith.constant 0 : index
    %250 = vector.load %arg13[%c1_152, %c0_153, %c0_154] : memref<2x1x32xf32, #tpu.memory_space<vmem>>, vector<1x1x32xf32>
    %251 = vector.shape_cast %250 : vector<1x1x32xf32> to vector<1x32xf32>
    %252 = arith.truncf %235 : vector<8x32xf32> to vector<8x32xbf16>
    %253 = arith.truncf %235 : vector<8x32xf32> to vector<8x32xbf16>
    %cst_155 = arith.constant dense<0.000000e+00> : vector<8x32xf32>
    %254 = tpu.matmul %252, %237, %cst_155 {dimension_numbers = #tpu.dot_dimension_numbers<[1], [0], [0], [1], [0, 0, 1, 1], [], []>} : vector<8x32xbf16>, vector<32x32xbf16>, vector<8x32xf32> -> vector<8x32xf32>
    %255 = vector.broadcast %239 : vector<1x32xf32> to vector<8x32xf32>
    %256 = arith.addf %254, %255 : vector<8x32xf32>
    %cst_156 = arith.constant dense<0.000000e+00> : vector<8x32xf32>
    %257 = tpu.matmul %253, %241, %cst_156 {dimension_numbers = #tpu.dot_dimension_numbers<[1], [0], [0], [1], [0, 0, 1, 1], [], []>} : vector<8x32xbf16>, vector<32x32xbf16>, vector<8x32xf32> -> vector<8x32xf32>
    %258 = vector.broadcast %243 : vector<1x32xf32> to vector<8x32xf32>
    %259 = arith.addf %257, %258 : vector<8x32xf32>
    %cst_157 = arith.constant dense<0.000000e+00> : vector<8x32xf32>
    %260 = tpu.matmul %253, %245, %cst_157 {dimension_numbers = #tpu.dot_dimension_numbers<[1], [0], [0], [1], [0, 0, 1, 1], [], []>} : vector<8x32xbf16>, vector<32x32xbf16>, vector<8x32xf32> -> vector<8x32xf32>
    %261 = vector.broadcast %247 : vector<1x32xf32> to vector<8x32xf32>
    %262 = arith.addf %260, %261 : vector<8x32xf32>
    %263 = vector.shape_cast %256 : vector<8x32xf32> to vector<8x4x8xf32>
    %264 = tpu.transpose %263, [1, 0, 2] : vector<8x4x8xf32> -> vector<4x8x8xf32>
    %265 = vector.shape_cast %259 : vector<8x32xf32> to vector<8x4x8xf32>
    %266 = tpu.transpose %265, [1, 0, 2] : vector<8x4x8xf32> -> vector<4x8x8xf32>
    %267 = vector.shape_cast %262 : vector<8x32xf32> to vector<8x4x8xf32>
    %268 = tpu.transpose %267, [1, 0, 2] : vector<8x4x8xf32> -> vector<4x8x8xf32>
    %269 = arith.truncf %264 : vector<4x8x8xf32> to vector<4x8x8xbf16>
    %270 = arith.truncf %266 : vector<4x8x8xf32> to vector<4x8x8xbf16>
    "tpu.trace_start"() <{level = 10 : i32, message = "hqd,hkd->hqk"}> : () -> ()
    %cst_158 = arith.constant dense<0.000000e+00> : vector<4x8x8xf32>
    %271 = tpu.matmul %269, %270, %cst_158 {dimension_numbers = #tpu.dot_dimension_numbers<[2], [2], [1], [1], [0, 0, 0, 1, 1, 1], [0], [0]>} : vector<4x8x8xbf16>, vector<4x8x8xbf16>, vector<4x8x8xf32> -> vector<4x8x8xf32>
    "tpu.trace_stop"() : () -> ()
    %cst_159 = arith.constant 0.353553385 : f32
    %272 = vector.broadcast %cst_159 : f32 to vector<4x8x8xf32>
    %273 = arith.mulf %271, %272 : vector<4x8x8xf32>
    %274 = vector.shape_cast %10 : vector<8x8xf32> to vector<1x8x8xf32>
    %275 = vector.broadcast %274 : vector<1x8x8xf32> to vector<4x8x8xf32>
    %276 = arith.addf %273, %275 : vector<4x8x8xf32>
    %cst_160 = arith.constant dense<0xFF800000> : vector<4x8xf32>
    %277 = vector.multi_reduction <maximumf>, %276, %cst_160 [2] : vector<4x8x8xf32> to vector<4x8xf32>
    %278 = vector.shape_cast %277 : vector<4x8xf32> to vector<4x8x1xf32>
    %279 = vector.broadcast %278 : vector<4x8x1xf32> to vector<4x8x8xf32>
    %280 = arith.subf %276, %279 : vector<4x8x8xf32>
    %281 = math.exp %280 : vector<4x8x8xf32>
    %cst_161 = arith.constant dense<0.000000e+00> : vector<4x8xf32>
    %282 = vector.multi_reduction <add>, %281, %cst_161 [2] : vector<4x8x8xf32> to vector<4x8xf32>
    %283 = vector.shape_cast %282 : vector<4x8xf32> to vector<4x8x1xf32>
    %284 = vector.broadcast %283 : vector<4x8x1xf32> to vector<4x8x8xf32>
    %285 = arith.divf %281, %284 : vector<4x8x8xf32>
    %286 = arith.truncf %285 : vector<4x8x8xf32> to vector<4x8x8xbf16>
    %287 = arith.truncf %268 : vector<4x8x8xf32> to vector<4x8x8xbf16>
    "tpu.trace_start"() <{level = 10 : i32, message = "hqk,hkd->hqd"}> : () -> ()
    %cst_162 = arith.constant dense<0.000000e+00> : vector<4x8x8xf32>
    %288 = tpu.matmul %286, %287, %cst_162 {dimension_numbers = #tpu.dot_dimension_numbers<[2], [1], [1], [2], [0, 0, 0, 1, 1, 2], [0], [0]>} : vector<4x8x8xbf16>, vector<4x8x8xbf16>, vector<4x8x8xf32> -> vector<4x8x8xf32>
    "tpu.trace_stop"() : () -> ()
    %289 = tpu.transpose %288, [1, 0, 2] : vector<4x8x8xf32> -> vector<8x4x8xf32>
    %290 = vector.shape_cast %289 : vector<8x4x8xf32> to vector<8x32xf32>
    %291 = arith.truncf %290 : vector<8x32xf32> to vector<8x32xbf16>
    %cst_163 = arith.constant dense<0.000000e+00> : vector<8x32xf32>
    %292 = tpu.matmul %291, %249, %cst_163 {dimension_numbers = #tpu.dot_dimension_numbers<[1], [0], [0], [1], [0, 0, 1, 1], [], []>} : vector<8x32xbf16>, vector<32x32xbf16>, vector<8x32xf32> -> vector<8x32xf32>
    %293 = vector.broadcast %251 : vector<1x32xf32> to vector<8x32xf32>
    %294 = arith.addf %292, %293 : vector<8x32xf32>
    %295 = arith.addf %235, %294 : vector<8x32xf32>
    %c1_164 = arith.constant 1 : index
    %c0_165 = arith.constant 0 : index
    %c0_166 = arith.constant 0 : index
    %296 = vector.load %arg14[%c1_164, %c0_165, %c0_166] : memref<2x1x32xf32, #tpu.memory_space<vmem>>, vector<1x1x32xf32>
    %297 = vector.shape_cast %296 : vector<1x1x32xf32> to vector<1x32xf32>
    %c1_167 = arith.constant 1 : index
    %c0_168 = arith.constant 0 : index
    %c0_169 = arith.constant 0 : index
    %298 = vector.load %arg15[%c1_167, %c0_168, %c0_169] : memref<2x1x32xf32, #tpu.memory_space<vmem>>, vector<1x1x32xf32>
    %299 = vector.shape_cast %298 : vector<1x1x32xf32> to vector<1x32xf32>
    %cst_170 = arith.constant dense<0.000000e+00> : vector<8xf32>
    %300 = vector.multi_reduction <add>, %295, %cst_170 [1] : vector<8x32xf32> to vector<8xf32>
    %301 = vector.shape_cast %300 : vector<8xf32> to vector<8x1xf32>
    %cst_171 = arith.constant 3.200000e+01 : f32
    %302 = vector.broadcast %cst_171 : f32 to vector<8x1xf32>
    %303 = arith.divf %301, %302 : vector<8x1xf32>
    %304 = vector.broadcast %303 : vector<8x1xf32> to vector<8x32xf32>
    %305 = arith.subf %295, %304 : vector<8x32xf32>
    %306 = arith.mulf %305, %305 : vector<8x32xf32>
    %cst_172 = arith.constant dense<0.000000e+00> : vector<8xf32>
    %307 = vector.multi_reduction <add>, %306, %cst_172 [1] : vector<8x32xf32> to vector<8xf32>
    %308 = vector.shape_cast %307 : vector<8xf32> to vector<8x1xf32>
    %cst_173 = arith.constant 3.200000e+01 : f32
    %309 = vector.broadcast %cst_173 : f32 to vector<8x1xf32>
    %310 = arith.divf %308, %309 : vector<8x1xf32>
    %311 = vector.broadcast %303 : vector<8x1xf32> to vector<8x32xf32>
    %312 = arith.subf %295, %311 : vector<8x32xf32>
    %cst_174 = arith.constant 9.99999974E-6 : f32
    %313 = vector.broadcast %cst_174 : f32 to vector<8x1xf32>
    %314 = arith.addf %310, %313 : vector<8x1xf32>
    %315 = math.rsqrt %314 : vector<8x1xf32>
    %316 = vector.broadcast %315 : vector<8x1xf32> to vector<8x32xf32>
    %317 = arith.mulf %312, %316 : vector<8x32xf32>
    %318 = vector.broadcast %297 : vector<1x32xf32> to vector<8x32xf32>
    %319 = arith.mulf %317, %318 : vector<8x32xf32>
    %320 = vector.broadcast %299 : vector<1x32xf32> to vector<8x32xf32>
    %321 = arith.addf %319, %320 : vector<8x32xf32>
    %c1_175 = arith.constant 1 : index
    %c0_176 = arith.constant 0 : index
    %c0_177 = arith.constant 0 : index
    %322 = vector.load %arg16[%c1_175, %c0_176, %c0_177] : memref<2x32x32xbf16, #tpu.memory_space<vmem>>, vector<1x32x32xbf16>
    %323 = vector.shape_cast %322 : vector<1x32x32xbf16> to vector<32x32xbf16>
    %c1_178 = arith.constant 1 : index
    %c0_179 = arith.constant 0 : index
    %c0_180 = arith.constant 0 : index
    %324 = vector.load %arg17[%c1_178, %c0_179, %c0_180] : memref<2x1x32xf32, #tpu.memory_space<vmem>>, vector<1x1x32xf32>
    %325 = vector.shape_cast %324 : vector<1x1x32xf32> to vector<1x32xf32>
    %c1_181 = arith.constant 1 : index
    %c0_182 = arith.constant 0 : index
    %c0_183 = arith.constant 0 : index
    %326 = vector.load %arg18[%c1_181, %c0_182, %c0_183] : memref<2x32x32xbf16, #tpu.memory_space<vmem>>, vector<1x32x32xbf16>
    %327 = vector.shape_cast %326 : vector<1x32x32xbf16> to vector<32x32xbf16>
    %c1_184 = arith.constant 1 : index
    %c0_185 = arith.constant 0 : index
    %c0_186 = arith.constant 0 : index
    %328 = vector.load %arg19[%c1_184, %c0_185, %c0_186] : memref<2x1x32xf32, #tpu.memory_space<vmem>>, vector<1x1x32xf32>
    %329 = vector.shape_cast %328 : vector<1x1x32xf32> to vector<1x32xf32>
    %c1_187 = arith.constant 1 : index
    %c0_188 = arith.constant 0 : index
    %c0_189 = arith.constant 0 : index
    %330 = vector.load %arg20[%c1_187, %c0_188, %c0_189] : memref<2x32x32xbf16, #tpu.memory_space<vmem>>, vector<1x32x32xbf16>
    %331 = vector.shape_cast %330 : vector<1x32x32xbf16> to vector<32x32xbf16>
    %c1_190 = arith.constant 1 : index
    %c0_191 = arith.constant 0 : index
    %c0_192 = arith.constant 0 : index
    %332 = vector.load %arg21[%c1_190, %c0_191, %c0_192] : memref<2x1x32xf32, #tpu.memory_space<vmem>>, vector<1x1x32xf32>
    %333 = vector.shape_cast %332 : vector<1x1x32xf32> to vector<1x32xf32>
    %c1_193 = arith.constant 1 : index
    %c0_194 = arith.constant 0 : index
    %c0_195 = arith.constant 0 : index
    %334 = vector.load %arg22[%c1_193, %c0_194, %c0_195] : memref<2x32x32xbf16, #tpu.memory_space<vmem>>, vector<1x32x32xbf16>
    %335 = vector.shape_cast %334 : vector<1x32x32xbf16> to vector<32x32xbf16>
    %c1_196 = arith.constant 1 : index
    %c0_197 = arith.constant 0 : index
    %c0_198 = arith.constant 0 : index
    %336 = vector.load %arg23[%c1_196, %c0_197, %c0_198] : memref<2x1x32xf32, #tpu.memory_space<vmem>>, vector<1x1x32xf32>
    %337 = vector.shape_cast %336 : vector<1x1x32xf32> to vector<1x32xf32>
    %338 = arith.truncf %321 : vector<8x32xf32> to vector<8x32xbf16>
    %339 = arith.truncf %5 : vector<8x32xf32> to vector<8x32xbf16>
    %cst_199 = arith.constant dense<0.000000e+00> : vector<8x32xf32>
    %340 = tpu.matmul %338, %323, %cst_199 {dimension_numbers = #tpu.dot_dimension_numbers<[1], [0], [0], [1], [0, 0, 1, 1], [], []>} : vector<8x32xbf16>, vector<32x32xbf16>, vector<8x32xf32> -> vector<8x32xf32>
    %341 = vector.broadcast %325 : vector<1x32xf32> to vector<8x32xf32>
    %342 = arith.addf %340, %341 : vector<8x32xf32>
    %cst_200 = arith.constant dense<0.000000e+00> : vector<8x32xf32>
    %343 = tpu.matmul %339, %327, %cst_200 {dimension_numbers = #tpu.dot_dimension_numbers<[1], [0], [0], [1], [0, 0, 1, 1], [], []>} : vector<8x32xbf16>, vector<32x32xbf16>, vector<8x32xf32> -> vector<8x32xf32>
    %344 = vector.broadcast %329 : vector<1x32xf32> to vector<8x32xf32>
    %345 = arith.addf %343, %344 : vector<8x32xf32>
    %cst_201 = arith.constant dense<0.000000e+00> : vector<8x32xf32>
    %346 = tpu.matmul %339, %331, %cst_201 {dimension_numbers = #tpu.dot_dimension_numbers<[1], [0], [0], [1], [0, 0, 1, 1], [], []>} : vector<8x32xbf16>, vector<32x32xbf16>, vector<8x32xf32> -> vector<8x32xf32>
    %347 = vector.broadcast %333 : vector<1x32xf32> to vector<8x32xf32>
    %348 = arith.addf %346, %347 : vector<8x32xf32>
    %349 = vector.shape_cast %342 : vector<8x32xf32> to vector<8x4x8xf32>
    %350 = tpu.transpose %349, [1, 0, 2] : vector<8x4x8xf32> -> vector<4x8x8xf32>
    %351 = vector.shape_cast %345 : vector<8x32xf32> to vector<8x4x8xf32>
    %352 = tpu.transpose %351, [1, 0, 2] : vector<8x4x8xf32> -> vector<4x8x8xf32>
    %353 = vector.shape_cast %348 : vector<8x32xf32> to vector<8x4x8xf32>
    %354 = tpu.transpose %353, [1, 0, 2] : vector<8x4x8xf32> -> vector<4x8x8xf32>
    %355 = arith.truncf %350 : vector<4x8x8xf32> to vector<4x8x8xbf16>
    %356 = arith.truncf %352 : vector<4x8x8xf32> to vector<4x8x8xbf16>
    "tpu.trace_start"() <{level = 10 : i32, message = "hqd,hkd->hqk"}> : () -> ()
    %cst_202 = arith.constant dense<0.000000e+00> : vector<4x8x8xf32>
    %357 = tpu.matmul %355, %356, %cst_202 {dimension_numbers = #tpu.dot_dimension_numbers<[2], [2], [1], [1], [0, 0, 0, 1, 1, 1], [0], [0]>} : vector<4x8x8xbf16>, vector<4x8x8xbf16>, vector<4x8x8xf32> -> vector<4x8x8xf32>
    "tpu.trace_stop"() : () -> ()
    %cst_203 = arith.constant 0.353553385 : f32
    %358 = vector.broadcast %cst_203 : f32 to vector<4x8x8xf32>
    %359 = arith.mulf %357, %358 : vector<4x8x8xf32>
    %360 = vector.shape_cast %12 : vector<1x8xf32> to vector<1x1x8xf32>
    %361 = vector.broadcast %360 : vector<1x1x8xf32> to vector<4x8x8xf32>
    %362 = arith.addf %359, %361 : vector<4x8x8xf32>
    %cst_204 = arith.constant dense<0xFF800000> : vector<4x8xf32>
    %363 = vector.multi_reduction <maximumf>, %362, %cst_204 [2] : vector<4x8x8xf32> to vector<4x8xf32>
    %364 = vector.shape_cast %363 : vector<4x8xf32> to vector<4x8x1xf32>
    %365 = vector.broadcast %364 : vector<4x8x1xf32> to vector<4x8x8xf32>
    %366 = arith.subf %362, %365 : vector<4x8x8xf32>
    %367 = math.exp %366 : vector<4x8x8xf32>
    %cst_205 = arith.constant dense<0.000000e+00> : vector<4x8xf32>
    %368 = vector.multi_reduction <add>, %367, %cst_205 [2] : vector<4x8x8xf32> to vector<4x8xf32>
    %369 = vector.shape_cast %368 : vector<4x8xf32> to vector<4x8x1xf32>
    %370 = vector.broadcast %369 : vector<4x8x1xf32> to vector<4x8x8xf32>
    %371 = arith.divf %367, %370 : vector<4x8x8xf32>
    %372 = arith.truncf %371 : vector<4x8x8xf32> to vector<4x8x8xbf16>
    %373 = arith.truncf %354 : vector<4x8x8xf32> to vector<4x8x8xbf16>
    "tpu.trace_start"() <{level = 10 : i32, message = "hqk,hkd->hqd"}> : () -> ()
    %cst_206 = arith.constant dense<0.000000e+00> : vector<4x8x8xf32>
    %374 = tpu.matmul %372, %373, %cst_206 {dimension_numbers = #tpu.dot_dimension_numbers<[2], [1], [1], [2], [0, 0, 0, 1, 1, 2], [0], [0]>} : vector<4x8x8xbf16>, vector<4x8x8xbf16>, vector<4x8x8xf32> -> vector<4x8x8xf32>
    "tpu.trace_stop"() : () -> ()
    %375 = tpu.transpose %374, [1, 0, 2] : vector<4x8x8xf32> -> vector<8x4x8xf32>
    %376 = vector.shape_cast %375 : vector<8x4x8xf32> to vector<8x32xf32>
    %377 = arith.truncf %376 : vector<8x32xf32> to vector<8x32xbf16>
    %cst_207 = arith.constant dense<0.000000e+00> : vector<8x32xf32>
    %378 = tpu.matmul %377, %335, %cst_207 {dimension_numbers = #tpu.dot_dimension_numbers<[1], [0], [0], [1], [0, 0, 1, 1], [], []>} : vector<8x32xbf16>, vector<32x32xbf16>, vector<8x32xf32> -> vector<8x32xf32>
    %379 = vector.broadcast %337 : vector<1x32xf32> to vector<8x32xf32>
    %380 = arith.addf %378, %379 : vector<8x32xf32>
    %cst_208 = arith.constant dense<0.000000e+00> : vector<8x8xf32>
    %381 = vector.multi_reduction <add>, %371, %cst_208 [0] : vector<4x8x8xf32> to vector<8x8xf32>
    %cst_209 = arith.constant 4.000000e+00 : f32
    %382 = vector.broadcast %cst_209 : f32 to vector<8x8xf32>
    %383 = arith.divf %381, %382 : vector<8x8xf32>
    %c0_210 = arith.constant 0 : index
    %c1_211 = arith.constant 1 : index
    %c0_212 = arith.constant 0 : index
    %c0_213 = arith.constant 0 : index
    %384 = vector.load %arg37[%c0_210, %c1_211, %c0_212, %c0_213] : memref<1x2x8x8xf32, #tpu.memory_space<vmem>>, vector<1x1x8x8xf32>
    %385 = vector.shape_cast %384 : vector<1x1x8x8xf32> to vector<8x8xf32>
    %386 = vector.shape_cast %383 : vector<8x8xf32> to vector<1x1x8x8xf32>
    tpu.vector_store %arg37[%c0_210, %c1_211, %c0_212, %c0_213], %386 {strides = array<i32>} : memref<1x2x8x8xf32, #tpu.memory_space<vmem>>, vector<1x1x8x8xf32>,
    %387 = arith.addf %321, %380 : vector<8x32xf32>
    %c1_214 = arith.constant 1 : index
    %c0_215 = arith.constant 0 : index
    %c0_216 = arith.constant 0 : index
    %388 = vector.load %arg24[%c1_214, %c0_215, %c0_216] : memref<2x1x32xf32, #tpu.memory_space<vmem>>, vector<1x1x32xf32>
    %389 = vector.shape_cast %388 : vector<1x1x32xf32> to vector<1x32xf32>
    %c1_217 = arith.constant 1 : index
    %c0_218 = arith.constant 0 : index
    %c0_219 = arith.constant 0 : index
    %390 = vector.load %arg25[%c1_217, %c0_218, %c0_219] : memref<2x1x32xf32, #tpu.memory_space<vmem>>, vector<1x1x32xf32>
    %391 = vector.shape_cast %390 : vector<1x1x32xf32> to vector<1x32xf32>
    %cst_220 = arith.constant dense<0.000000e+00> : vector<8xf32>
    %392 = vector.multi_reduction <add>, %387, %cst_220 [1] : vector<8x32xf32> to vector<8xf32>
    %393 = vector.shape_cast %392 : vector<8xf32> to vector<8x1xf32>
    %cst_221 = arith.constant 3.200000e+01 : f32
    %394 = vector.broadcast %cst_221 : f32 to vector<8x1xf32>
    %395 = arith.divf %393, %394 : vector<8x1xf32>
    %396 = vector.broadcast %395 : vector<8x1xf32> to vector<8x32xf32>
    %397 = arith.subf %387, %396 : vector<8x32xf32>
    %398 = arith.mulf %397, %397 : vector<8x32xf32>
    %cst_222 = arith.constant dense<0.000000e+00> : vector<8xf32>
    %399 = vector.multi_reduction <add>, %398, %cst_222 [1] : vector<8x32xf32> to vector<8xf32>
    %400 = vector.shape_cast %399 : vector<8xf32> to vector<8x1xf32>
    %cst_223 = arith.constant 3.200000e+01 : f32
    %401 = vector.broadcast %cst_223 : f32 to vector<8x1xf32>
    %402 = arith.divf %400, %401 : vector<8x1xf32>
    %403 = vector.broadcast %395 : vector<8x1xf32> to vector<8x32xf32>
    %404 = arith.subf %387, %403 : vector<8x32xf32>
    %cst_224 = arith.constant 9.99999974E-6 : f32
    %405 = vector.broadcast %cst_224 : f32 to vector<8x1xf32>
    %406 = arith.addf %402, %405 : vector<8x1xf32>
    %407 = math.rsqrt %406 : vector<8x1xf32>
    %408 = vector.broadcast %407 : vector<8x1xf32> to vector<8x32xf32>
    %409 = arith.mulf %404, %408 : vector<8x32xf32>
    %410 = vector.broadcast %389 : vector<1x32xf32> to vector<8x32xf32>
    %411 = arith.mulf %409, %410 : vector<8x32xf32>
    %412 = vector.broadcast %391 : vector<1x32xf32> to vector<8x32xf32>
    %413 = arith.addf %411, %412 : vector<8x32xf32>
    %c1_225 = arith.constant 1 : index
    %c0_226 = arith.constant 0 : index
    %c0_227 = arith.constant 0 : index
    %414 = vector.load %arg26[%c1_225, %c0_226, %c0_227] : memref<2x32x64xbf16, #tpu.memory_space<vmem>>, vector<1x32x64xbf16>
    %415 = vector.shape_cast %414 : vector<1x32x64xbf16> to vector<32x64xbf16>
    %c1_228 = arith.constant 1 : index
    %c0_229 = arith.constant 0 : index
    %c0_230 = arith.constant 0 : index
    %416 = vector.load %arg27[%c1_228, %c0_229, %c0_230] : memref<2x1x64xf32, #tpu.memory_space<vmem>>, vector<1x1x64xf32>
    %417 = vector.shape_cast %416 : vector<1x1x64xf32> to vector<1x64xf32>
    %c1_231 = arith.constant 1 : index
    %c0_232 = arith.constant 0 : index
    %c0_233 = arith.constant 0 : index
    %418 = vector.load %arg28[%c1_231, %c0_232, %c0_233] : memref<2x64x32xbf16, #tpu.memory_space<vmem>>, vector<1x64x32xbf16>
    %419 = vector.shape_cast %418 : vector<1x64x32xbf16> to vector<64x32xbf16>
    %c1_234 = arith.constant 1 : index
    %c0_235 = arith.constant 0 : index
    %c0_236 = arith.constant 0 : index
    %420 = vector.load %arg29[%c1_234, %c0_235, %c0_236] : memref<2x1x32xf32, #tpu.memory_space<vmem>>, vector<1x1x32xf32>
    %421 = vector.shape_cast %420 : vector<1x1x32xf32> to vector<1x32xf32>
    %422 = arith.truncf %413 : vector<8x32xf32> to vector<8x32xbf16>
    %cst_237 = arith.constant dense<0.000000e+00> : vector<8x64xf32>
    %423 = tpu.matmul %422, %415, %cst_237 {dimension_numbers = #tpu.dot_dimension_numbers<[1], [0], [0], [1], [0, 0, 1, 1], [], []>} : vector<8x32xbf16>, vector<32x64xbf16>, vector<8x64xf32> -> vector<8x64xf32>
    %424 = vector.broadcast %417 : vector<1x64xf32> to vector<8x64xf32>
    %425 = arith.addf %423, %424 : vector<8x64xf32>
    %cst_238 = arith.constant 0.000000e+00 : f32
    %426 = vector.broadcast %cst_238 : f32 to vector<8x64xf32>
    %427 = arith.maximumf %425, %426 : vector<8x64xf32>
    %428 = arith.truncf %427 : vector<8x64xf32> to vector<8x64xbf16>
    %cst_239 = arith.constant dense<0.000000e+00> : vector<8x32xf32>
    %429 = tpu.matmul %428, %419, %cst_239 {dimension_numbers = #tpu.dot_dimension_numbers<[1], [0], [0], [1], [0, 0, 1, 1], [], []>} : vector<8x64xbf16>, vector<64x32xbf16>, vector<8x32xf32> -> vector<8x32xf32>
    %430 = vector.broadcast %421 : vector<1x32xf32> to vector<8x32xf32>
    %431 = arith.addf %429, %430 : vector<8x32xf32>
    %432 = arith.addf %413, %431 : vector<8x32xf32>
    %c1_240 = arith.constant 1 : index
    %c0_241 = arith.constant 0 : index
    %c0_242 = arith.constant 0 : index
    %433 = vector.load %arg30[%c1_240, %c0_241, %c0_242] : memref<2x1x32xf32, #tpu.memory_space<vmem>>, vector<1x1x32xf32>
    %434 = vector.shape_cast %433 : vector<1x1x32xf32> to vector<1x32xf32>
    %c1_243 = arith.constant 1 : index
    %c0_244 = arith.constant 0 : index
    %c0_245 = arith.constant 0 : index
    %435 = vector.load %arg31[%c1_243, %c0_244, %c0_245] : memref<2x1x32xf32, #tpu.memory_space<vmem>>, vector<1x1x32xf32>
    %436 = vector.shape_cast %435 : vector<1x1x32xf32> to vector<1x32xf32>
    %cst_246 = arith.constant dense<0.000000e+00> : vector<8xf32>
    %437 = vector.multi_reduction <add>, %432, %cst_246 [1] : vector<8x32xf32> to vector<8xf32>
    %438 = vector.shape_cast %437 : vector<8xf32> to vector<8x1xf32>
    %cst_247 = arith.constant 3.200000e+01 : f32
    %439 = vector.broadcast %cst_247 : f32 to vector<8x1xf32>
    %440 = arith.divf %438, %439 : vector<8x1xf32>
    %441 = vector.broadcast %440 : vector<8x1xf32> to vector<8x32xf32>
    %442 = arith.subf %432, %441 : vector<8x32xf32>
    %443 = arith.mulf %442, %442 : vector<8x32xf32>
    %cst_248 = arith.constant dense<0.000000e+00> : vector<8xf32>
    %444 = vector.multi_reduction <add>, %443, %cst_248 [1] : vector<8x32xf32> to vector<8xf32>
    %445 = vector.shape_cast %444 : vector<8xf32> to vector<8x1xf32>
    %cst_249 = arith.constant 3.200000e+01 : f32
    %446 = vector.broadcast %cst_249 : f32 to vector<8x1xf32>
    %447 = arith.divf %445, %446 : vector<8x1xf32>
    %448 = vector.broadcast %440 : vector<8x1xf32> to vector<8x32xf32>
    %449 = arith.subf %432, %448 : vector<8x32xf32>
    %cst_250 = arith.constant 9.99999974E-6 : f32
    %450 = vector.broadcast %cst_250 : f32 to vector<8x1xf32>
    %451 = arith.addf %447, %450 : vector<8x1xf32>
    %452 = math.rsqrt %451 : vector<8x1xf32>
    %453 = vector.broadcast %452 : vector<8x1xf32> to vector<8x32xf32>
    %454 = arith.mulf %449, %453 : vector<8x32xf32>
    %455 = vector.broadcast %434 : vector<1x32xf32> to vector<8x32xf32>
    %456 = arith.mulf %454, %455 : vector<8x32xf32>
    %457 = vector.broadcast %436 : vector<1x32xf32> to vector<8x32xf32>
    %458 = arith.addf %456, %457 : vector<8x32xf32>
    %c0_251 = arith.constant 0 : index
    %c0_252 = arith.constant 0 : index
    %459 = vector.load %arg32[%c0_251, %c0_252] : memref<1x32xf32, #tpu.memory_space<vmem>>, vector<1x32xf32>
    %c0_253 = arith.constant 0 : index
    %c0_254 = arith.constant 0 : index
    %460 = vector.load %arg33[%c0_253, %c0_254] : memref<1x32xf32, #tpu.memory_space<vmem>>, vector<1x32xf32>
    %cst_255 = arith.constant dense<0.000000e+00> : vector<8xf32>
    %461 = vector.multi_reduction <add>, %458, %cst_255 [1] : vector<8x32xf32> to vector<8xf32>
    %462 = vector.shape_cast %461 : vector<8xf32> to vector<8x1xf32>
    %cst_256 = arith.constant 3.200000e+01 : f32
    %463 = vector.broadcast %cst_256 : f32 to vector<8x1xf32>
    %464 = arith.divf %462, %463 : vector<8x1xf32>
    %465 = vector.broadcast %464 : vector<8x1xf32> to vector<8x32xf32>
    %466 = arith.subf %458, %465 : vector<8x32xf32>
    %467 = arith.mulf %466, %466 : vector<8x32xf32>
    %cst_257 = arith.constant dense<0.000000e+00> : vector<8xf32>
    %468 = vector.multi_reduction <add>, %467, %cst_257 [1] : vector<8x32xf32> to vector<8xf32>
    %469 = vector.shape_cast %468 : vector<8xf32> to vector<8x1xf32>
    %cst_258 = arith.constant 3.200000e+01 : f32
    %470 = vector.broadcast %cst_258 : f32 to vector<8x1xf32>
    %471 = arith.divf %469, %470 : vector<8x1xf32>
    %472 = vector.broadcast %464 : vector<8x1xf32> to vector<8x32xf32>
    %473 = arith.subf %458, %472 : vector<8x32xf32>
    %cst_259 = arith.constant 9.99999974E-6 : f32
    %474 = vector.broadcast %cst_259 : f32 to vector<8x1xf32>
    %475 = arith.addf %471, %474 : vector<8x1xf32>
    %476 = math.rsqrt %475 : vector<8x1xf32>
    %477 = vector.broadcast %476 : vector<8x1xf32> to vector<8x32xf32>
    %478 = arith.mulf %473, %477 : vector<8x32xf32>
    %479 = vector.broadcast %459 : vector<1x32xf32> to vector<8x32xf32>
    %480 = arith.mulf %478, %479 : vector<8x32xf32>
    %481 = vector.broadcast %460 : vector<1x32xf32> to vector<8x32xf32>
    %482 = arith.addf %480, %481 : vector<8x32xf32>
    %483 = arith.truncf %482 : vector<8x32xf32> to vector<8x32xbf16>
    %c0_260 = arith.constant 0 : index
    %c0_261 = arith.constant 0 : index
    %484 = vector.load %arg34[%c0_260, %c0_261] : memref<32x128xbf16, #tpu.memory_space<vmem>>, vector<32x128xbf16>
    %cst_262 = arith.constant dense<0.000000e+00> : vector<8x128xf32>
    %485 = tpu.matmul %483, %484, %cst_262 {dimension_numbers = #tpu.dot_dimension_numbers<[1], [0], [0], [1], [0, 0, 1, 1], [], []>} : vector<8x32xbf16>, vector<32x128xbf16>, vector<8x128xf32> -> vector<8x128xf32>
    %c0_263 = arith.constant 0 : index
    %c0_264 = arith.constant 0 : index
    %486 = vector.load %arg35[%c0_263, %c0_264] : memref<1x128xf32, #tpu.memory_space<vmem>>, vector<1x128xf32>
    %487 = vector.broadcast %486 : vector<1x128xf32> to vector<8x128xf32>
    %488 = arith.addf %485, %487 : vector<8x128xf32>
    %c0_265 = arith.constant 0 : index
    %c0_266 = arith.constant 0 : index
    %c0_267 = arith.constant 0 : index
    %489 = vector.load %arg36[%c0_265, %c0_266, %c0_267] : memref<1x8x128xf32, #tpu.memory_space<vmem>>, vector<1x8x128xf32>
    %490 = vector.shape_cast %489 : vector<1x8x128xf32> to vector<8x128xf32>
    %491 = vector.shape_cast %488 : vector<8x128xf32> to vector<1x8x128xf32>
    tpu.vector_store %arg36[%c0_265, %c0_266, %c0_267], %491 {strides = array<i32>} : memref<1x8x128xf32, #tpu.memory_space<vmem>>, vector<1x8x128xf32>,
    return
  }
  func.func @transform_0(%arg0: i32) -> (i32, i32, i32) {
    %c0_i32 = arith.constant 0 : i32
    %c0_i32_0 = arith.constant 0 : i32
    %c0_i32_1 = arith.constant 0 : i32
    return %arg0, %c0_i32, %c0_i32_0 : i32, i32, i32
  }
  func.func @transform_1(%arg0: i32) -> (i32, i32, i32) {
    %c0_i32 = arith.constant 0 : i32
    %c0_i32_0 = arith.constant 0 : i32
    %c0_i32_1 = arith.constant 0 : i32
    return %arg0, %c0_i32, %c0_i32_0 : i32, i32, i32
  }
  func.func @transform_2(%arg0: i32) -> (i32, i32) {
    %c0_i32 = arith.constant 0 : i32
    %c0_i32_0 = arith.constant 0 : i32
    %c0_i32_1 = arith.constant 0 : i32
    return %c0_i32, %c0_i32_0 : i32, i32
  }
  func.func @transform_3(%arg0: i32) -> (i32, i32, i32) {
    %c0_i32 = arith.constant 0 : i32
    %c0_i32_0 = arith.constant 0 : i32
    %c0_i32_1 = arith.constant 0 : i32
    return %arg0, %c0_i32, %c0_i32_0 : i32, i32, i32
  }
  func.func @transform_4(%arg0: i32) -> (i32, i32, i32) {
    %c0_i32 = arith.constant 0 : i32
    %c0_i32_0 = arith.constant 0 : i32
    %c0_i32_1 = arith.constant 0 : i32
    return %arg0, %c0_i32, %c0_i32_0 : i32, i32, i32
  }
  func.func @transform_5(%arg0: i32) -> (i32, i32, i32) {
    %c0_i32 = arith.constant 0 : i32
    %c0_i32_0 = arith.constant 0 : i32
    %c0_i32_1 = arith.constant 0 : i32
    %c0_i32_2 = arith.constant 0 : i32
    return %c0_i32, %c0_i32_0, %c0_i32_1 : i32, i32, i32
  }
  func.func @transform_6(%arg0: i32) -> (i32, i32, i32) {
    %c0_i32 = arith.constant 0 : i32
    %c0_i32_0 = arith.constant 0 : i32
    %c0_i32_1 = arith.constant 0 : i32
    %c0_i32_2 = arith.constant 0 : i32
    return %c0_i32, %c0_i32_0, %c0_i32_1 : i32, i32, i32
  }
  func.func @transform_7(%arg0: i32) -> (i32, i32, i32) {
    %c0_i32 = arith.constant 0 : i32
    %c0_i32_0 = arith.constant 0 : i32
    %c0_i32_1 = arith.constant 0 : i32
    %c0_i32_2 = arith.constant 0 : i32
    return %c0_i32, %c0_i32_0, %c0_i32_1 : i32, i32, i32
  }
  func.func @transform_8(%arg0: i32) -> (i32, i32, i32) {
    %c0_i32 = arith.constant 0 : i32
    %c0_i32_0 = arith.constant 0 : i32
    %c0_i32_1 = arith.constant 0 : i32
    %c0_i32_2 = arith.constant 0 : i32
    return %c0_i32, %c0_i32_0, %c0_i32_1 : i32, i32, i32
  }
  func.func @transform_9(%arg0: i32) -> (i32, i32, i32) {
    %c0_i32 = arith.constant 0 : i32
    %c0_i32_0 = arith.constant 0 : i32
    %c0_i32_1 = arith.constant 0 : i32
    %c0_i32_2 = arith.constant 0 : i32
    return %c0_i32, %c0_i32_0, %c0_i32_1 : i32, i32, i32
  }
  func.func @transform_10(%arg0: i32) -> (i32, i32, i32) {
    %c0_i32 = arith.constant 0 : i32
    %c0_i32_0 = arith.constant 0 : i32
    %c0_i32_1 = arith.constant 0 : i32
    %c0_i32_2 = arith.constant 0 : i32
    return %c0_i32, %c0_i32_0, %c0_i32_1 : i32, i32, i32
  }
  func.func @transform_11(%arg0: i32) -> (i32, i32, i32) {
    %c0_i32 = arith.constant 0 : i32
    %c0_i32_0 = arith.constant 0 : i32
    %c0_i32_1 = arith.constant 0 : i32
    %c0_i32_2 = arith.constant 0 : i32
    return %c0_i32, %c0_i32_0, %c0_i32_1 : i32, i32, i32
  }
  func.func @transform_12(%arg0: i32) -> (i32, i32, i32) {
    %c0_i32 = arith.constant 0 : i32
    %c0_i32_0 = arith.constant 0 : i32
    %c0_i32_1 = arith.constant 0 : i32
    %c0_i32_2 = arith.constant 0 : i32
    return %c0_i32, %c0_i32_0, %c0_i32_1 : i32, i32, i32
  }
  func.func @transform_13(%arg0: i32) -> (i32, i32, i32) {
    %c0_i32 = arith.constant 0 : i32
    %c0_i32_0 = arith.constant 0 : i32
    %c0_i32_1 = arith.constant 0 : i32
    %c0_i32_2 = arith.constant 0 : i32
    return %c0_i32, %c0_i32_0, %c0_i32_1 : i32, i32, i32
  }
  func.func @transform_14(%arg0: i32) -> (i32, i32, i32) {
    %c0_i32 = arith.constant 0 : i32
    %c0_i32_0 = arith.constant 0 : i32
    %c0_i32_1 = arith.constant 0 : i32
    %c0_i32_2 = arith.constant 0 : i32
    return %c0_i32, %c0_i32_0, %c0_i32_1 : i32, i32, i32
  }
  func.func @transform_15(%arg0: i32) -> (i32, i32, i32) {
    %c0_i32 = arith.constant 0 : i32
    %c0_i32_0 = arith.constant 0 : i32
    %c0_i32_1 = arith.constant 0 : i32
    %c0_i32_2 = arith.constant 0 : i32
    return %c0_i32, %c0_i32_0, %c0_i32_1 : i32, i32, i32
  }
  func.func @transform_16(%arg0: i32) -> (i32, i32, i32) {
    %c0_i32 = arith.constant 0 : i32
    %c0_i32_0 = arith.constant 0 : i32
    %c0_i32_1 = arith.constant 0 : i32
    %c0_i32_2 = arith.constant 0 : i32
    return %c0_i32, %c0_i32_0, %c0_i32_1 : i32, i32, i32
  }
  func.func @transform_17(%arg0: i32) -> (i32, i32, i32) {
    %c0_i32 = arith.constant 0 : i32
    %c0_i32_0 = arith.constant 0 : i32
    %c0_i32_1 = arith.constant 0 : i32
    %c0_i32_2 = arith.constant 0 : i32
    return %c0_i32, %c0_i32_0, %c0_i32_1 : i32, i32, i32
  }
  func.func @transform_18(%arg0: i32) -> (i32, i32, i32) {
    %c0_i32 = arith.constant 0 : i32
    %c0_i32_0 = arith.constant 0 : i32
    %c0_i32_1 = arith.constant 0 : i32
    %c0_i32_2 = arith.constant 0 : i32
    return %c0_i32, %c0_i32_0, %c0_i32_1 : i32, i32, i32
  }
  func.func @transform_19(%arg0: i32) -> (i32, i32, i32) {
    %c0_i32 = arith.constant 0 : i32
    %c0_i32_0 = arith.constant 0 : i32
    %c0_i32_1 = arith.constant 0 : i32
    %c0_i32_2 = arith.constant 0 : i32
    return %c0_i32, %c0_i32_0, %c0_i32_1 : i32, i32, i32
  }
  func.func @transform_20(%arg0: i32) -> (i32, i32, i32) {
    %c0_i32 = arith.constant 0 : i32
    %c0_i32_0 = arith.constant 0 : i32
    %c0_i32_1 = arith.constant 0 : i32
    %c0_i32_2 = arith.constant 0 : i32
    return %c0_i32, %c0_i32_0, %c0_i32_1 : i32, i32, i32
  }
  func.func @transform_21(%arg0: i32) -> (i32, i32, i32) {
    %c0_i32 = arith.constant 0 : i32
    %c0_i32_0 = arith.constant 0 : i32
    %c0_i32_1 = arith.constant 0 : i32
    %c0_i32_2 = arith.constant 0 : i32
    return %c0_i32, %c0_i32_0, %c0_i32_1 : i32, i32, i32
  }
  func.func @transform_22(%arg0: i32) -> (i32, i32, i32) {
    %c0_i32 = arith.constant 0 : i32
    %c0_i32_0 = arith.constant 0 : i32
    %c0_i32_1 = arith.constant 0 : i32
    %c0_i32_2 = arith.constant 0 : i32
    return %c0_i32, %c0_i32_0, %c0_i32_1 : i32, i32, i32
  }
  func.func @transform_23(%arg0: i32) -> (i32, i32, i32) {
    %c0_i32 = arith.constant 0 : i32
    %c0_i32_0 = arith.constant 0 : i32
    %c0_i32_1 = arith.constant 0 : i32
    %c0_i32_2 = arith.constant 0 : i32
    return %c0_i32, %c0_i32_0, %c0_i32_1 : i32, i32, i32
  }
  func.func @transform_24(%arg0: i32) -> (i32, i32, i32) {
    %c0_i32 = arith.constant 0 : i32
    %c0_i32_0 = arith.constant 0 : i32
    %c0_i32_1 = arith.constant 0 : i32
    %c0_i32_2 = arith.constant 0 : i32
    return %c0_i32, %c0_i32_0, %c0_i32_1 : i32, i32, i32
  }
  func.func @transform_25(%arg0: i32) -> (i32, i32, i32) {
    %c0_i32 = arith.constant 0 : i32
    %c0_i32_0 = arith.constant 0 : i32
    %c0_i32_1 = arith.constant 0 : i32
    %c0_i32_2 = arith.constant 0 : i32
    return %c0_i32, %c0_i32_0, %c0_i32_1 : i32, i32, i32
  }
  func.func @transform_26(%arg0: i32) -> (i32, i32, i32) {
    %c0_i32 = arith.constant 0 : i32
    %c0_i32_0 = arith.constant 0 : i32
    %c0_i32_1 = arith.constant 0 : i32
    %c0_i32_2 = arith.constant 0 : i32
    return %c0_i32, %c0_i32_0, %c0_i32_1 : i32, i32, i32
  }
  func.func @transform_27(%arg0: i32) -> (i32, i32, i32) {
    %c0_i32 = arith.constant 0 : i32
    %c0_i32_0 = arith.constant 0 : i32
    %c0_i32_1 = arith.constant 0 : i32
    %c0_i32_2 = arith.constant 0 : i32
    return %c0_i32, %c0_i32_0, %c0_i32_1 : i32, i32, i32
  }
  func.func @transform_28(%arg0: i32) -> (i32, i32, i32) {
    %c0_i32 = arith.constant 0 : i32
    %c0_i32_0 = arith.constant 0 : i32
    %c0_i32_1 = arith.constant 0 : i32
    %c0_i32_2 = arith.constant 0 : i32
    return %c0_i32, %c0_i32_0, %c0_i32_1 : i32, i32, i32
  }
  func.func @transform_29(%arg0: i32) -> (i32, i32, i32) {
    %c0_i32 = arith.constant 0 : i32
    %c0_i32_0 = arith.constant 0 : i32
    %c0_i32_1 = arith.constant 0 : i32
    %c0_i32_2 = arith.constant 0 : i32
    return %c0_i32, %c0_i32_0, %c0_i32_1 : i32, i32, i32
  }
  func.func @transform_30(%arg0: i32) -> (i32, i32, i32) {
    %c0_i32 = arith.constant 0 : i32
    %c0_i32_0 = arith.constant 0 : i32
    %c0_i32_1 = arith.constant 0 : i32
    %c0_i32_2 = arith.constant 0 : i32
    return %c0_i32, %c0_i32_0, %c0_i32_1 : i32, i32, i32
  }
  func.func @transform_31(%arg0: i32) -> (i32, i32) {
    %c0_i32 = arith.constant 0 : i32
    %c0_i32_0 = arith.constant 0 : i32
    %c0_i32_1 = arith.constant 0 : i32
    return %c0_i32, %c0_i32_0 : i32, i32
  }
  func.func @transform_32(%arg0: i32) -> (i32, i32) {
    %c0_i32 = arith.constant 0 : i32
    %c0_i32_0 = arith.constant 0 : i32
    %c0_i32_1 = arith.constant 0 : i32
    return %c0_i32, %c0_i32_0 : i32, i32
  }
  func.func @transform_33(%arg0: i32) -> (i32, i32) {
    %c0_i32 = arith.constant 0 : i32
    %c0_i32_0 = arith.constant 0 : i32
    %c0_i32_1 = arith.constant 0 : i32
    return %c0_i32, %c0_i32_0 : i32, i32
  }
  func.func @transform_34(%arg0: i32) -> (i32, i32) {
    %c0_i32 = arith.constant 0 : i32
    %c0_i32_0 = arith.constant 0 : i32
    %c0_i32_1 = arith.constant 0 : i32
    return %c0_i32, %c0_i32_0 : i32, i32
  }
  func.func @transform_35(%arg0: i32) -> (i32, i32, i32) {
    %c0_i32 = arith.constant 0 : i32
    %c0_i32_0 = arith.constant 0 : i32
    %c0_i32_1 = arith.constant 0 : i32
    return %arg0, %c0_i32, %c0_i32_0 : i32, i32, i32
  }
  func.func @transform_36(%arg0: i32) -> (i32, i32, i32, i32) {
    %c0_i32 = arith.constant 0 : i32
    %c0_i32_0 = arith.constant 0 : i32
    %c0_i32_1 = arith.constant 0 : i32
    %c0_i32_2 = arith.constant 0 : i32
    return %arg0, %c0_i32, %c0_i32_0, %c0_i32_1 : i32, i32, i32, i32
  }
}

</mosaic_0001>

<bundles_post_ra>
// kernel: score_transformer_forward.2
= control target key start
LH: loop header
LB: loop body
LE: loop exit
PB: predicated region body
PF: predicated region fallthrough
CT: control target
= control target key end

     0   :  { %s3972_s0 = inlined_call_operand.vmem [shape: bf16[2,8,32], index: 0, kind: input, shape index: {}]   ;;  %s3973_s1 = inlined_call_operand.vmem [shape: f32[2,1,8], index: 1, kind: input, shape index: {}]   ;;  %s3974_s2 = inlined_call_operand.vmem [shape: bf16[2,32,32], index: 2, kind: input, shape index: {}]   ;;  %s3975_s3 = inlined_call_operand.vmem [shape: f32[2,1,32], index: 3, kind: input, shape index: {}]   ;;  %s3976_s4 = inlined_call_operand.vmem [shape: bf16[2,32,32], index: 4, kind: input, shape index: {}]   ;;  %s3977_s5 = inlined_call_operand.vmem [shape: f32[2,1,32], index: 5, kind: input, shape index: {}]   ;;  %s3978_s6 = inlined_call_operand.vmem [shape: bf16[2,32,32], index: 6, kind: input, shape index: {}]   ;;  %s3979_s7 = inlined_call_operand.vmem [shape: f32[2,1,32], index: 7, kind: input, shape index: {}]   ;;  %s3980_s8 = inlined_call_operand.vmem [shape: bf16[2,32,32], index: 8, kind: input, shape index: {}]   ;;  %s3981_s9 = inlined_call_operand.vmem [shape: f32[2,1,32], index: 9, kind: input, shape index: {}]   ;;  %s3982_s10 = inlined_call_operand.vmem [shape: f32[2,1,32], index: 10, kind: input, shape index: {}]   ;;  %s3983_s11 = inlined_call_operand.vmem [shape: f32[2,1,32], index: 11, kind: input, shape index: {}]   ;;  %s3984_s12 = inlined_call_operand.vmem [shape: bf16[2,32,64], index: 12, kind: input, shape index: {}]   ;;  %s3985_s13 = inlined_call_operand.vmem [shape: f32[2,1,64], index: 13, kind: input, shape index: {}]   ;;  %s3986_s14 = inlined_call_operand.vmem [shape: bf16[2,64,32], index: 14, kind: input, shape index: {}]   ;;  %s3987_s15 = inlined_call_operand.vmem [shape: f32[2,1,32], index: 15, kind: input, shape index: {}]   ;;  %s3988_s16 = inlined_call_operand.vmem [shape: f32[2,1,32], index: 16, kind: input, shape index: {}]   ;;  %s3989_s17 = inlined_call_operand.vmem [shape: f32[2,1,32], index: 17, kind: input, shape index: {}]   ;;  %s3990_s18 = inlined_call_operand.vmem [shape: f32[1,32], index: 18, kind: input, shape index: {}]   ;;  %s3991_s19 = inlined_call_operand.vmem [shape: f32[1,32], index: 19, kind: input, shape index: {}]   ;;  %s3992_s20 = inlined_call_operand.vmem [shape: bf16[2,8,32], index: 20, kind: output, shape index: {}]  }
   0x1   :  { %4007 = sst [smem:[#allocation3_spill]] %s3972_s0 }
   0x2   :  { %4008 = sst [smem:[#allocation4_spill]] %s3973_s1  ;;  %s3302_s1 = smov 0  }
   0x3   :  { %4009 = sst [smem:[#allocation5_spill]] %s3974_s2 }
   0x4   :  { %4010 = sst [smem:[#allocation6_spill]] %s3975_s3 }
   0x5   :  { %4011 = sst [smem:[#allocation7_spill]] %s3976_s4 }
   0x6 LB: > { %4012 = sst [smem:[#allocation2_spill]] %s3186_s1  ;;  %s2880_s22 = sadd.s32 4294967295, %s3186_s1   ;;  %s3186_s1 = sphi %s3302_s1, %s30_s1  }
   0x7   : > { %p2884_p0 = scmp.ge.s32.totalorder %s3186_s1, 1  ;;  %p569_p1 = scmp.lt.s32.totalorder %s3186_s1, 3 }
   0x9   : > { %p570_p2 = pnand %p2884_p0, %p569_p1 }
   0xa   : > { %s4013_s2 = sld [smem:[#allocation5_spill]] (!%p570_p2)  ;;  %p628_p3 = scmp.lt.s32.totalorder (!%p570_p2), %s2880_s22, 1 }
   0xb   : > { %573 = sbr.rel (%p570_p2) target bundleno = 4107 (0x100b), region = 100  ;;  %s4014_s26 = sld [smem:[#allocation7_spill]] (!%p570_p2) }
   0xc   : > { %s4015_s23 = sld [smem:[#allocation4_spill]] (!%p570_p2)  ;;  %s4004_s25 = smov (!%p570_p2), 104  }
   0xd   : > { %s4016_s27 = sld [smem:[#allocation3_spill]] (!%p570_p2)  ;;  %s4000_s3 = smov (!%p570_p2), 120  }
   0xe   : > { %s4017_s0 = sld [smem:[#allocation6_spill]] (!%p570_p2)  ;;  %s3997_s4 = smov (!%p570_p2), 24  }
   0xf   : > { %s3999_s29 = smov (!%p570_p2), 16   ;;  %s3998_s21 = smov (!%p570_p2), 8  }
  0x10   : > { %v3068_v0 = vld [vmem:[%s4013_s2 + $0x8] sm:$0xff]  ;;  %v3067_v2 = vld [vmem:[%s4013_s2] sm:$0xff]  ;;  %s4029_s22 = smov (!%p628_p3, %s2880_s22), 1  ;;  %vm678_vm0 = vcmask 261120   ;;  %v3191_v16 = vmov 1983009808  }
  0x11   : > { %v3070_v1 = vld [vmem:[%s4014_s26 + $0x8] sm:$0xff]  ;;  %688 = vmatpush.bf16.msra.mxu0 %v3068_v0  ;;  %v3069_v3 = vld [vmem:[%s4014_s26] sm:$0xff]  ;;  %s3996_s30 = sshll.u32 %s4029_s22, 2  ;;  %v767_v17 = vunpack.c.l.s4 %v3191_v16  ;;  %vm762_vm1 = vcmask 1047556   ;;  %v3192_v29 = vmov 1934713408  }
  0x12   : > { %716 = vmatpush.bf16.msra.mxu1 %v3070_v1  ;;  %s3329_s24 = scalar_lea.vmem %s4015_s23, %s4029_s22  ;;  %v3114_v6 = vld [vmem:[%s3977_s5] ss:$0 sm:$0xff]  ;;  %v3072_v13 = vld [vmem:[%s3978_s6 + $0x8] sm:$0xff]  ;;  %v791_v30 = vunpack.c.l.s4 %v3192_v29  ;;  %vm1120_vm2 = vcmask 64512   ;;  %vm1315_vm3 = vcmask 1043456   ;;  %s4023_s23 = smov 16  }
  0x13   : > { %s631_s28 = scalar_lea.vmem %s4016_s27, %s3996_s30  ;;  %s4002_s27 = smov 112   ;;  %744 = vmatpush.bf16.msra.mxu2 %v3072_v13  ;;  %v3071_v14 = vld [vmem:[%s3978_s6] sm:$0xff]  ;;  %v3363_v25 = vunpack.c.0.s8 %v767_v17 }
  0x14   : > { %v3336_v4 = vld [vmem:[%s631_s28] sm:$0xf]  ;;  %v3372_v38 = vunpack.c.0.s8 %v791_v30  ;;  %s4018_s30 = smov 104   ;;  %s4024_s28 = smov 24  }
  0x15   : > { %689 = vmatpush.bf16.msra.mxu0 %v3067_v2  ;;  %v3113_v5 = vld [vmem:[%s4017_s0] ss:$0 sm:$0xff] }
  0x16   : > { %717 = vmatpush.bf16.msra.mxu1 %v3069_v3 }
  0x17   : > { %745 = vmatpush.bf16.msra.mxu2 %v3071_v14 }
  0x18   : > { %2895 = vmatmul.msk.bf16.vlgmr.msra.gmra.mxu0 %vm678_vm0, %v3336_v4 }
  0x19   : > { %2904 = vmatmul.msk.bf16.vlgmr.msra.gmra.mxu1 %vm678_vm0, %v3336_v4 }
  0x1a   : > { %2913 = vmatmul.msk.bf16.vlgmr.msra.gmra.mxu2 %vm678_vm0, %v3336_v4 }
  0x95   : > { %v691_v7 = vpop.f32.mrf.mxu0 }
  0x96   : > { %v719_v8 = vpop.f32.mrf.mxu1  ;;  %v692_v9 = vadd.f32 %v3113_v5, %v691_v7 }
  0x97   : > { %v720_v10 = vadd.f32 %v3114_v6, %v719_v8 }
  0x98   : > { %755 = vrot.lane.b32.xlu2 %v692_v9, %s4002_s27  ;;  %v764_v23 = vrot.slane %v692_v9, 4 }
  0x99   : > { %879 = vrot.lane.b32.xlu1 %v720_v10, %s4004_s25  ;;  %873 = vrot.lane.b32.xlu0 %v720_v10, %s4000_s3  ;;  %v884_v36 = vrot.slane %v720_v10, 4 }
  0x9d   : > { %v693_v12 = vpop.f32.mrf.mxu0 }
  0x9e   : > { %v721_v11 = vpop.f32.mrf.mxu1 }
  0xa0   : > { %758 = vrot.lane.b32.xlu2 %v692_v9, %s4004_s25 }
  0xa1   : > { %876 = vrot.lane.b32.xlu0 %v720_v10, %s4002_s27  ;;  %752 = vrot.lane.b32.xlu1 %v692_v9, %s4000_s3 }
  0xf2   : > { %v756_v15 = vpop.permute.xlu2 %755 }
  0xf3   : > { %v761_v18 = vrot.slane %v756_v15, 4  ;;  %v765_v31 = vsel %vm762_vm1, %v756_v15, %v764_v23 }
  0xf4   : > { %v773_v37 = vperm.slane %v765_v31, %v3363_v25 }
  0xf5   : > { %v763_v26 = vsel %vm762_vm1, %v761_v18, %v692_v9 }
  0xf6   : > { %v769_v33 = vperm.slane %v763_v26, %v3363_v25  ;;  %v800_v56 = vrot.slane %v773_v37, 4 }
  0xf8   : > { %v788_v48 = vrot.slane %v769_v33, 4 }
  0xfa   : > { %v759_v27 = vpop.permute.xlu2 %758 }
  0xfb   : > { %v774_v34 = vrot.slane %v759_v27, 4 }
 0x10b   : > { %v880_v19 = vpop.permute.xlu1 %879  ;;  %v874_v20 = vpop.permute.xlu0 %873 }
 0x10c   : > { %v894_v21 = vrot.slane %v880_v19, 4  ;;  %v896_v22 = vrot.slane %v874_v20, 4 }
 0x10e   : > { %v897_v24 = vsel %vm762_vm1, %v880_v19, %v896_v22  ;;  %v895_v28 = vsel %vm762_vm1, %v894_v21, %v874_v20 }
 0x10f   : > { %v905_v32 = vperm.slane %v897_v24, %v3363_v25  ;;  %v901_v35 = vperm.slane %v895_v28, %v3363_v25 }
 0x111   : > { %v918_v45 = vrot.slane %v905_v32, 4  ;;  %v906_v49 = vrot.slane %v901_v35, 4 }
 0x113   : > { %v877_v39 = vpop.permute.xlu0 %876  ;;  %v753_v40 = vpop.permute.xlu1 %752 }
 0x114   : > { %v882_v41 = vrot.slane %v877_v39, 4  ;;  %v885_v42 = vsel %vm762_vm1, %v877_v39, %v884_v36  ;;  %v775_v43 = vsel %vm762_vm1, %v774_v34, %v753_v40  ;;  %v776_v44 = vrot.slane %v753_v40, 4 }
 0x115   : > { %v893_v46 = vperm.slane %v885_v42, %v3363_v25  ;;  %v781_v47 = vperm.slane %v775_v43, %v3363_v25 }
 0x116   : > { %v883_v50 = vsel %vm762_vm1, %v882_v41, %v720_v10  ;;  %v777_v51 = vsel %vm762_vm1, %v759_v27, %v776_v44 }
 0x117   : > { %v889_v52 = vperm.slane %v883_v50, %v3363_v25  ;;  %v919_v53 = vsel %vm762_vm1, %v918_v45, %v893_v46  ;;  %v920_v54 = vrot.slane %v893_v46, 4  ;;  %v785_v55 = vperm.slane %v777_v51, %v3363_v25 }
 0x118   : > { %v925_v57 = vperm.slane %v919_v53, %v3372_v38  ;;  %v786_v58 = vrot.slane %v781_v47, 4  ;;  %v789_v59 = vsel %vm762_vm1, %v781_v47, %v788_v48 }
 0x119   : > { %v907_v60 = vsel %vm762_vm1, %v906_v49, %v889_v52  ;;  %v908_v61 = vrot.slane %v889_v52, 4  ;;  %v921_v62 = vsel %vm762_vm1, %v905_v32, %v920_v54  ;;  %v797_v63 = vperm.slane %v789_v59, %v3372_v38 }
 0x11a   : > { %v913_v0 = vperm.slane %v907_v60, %v3372_v38  ;;  %v929_v1 = vperm.slane %v921_v62, %v3372_v38  ;;  %v934_v2 = vrot.slane %v925_v57, 4  ;;  %v787_v3 = vsel %vm762_vm1, %v786_v58, %v769_v33 }
 0x11b   : > { %v909_v5 = vsel %vm762_vm1, %v901_v35, %v908_v61  ;;  %v793_v6 = vperm.slane %v787_v3, %v3372_v38  ;;  %v798_v7 = vrot.slane %v785_v55, 4  ;;  %v801_v8 = vsel %vm762_vm1, %v785_v55, %v800_v56 }
 0x11c   : > { %v917_v9 = vperm.slane %v909_v5, %v3372_v38  ;;  %v930_v10 = vrot.slane %v913_v0, 4  ;;  %v935_v11 = vsel %vm762_vm1, 0.0, %v934_v2  ;;  %v936_v12 = vrot.slane %v929_v1, 4 }
 0x11d   : > { %v799_v13 = vsel %vm762_vm1, %v798_v7, %v773_v37  ;;  %v809_v14 = vperm.slane %v801_v8, %v3372_v38  ;;  %v810_v15 = vrot.slane %v793_v6, 4  ;;  %v812_v16 = vrot.slane %v797_v63, 4 }
 0x11e   : > { %v932_v17 = vrot.slane %v917_v9, 4  ;;  %v937_v18 = vsel %vm762_vm1, 0.0, %v936_v12  ;;  %v949_v19 = vsel %vm762_vm1, %v936_v12, %v925_v57  ;;  %v805_v20 = vperm.slane %v799_v13, %v3372_v38 }
 0x11f   : > { %v953_v21 = vperm.slane %v949_v19, %v3363_v25  ;;  %v954_v22 = vrot.slane %v937_v18, 4  ;;  %v811_v23 = vsel %vm762_vm1, 0.0, %v810_v15  ;;  %v813_v24 = vsel %vm762_vm1, 0.0, %v812_v16 }
 0x120   : > { %v933_v26 = vsel %vm762_vm1, 0.0, %v932_v17  ;;  %v814_v27 = vrot.slane %v805_v20, 4  ;;  %v816_v28 = vrot.slane %v809_v14, 4  ;;  %v818_v29 = vsel %vm762_vm1, %v812_v16, %v793_v6 }
 0x121   : > { %v943_v30 = vrot.slane %v933_v26, 4  ;;  %v955_v31 = vsel %vm762_vm1, %v954_v22, %v935_v11  ;;  %v822_v32 = vperm.slane %v818_v29, %v3363_v25  ;;  %v823_v33 = vrot.slane %v813_v24, 4 }
 0x122   : > { %v815_v34 = vsel %vm762_vm1, 0.0, %v814_v27  ;;  %v817_v35 = vsel %vm762_vm1, 0.0, %v816_v28  ;;  %v829_v36 = vsel %vm762_vm1, %v816_v28, %v805_v20  ;;  %v931_v37 = vsel %vm762_vm1, 0.0, %v930_v10 }
 0x123   : > { %v824_v39 = vsel %vm762_vm1, %v823_v33, %v811_v23  ;;  %v833_v40 = vperm.slane %v829_v36, %v3363_v25  ;;  %v834_v41 = vrot.slane %v817_v35, 4  ;;  %v842_v42 = vrot.slane %v822_v32, 4 }
 0x124   : > { %v828_v43 = vperm.slane %v824_v39, %v3363_v25  ;;  %v938_v44 = vsel %vm762_vm1, %v932_v17, %v913_v0  ;;  %v944_v45 = vsel %vm762_vm1, %v943_v30, %v931_v37  ;;  %v959_v46 = vperm.slane %v955_v31, %v3363_v25 }
 0x125   : > { %v835_v47 = vsel %vm762_vm1, %v834_v41, %v815_v34  ;;  %v942_v48 = vperm.slane %v938_v44, %v3363_v25  ;;  %v948_v49 = vperm.slane %v944_v45, %v3363_v25  ;;  %v974_v50 = vrot.slane %v953_v21, 4  ;;  %v747_v41 = vpop.f32.mrf.mxu2 }
 0x126   : > { %v972_v51 = vrot.slane %v959_v46, 4  ;;  %v839_v52 = vperm.slane %v835_v47, %v3363_v25  ;;  %v854_v53 = vrot.slane %v833_v40, 4  ;;  %v843_v57 = vsel %vm762_vm1, %v828_v43, %v842_v42 }
 0x127   : > { %v962_v54 = vrot.slane %v942_v48, 4  ;;  %v975_v55 = vsel %vm762_vm1, %v959_v46, %v974_v50  ;;  %v960_v56 = vrot.slane %v948_v49, 4  ;;  %v840_v61 = vrot.slane %v828_v43, 4  ;;  %v3112_v43 = vld [vmem:[%s3329_s24] ss:$0 sm:$0xff] }
 0x128   : > { %v983_v58 = vperm.slane %v975_v55, %v3372_v38  ;;  %v973_v59 = vsel %vm762_vm1, %v972_v51, %v953_v21  ;;  %v855_v60 = vsel %vm762_vm1, %v839_v52, %v854_v53  ;;  %v851_v8 = vperm.slane %v843_v57, %v3372_v38 }
 0x129   : > { %v963_v62 = vsel %vm762_vm1, %v948_v49, %v962_v54  ;;  %v961_v63 = vsel %vm762_vm1, %v960_v56, %v942_v48  ;;  %v979_v0 = vperm.slane %v973_v59, %v3372_v38  ;;  %v863_v1 = vperm.slane %v855_v60, %v3372_v38 }
 0x12a   : > { %v971_v2 = vperm.slane %v963_v62, %v3372_v38  ;;  %v988_v3 = vrot.slane %v983_v58, 4  ;;  %v967_v5 = vperm.slane %v961_v63, %v3372_v38  ;;  %v841_v6 = vsel %vm762_vm1, %v840_v61, %v822_v32 }
 0x12b   : > { %v984_v7 = vrot.slane %v979_v0, 4  ;;  %v852_v9 = vrot.slane %v839_v52, 4  ;;  %v847_v13 = vperm.slane %v841_v6, %v3372_v38  ;;  %v868_v20 = vrot.slane %v863_v1, 4 }
 0x12c   : > { %v989_v10 = vsel %vm762_vm1, %v988_v3, %v971_v2  ;;  %v990_v11 = vrot.slane %v971_v2, 4  ;;  %v986_v12 = vrot.slane %v967_v5, 4  ;;  %v870_v28 = vrot.slane %v851_v8, 4 }
 0x12d   : > { %v1118_v14 = vpack.c.bf16 %v989_v10, %v989_v10  ;;  %v985_v15 = vsel %vm762_vm1, %v984_v7, %v967_v5  ;;  %v853_v16 = vsel %vm762_vm1, %v852_v9, %v833_v40  ;;  %v866_v27 = vrot.slane %v847_v13, 4  ;;  %v749_v42 = vpop.f32.mrf.mxu2 }
 0x12e   : > { %v1116_v17 = vpack.c.bf16 %v985_v15, %v985_v15  ;;  %v991_v18 = vsel %vm762_vm1, %v983_v58, %v990_v11  ;;  %v987_v19 = vsel %vm762_vm1, %v979_v0, %v986_v12  ;;  %v859_v24 = vperm.slane %v853_v16, %v3372_v38  ;;  %v3115_v0 = vld [vmem:[%s3979_s7] ss:$0 sm:$0xff] }
 0x12f   : > { %v1163_v21 = vsel %vm1120_vm2, %v1118_v14, 0  ;;  %v1119_v22 = vpack.c.bf16 %v991_v18, %v991_v18  ;;  %v1117_v23 = vpack.c.bf16 %v987_v19, %v987_v19  ;;  %v869_v32 = vsel %vm762_vm1, %v868_v20, %v851_v8 }
 0x130   : > { %1172 = vmatpush.bf16.xpose.msrb.mxu1 %v1163_v21  ;;  %v1125_v26 = vsel %vm1120_vm2, %v1116_v17, 0  ;;  %v864_v31 = vrot.slane %v859_v24, 4  ;;  %v871_v34 = vsel %vm762_vm1, %v863_v1, %v870_v28  ;;  %v867_v35 = vsel %vm762_vm1, %v859_v24, %v866_v27 }
 0x131   : > { %1134 = vmatpush.bf16.xpose.msra.mxu3 %v1125_v26  ;;  %v1182_v29 = vsel %vm1120_vm2, %v1119_v22, 0  ;;  %v1144_v30 = vsel %vm1120_vm2, %v1117_v23, 0  ;;  %v1114_v36 = vpack.c.bf16 %v869_v32, %v869_v32  ;;  %v1115_v39 = vpack.c.bf16 %v871_v34, %v871_v34 }
 0x132   : > { %1191 = vmatpush.bf16.xpose.msrb.mxu2 %v1182_v29  ;;  %1153 = vmatpush.bf16.xpose.msrb.mxu0 %v1144_v30  ;;  %v865_v33 = vsel %vm762_vm1, %v864_v31, %v847_v13  ;;  %v1113_v40 = vpack.c.bf16 %v867_v35, %v867_v35  ;;  %v748_v1 = vadd.f32 %v3115_v0, %v747_v41 }
 0x133   : > { %v1112_v37 = vpack.c.bf16 %v865_v33, %v865_v33 }
 0x134   : > { %v1004_v31 = vrot.slane %v748_v1, 4 }
 0x137   : > { %2916 = vmatmul.msk.bf16.vlgmr.msrb.gmra.mxu1 %vm1120_vm2, %v1114_v36 }
 0x138   : > { %2914 = vmatmul.msk.bf16.vlgmr.msra.gmra.mxu3 %vm1120_vm2, %v1112_v37 }
 0x139   : > { %2917 = vmatmul.msk.bf16.vlgmr.msrb.gmra.mxu2 %vm1120_vm2, %v1115_v39  ;;  %2915 = vmatmul.msk.bf16.vlgmr.msrb.gmra.mxu0 %vm1120_vm2, %v1113_v40 }
 0x1b4   : > { %v1174_v44 = vpop.f32.mrf.mxu1 }
 0x1b5   : > { %v1199_v45 = vmul.f32 0.35355338, %v1174_v44 }
 0x1b6   : > { %v1155_v46 = vpop.f32.mrf.mxu0 }
 0x1b7   : > { %v1206_v47 = vadd.f32 %v3112_v43, %v1199_v45  ;;  %v1198_v48 = vmul.f32 0.35355338, %v1155_v46 }
 0x1b9   : > { %v1214_v49 = vsel %vm1120_vm2, %v1206_v47, -inf  ;;  %v1205_v55 = vadd.f32 %v3112_v43, %v1198_v48 }
 0x1ba   : > { %1215 = vmax.xlane.f32.xlu2 %v1214_v49 }
 0x1bb   : > { %v1136_v50 = vpop.f32.mrf.mxu3  ;;  %v1211_v61 = vsel %vm1120_vm2, %v1205_v55, -inf }
 0x1bc   : > { %v1197_v51 = vmul.f32 0.35355338, %v1136_v50  ;;  %v1176_v52 = vpop.f32.mrf.mxu1  ;;  %v1193_v53 = vpop.f32.mrf.mxu2 }
 0x1bd   : > { %v1200_v54 = vmul.f32 0.35355338, %v1193_v53 }
 0x1be   : > { %v1157_v56 = vpop.f32.mrf.mxu0  ;;  %v1204_v57 = vadd.f32 %v3112_v43, %v1197_v51 }
 0x1bf   : > { %v1207_v58 = vadd.f32 %v3112_v43, %v1200_v54 }
 0x1c0   : > { %v1208_v59 = vsel %vm1120_vm2, %v1204_v57, -inf }
 0x1c1   : > { %v1217_v60 = vsel %vm1120_vm2, %v1207_v58, -inf  ;;  %1209 = vmax.xlane.f32.xlu0 %v1208_v59 }
 0x1c2   : > { %1218 = vmax.xlane.f32.xlu1 %v1217_v60  ;;  %1212 = vmax.xlane.f32.xlu2 %v1211_v61 }
 0x1c3   : > { %v1138_v62 = vpop.f32.mrf.mxu3 }
 0x1c4   : > { %v1195_v63 = vpop.f32.mrf.mxu2 }
 0x1d5   : > { %993 = vrot.lane.b32.xlu0 %v748_v1, %s4000_s3  ;;  %s4019_s3 = smov 112  }
 0x1da   : > { %999 = vrot.lane.b32.xlu2 %v748_v1, %s4004_s25 }
 0x1db   : > { %996 = vrot.lane.b32.xlu1 %v748_v1, %s4002_s27  ;;  %s4020_s27 = smov 120  }
 0x22d   : > { %v1216_v2 = vpop.xlane.xlu2 %1215 }
 0x22e   : > { %v1222_v3 = vsub.f32 %v1206_v47, %v1216_v2 }
 0x230   : > { %v1228_v5 = vmul.f32 1.442695, %v1222_v3 }
 0x232   : > { %3135 = vpow2.f32 %v1228_v5 }
 0x234   : > { %v1210_v6 = vpop.xlane.xlu0 %1209 }
 0x235   : > { %v1219_v7 = vpop.xlane.xlu1 %1218  ;;  %v1213_v8 = vpop.xlane.xlu2 %1212  ;;  %v1220_v9 = vsub.f32 %v1204_v57, %v1210_v6 }
 0x236   : > { %v1223_v10 = vsub.f32 %v1207_v58, %v1219_v7  ;;  %v1221_v11 = vsub.f32 %v1205_v55, %v1213_v8 }
 0x237   : > { %v1224_v12 = vmul.f32 1.442695, %v1220_v9 }
 0x238   : > { %v3465_v13 = vpop.eup %3135  ;;  %v1230_v14 = vmul.f32 1.442695, %v1223_v10  ;;  %v1226_v16 = vmul.f32 1.442695, %v1221_v11 }
 0x239   : > { %3137 = vpow2.f32 %v1224_v12  ;;  %v1238_v15 = vsel %vm1120_vm2, %v3465_v13, 0.0 }
 0x23a   : > { %3139 = vpow2.f32 %v1230_v14  ;;  %1239 = vadd.xlane.f32.xlu2 %v1238_v15 }
 0x23b   : > { %3141 = vpow2.f32 %v1226_v16 }
 0x23d   : > { %v1000_v22 = vpop.permute.xlu2 %999 }
 0x23e   : > { %v1014_v24 = vrot.slane %v1000_v22, 4 }
 0x23f   : > { %v3469_v17 = vpop.eup %3137 }
 0x240   : > { %v3471_v18 = vpop.eup %3139  ;;  %v1232_v19 = vsel %vm1120_vm2, %v3469_v17, 0.0 }
 0x241   : > { %v1241_v20 = vsel %vm1120_vm2, %v3471_v18, 0.0  ;;  %1233 = vadd.xlane.f32.xlu0 %v1232_v19  ;;  %v3477_v21 = vpop.eup %3141 }
 0x242   : > { %1242 = vadd.xlane.f32.xlu1 %v1241_v20  ;;  %v1235_v27 = vsel %vm1120_vm2, %v3477_v21, 0.0 }
 0x247   : > { %v994_v23 = vpop.permute.xlu0 %993 }
 0x248   : > { %v1016_v26 = vrot.slane %v994_v23, 4  ;;  %v1015_v28 = vsel %vm762_vm1, %v1014_v24, %v994_v23 }
 0x249   : > { %1236 = vadd.xlane.f32.xlu0 %v1235_v27  ;;  %v1021_v32 = vperm.slane %v1015_v28, %v3363_v25 }
 0x24a   : > { %v1017_v29 = vsel %vm762_vm1, %v1000_v22, %v1016_v26 }
 0x24b   : > { %v1025_v30 = vperm.slane %v1017_v29, %v3363_v25  ;;  %v1026_v40 = vrot.slane %v1021_v32, 4 }
 0x24d   : > { %v1038_v33 = vrot.slane %v1025_v30, 4  ;;  %v997_v34 = vpop.permute.xlu1 %996 }
 0x24e   : > { %v1002_v35 = vrot.slane %v997_v34, 4  ;;  %v1005_v36 = vsel %vm762_vm1, %v997_v34, %v1004_v31 }
 0x24f   : > { %v1013_v37 = vperm.slane %v1005_v36, %v3363_v25 }
 0x250   : > { %v1003_v39 = vsel %vm762_vm1, %v1002_v35, %v748_v1 }
 0x251   : > { %v1009_v41 = vperm.slane %v1003_v39, %v3363_v25  ;;  %v1039_v42 = vsel %vm762_vm1, %v1038_v33, %v1013_v37  ;;  %v1040_v43 = vrot.slane %v1013_v37, 4 }
 0x252   : > { %v1045_v44 = vperm.slane %v1039_v42, %v3372_v38 }
 0x253   : > { %v1027_v45 = vsel %vm762_vm1, %v1026_v40, %v1009_v41  ;;  %v1028_v46 = vrot.slane %v1009_v41, 4  ;;  %v1041_v47 = vsel %vm762_vm1, %v1025_v30, %v1040_v43 }
 0x254   : > { %v1033_v48 = vperm.slane %v1027_v45, %v3372_v38  ;;  %v1049_v49 = vperm.slane %v1041_v47, %v3372_v38  ;;  %v1054_v52 = vrot.slane %v1045_v44, 4 }
 0x255   : > { %v1029_v50 = vsel %vm762_vm1, %v1021_v32, %v1028_v46 }
 0x256   : > { %v1037_v51 = vperm.slane %v1029_v50, %v3372_v38  ;;  %v1056_v53 = vrot.slane %v1049_v49, 4  ;;  %v1050_v54 = vrot.slane %v1033_v48, 4  ;;  %v1055_v61 = vsel %vm762_vm1, 0.0, %v1054_v52 }
 0x258   : > { %v1052_v55 = vrot.slane %v1037_v51, 4  ;;  %v1057_v56 = vsel %vm762_vm1, 0.0, %v1056_v53  ;;  %v1069_v57 = vsel %vm762_vm1, %v1056_v53, %v1045_v44  ;;  %v1051_v3 = vsel %vm762_vm1, 0.0, %v1050_v54 }
 0x259   : > { %v1073_v58 = vperm.slane %v1069_v57, %v3363_v25  ;;  %v1074_v59 = vrot.slane %v1057_v56, 4 }
 0x25a   : > { %v1053_v60 = vsel %vm762_vm1, 0.0, %v1052_v55  ;;  %v1058_v62 = vsel %vm762_vm1, %v1052_v55, %v1033_v48 }
 0x25b   : > { %v1063_v63 = vrot.slane %v1053_v60, 4  ;;  %v1075_v0 = vsel %vm762_vm1, %v1074_v59, %v1055_v61  ;;  %v1094_v1 = vrot.slane %v1073_v58, 4  ;;  %v1062_v2 = vperm.slane %v1058_v62, %v3363_v25 }
 0x25c   : > { %v1079_v5 = vperm.slane %v1075_v0, %v3363_v25 }
 0x25d   : > { %v1064_v6 = vsel %vm762_vm1, %v1063_v63, %v1051_v3  ;;  %v1082_v7 = vrot.slane %v1062_v2, 4 }
 0x25e   : > { %v1068_v8 = vperm.slane %v1064_v6, %v3363_v25  ;;  %v1095_v9 = vsel %vm762_vm1, %v1079_v5, %v1094_v1  ;;  %v1092_v10 = vrot.slane %v1079_v5, 4 }
 0x25f   : > { %v1103_v11 = vperm.slane %v1095_v9, %v3372_v38 }
 0x260   : > { %v1083_v12 = vsel %vm762_vm1, %v1068_v8, %v1082_v7  ;;  %v1080_v14 = vrot.slane %v1068_v8, 4  ;;  %v1093_v15 = vsel %vm762_vm1, %v1092_v10, %v1073_v58 }
 0x261   : > { %v1091_v16 = vperm.slane %v1083_v12, %v3372_v38  ;;  %v1108_v19 = vrot.slane %v1103_v11, 4  ;;  %v1099_v20 = vperm.slane %v1093_v15, %v3372_v38 }
 0x262   : > { %v1081_v22 = vsel %vm762_vm1, %v1080_v14, %v1062_v2 }
 0x263   : > { %v1109_v23 = vsel %vm762_vm1, %v1108_v19, %v1091_v16  ;;  %v1087_v24 = vperm.slane %v1081_v22, %v3372_v38  ;;  %v1104_v26 = vrot.slane %v1099_v20, 4  ;;  %v1110_v27 = vrot.slane %v1091_v16, 4 }
 0x264   : > { %v1310_v28 = vpack.c.bf16 %v1109_v23, %v1109_v23 }
 0x265   : > { %v1105_v29 = vsel %vm762_vm1, %v1104_v26, %v1087_v24  ;;  %v1106_v30 = vrot.slane %v1087_v24, 4  ;;  %v1111_v31 = vsel %vm762_vm1, %v1103_v11, %v1110_v27 }
 0x266   : > { %v1355_v32 = vsel %vm1315_vm3, %v1310_v28, 0  ;;  %v1308_v33 = vpack.c.bf16 %v1105_v29, %v1105_v29  ;;  %v1311_v34 = vpack.c.bf16 %v1111_v31, %v1111_v31 }
 0x267   : > { %1364 = vmatpush.bf16.msra.mxu1 %v1355_v32  ;;  %v1107_v35 = vsel %vm762_vm1, %v1099_v20, %v1106_v30 }
 0x268   : > { %v1317_v36 = vsel %vm1315_vm3, %v1308_v33, 0  ;;  %v1374_v37 = vsel %vm1315_vm3, %v1311_v34, 0  ;;  %v1309_v39 = vpack.c.bf16 %v1107_v35, %v1107_v35 }
 0x269   : > { %1326 = vmatpush.bf16.msrb.mxu3 %v1317_v36  ;;  %1383 = vmatpush.bf16.msra.mxu2 %v1374_v37 }
 0x26a   : > { %v1336_v40 = vsel %vm1315_vm3, %v1309_v39, 0 }
 0x26b   : > { %1345 = vmatpush.bf16.msra.mxu0 %v1336_v40 }
 0x2ad   : > { %v1240_v41 = vpop.xlane.xlu2 %1239 }
 0x2ae   : > { %3143 = vrcp.f32 %v1240_v41  ;;  %v1285_v47 = vand.u32 2147483648, %v1240_v41  ;;  %v1283_v49 = vand.u32 2147483647, %v1240_v41  ;;  %vm1279_vm5 = vweird.f32 %v1240_v41 }
 0x2b0   : > { %v1286_v53 = vor.u32 1.1754944e-38, %v1285_v47  ;;  %vm1284_vm7 = vcmp.eq.f32.partialorder %v1283_v49, 8.507059e+37 }
 0x2b4   : > { %v3144_v42 = vpop.eup %3143  ;;  %v1234_v43 = vpop.xlane.xlu0 %1233 }
 0x2b5   : > { %v1275_v44 = vmul.f32 %v3144_v42, %v1240_v41  ;;  %v1243_v45 = vpop.xlane.xlu1 %1242  ;;  %3145 = vrcp.f32 %v1234_v43  ;;  %vm1280_vm4 = vweird.f32 %v3144_v42  ;;  %v1255_v62 = vand.u32 2147483648, %v1234_v43 }
 0x2b6   : > { %3147 = vrcp.f32 %v1243_v45  ;;  %vm1281_vm6 = vmor %vm1279_vm5, %vm1280_vm4  ;;  %v1300_v63 = vand.u32 2147483648, %v1243_v45  ;;  %v1253_v1 = vand.u32 2147483647, %v1234_v43  ;;  %v1298_v3 = vand.u32 2147483647, %v1243_v45 }
 0x2b7   : > { %v1276_v46 = vsub.f32 1.0, %v1275_v44  ;;  %vm1249_vm10 = vweird.f32 %v1234_v43  ;;  %vm1294_vm11 = vweird.f32 %v1243_v45  ;;  %v1256_v9 = vor.u32 1.1754944e-38, %v1255_v62 }
 0x2b8   : > { %vm1254_vm14 = vcmp.eq.f32.partialorder %v1253_v1, 8.507059e+37  ;;  %vm1299_vm15 = vcmp.eq.f32.partialorder %v1298_v3, 8.507059e+37 }
 0x2b9   : > { %v1277_v48 = vmul.f32 %v3144_v42, %v1276_v46 }
 0x2bb   : > { %v3146_v50 = vpop.eup %3145  ;;  %v1278_v51 = vadd.f32 %v3144_v42, %v1277_v48 }
 0x2bc   : > { %v3148_v52 = vpop.eup %3147  ;;  %v1245_v54 = vmul.f32 %v3146_v50, %v1234_v43  ;;  %v1237_v55 = vpop.xlane.xlu0 %1236  ;;  %vm1250_vm8 = vweird.f32 %v3146_v50 }
 0x2bd   : > { %v1282_v56 = vsel %vm1281_vm6, %v3144_v42, %v1278_v51  ;;  %v1290_v57 = vmul.f32 %v3148_v52, %v1243_v45  ;;  %3149 = vrcp.f32 %v1237_v55  ;;  %vm1295_vm9 = vweird.f32 %v3148_v52  ;;  %vm1251_vm12 = vmor %vm1249_vm10, %vm1250_vm8 }
 0x2be   : > { %v1287_v58 = vsel %vm1284_vm7, %v1286_v53, %v1282_v56  ;;  %v1246_v59 = vsub.f32 1.0, %v1245_v54  ;;  %vm1296_vm13 = vmor %vm1294_vm11, %vm1295_vm9  ;;  %v1270_v22 = vand.u32 2147483648, %v1237_v55  ;;  %v1268_v24 = vand.u32 2147483647, %v1237_v55 }
 0x2bf   : > { %v1288_v60 = vmul.f32 %v3465_v13, %v1287_v58  ;;  %v1291_v61 = vsub.f32 1.0, %v1290_v57  ;;  %v1301_v13 = vor.u32 1.1754944e-38, %v1300_v63  ;;  %vm1264_vm5 = vweird.f32 %v1237_v55 }
 0x2c0   : > { %v1247_v0 = vmul.f32 %v3146_v50, %v1246_v59  ;;  %v1271_v29 = vor.u32 1.1754944e-38, %v1270_v22  ;;  %vm1269_vm7 = vcmp.eq.f32.partialorder %v1268_v24, 8.507059e+37  ;;  %vm1512_vm8 = vcmask 130048  }
 0x2c1   : > { %v1292_v2 = vmul.f32 %v3148_v52, %v1291_v61  ;;  %v1306_v5 = vpack.c.bf16 %v1288_v60, %v1288_v60  ;;  %vm1514_vm9 = vcmask 195584  }
 0x2c2   : > { %v1248_v6 = vadd.f32 %v3146_v50, %v1247_v0 }
 0x2c3   : > { %v3150_v7 = vpop.eup %3149  ;;  %v1293_v8 = vadd.f32 %v3148_v52, %v1292_v2  ;;  %2920 = vmatmul.msk.bf16.vlgmr.msra.gmra.mxu1 %vm1120_vm2, %v1306_v5 }
 0x2c4   : > { %v1260_v10 = vmul.f32 %v3150_v7, %v1237_v55  ;;  %v1252_v11 = vsel %vm1251_vm12, %v3146_v50, %v1248_v6  ;;  %vm1265_vm4 = vweird.f32 %v3150_v7 }
 0x2c5   : > { %v1297_v12 = vsel %vm1296_vm13, %v3148_v52, %v1293_v8  ;;  %v1257_v14 = vsel %vm1254_vm14, %v1256_v9, %v1252_v11  ;;  %vm1266_vm6 = vmor %vm1264_vm5, %vm1265_vm4  ;;  %vm1663_vm14 = vcmask 523264  }
 0x2c6   : > { %v1302_v15 = vsel %vm1299_vm15, %v1301_v13, %v1297_v12  ;;  %v1261_v16 = vsub.f32 1.0, %v1260_v10  ;;  %v1258_v19 = vmul.f32 %v3469_v17, %v1257_v14 }
 0x2c7   : > { %v1303_v20 = vmul.f32 %v3471_v18, %v1302_v15 }
 0x2c8   : > { %v1262_v23 = vmul.f32 %v3150_v7, %v1261_v16  ;;  %v1304_v26 = vpack.c.bf16 %v1258_v19, %v1258_v19 }
 0x2c9   : > { %v1307_v27 = vpack.c.bf16 %v1303_v20, %v1303_v20 }
 0x2ca   : > { %v1263_v28 = vadd.f32 %v3150_v7, %v1262_v23  ;;  %2918 = vmatmul.msk.bf16.vlgmr.msrb.gmra.mxu3 %vm1120_vm2, %v1304_v26 }
 0x2cb   : > { %2921 = vmatmul.msk.bf16.vlgmr.msra.gmra.mxu2 %vm1120_vm2, %v1307_v27 }
 0x2cc   : > { %v1267_v30 = vsel %vm1266_vm6, %v3150_v7, %v1263_v28 }
 0x2cd   : > { %v1272_v31 = vsel %vm1269_vm7, %v1271_v29, %v1267_v30 }
 0x2ce   : > { %v1273_v17 = vmul.f32 %v3477_v21, %v1272_v31 }
 0x2d0   : > { %v1305_v18 = vpack.c.bf16 %v1273_v17, %v1273_v17 }
 0x2d2   : > { %2919 = vmatmul.msk.bf16.vlgmr.msra.gmra.mxu0 %vm1120_vm2, %v1305_v18 }
 0x340   : > { %v1366_v32 = vpop.f32.mrf.mxu1 }
 0x341   : > { %v1389_v34 = vrot.slane %v1366_v32, 4 }
 0x348   : > { %v1368_v33 = vpop.f32.mrf.mxu1 }
 0x34d   : > { %v1328_v35 = vpop.f32.mrf.mxu3 }
 0x34e   : > { %v1390_v36 = vsel %vm762_vm1, %v1389_v34, %v1328_v35  ;;  %v1391_v37 = vrot.slane %v1328_v35, 4  ;;  %v1385_v39 = vpop.f32.mrf.mxu2 }
 0x34f   : > { %v1396_v40 = vperm.slane %v1390_v36, %v3363_v25  ;;  %v1401_v41 = vrot.slane %v1385_v39, 4  ;;  %v1347_v42 = vpop.f32.mrf.mxu0 }
 0x350   : > { %v1392_v43 = vsel %vm762_vm1, %v1366_v32, %v1391_v37  ;;  %v1403_v44 = vrot.slane %v1347_v42, 4 }
 0x351   : > { %v1400_v21 = vperm.slane %v1392_v43, %v3363_v25  ;;  %v1415_v45 = vrot.slane %v1396_v40, 4  ;;  %v1402_v46 = vsel %vm762_vm1, %v1401_v41, %v1347_v42  ;;  %v3074_v42 = vld [vmem:[%s3980_s8 + $0x8] sm:$0xff]  ;;  %v3073_v43 = vld [vmem:[%s3980_s8] sm:$0xff] }
 0x352   : > { %v1404_v47 = vsel %vm762_vm1, %v1385_v39, %v1403_v44  ;;  %v1408_v48 = vperm.slane %v1402_v46, %v3363_v25  ;;  %1541 = vmatpush.bf16.msra.mxu3 %v3074_v42 }
 0x353   : > { %v1427_v49 = vrot.slane %v1400_v21, 4  ;;  %v1412_v50 = vperm.slane %v1404_v47, %v3363_v25 }
 0x354   : > { %v1413_v51 = vrot.slane %v1408_v48, 4  ;;  %v1416_v52 = vsel %vm762_vm1, %v1408_v48, %v1415_v45 }
 0x355   : > { %v1424_v53 = vperm.slane %v1416_v52, %v3372_v38  ;;  %v1425_v54 = vrot.slane %v1412_v50, 4  ;;  %v1428_v55 = vsel %vm762_vm1, %v1412_v50, %v1427_v49  ;;  %v1330_v56 = vpop.f32.mrf.mxu3  ;;  %v3116_v50 = vld [vmem:[%s3981_s9] ss:$0 sm:$0xff] }
 0x356   : > { %v1414_v57 = vsel %vm762_vm1, %v1413_v51, %v1396_v40  ;;  %v1436_v58 = vperm.slane %v1428_v55, %v3372_v38  ;;  %v1387_v59 = vpop.f32.mrf.mxu2  ;;  %1542 = vmatpush.bf16.msra.mxu3 %v3073_v43  ;;  %v641_v51 = vunpack.c.l.bf16 %v3336_v4 }
 0x357   : > { %v1420_v60 = vperm.slane %v1414_v57, %v3372_v38  ;;  %v1426_v61 = vsel %vm762_vm1, %v1425_v54, %v1400_v21  ;;  %v1439_v62 = vrot.slane %v1424_v53, 4  ;;  %v1349_v63 = vpop.f32.mrf.mxu0  ;;  %v3196_v57 = vmov 32.0  }
 0x358   : > { %v1432_v0 = vperm.slane %v1426_v61, %v3372_v38  ;;  %v1443_v1 = vrot.slane %v1436_v58, 4  ;;  %3151 = vrcp.f32 %v3196_v57 }
 0x359   : > { %v1437_v2 = vrot.slane %v1420_v60, 4  ;;  %v1440_v3 = vsel %vm762_vm1, 0.0, %v1439_v62  ;;  %v1445_v5 = vsel %vm762_vm1, %v1439_v62, %v1420_v60 }
 0x35a   : > { %v1441_v6 = vrot.slane %v1432_v0, 4  ;;  %v1444_v7 = vsel %vm762_vm1, 0.0, %v1443_v1  ;;  %v1449_v8 = vperm.slane %v1445_v5, %v3363_v25  ;;  %v1450_v9 = vrot.slane %v1440_v3, 4  ;;  %v3076_v5 = vld [vmem:[%s3984_s12 + $0x8] sm:$0xff] }
 0x35b   : > { %v1438_v13 = vsel %vm762_vm1, 0.0, %v1437_v2  ;;  %v1461_v10 = vrot.slane %v1444_v7, 4  ;;  %v1456_v11 = vsel %vm762_vm1, %v1443_v1, %v1432_v0  ;;  %1627 = vmatpush.bf16.msrb.mxu0 %v3076_v5  ;;  %v3080_v7 = vld [vmem:[%s3986_s14 + $0x18] sm:$0xff] }
 0x35c   : > { %v1442_v12 = vsel %vm762_vm1, 0.0, %v1441_v6  ;;  %v1451_v14 = vsel %vm762_vm1, %v1450_v9, %v1438_v13  ;;  %v1460_v15 = vperm.slane %v1456_v11, %v3363_v25  ;;  %v1469_v16 = vrot.slane %v1449_v8, 4  ;;  %v3075_v6 = vld [vmem:[%s3984_s12] sm:$0xff]  ;;  %1671 = vmatpush.bf16.msrb.mxu1 %v3080_v7  ;;  %v3079_v13 = vld [vmem:[%s3986_s14 + $0x10] sm:$0xff] }
 0x35d   : > { %v1455_v19 = vperm.slane %v1451_v14, %v3363_v25  ;;  %v1462_v20 = vsel %vm762_vm1, %v1461_v10, %v1442_v12 }
 0x35e   : > { %v1466_v22 = vperm.slane %v1462_v20, %v3363_v25  ;;  %v1481_v23 = vrot.slane %v1460_v15, 4  ;;  %v3152_v58 = vpop.eup %3151  ;;  %v3117_v20 = vld [vmem:[%s3982_s10] ss:$0 sm:$0xff] }
 0x35f   : > { %v1470_v24 = vsel %vm762_vm1, %v1455_v19, %v1469_v16  ;;  %v1467_v26 = vrot.slane %v1455_v19, 4  ;;  %v1555_v59 = vmul.f32 32.0, %v3152_v58  ;;  %vm1559_vm10 = vweird.f32 %v3152_v58  ;;  %1628 = vmatpush.bf16.msrb.mxu0 %v3075_v6  ;;  %v3125_v6 = vld [vmem:[%s3977_s5 + $0x1] ss:$0 sm:$0xff] }
 0x360   : > { %v1478_v27 = vperm.slane %v1470_v24, %v3372_v38  ;;  %v1482_v28 = vsel %vm762_vm1, %v1466_v22, %v1481_v23  ;;  %v1479_v29 = vrot.slane %v1466_v22, 4  ;;  %1672 = vmatpush.bf16.msrb.mxu1 %v3079_v13  ;;  %v3118_v23 = vld [vmem:[%s3983_s11] ss:$0 sm:$0xff] }
 0x361   : > { %v1490_v30 = vperm.slane %v1482_v28, %v3372_v38  ;;  %v1468_v31 = vsel %vm762_vm1, %v1467_v26, %v1449_v8  ;;  %v1556_v60 = vsub.f32 1.0, %v1555_v59 }
 0x362   : > { %v1497_v17 = vrot.slane %v1478_v27, 4  ;;  %v1474_v18 = vperm.slane %v1468_v31, %v3372_v38  ;;  %v1480_v32 = vsel %vm762_vm1, %v1479_v29, %v1460_v15  ;;  %v3078_v29 = vld [vmem:[%s3986_s14 + $0x8] sm:$0xff]  ;;  %v3119_v31 = vld [vmem:[%s3985_s13] ss:$0 sm:$0xff] }
 0x363   : > { %v1495_v33 = vrot.slane %v1490_v30, 4  ;;  %v1486_v34 = vperm.slane %v1480_v32, %v3372_v38  ;;  %v1557_v61 = vmul.f32 %v3152_v58, %v1556_v60 }
 0x364   : > { %v1498_v35 = vsel %vm762_vm1, %v1490_v30, %v1497_v17  ;;  %v1493_v36 = vrot.slane %v1474_v18, 4  ;;  %1673 = vmatpush.bf16.msrb.mxu1 %v3078_v29  ;;  %v3077_v30 = vld [vmem:[%s3986_s14] sm:$0xff] }
 0x365   : > { %1508 = vrot.lane.b32.xlu2 %v1498_v35, %s3997_s4  ;;  %v1496_v37 = vsel %vm762_vm1, %v1495_v33, %v1478_v27  ;;  %v1491_v39 = vrot.slane %v1486_v34, 4  ;;  %v1558_v62 = vadd.f32 %v3152_v58, %v1557_v61  ;;  %v3120_v35 = vld [vmem:[%s3987_s15] ss:$0 sm:$0xff] }
 0x366   : > { %1504 = vrot.lane.b32.xlu0 %v1496_v37, %s3999_s29  ;;  %v1494_v40 = vsel %vm762_vm1, %v1486_v34, %v1493_v36  ;;  %v3121_v61 = vld [vmem:[%s3988_s16] ss:$0 sm:$0xff]  ;;  %s4025_s29 = smov 8  }
 0x367   : > { %1500 = vrot.lane.b32.xlu1 %v1494_v40, %s3998_s21  ;;  %v1492_v41 = vsel %vm762_vm1, %v1491_v39, %v1474_v18  ;;  %v3591_v63 = vsel %vm1559_vm10, %v3152_v58, %v1558_v62 }
 0x368   : > { %1674 = vmatpush.bf16.msrb.mxu1 %v3077_v30 }
 0x3bf   : > { %v1509_v46 = vpop.permute.xlu2 %1508 }
 0x3d8   : > { %v1505_v44 = vpop.permute.xlu0 %1504 }
 0x3d9   : > { %v1501_v21 = vpop.permute.xlu1 %1500 }
 0x3da   : > { %v1511_v45 = vsel %vm1120_vm2, %v1492_v41, %v1501_v21 }
 0x3db   : > { %v1513_v47 = vsel %vm1512_vm8, %v1511_v45, %v1505_v44 }
 0x3dc   : > { %v1515_v48 = vsel %vm1514_vm9, %v1513_v47, %v1509_v46  ;;  %v3082_v46 = vld [vmem:[%s4013_s2 + $0x18] sm:$0xff] }
 0x3dd   : > { %v1516_v49 = vpack.c.bf16 %v1515_v48, %v1515_v48  ;;  %v3084_v47 = vld [vmem:[%s4014_s26 + $0x18] sm:$0xff]  ;;  %1766 = vmatpush.bf16.msrb.mxu2 %v3082_v46 }
 0x3de   : > { %v3086_v48 = vld [vmem:[%s3978_s6 + $0x18] sm:$0xff]  ;;  %1794 = vmatpush.bf16.msrb.mxu3 %v3084_v47 }
 0x3df   : > { %2930 = vmatmul.msk.bf16.vlgmr.msra.gmra.mxu3 %vm678_vm0, %v1516_v49  ;;  %v3081_v49 = vld [vmem:[%s4013_s2 + $0x10] sm:$0xff]  ;;  %1822 = vmatpush.bf16.msra.mxu0 %v3086_v48 }
 0x3e1   : > { %1767 = vmatpush.bf16.msrb.mxu2 %v3081_v49 }
 0x462   : > { %v1544_v52 = vpop.f32.mrf.mxu3 }
 0x463   : > { %v1545_v53 = vadd.f32 %v3116_v50, %v1544_v52  ;;  %v3083_v50 = vld [vmem:[%s4014_s26 + $0x10] sm:$0xff] }
 0x464   : > { %1795 = vmatpush.bf16.msrb.mxu3 %v3083_v50 }
 0x465   : > { %v1548_v54 = vadd.f32 %v1545_v53, %v641_v51  ;;  %v3085_v51 = vld [vmem:[%s3978_s6 + $0x10] sm:$0xff] }
 0x466   : > { %1823 = vmatpush.bf16.msra.mxu0 %v3085_v51 }
 0x467   : > { %v1551_v55 = vsel %vm678_vm0, %v1548_v54, 0.0 }
 0x468   : > { %1552 = vadd.xlane.f32.xlu0 %v1551_v55 }
 0x46a   : > { %v1546_v56 = vpop.f32.mrf.mxu3 }
 0x4db   : > { %v1553_v0 = vpop.xlane.xlu0 %1552 }
 0x4dc   : > { %v1561_v4 = vmul.f32 %v3591_v63, %v1553_v0  ;;  %v3122_v0 = vld [vmem:[%s3989_s17] ss:$0 sm:$0xff] }
 0x4de   : > { %v1562_v1 = vsub.f32 %v1548_v54, %v1561_v4 }
 0x4e0   : > { %v1563_v2 = vmul.f32 %v1562_v1, %v1562_v1 }
 0x4e2   : > { %v1564_v3 = vsel %vm678_vm0, %v1563_v2, 0.0 }
 0x4e3   : > { %1565 = vadd.xlane.f32.xlu1 %v1564_v3 }
 0x556   : > { %v1566_v8 = vpop.xlane.xlu1 %1565 }
 0x557   : > { %v1567_v9 = vmul.f32 %v1566_v8, %v3591_v63 }
 0x559   : > { %v1568_v10 = vadd.f32 1e-05, %v1567_v9 }
 0x55b   : > { %3153 = vrsqrt.f32 %v1568_v10  ;;  %vm1575_vm12 = vweird.f32 %v1568_v10 }
 0x561   : > { %v3154_v11 = vpop.eup %3153 }
 0x562   : > { %v1570_v12 = vmul.f32 %v3154_v11, %v1568_v10  ;;  %vm1576_vm11 = vweird.f32 %v3154_v11  ;;  %v3124_v10 = vld [vmem:[%s4017_s0 + $0x1] ss:$0 sm:$0xff] }
 0x563   : > { %vm1577_vm13 = vmor %vm1575_vm12, %vm1576_vm11 }
 0x564   : > { %v1571_v14 = vmul.f32 %v3154_v11, %v1570_v12 }
 0x566   : > { %v1572_v15 = vmul.f32 0.5, %v1571_v14 }
 0x568   : > { %v1573_v16 = vsub.f32 1.5, %v1572_v15 }
 0x56a   : > { %v1574_v19 = vmul.f32 %v3154_v11, %v1573_v16 }
 0x56c   : > { %v1578_v22 = vsel %vm1577_vm13, %v3154_v11, %v1574_v19 }
 0x56d   : > { %v1579_v24 = vmul.f32 %v1578_v22, %v1562_v1 }
 0x56f   : > { %v1583_v26 = vmul.f32 %v3117_v20, %v1579_v24 }
 0x571   : > { %v1587_v27 = vadd.f32 %v3118_v23, %v1583_v26 }
 0x573   : > { %v1602_v28 = vpack.c.bf16 %v1587_v27, %v1587_v27 }
 0x575   : > { %2939 = vmatmul.msk.bf16.vlgmr.msrb.gmra.mxu0 %vm678_vm0, %v1602_v28 }
 0x5f2   : > { %v1630_v17 = vpop.f32.mrf.mxu0 }
 0x5f3   : > { %v1631_v18 = vadd.f32 %v3119_v31, %v1630_v17 }
 0x5f5   : > { %v1634_v32 = vmax.f32 %v1631_v18, 0.0 }
 0x5f7   : > { %v1635_v33 = vpack.c.bf16 %v1634_v32, %v1634_v32 }
 0x5f9   : > { %2956 = vmatmul.msk.bf16.vlgmr.msrb.gmra.mxu1 %vm1663_vm14, %v1635_v33 }
 0x5fa   : > { %v1632_v34 = vpop.f32.mrf.mxu0 }
 0x676   : > { %v1676_v36 = vpop.f32.mrf.mxu1 }
 0x677   : > { %v1677_v37 = vadd.f32 %v3120_v35, %v1676_v36 }
 0x679   : > { %v1680_v39 = vadd.f32 %v1677_v37, %v1587_v27 }
 0x67b   : > { %v1683_v40 = vsel %vm678_vm0, %v1680_v39, 0.0 }
 0x67c   : > { %1684 = vadd.xlane.f32.xlu2 %v1683_v40 }
 0x67e   : > { %v1678_v41 = vpop.f32.mrf.mxu1 }
 0x6ef   : > { %v1685_v42 = vpop.xlane.xlu2 %1684 }
 0x6f0   : > { %v1686_v43 = vmul.f32 %v1685_v42, %v3591_v63 }
 0x6f2   : > { %v1687_v44 = vsub.f32 %v1680_v39, %v1686_v43 }
 0x6f4   : > { %v1688_v21 = vmul.f32 %v1687_v44, %v1687_v44 }
 0x6f6   : > { %v1689_v45 = vsel %vm678_vm0, %v1688_v21, 0.0 }
 0x6f7   : > { %1690 = vadd.xlane.f32.xlu0 %v1689_v45 }
 0x76a   : > { %v1691_v52 = vpop.xlane.xlu0 %1690 }
 0x76b   : > { %v1692_v53 = vmul.f32 %v1691_v52, %v3591_v63 }
 0x76d   : > { %v1693_v54 = vadd.f32 1e-05, %v1692_v53 }
 0x76f   : > { %3155 = vrsqrt.f32 %v1693_v54  ;;  %vm1700_vm4 = vweird.f32 %v1693_v54 }
 0x775   : > { %v3156_v55 = vpop.eup %3155 }
 0x776   : > { %v1695_v56 = vmul.f32 %v3156_v55, %v1693_v54  ;;  %vm1701_vm15 = vweird.f32 %v3156_v55 }
 0x777   : > { %vm1702_vm5 = vmor %vm1700_vm4, %vm1701_vm15 }
 0x778   : > { %v1696_v57 = vmul.f32 %v3156_v55, %v1695_v56 }
 0x77a   : > { %v1697_v58 = vmul.f32 0.5, %v1696_v57 }
 0x77c   : > { %v1698_v59 = vsub.f32 1.5, %v1697_v58 }
 0x77e   : > { %v1699_v60 = vmul.f32 %v3156_v55, %v1698_v59 }
 0x780   : > { %v1703_v62 = vsel %vm1702_vm5, %v3156_v55, %v1699_v60 }
 0x781   : > { %v1704_v4 = vmul.f32 %v1703_v62, %v1687_v44 }
 0x783   : > { %v1708_v1 = vmul.f32 %v3121_v61, %v1704_v4 }
 0x785   : > { %v3656_v2 = vadd.f32 %v3122_v0, %v1708_v1 }
 0x787   : > { %v1741_v3 = vpack.c.bf16 %v3656_v2, %v3656_v2 }
 0x789   : > { %2985 = vmatmul.msk.bf16.vlgmr.msrb.gmra.mxu2 %vm678_vm0, %v1741_v3  ;;  %2994 = vmatmul.msk.bf16.vlgmr.msrb.gmra.mxu3 %vm678_vm0, %v1741_v3 }
 0x78a   : > { %3003 = vmatmul.msk.bf16.vlgmr.msra.gmra.mxu0 %vm678_vm0, %v1741_v3 }
 0x807   : > { %v3663_v5 = vpop.f32.mrf.mxu0 }
 0x80c   : > { %v1769_v7 = vpop.f32.mrf.mxu2  ;;  %v1797_v8 = vpop.f32.mrf.mxu3 }
 0x80d   : > { %v1798_v9 = vadd.f32 %v3125_v6, %v1797_v8  ;;  %v1770_v14 = vadd.f32 %v3124_v10, %v1769_v7 }
 0x80f   : > { %v1827_v13 = vpop.f32.mrf.mxu0  ;;  %1956 = vrot.lane.b32.xlu0 %v1798_v9, %s4018_s30  ;;  %1953 = vrot.lane.b32.xlu2 %v1798_v9, %s4019_s3  ;;  %v1961_v19 = vrot.slane %v1798_v9, 4  ;;  %v1841_v21 = vrot.slane %v1770_v14, 4 }
 0x810   : > { %1950 = vrot.lane.b32.xlu1 %v1798_v9, %s4020_s27 }
 0x814   : > { %v1771_v11 = vpop.f32.mrf.mxu2  ;;  %v1799_v12 = vpop.f32.mrf.mxu3 }
 0x817   : > { %1836 = vrot.lane.b32.xlu2 %v1770_v14, %s4018_s30  ;;  %1833 = vrot.lane.b32.xlu0 %v1770_v14, %s4019_s3 }
 0x818   : > { %1830 = vrot.lane.b32.xlu1 %v1770_v14, %s4020_s27 }
 0x869   : > { %v1954_v15 = vpop.permute.xlu2 %1953 }
 0x86a   : > { %v1959_v16 = vrot.slane %v1954_v15, 4  ;;  %v1962_v22 = vsel %vm762_vm1, %v1954_v15, %v1961_v19 }
 0x86b   : > { %v1970_v26 = vperm.slane %v1962_v22, %v3363_v25 }
 0x86c   : > { %v1960_v20 = vsel %vm762_vm1, %v1959_v16, %v1798_v9 }
 0x86d   : > { %v1966_v23 = vperm.slane %v1960_v20, %v3363_v25  ;;  %v1997_v32 = vrot.slane %v1970_v26, 4 }
 0x86f   : > { %v1985_v31 = vrot.slane %v1966_v23, 4 }
 0x871   : > { %v1837_v33 = vpop.permute.xlu2 %1836 }
 0x872   : > { %v1851_v41 = vrot.slane %v1837_v33, 4 }
 0x881   : > { %v1957_v24 = vpop.permute.xlu0 %1956 }
 0x882   : > { %v1971_v27 = vrot.slane %v1957_v24, 4  ;;  %v1951_v28 = vpop.permute.xlu1 %1950 }
 0x883   : > { %v1973_v29 = vrot.slane %v1951_v28, 4 }
 0x884   : > { %v1972_v30 = vsel %vm762_vm1, %v1971_v27, %v1951_v28 }
 0x885   : > { %v1974_v17 = vsel %vm762_vm1, %v1957_v24, %v1973_v29  ;;  %v1978_v18 = vperm.slane %v1972_v30, %v3363_v25 }
 0x886   : > { %v1982_v34 = vperm.slane %v1974_v17, %v3363_v25 }
 0x887   : > { %v1983_v35 = vrot.slane %v1978_v18, 4  ;;  %v1986_v36 = vsel %vm762_vm1, %v1978_v18, %v1985_v31 }
 0x888   : > { %v1994_v37 = vperm.slane %v1986_v36, %v3372_v38  ;;  %v1995_v39 = vrot.slane %v1982_v34, 4  ;;  %v1998_v40 = vsel %vm762_vm1, %v1982_v34, %v1997_v32 }
 0x889   : > { %v1984_v42 = vsel %vm762_vm1, %v1983_v35, %v1966_v23  ;;  %v2006_v43 = vperm.slane %v1998_v40, %v3372_v38  ;;  %v1834_v44 = vpop.permute.xlu0 %1833 }
 0x88a   : > { %v1990_v45 = vperm.slane %v1984_v42, %v3372_v38  ;;  %v1996_v46 = vsel %vm762_vm1, %v1995_v39, %v1970_v26  ;;  %v2009_v47 = vrot.slane %v1994_v37, 4  ;;  %v1839_v48 = vrot.slane %v1834_v44, 4  ;;  %v1831_v49 = vpop.permute.xlu1 %1830 }
 0x88b   : > { %v2002_v50 = vperm.slane %v1996_v46, %v3372_v38  ;;  %v2013_v51 = vrot.slane %v2006_v43, 4  ;;  %v1842_v52 = vsel %vm762_vm1, %v1834_v44, %v1841_v21  ;;  %v1852_v53 = vsel %vm762_vm1, %v1851_v41, %v1831_v49 }
 0x88c   : > { %v2007_v54 = vrot.slane %v1990_v45, 4  ;;  %v2010_v55 = vsel %vm762_vm1, 0.0, %v2009_v47  ;;  %v2015_v56 = vsel %vm762_vm1, %v2009_v47, %v1990_v45  ;;  %v1840_v57 = vsel %vm762_vm1, %v1839_v48, %v1770_v14 }
 0x88d   : > { %v2011_v58 = vrot.slane %v2002_v50, 4  ;;  %v2014_v59 = vsel %vm762_vm1, 0.0, %v2013_v51  ;;  %v2019_v60 = vperm.slane %v2015_v56, %v3363_v25  ;;  %v2020_v61 = vrot.slane %v2010_v55, 4 }
 0x88e   : > { %v2008_v62 = vsel %vm762_vm1, 0.0, %v2007_v54  ;;  %v2026_v0 = vsel %vm762_vm1, %v2013_v51, %v2002_v50  ;;  %v2031_v4 = vrot.slane %v2014_v59, 4  ;;  %v1846_v1 = vperm.slane %v1840_v57, %v3363_v25 }
 0x88f   : > { %v2012_v3 = vsel %vm762_vm1, 0.0, %v2011_v58  ;;  %v2021_v6 = vsel %vm762_vm1, %v2020_v61, %v2008_v62  ;;  %v2030_v7 = vperm.slane %v2026_v0, %v3363_v25  ;;  %v1850_v8 = vperm.slane %v1842_v52, %v3363_v25 }
 0x890   : > { %v1865_v9 = vrot.slane %v1846_v1, 4  ;;  %v1853_v13 = vrot.slane %v1831_v49, 4  ;;  %v1858_v10 = vperm.slane %v1852_v53, %v3363_v25  ;;  %v2025_v11 = vperm.slane %v2021_v6, %v3363_v25 }
 0x891   : > { %v1877_v12 = vrot.slane %v1850_v8, 4  ;;  %v2032_v14 = vsel %vm762_vm1, %v2031_v4, %v2012_v3  ;;  %v2039_v15 = vrot.slane %v2019_v60, 4  ;;  %v2051_v16 = vrot.slane %v2030_v7, 4 }
 0x892   : > { %v1854_v19 = vsel %vm762_vm1, %v1837_v33, %v1853_v13  ;;  %v1863_v20 = vrot.slane %v1858_v10, 4  ;;  %v1866_v22 = vsel %vm762_vm1, %v1858_v10, %v1865_v9  ;;  %v2036_v23 = vperm.slane %v2032_v14, %v3363_v25 }
 0x893   : > { %v1862_v24 = vperm.slane %v1854_v19, %v3363_v25  ;;  %v1874_v26 = vperm.slane %v1866_v22, %v3372_v38  ;;  %v2040_v27 = vsel %vm762_vm1, %v2025_v11, %v2039_v15  ;;  %v2037_v28 = vrot.slane %v2025_v11, 4 }
 0x894   : > { %v1864_v29 = vsel %vm762_vm1, %v1863_v20, %v1846_v1  ;;  %v2048_v30 = vperm.slane %v2040_v27, %v3372_v38  ;;  %v2052_v31 = vsel %vm762_vm1, %v2036_v23, %v2051_v16  ;;  %v2049_v17 = vrot.slane %v2036_v23, 4 }
 0x895   : > { %v1870_v18 = vperm.slane %v1864_v29, %v3372_v38  ;;  %v1875_v32 = vrot.slane %v1862_v24, 4  ;;  %v1878_v33 = vsel %vm762_vm1, %v1862_v24, %v1877_v12  ;;  %v1889_v34 = vrot.slane %v1874_v26, 4 }
 0x896   : > { %v1886_v35 = vperm.slane %v1878_v33, %v3372_v38  ;;  %v2060_v36 = vperm.slane %v2052_v31, %v3372_v38  ;;  %v2067_v37 = vrot.slane %v2048_v30, 4  ;;  %v2038_v39 = vsel %vm762_vm1, %v2037_v28, %v2019_v60 }
 0x897   : > { %v1876_v40 = vsel %vm762_vm1, %v1875_v32, %v1850_v8  ;;  %v1887_v41 = vrot.slane %v1870_v18, 4  ;;  %v1890_v42 = vsel %vm762_vm1, 0.0, %v1889_v34  ;;  %v1895_v43 = vsel %vm762_vm1, %v1889_v34, %v1870_v18 }
 0x898   : > { %v1882_v44 = vperm.slane %v1876_v40, %v3372_v38  ;;  %v1893_v21 = vrot.slane %v1886_v35, 4  ;;  %v1899_v45 = vperm.slane %v1895_v43, %v3363_v25  ;;  %v1900_v46 = vrot.slane %v1890_v42, 4 }
 0x899   : > { %v1888_v47 = vsel %vm762_vm1, 0.0, %v1887_v41  ;;  %v2065_v48 = vrot.slane %v2060_v36, 4  ;;  %v2068_v49 = vsel %vm762_vm1, %v2060_v36, %v2067_v37  ;;  %v2044_v50 = vperm.slane %v2038_v39, %v3372_v38 }
 0x89a   : > { %v1891_v51 = vrot.slane %v1882_v44, 4  ;;  %v1894_v52 = vsel %vm762_vm1, 0.0, %v1893_v21  ;;  %v1901_v53 = vsel %vm762_vm1, %v1900_v46, %v1888_v47  ;;  %v1906_v54 = vsel %vm762_vm1, %v1893_v21, %v1882_v44  ;;  %v3179_v44 = vld [vmem:[%s3329_s24] ss:$0 sm:$0xff] }
 0x89b   : > { %v1905_v55 = vperm.slane %v1901_v53, %v3363_v25  ;;  %v1910_v56 = vperm.slane %v1906_v54, %v3363_v25  ;;  %v1911_v57 = vrot.slane %v1894_v52, 4  ;;  %v1919_v58 = vrot.slane %v1899_v45, 4 }
 0x89c   : > { %v1892_v59 = vsel %vm762_vm1, 0.0, %v1891_v51  ;;  %v2066_v60 = vsel %vm762_vm1, %v2065_v48, %v2048_v30  ;;  %v2196_v61 = vpack.c.bf16 %v2068_v49, %v2068_v49  ;;  %v2050_v62 = vsel %vm762_vm1, %v2049_v17, %v2030_v7 }
 0x89d   : > { %v1912_v0 = vsel %vm762_vm1, %v1911_v57, %v1892_v59  ;;  %v1917_v4 = vrot.slane %v1905_v55, 4  ;;  %v1931_v1 = vrot.slane %v1910_v56, 4  ;;  %v2195_v3 = vpack.c.bf16 %v2066_v60, %v2066_v60 }
 0x89e   : > { %v1916_v6 = vperm.slane %v1912_v0, %v3363_v25  ;;  %v2258_v8 = vsel %vm1120_vm2, %v2196_v61, 0  ;;  %v2056_v9 = vperm.slane %v2050_v62, %v3372_v38  ;;  %v2063_v13 = vrot.slane %v2044_v50, 4  ;;  %v3123_v62 = vld [vmem:[%s3979_s7 + $0x1] ss:$0 sm:$0xff] }
 0x89f   : > { %v2239_v10 = vsel %vm1120_vm2, %v2195_v3, 0  ;;  %2267 = vmatpush.bf16.xpose.msrb.mxu0 %v2258_v8  ;;  %v1920_v11 = vsel %vm762_vm1, %v1905_v55, %v1919_v58  ;;  %v1918_v12 = vsel %vm762_vm1, %v1917_v4, %v1899_v45  ;;  %v1826_v0 = vadd.f32 %v3123_v62, %v3663_v5 }
 0x8a0   : > { %v1929_v7 = vrot.slane %v1916_v6, 4  ;;  %2248 = vmatpush.bf16.xpose.msra.mxu3 %v2239_v10  ;;  %v2061_v14 = vrot.slane %v2056_v9, 4  ;;  %v2064_v15 = vsel %vm762_vm1, %v2056_v9, %v2063_v13  ;;  %v1928_v16 = vperm.slane %v1920_v11, %v3372_v38 }
 0x8a1   : > { %v2194_v19 = vpack.c.bf16 %v2064_v15, %v2064_v15  ;;  %v1932_v20 = vsel %vm762_vm1, %v1916_v6, %v1931_v1  ;;  %v1924_v22 = vperm.slane %v1918_v12, %v3372_v38 }
 0x8a2   : > { %v2062_v23 = vsel %vm762_vm1, %v2061_v14, %v2044_v50  ;;  %v1940_v24 = vperm.slane %v1932_v20, %v3372_v38  ;;  %v1930_v26 = vsel %vm762_vm1, %v1929_v7, %v1910_v56  ;;  %v1947_v27 = vrot.slane %v1928_v16, 4 }
 0x8a3   : > { %v2193_v28 = vpack.c.bf16 %v2062_v23, %v2062_v23  ;;  %v2220_v29 = vsel %vm1120_vm2, %v2194_v19, 0  ;;  %v1936_v30 = vperm.slane %v1930_v26, %v3372_v38  ;;  %v1943_v31 = vrot.slane %v1924_v22, 4 }
 0x8a4   : > { %2229 = vmatpush.bf16.xpose.msra.mxu2 %v2220_v29  ;;  %v1945_v17 = vrot.slane %v1940_v24, 4  ;;  %v1948_v18 = vsel %vm762_vm1, %v1940_v24, %v1947_v27  ;;  %v2081_v26 = vrot.slane %v1826_v0, 4 }
 0x8a5   : > { %v2201_v32 = vsel %vm1120_vm2, %v2193_v28, 0  ;;  %v1941_v33 = vrot.slane %v1936_v30, 4  ;;  %v2192_v34 = vpack.c.bf16 %v1948_v18, %v1948_v18  ;;  %v1944_v35 = vsel %vm762_vm1, %v1936_v30, %v1943_v31 }
 0x8a6   : > { %2210 = vmatpush.bf16.xpose.msra.mxu1 %v2201_v32  ;;  %v1946_v36 = vsel %vm762_vm1, %v1945_v17, %v1928_v16  ;;  %v2190_v40 = vpack.c.bf16 %v1944_v35, %v1944_v35 }
 0x8a7   : > { %v2191_v37 = vpack.c.bf16 %v1946_v36, %v1946_v36  ;;  %v1942_v39 = vsel %vm762_vm1, %v1941_v33, %v1924_v22  ;;  %3007 = vmatmul.msk.bf16.vlgmr.msrb.gmra.mxu0 %vm1120_vm2, %v2192_v34 }
 0x8a8   : > { %v2189_v41 = vpack.c.bf16 %v1942_v39, %v1942_v39 }
 0x8a9   : > { %3006 = vmatmul.msk.bf16.vlgmr.msra.gmra.mxu3 %vm1120_vm2, %v2191_v37 }
 0x8ab   : > { %3005 = vmatmul.msk.bf16.vlgmr.msra.gmra.mxu2 %vm1120_vm2, %v2190_v40 }
 0x8ad   : > { %3004 = vmatmul.msk.bf16.vlgmr.msra.gmra.mxu1 %vm1120_vm2, %v2189_v41 }
 0x924   : > { %v2269_v42 = vpop.f32.mrf.mxu0 }
 0x925   : > { %v2276_v43 = vmul.f32 0.35355338, %v2269_v42 }
 0x927   : > { %v2280_v21 = vadd.f32 %v3179_v44, %v2276_v43 }
 0x929   : > { %v2290_v45 = vsel %vm1120_vm2, %v2280_v21, -inf }
 0x92a   : > { %v2212_v46 = vpop.f32.mrf.mxu1  ;;  %2291 = vmax.xlane.f32.xlu1 %v2290_v45 }
 0x92b   : > { %v2273_v47 = vmul.f32 0.35355338, %v2212_v46 }
 0x92c   : > { %v2250_v48 = vpop.f32.mrf.mxu3  ;;  %v2271_v49 = vpop.f32.mrf.mxu0 }
 0x92d   : > { %v2275_v50 = vmul.f32 0.35355338, %v2250_v48  ;;  %v2277_v51 = vadd.f32 %v3179_v44, %v2273_v47 }
 0x92e   : > { %v2231_v52 = vpop.f32.mrf.mxu2 }
 0x92f   : > { %v2281_v53 = vsel %vm1120_vm2, %v2277_v51, -inf  ;;  %v2274_v54 = vmul.f32 0.35355338, %v2231_v52  ;;  %v2279_v55 = vadd.f32 %v3179_v44, %v2275_v50 }
 0x930   : > { %2282 = vmax.xlane.f32.xlu2 %v2281_v53 }
 0x931   : > { %v2287_v56 = vsel %vm1120_vm2, %v2279_v55, -inf  ;;  %v2278_v57 = vadd.f32 %v3179_v44, %v2274_v54 }
 0x932   : > { %v2214_v58 = vpop.f32.mrf.mxu1  ;;  %2288 = vmax.xlane.f32.xlu1 %v2287_v56 }
 0x933   : > { %v2284_v59 = vsel %vm1120_vm2, %v2278_v57, -inf }
 0x934   : > { %v2252_v60 = vpop.f32.mrf.mxu3  ;;  %2285 = vmax.xlane.f32.xlu0 %v2284_v59 }
 0x936   : > { %v2233_v61 = vpop.f32.mrf.mxu2 }
 0x948   : > { %2073 = vrot.lane.b32.xlu2 %v1826_v0, %s4019_s3  ;;  %2070 = vrot.lane.b32.xlu0 %v1826_v0, %s4020_s27 }
 0x94b   : > { %2076 = vrot.lane.b32.xlu1 %v1826_v0, %s4018_s30  ;;  %s4026_s30 = sshll.u32 %s4029_s22, 2 }
 0x94c   : > { %s638_s4 = scalar_lea.vmem %s3992_s20, %s4026_s30 }
 0x99d   : > { %v2292_v4 = vpop.xlane.xlu1 %2291 }
 0x99e   : > { %v2296_v10 = vsub.f32 %v2280_v21, %v2292_v4 }
 0x9a0   : > { %v2303_v5 = vmul.f32 1.442695, %v2296_v10 }
 0x9a3   : > { %v2283_v1 = vpop.xlane.xlu2 %2282 }
 0x9a4   : > { %v2293_v3 = vsub.f32 %v2277_v51, %v2283_v1 }
 0x9a5   : > { %v2289_v6 = vpop.xlane.xlu1 %2288 }
 0x9a6   : > { %v2297_v8 = vmul.f32 1.442695, %v2293_v3  ;;  %v2295_v9 = vsub.f32 %v2279_v55, %v2289_v6 }
 0x9a7   : > { %v2286_v13 = vpop.xlane.xlu0 %2285 }
 0x9a8   : > { %3157 = vpow2.f32 %v2297_v8  ;;  %v2301_v11 = vmul.f32 1.442695, %v2295_v9  ;;  %v2294_v12 = vsub.f32 %v2278_v57, %v2286_v13 }
 0x9aa   : > { %3159 = vpow2.f32 %v2301_v11  ;;  %v2299_v7 = vmul.f32 1.442695, %v2294_v12 }
 0x9ab   : > { %v2074_v22 = vpop.permute.xlu2 %2073 }
 0x9ac   : > { %3161 = vpow2.f32 %v2299_v7  ;;  %v2079_v27 = vrot.slane %v2074_v22, 4  ;;  %v2082_v28 = vsel %vm762_vm1, %v2074_v22, %v2081_v26 }
 0x9ad   : > { %3163 = vpow2.f32 %v2303_v5  ;;  %v2090_v17 = vperm.slane %v2082_v28, %v3363_v25 }
 0x9ae   : > { %v3777_v14 = vpop.eup %3157  ;;  %v2080_v30 = vsel %vm762_vm1, %v2079_v27, %v1826_v0 }
 0x9af   : > { %v2305_v15 = vsel %vm1120_vm2, %v3777_v14, 0.0  ;;  %v2086_v32 = vperm.slane %v2080_v30, %v3363_v25  ;;  %v2117_v36 = vrot.slane %v2090_v17, 4 }
 0x9b0   : > { %v3781_v16 = vpop.eup %3159  ;;  %2306 = vadd.xlane.f32.xlu1 %v2305_v15 }
 0x9b1   : > { %v2311_v19 = vsel %vm1120_vm2, %v3781_v16, 0.0  ;;  %v2105_v40 = vrot.slane %v2086_v32, 4 }
 0x9b2   : > { %v3785_v20 = vpop.eup %3161  ;;  %2312 = vadd.xlane.f32.xlu0 %v2311_v19 }
 0x9b3   : > { %v2308_v23 = vsel %vm1120_vm2, %v3785_v20, 0.0  ;;  %v3789_v24 = vpop.eup %3163 }
 0x9b4   : > { %2309 = vadd.xlane.f32.xlu2 %v2308_v23  ;;  %v2314_v29 = vsel %vm1120_vm2, %v3789_v24, 0.0 }
 0x9ba   : > { %v2071_v31 = vpop.permute.xlu0 %2070  ;;  %2315 = vadd.xlane.f32.xlu0 %v2314_v29 }
 0x9bb   : > { %v2093_v18 = vrot.slane %v2071_v31, 4 }
 0x9bd   : > { %v2077_v33 = vpop.permute.xlu1 %2076 }
 0x9be   : > { %v2091_v34 = vrot.slane %v2077_v33, 4  ;;  %v2094_v35 = vsel %vm762_vm1, %v2077_v33, %v2093_v18 }
 0x9bf   : > { %v2102_v37 = vperm.slane %v2094_v35, %v3363_v25 }
 0x9c0   : > { %v2092_v39 = vsel %vm762_vm1, %v2091_v34, %v2071_v31 }
 0x9c1   : > { %v2098_v41 = vperm.slane %v2092_v39, %v3363_v25  ;;  %v2115_v42 = vrot.slane %v2102_v37, 4  ;;  %v2118_v43 = vsel %vm762_vm1, %v2102_v37, %v2117_v36 }
 0x9c2   : > { %v2126_v44 = vperm.slane %v2118_v43, %v3372_v38 }
 0x9c3   : > { %v2103_v21 = vrot.slane %v2098_v41, 4  ;;  %v2106_v45 = vsel %vm762_vm1, %v2098_v41, %v2105_v40  ;;  %v2116_v46 = vsel %vm762_vm1, %v2115_v42, %v2090_v17 }
 0x9c4   : > { %v2114_v47 = vperm.slane %v2106_v45, %v3372_v38  ;;  %v2122_v48 = vperm.slane %v2116_v46, %v3372_v38  ;;  %v2133_v49 = vrot.slane %v2126_v44, 4 }
 0x9c5   : > { %v2104_v50 = vsel %vm762_vm1, %v2103_v21, %v2086_v32 }
 0x9c6   : > { %v2110_v51 = vperm.slane %v2104_v50, %v3372_v38  ;;  %v2129_v52 = vrot.slane %v2114_v47, 4  ;;  %v2131_v53 = vrot.slane %v2122_v48, 4  ;;  %v2134_v54 = vsel %vm762_vm1, 0.0, %v2133_v49 }
 0x9c7   : > { %v2146_v55 = vsel %vm762_vm1, %v2133_v49, %v2122_v48  ;;  %v2151_v56 = vrot.slane %v2134_v54, 4 }
 0x9c8   : > { %v2127_v57 = vrot.slane %v2110_v51, 4  ;;  %v2130_v58 = vsel %vm762_vm1, 0.0, %v2129_v52  ;;  %v2132_v59 = vsel %vm762_vm1, 0.0, %v2131_v53  ;;  %v2135_v60 = vsel %vm762_vm1, %v2129_v52, %v2110_v51 }
 0x9c9   : > { %v2140_v61 = vrot.slane %v2130_v58, 4  ;;  %v2150_v62 = vperm.slane %v2146_v55, %v3363_v25  ;;  %v2152_v0 = vsel %vm762_vm1, %v2151_v56, %v2132_v59  ;;  %v2139_v4 = vperm.slane %v2135_v60, %v3363_v25 }
 0x9ca   : > { %v2128_v1 = vsel %vm762_vm1, 0.0, %v2127_v57  ;;  %v2156_v3 = vperm.slane %v2152_v0, %v3363_v25 }
 0x9cb   : > { %v2171_v6 = vrot.slane %v2150_v62, 4  ;;  %v2141_v8 = vsel %vm762_vm1, %v2140_v61, %v2128_v1  ;;  %v2159_v9 = vrot.slane %v2139_v4, 4 }
 0x9cc   : > { %v2145_v13 = vperm.slane %v2141_v8, %v3363_v25  ;;  %v2169_v10 = vrot.slane %v2156_v3, 4 }
 0x9cd   : > { %v2172_v11 = vsel %vm762_vm1, %v2156_v3, %v2171_v6 }
 0x9ce   : > { %v2160_v12 = vsel %vm762_vm1, %v2145_v13, %v2159_v9  ;;  %v2180_v7 = vperm.slane %v2172_v11, %v3372_v38  ;;  %v2157_v5 = vrot.slane %v2145_v13, 4  ;;  %v2170_v15 = vsel %vm762_vm1, %v2169_v10, %v2150_v62 }
 0x9cf   : > { %v2168_v19 = vperm.slane %v2160_v12, %v3372_v38  ;;  %v2176_v22 = vperm.slane %v2170_v15, %v3372_v38 }
 0x9d0   : > { %v2185_v23 = vrot.slane %v2180_v7, 4  ;;  %v2158_v26 = vsel %vm762_vm1, %v2157_v5, %v2139_v4 }
 0x9d1   : > { %v2164_v27 = vperm.slane %v2158_v26, %v3372_v38  ;;  %v2181_v28 = vrot.slane %v2176_v22, 4  ;;  %v2187_v29 = vrot.slane %v2168_v19, 4 }
 0x9d2   : > { %v2186_v30 = vsel %vm762_vm1, %v2185_v23, %v2168_v19 }
 0x9d3   : > { %v2383_v31 = vpack.c.bf16 %v2186_v30, %v2186_v30  ;;  %v2182_v17 = vsel %vm762_vm1, %v2181_v28, %v2164_v27  ;;  %v2188_v18 = vsel %vm762_vm1, %v2180_v7, %v2187_v29  ;;  %v2183_v32 = vrot.slane %v2164_v27, 4 }
 0x9d4   : > { %v2381_v33 = vpack.c.bf16 %v2182_v17, %v2182_v17  ;;  %v2384_v34 = vpack.c.bf16 %v2188_v18, %v2188_v18 }
 0x9d5   : > { %v2427_v35 = vsel %vm1315_vm3, %v2383_v31, 0  ;;  %v2184_v36 = vsel %vm762_vm1, %v2176_v22, %v2183_v32 }
 0x9d6   : > { %2436 = vmatpush.bf16.msrb.mxu3 %v2427_v35  ;;  %v2389_v37 = vsel %vm1315_vm3, %v2381_v33, 0  ;;  %v2446_v39 = vsel %vm1315_vm3, %v2384_v34, 0  ;;  %v2382_v40 = vpack.c.bf16 %v2184_v36, %v2184_v36 }
 0x9d7   : > { %2398 = vmatpush.bf16.msrb.mxu1 %v2389_v37  ;;  %2455 = vmatpush.bf16.msra.mxu0 %v2446_v39 }
 0x9d8   : > { %v2408_v41 = vsel %vm1315_vm3, %v2382_v40, 0 }
 0x9d9   : > { %2417 = vmatpush.bf16.msrb.mxu2 %v2408_v41 }
 0xa23   : > { %v2307_v42 = vpop.xlane.xlu1 %2306 }
 0xa24   : > { %3165 = vrcp.f32 %v2307_v42  ;;  %v2326_v47 = vand.u32 2147483647, %v2307_v42  ;;  %v2328_v52 = vand.u32 2147483648, %v2307_v42  ;;  %vm2322_vm3 = vweird.f32 %v2307_v42 }
 0xa25   : > { %v2313_v43 = vpop.xlane.xlu0 %2312 }
 0xa26   : > { %3167 = vrcp.f32 %v2313_v43  ;;  %vm3837_vm7 = vcmp.eq.f32.partialorder %v2326_v47, 8.507059e+37  ;;  %v2356_v57 = vand.u32 2147483647, %v2313_v43  ;;  %v2358_v58 = vand.u32 2147483648, %v2313_v43 }
 0xa27   : > { %v2310_v44 = vpop.xlane.xlu2 %2309  ;;  %v2329_v62 = vor.u32 1.1754944e-38, %v2328_v52  ;;  %vm2352_vm12 = vweird.f32 %v2313_v43 }
 0xa28   : > { %3169 = vrcp.f32 %v2310_v44  ;;  %v2341_v0 = vand.u32 2147483647, %v2310_v44  ;;  %v2343_v4 = vand.u32 2147483648, %v2310_v44  ;;  %vm2357_vm4 = vcmp.eq.f32.partialorder %v2356_v57, 8.507059e+37 }
 0xa29   : > { %v2359_v13 = vor.u32 1.1754944e-38, %v2358_v58  ;;  %vm2337_vm5 = vweird.f32 %v2310_v44 }
 0xa2a   : > { %v3166_v21 = vpop.eup %3165  ;;  %v2344_v15 = vor.u32 1.1754944e-38, %v2343_v4 }
 0xa2b   : > { %v2318_v45 = vmul.f32 %v3166_v21, %v2307_v42  ;;  %vm2323_vm6 = vweird.f32 %v3166_v21 }
 0xa2c   : > { %v3168_v46 = vpop.eup %3167  ;;  %vm2324_vm11 = vmor %vm2322_vm3, %vm2323_vm6  ;;  %vm2342_vm3 = vcmp.eq.f32.partialorder %v2341_v0, 8.507059e+37 }
 0xa2d   : > { %v2319_v48 = vsub.f32 1.0, %v2318_v45  ;;  %v2348_v49 = vmul.f32 %v3168_v46, %v2313_v43  ;;  %v2316_v50 = vpop.xlane.xlu0 %2315  ;;  %vm2353_vm10 = vweird.f32 %v3168_v46 }
 0xa2e   : > { %v3170_v51 = vpop.eup %3169  ;;  %3171 = vrcp.f32 %v2316_v50  ;;  %vm2354_vm15 = vmor %vm2352_vm12, %vm2353_vm10  ;;  %v2371_v28 = vand.u32 2147483647, %v2316_v50  ;;  %v2373_v29 = vand.u32 2147483648, %v2316_v50  ;;  %vm2367_vm10 = vweird.f32 %v2316_v50 }
 0xa2f   : > { %v2320_v53 = vmul.f32 %v3166_v21, %v2319_v48  ;;  %v2349_v54 = vsub.f32 1.0, %v2348_v49  ;;  %v2333_v55 = vmul.f32 %v3170_v51, %v2310_v44  ;;  %vm2338_vm13 = vweird.f32 %v3170_v51 }
 0xa30   : > { %vm2339_vm6 = vmor %vm2337_vm5, %vm2338_vm13  ;;  %vm2372_vm12 = vcmp.eq.f32.partialorder %v2371_v28, 8.507059e+37  ;;  %vm2816_vm5 = vcmask 257024  }
 0xa31   : > { %v2321_v59 = vadd.f32 %v3166_v21, %v2320_v53  ;;  %v2350_v60 = vmul.f32 %v3168_v46, %v2349_v54  ;;  %v2334_v61 = vsub.f32 1.0, %v2333_v55 }
 0xa33   : > { %v2325_v1 = vsel %vm2324_vm11, %v3166_v21, %v2321_v59  ;;  %v2351_v3 = vadd.f32 %v3168_v46, %v2350_v60  ;;  %v2335_v6 = vmul.f32 %v3170_v51, %v2334_v61 }
 0xa34   : > { %v3172_v8 = vpop.eup %3171  ;;  %v2330_v9 = vsel %vm3837_vm7, %v2329_v62, %v2325_v1 }
 0xa35   : > { %v2331_v10 = vmul.f32 %v3777_v14, %v2330_v9  ;;  %v2355_v11 = vsel %vm2354_vm15, %v3168_v46, %v2351_v3  ;;  %v2336_v12 = vadd.f32 %v3170_v51, %v2335_v6  ;;  %v2363_v7 = vmul.f32 %v3172_v8, %v2316_v50 }
 0xa36   : > { %v2360_v5 = vsel %vm2357_vm4, %v2359_v13, %v2355_v11  ;;  %vm2368_vm7 = vweird.f32 %v3172_v8 }
 0xa37   : > { %v2361_v19 = vmul.f32 %v3781_v16, %v2360_v5  ;;  %v2340_v22 = vsel %vm2339_vm6, %v3170_v51, %v2336_v12  ;;  %v2364_v23 = vsub.f32 1.0, %v2363_v7  ;;  %v2377_v26 = vpack.c.bf16 %v2331_v10, %v2331_v10  ;;  %vm2369_vm11 = vmor %vm2367_vm10, %vm2368_vm7 }
 0xa38   : > { %v2345_v27 = vsel %vm2342_vm3, %v2344_v15, %v2340_v22  ;;  %v2374_v16 = vor.u32 1.1754944e-38, %v2373_v29 }
 0xa39   : > { %v2346_v30 = vmul.f32 %v3785_v20, %v2345_v27  ;;  %v2365_v31 = vmul.f32 %v3172_v8, %v2364_v23  ;;  %3008 = vmatmul.msk.bf16.vlgmr.msrb.gmra.mxu1 %vm1120_vm2, %v2377_v26  ;;  %v2379_v14 = vpack.c.bf16 %v2361_v19, %v2361_v19 }
 0xa3b   : > { %v2366_v17 = vadd.f32 %v3172_v8, %v2365_v31  ;;  %v2378_v18 = vpack.c.bf16 %v2346_v30, %v2346_v30  ;;  %3010 = vmatmul.msk.bf16.vlgmr.msrb.gmra.mxu3 %vm1120_vm2, %v2379_v14 }
 0xa3d   : > { %v2370_v32 = vsel %vm2369_vm11, %v3172_v8, %v2366_v17  ;;  %3009 = vmatmul.msk.bf16.vlgmr.msrb.gmra.mxu2 %vm1120_vm2, %v2378_v18 }
 0xa3e   : > { %v2375_v33 = vsel %vm2372_vm12, %v2374_v16, %v2370_v32 }
 0xa3f   : > { %v2376_v34 = vmul.f32 %v3789_v24, %v2375_v33 }
 0xa41   : > { %v2380_v20 = vpack.c.bf16 %v2376_v34, %v2376_v34 }
 0xa43   : > { %3011 = vmatmul.msk.bf16.vlgmr.msra.gmra.mxu0 %vm1120_vm2, %v2380_v20 }
 0xab6   : > { %v2400_v35 = vpop.f32.mrf.mxu1 }
 0xab7   : > { %v2463_v36 = vrot.slane %v2400_v35, 4 }
 0xabe   : > { %v2402_v37 = vpop.f32.mrf.mxu1  ;;  %v2438_v39 = vpop.f32.mrf.mxu3 }
 0xabf   : > { %v2461_v40 = vrot.slane %v2438_v39, 4  ;;  %v2464_v41 = vsel %vm762_vm1, %v2438_v39, %v2463_v36 }
 0xac0   : > { %v2419_v42 = vpop.f32.mrf.mxu2  ;;  %v2472_v43 = vperm.slane %v2464_v41, %v3363_v25  ;;  %v2457_v44 = vpop.f32.mrf.mxu0 }
 0xac1   : > { %v2475_v21 = vrot.slane %v2419_v42, 4  ;;  %v2462_v45 = vsel %vm762_vm1, %v2461_v40, %v2400_v35  ;;  %v2473_v46 = vrot.slane %v2457_v44, 4 }
 0xac2   : > { %v2468_v24 = vperm.slane %v2462_v45, %v3363_v25  ;;  %v2499_v47 = vrot.slane %v2472_v43, 4 }
 0xac3   : > { %v2474_v48 = vsel %vm762_vm1, %v2473_v46, %v2419_v42  ;;  %v2476_v49 = vsel %vm762_vm1, %v2457_v44, %v2475_v21  ;;  %v3087_v21 = vld [vmem:[%s3980_s8 + $0x10] sm:$0xff] }
 0xac4   : > { %v2487_v50 = vrot.slane %v2468_v24, 4  ;;  %v2480_v51 = vperm.slane %v2474_v48, %v3363_v25  ;;  %v2484_v52 = vperm.slane %v2476_v49, %v3363_v25 }
 0xac6   : > { %v2485_v53 = vrot.slane %v2480_v51, 4  ;;  %v2488_v54 = vsel %vm762_vm1, %v2480_v51, %v2487_v50  ;;  %v2497_v55 = vrot.slane %v2484_v52, 4  ;;  %v2500_v56 = vsel %vm762_vm1, %v2484_v52, %v2499_v47  ;;  %v2440_v57 = vpop.f32.mrf.mxu3  ;;  %v3126_v51 = vld [vmem:[%s3981_s9 + $0x1] ss:$0 sm:$0xff] }
 0xac7   : > { %v2496_v58 = vperm.slane %v2488_v54, %v3372_v38  ;;  %v2508_v59 = vperm.slane %v2500_v56, %v3372_v38 }
 0xac8   : > { %v2486_v60 = vsel %vm762_vm1, %v2485_v53, %v2468_v24  ;;  %v2498_v61 = vsel %vm762_vm1, %v2497_v55, %v2472_v43  ;;  %v2421_v62 = vpop.f32.mrf.mxu2  ;;  %v2459_v0 = vpop.f32.mrf.mxu0 }
 0xac9   : > { %v2492_v4 = vperm.slane %v2486_v60, %v3372_v38  ;;  %v2504_v1 = vperm.slane %v2498_v61, %v3372_v38  ;;  %v2511_v3 = vrot.slane %v2496_v58, 4  ;;  %v2515_v6 = vrot.slane %v2508_v59, 4  ;;  %v3090_v62 = vld [vmem:[%s3984_s12 + $0x18] sm:$0xff] }
 0xaca   : > { %2696 = vmatpush.bf16.msra.mxu2 %v3090_v62  ;;  %v3094_v0 = vld [vmem:[%s3986_s14 + $0x38] sm:$0xff] }
 0xacb   : > { %v2509_v8 = vrot.slane %v2492_v4, 4  ;;  %v2512_v9 = vsel %vm762_vm1, 0.0, %v2511_v3  ;;  %v2513_v13 = vrot.slane %v2504_v1, 4  ;;  %v2516_v10 = vsel %vm762_vm1, 0.0, %v2515_v6  ;;  %2739 = vmatpush.bf16.msra.mxu3 %v3094_v0 }
 0xacc   : > { %v2522_v11 = vrot.slane %v2512_v9, 4  ;;  %v2528_v12 = vsel %vm762_vm1, %v2515_v6, %v2504_v1  ;;  %v2533_v7 = vrot.slane %v2516_v10, 4  ;;  %v2517_v5 = vsel %vm762_vm1, %v2511_v3, %v2492_v4  ;;  %v3093_v3 = vld [vmem:[%s3986_s14 + $0x30] sm:$0xff] }
 0xacd   : > { %v2514_v15 = vsel %vm762_vm1, 0.0, %v2513_v13  ;;  %v2532_v19 = vperm.slane %v2528_v12, %v3363_v25  ;;  %v2510_v22 = vsel %vm762_vm1, 0.0, %v2509_v8  ;;  %v2521_v23 = vperm.slane %v2517_v5, %v3363_v25 }
 0xace   : > { %v2523_v26 = vsel %vm762_vm1, %v2522_v11, %v2510_v22  ;;  %v2534_v27 = vsel %vm762_vm1, %v2533_v7, %v2514_v15  ;;  %v3127_v7 = vld [vmem:[%s3982_s10 + $0x1] ss:$0 sm:$0xff] }
 0xacf   : > { %v2527_v28 = vperm.slane %v2523_v26, %v3363_v25  ;;  %v2538_v29 = vperm.slane %v2534_v27, %v3363_v25  ;;  %v2541_v30 = vrot.slane %v2521_v23, 4  ;;  %v2553_v31 = vrot.slane %v2532_v19, 4  ;;  %2740 = vmatpush.bf16.msra.mxu3 %v3093_v3  ;;  %v3128_v15 = vld [vmem:[%s3983_s11 + $0x1] ss:$0 sm:$0xff]  ;;  %v3092_v27 = vld [vmem:[%s3986_s14 + $0x28] sm:$0xff] }
 0xad1   : > { %v2542_v14 = vsel %vm762_vm1, %v2527_v28, %v2541_v30  ;;  %v2554_v17 = vsel %vm762_vm1, %v2538_v29, %v2553_v31  ;;  %v2539_v18 = vrot.slane %v2527_v28, 4  ;;  %v2551_v16 = vrot.slane %v2538_v29, 4  ;;  %v3091_v28 = vld [vmem:[%s3986_s14 + $0x20] sm:$0xff] }
 0xad2   : > { %v2550_v32 = vperm.slane %v2542_v14, %v3372_v38  ;;  %v2562_v33 = vperm.slane %v2554_v17, %v3372_v38  ;;  %v3129_v29 = vld [vmem:[%s3985_s13 + $0x1] ss:$0 sm:$0xff] }
 0xad3   : > { %v2540_v34 = vsel %vm762_vm1, %v2539_v18, %v2521_v23  ;;  %v2552_v20 = vsel %vm762_vm1, %v2551_v16, %v2532_v19  ;;  %2741 = vmatpush.bf16.msra.mxu3 %v3092_v27  ;;  %v3130_v16 = vld [vmem:[%s3987_s15 + $0x1] ss:$0 sm:$0xff] }
 0xad4   : > { %v2567_v35 = vrot.slane %v2562_v33, 4  ;;  %v2569_v36 = vrot.slane %v2550_v32, 4  ;;  %v2546_v25 = vperm.slane %v2540_v34, %v3372_v38  ;;  %v2558_v37 = vperm.slane %v2552_v20, %v3372_v38  ;;  %v3088_v38 = vld [vmem:[%s3980_s8 + $0x18] sm:$0xff] }
 0xad5   : > { %2611 = vmatpush.bf16.msra.mxu1 %v3088_v38 }
 0xad6   : > { %v2568_v39 = vsel %vm762_vm1, %v2567_v35, %v2550_v32  ;;  %v2570_v40 = vsel %vm762_vm1, %v2562_v33, %v2569_v36  ;;  %v2563_v41 = vrot.slane %v2558_v37, 4  ;;  %v2565_v42 = vrot.slane %v2546_v25, 4 }
 0xad7   : > { %2576 = vrot.lane.b32.xlu0 %v2568_v39, %s4023_s23  ;;  %2580 = vrot.lane.b32.xlu1 %v2570_v40, %s4024_s28 }
 0xad8   : > { %v2566_v43 = vsel %vm762_vm1, %v2558_v37, %v2565_v42  ;;  %v2564_v44 = vsel %vm762_vm1, %v2563_v41, %v2546_v25  ;;  %2742 = vmatpush.bf16.msra.mxu3 %v3091_v28 }
 0xad9   : > { %2572 = vrot.lane.b32.xlu2 %v2566_v43, %s4025_s29  ;;  %2612 = vmatpush.bf16.msra.mxu1 %v3087_v21 }
 0xb33   : > { %v2573_v45 = vpop.permute.xlu2 %2572 }
 0xb34   : > { %v2583_v46 = vsel %vm1120_vm2, %v2564_v44, %v2573_v45 }
 0xb49   : > { %v2577_v24 = vpop.permute.xlu0 %2576  ;;  %v2581_v47 = vpop.permute.xlu1 %2580 }
 0xb4a   : > { %v2584_v48 = vsel %vm1512_vm8, %v2583_v46, %v2577_v24 }
 0xb4b   : > { %v2585_v49 = vsel %vm1514_vm9, %v2584_v48, %v2581_v47  ;;  %v3131_v47 = vld [vmem:[%s3988_s16 + $0x1] ss:$0 sm:$0xff] }
 0xb4c   : > { %v2586_v50 = vpack.c.bf16 %v2585_v49, %v2585_v49 }
 0xb4e   : > { %3020 = vmatmul.msk.bf16.vlgmr.msra.gmra.mxu1 %vm678_vm0, %v2586_v50  ;;  %v3132_v50 = vld [vmem:[%s3989_s17 + $0x1] ss:$0 sm:$0xff] }
 0xbcb   : > { %v2614_v52 = vpop.f32.mrf.mxu1 }
 0xbcc   : > { %v2615_v53 = vadd.f32 %v3126_v51, %v2614_v52 }
 0xbce   : > { %v2618_v54 = vadd.f32 %v2615_v53, %v3656_v2  ;;  %v3089_v2 = vld [vmem:[%s3984_s12 + $0x10] sm:$0xff] }
 0xbcf   : > { %2697 = vmatpush.bf16.msra.mxu2 %v3089_v2 }
 0xbd0   : > { %v2623_v55 = vsel %vm678_vm0, %v2618_v54, 0.0 }
 0xbd1   : > { %2624 = vadd.xlane.f32.xlu2 %v2623_v55 }
 0xbd3   : > { %v2616_v56 = vpop.f32.mrf.mxu1 }
 0xc44   : > { %v2625_v57 = vpop.xlane.xlu2 %2624 }
 0xc45   : > { %v2626_v58 = vmul.f32 %v2625_v57, %v3591_v63 }
 0xc47   : > { %v2627_v59 = vsub.f32 %v2618_v54, %v2626_v58 }
 0xc49   : > { %v2628_v60 = vmul.f32 %v2627_v59, %v2627_v59 }
 0xc4b   : > { %v2629_v61 = vsel %vm678_vm0, %v2628_v60, 0.0 }
 0xc4c   : > { %2630 = vadd.xlane.f32.xlu0 %v2629_v61 }
 0xcbf   : > { %v2631_v4 = vpop.xlane.xlu0 %2630 }
 0xcc0   : > { %v2632_v1 = vmul.f32 %v2631_v4, %v3591_v63 }
 0xcc2   : > { %v2633_v6 = vadd.f32 1e-05, %v2632_v1 }
 0xcc4   : > { %3173 = vrsqrt.f32 %v2633_v6  ;;  %vm2640_vm2 = vweird.f32 %v2633_v6 }
 0xcca   : > { %v3174_v8 = vpop.eup %3173 }
 0xccb   : > { %v2635_v9 = vmul.f32 %v3174_v8, %v2633_v6  ;;  %vm2641_vm1 = vweird.f32 %v3174_v8  ;;  %v3133_v6 = vld [vmem:[%s3990_s18] ss:$0 sm:$0xff] }
 0xccc   : > { %vm2642_vm8 = vmor %vm2640_vm2, %vm2641_vm1 }
 0xccd   : > { %v2636_v13 = vmul.f32 %v3174_v8, %v2635_v9 }
 0xccf   : > { %v2637_v10 = vmul.f32 0.5, %v2636_v13 }
 0xcd1   : > { %v2638_v11 = vsub.f32 1.5, %v2637_v10 }
 0xcd3   : > { %v2639_v12 = vmul.f32 %v3174_v8, %v2638_v11 }
 0xcd5   : > { %v2643_v5 = vsel %vm2642_vm8, %v3174_v8, %v2639_v12 }
 0xcd6   : > { %v2644_v19 = vmul.f32 %v2643_v5, %v2627_v59 }
 0xcd8   : > { %v2648_v22 = vmul.f32 %v3127_v7, %v2644_v19 }
 0xcda   : > { %v2652_v23 = vadd.f32 %v3128_v15, %v2648_v22 }
 0xcdc   : > { %v2671_v26 = vpack.c.bf16 %v2652_v23, %v2652_v23 }
 0xcde   : > { %3045 = vmatmul.msk.bf16.vlgmr.msra.gmra.mxu2 %vm678_vm0, %v2671_v26 }
 0xd61   : > { %v2699_v30 = vpop.f32.mrf.mxu2 }
 0xd62   : > { %v2700_v31 = vadd.f32 %v3129_v29, %v2699_v30 }
 0xd64   : > { %v2703_v14 = vmax.f32 %v2700_v31, 0.0 }
 0xd66   : > { %v2704_v17 = vpack.c.bf16 %v2703_v14, %v2703_v14 }
 0xd68   : > { %3062 = vmatmul.msk.bf16.vlgmr.msra.gmra.mxu3 %vm1663_vm14, %v2704_v17 }
 0xd69   : > { %v2701_v18 = vpop.f32.mrf.mxu2 }
 0xdeb   : > { %v2744_v32 = vpop.f32.mrf.mxu3 }
 0xdec   : > { %v2745_v33 = vadd.f32 %v3130_v16, %v2744_v32 }
 0xdee   : > { %v2748_v34 = vadd.f32 %v2745_v33, %v2652_v23 }
 0xdf0   : > { %v2753_v20 = vsel %vm678_vm0, %v2748_v34, 0.0 }
 0xdf1   : > { %2754 = vadd.xlane.f32.xlu1 %v2753_v20 }
 0xdf3   : > { %v2746_v35 = vpop.f32.mrf.mxu3 }
 0xe64   : > { %v2755_v36 = vpop.xlane.xlu1 %2754 }
 0xe65   : > { %v2756_v25 = vmul.f32 %v2755_v36, %v3591_v63 }
 0xe67   : > { %v2757_v37 = vsub.f32 %v2748_v34, %v2756_v25 }
 0xe69   : > { %v2758_v39 = vmul.f32 %v2757_v37, %v2757_v37 }
 0xe6b   : > { %v2759_v40 = vsel %vm678_vm0, %v2758_v39, 0.0 }
 0xe6c   : > { %2760 = vadd.xlane.f32.xlu2 %v2759_v40 }
 0xedf   : > { %v2761_v41 = vpop.xlane.xlu2 %2760 }
 0xee0   : > { %v2762_v42 = vmul.f32 %v2761_v41, %v3591_v63 }
 0xee2   : > { %v2763_v43 = vadd.f32 1e-05, %v2762_v42 }
 0xee4   : > { %3175 = vrsqrt.f32 %v2763_v43  ;;  %vm2770_vm14 = vweird.f32 %v2763_v43 }
 0xeea   : > { %v3176_v44 = vpop.eup %3175 }
 0xeeb   : > { %v2765_v38 = vmul.f32 %v3176_v44, %v2763_v43  ;;  %vm2771_vm9 = vweird.f32 %v3176_v44 }
 0xeec   : > { %vm2772_vm13 = vmor %vm2770_vm14, %vm2771_vm9 }
 0xeed   : > { %v2766_v21 = vmul.f32 %v3176_v44, %v2765_v38 }
 0xeef   : > { %v2767_v45 = vmul.f32 0.5, %v2766_v21 }
 0xef1   : > { %v2768_v46 = vsub.f32 1.5, %v2767_v45 }
 0xef3   : > { %v2769_v24 = vmul.f32 %v3176_v44, %v2768_v46 }
 0xef5   : > { %v2773_v48 = vsel %vm2772_vm13, %v3176_v44, %v2769_v24 }
 0xef6   : > { %v2774_v49 = vmul.f32 %v2773_v48, %v2757_v37 }
 0xef8   : > { %v2778_v51 = vmul.f32 %v3131_v47, %v2774_v49 }
 0xefa   : > { %v2782_v52 = vadd.f32 %v3132_v50, %v2778_v51 }
 0xefc   : > { %v2785_v53 = vsel %vm678_vm0, %v2782_v52, 0.0 }
 0xefd   : > { %2786 = vadd.xlane.f32.xlu0 %v2785_v53 }
 0xf70   : > { %v2787_v54 = vpop.xlane.xlu0 %2786 }
 0xf71   : > { %v2788_v55 = vmul.f32 %v2787_v54, %v3591_v63 }
 0xf73   : > { %v2789_v56 = vsub.f32 %v2782_v52, %v2788_v55 }
 0xf75   : > { %v2790_v57 = vmul.f32 %v2789_v56, %v2789_v56 }
 0xf77   : > { %v2791_v58 = vsel %vm678_vm0, %v2790_v57, 0.0 }
 0xf78   : > { %2792 = vadd.xlane.f32.xlu2 %v2791_v58 }
 0xfeb   : > { %v2793_v59 = vpop.xlane.xlu2 %2792 }
 0xfec   : > { %v2794_v60 = vmul.f32 %v2793_v59, %v3591_v63  ;;  %v3134_v63 = vld [vmem:[%s3991_s19] ss:$0 sm:$0xff] }
 0xfee   : > { %v2795_v61 = vadd.f32 1e-05, %v2794_v60 }
 0xff0   : > { %3177 = vrsqrt.f32 %v2795_v61  ;;  %vm2802_vm4 = vweird.f32 %v2795_v61 }
 0xff6   : > { %v3178_v62 = vpop.eup %3177 }
 0xff7   : > { %v2797_v2 = vmul.f32 %v3178_v62, %v2795_v61  ;;  %vm2803_vm15 = vweird.f32 %v3178_v62 }
 0xff8   : > { %vm2804_vm0 = vmor %vm2802_vm4, %vm2803_vm15 }
 0xff9   : > { %v2798_v0 = vmul.f32 %v3178_v62, %v2797_v2 }
 0xffb   : > { %v2799_v4 = vmul.f32 0.5, %v2798_v0 }
 0xffd   : > { %v2800_v1 = vsub.f32 1.5, %v2799_v4 }
 0xfff   : > { %v2801_v3 = vmul.f32 %v3178_v62, %v2800_v1 }
0x1001   : > { %v2805_v8 = vsel %vm2804_vm0, %v3178_v62, %v2801_v3 }
0x1002   : > { %v2806_v9 = vmul.f32 %v2805_v8, %v2789_v56 }
0x1004   : > { %v2810_v13 = vmul.f32 %v3133_v6, %v2806_v9 }
0x1006   : > { %v2814_v10 = vadd.f32 %v3134_v63, %v2810_v13 }
0x1008   : > { %v2815_v11 = vpack.c.bf16 %v2814_v10, %v2814_v10 }
0x100a   : > { %2817 = vst.msk [vmem:[%s638_s4] sm:$0xf] %vm2816_vm5, %v2815_v11 }
0x100b PF: > { %s4027_s1 = sld [smem:[#allocation2_spill]] }
0x1011   : > { %s30_s1 = sadd.s32 1, %s4027_s1  }
0x1012   : > { %p27_p4 = scmp.ge.s32.totalorder %s30_s1, 4  }
0x1014   :  { %29 = sbr.rel (!%p27_p4) target bundleno = 6 (0x6), region = 149 }

// kernel: score_transformer_forward.3
= control target key start
LH: loop header
LB: loop body
LE: loop exit
PB: predicated region body
PF: predicated region fallthrough
CT: control target
= control target key end

     0   :  { %s6900_s6 = smov 1   ;;  %s6901_s10 = smov 2   ;;  %s8500_s0 = inlined_call_operand.smem [shape: u32[37], index: -1, kind: input, shape index: {}] }
   0x1   :  { %s6968_s5 = sld [smem:[%s8500_s0]]   ;;  %s6902_s14 = smov 3  }
   0x2   :  { %s6973_s9 = sld [smem:[%s8500_s0 + %s6900_s6]]   ;;  %s6903_s18 = smov 4  }
   0x3   :  { %s6978_s13 = sld [smem:[%s8500_s0 + %s6901_s10]]   ;;  %s6904_s22 = smov 5  }
   0x4   :  { %s6983_s17 = sld [smem:[%s8500_s0 + %s6902_s14]]   ;;  %s6905_s26 = smov 6  }
   0x5   :  { %s6988_s21 = sld [smem:[%s8500_s0 + %s6903_s18]]   ;;  %s6906_s30 = smov 7  }
   0x6   :  { %s6993_s25 = sld [smem:[%s8500_s0 + %s6904_s22]]   ;;  %s6907_s4 = smov 8  }
   0x7   :  { %8557 = sst [smem:[#allocation31_spill]] %s6968_s5  ;;  %s6908_s10 = smov 9  }
   0x8   :  { %8558 = sst [smem:[#allocation32_spill]] %s6973_s9  ;;  %s6909_s15 = smov 10  }
   0x9   :  { %8559 = sst [smem:[#allocation33_spill]] %s6978_s13  ;;  %s6910_s20 = smov 11  }
   0xa   :  { %8560 = sst [smem:[#allocation34_spill]] %s6983_s17  ;;  %s6912_s1 = smov 13  }
   0xb   :  { %8561 = sst [smem:[#allocation35_spill]] %s6988_s21  ;;  %s6913_s7 = smov 14  }
   0xc   :  { %s6998_s29 = sld [smem:[%s8500_s0 + %s6905_s26]]   ;;  %s6911_s26 = smov 12  }
   0xd   :  { %s7003_s3 = sld [smem:[%s8500_s0 + %s6906_s30]]   ;;  %s6915_s22 = smov 16  }
   0xe   :  { %s7008_s8 = sld [smem:[%s8500_s0 + %s6907_s4]]   ;;  %s6916_s28 = smov 17  }
   0xf   :  { %s7013_s14 = sld [smem:[%s8500_s0 + %s6908_s10]]  }
  0x10   :  { %s7018_s19 = sld [smem:[%s8500_s0 + %s6909_s15]]   ;;  %s6914_s15 = smov 15  }
  0x11   :  { %s7023_s24 = sld [smem:[%s8500_s0 + %s6910_s20]]  }
  0x12   :  { %8562 = sst [smem:[#allocation36_spill]] %s6998_s29 }
  0x13   :  { %8563 = sst [smem:[#allocation37_spill]] %s7003_s3 }
  0x14   :  { %8564 = sst [smem:[#allocation38_spill]] %s7008_s8 }
  0x15   :  { %8565 = sst [smem:[#allocation39_spill]] %s7013_s14 }
  0x16   :  { %8566 = sst [smem:[#allocation40_spill]] %s7018_s19 }
  0x17   :  { %8567 = sst [smem:[#allocation41_spill]] %s7023_s24 }
  0x18   :  { %s7028_s30 = sld [smem:[%s8500_s0 + %s6911_s26]]  }
  0x19   :  { %s7033_s6 = sld [smem:[%s8500_s0 + %s6912_s1]]  }
  0x1a   :  { %s7038_s12 = sld [smem:[%s8500_s0 + %s6913_s7]]   ;;  %s6917_s7 = smov 18  }
  0x1b   :  { %s7043_s20 = sld [smem:[%s8500_s0 + %s6914_s15]]   ;;  %s6918_s15 = smov 19  }
  0x1c   :  { %s7048_s27 = sld [smem:[%s8500_s0 + %s6915_s22]]   ;;  %s6919_s22 = smov 20  }
  0x1d   :  { %s7053_s4 = sld [smem:[%s8500_s0 + %s6916_s28]]   ;;  %s6920_s28 = smov 21  }
  0x1e   :  { %8568 = sst [smem:[#allocation42_spill]] %s7028_s30 }
  0x1f   :  { %8569 = sst [smem:[#allocation43_spill]] %s7033_s6 }
  0x20   :  { %8570 = sst [smem:[#allocation44_spill]] %s7038_s12 }
  0x21   :  { %8571 = sst [smem:[#allocation45_spill]] %s7043_s20 }
  0x22   :  { %8572 = sst [smem:[#allocation46_spill]] %s7048_s27 }
  0x23   :  { %8573 = sst [smem:[#allocation47_spill]] %s7053_s4 }
  0x24   :  { %s7058_s12 = sld [smem:[%s8500_s0 + %s6917_s7]]   ;;  %s6921_s7 = smov 22  }
  0x25   :  { %s7063_s6 = sld [smem:[%s8500_s0 + %s6918_s15]]   ;;  %s6922_s15 = smov 23  }
  0x26   :  { %s7068_s27 = sld [smem:[%s8500_s0 + %s6919_s22]]   ;;  %s6923_s22 = smov 24  }
  0x27   :  { %s7073_s20 = sld [smem:[%s8500_s0 + %s6920_s28]]   ;;  %s6924_s28 = smov 25  }
  0x28   :  { %s7078_s9 = sld [smem:[%s8500_s0 + %s6921_s7]]   ;;  %s6925_s7 = smov 26  }
  0x29   :  { %s7088_s4 = sld [smem:[%s8500_s0 + %s6923_s22]]   ;;  %s6927_s22 = smov 28  }
  0x2a   :  { %8574 = sst [smem:[#allocation48_spill]] %s7058_s12 }
  0x2b   :  { %8575 = sst [smem:[#allocation49_spill]] %s7063_s6 }
  0x2c   :  { %8576 = sst [smem:[#allocation50_spill]] %s7068_s27 }
  0x2d   :  { %8577 = sst [smem:[#allocation51_spill]] %s7073_s20 }
  0x2e   :  { %8578 = sst [smem:[#allocation52_spill]] %s7078_s9 }
  0x2f   :  { %s7083_s6 = sld [smem:[%s8500_s0 + %s6922_s15]]   ;;  %s6926_s15 = smov 27  }
  0x30   :  { %8580 = sst [smem:[#allocation54_spill]] %s7088_s4 }
  0x31   :  { %s7093_s20 = sld [smem:[%s8500_s0 + %s6924_s28]]   ;;  %s6928_s28 = smov 29  }
  0x32   :  { %s7098_s30 = sld [smem:[%s8500_s0 + %s6925_s7]]   ;;  %s6929_s7 = smov 30  }
  0x33   :  { %s7103_s24 = sld [smem:[%s8500_s0 + %s6926_s15]]   ;;  %s6930_s15 = smov 31  }
  0x34   :  { %s7108_s19 = sld [smem:[%s8500_s0 + %s6927_s22]]   ;;  %s6931_s22 = smov 32  }
  0x35   :  { %8579 = sst [smem:[#allocation53_spill]] %s7083_s6 }
  0x36   :  { %s7118_s13 = sld [smem:[%s8500_s0 + %s6929_s7]]   ;;  %s6933_s7 = smov 34  }
  0x37   :  { %8581 = sst [smem:[#allocation55_spill]] %s7093_s20 }
  0x38   :  { %s7113_s20 = sld [smem:[%s8500_s0 + %s6928_s28]]   ;;  %s6932_s28 = smov 33  }
  0x39   :  { %8582 = sst [smem:[#allocation56_spill]] %s7103_s24 }
  0x3a   :  { %8583 = sst [smem:[#allocation57_spill]] %s7108_s19 }
  0x3b   :  { %s7123_s24 = sld [smem:[%s8500_s0 + %s6930_s15]]   ;;  %s6934_s15 = smov 35  }
  0x3c   :  { %8585 = sst [smem:[#allocation59_spill]] %s7118_s13 }
  0x3d   :  { %s7128_s14 = sld [smem:[%s8500_s0 + %s6931_s22]]   ;;  %s6935_s22 = smov 36  }
  0x3e   :  { %8584 = sst [smem:[#allocation58_spill]] %s7113_s20 }
  0x3f   :  { %s7133_s8 = sld [smem:[%s8500_s0 + %s6932_s28]]  }
  0x40   :  { %s7138_s29 = sld [smem:[%s8500_s0 + %s6933_s7]]  }
  0x41   :  { %8586 = sst [smem:[#allocation60_spill]] %s7123_s24 }
  0x42   :  { %s7143_s24 = sld [smem:[%s8500_s0 + %s6934_s15]]  }
  0x43   :  { %8587 = sst [smem:[#allocation61_spill]] %s7128_s14 }
  0x44   :  { %s7148_s21 = sld [smem:[%s8500_s0 + %s6935_s22]]  }
  0x45   :  { %8588 = sst [smem:[#allocation62_spill]] %s7133_s8 }
  0x46   :  { %8589 = sst [smem:[#allocation63_spill]] %s7138_s29 }
  0x48   :  { %8590 = sst [smem:[#allocation64_spill]] %s7143_s24 }
  0x4a   :  { %8591 = sst [smem:[#allocation65_spill]] %s7148_s21 }
  0x4b   :  { %79 = vsyncpa [#allocation3], 0 }
  0x4c   :  { %80 = vsyncpa [#allocation6], 0 }
  0x4d   :  { %81 = vsyncpa [#allocation9], 0 }
  0x4e   :  { %82 = vsyncpa [#allocation12], 0 }
  0x4f   :  { %83 = vsyncpa [#allocation15], 0 }
  0x50   :  { %84 = vsyncpa [#allocation18], 0 }
  0x51   :  { %85 = vsyncpa [#allocation4], 0 }
  0x52   :  { %87 = vsyncpa [#allocation4 + $0x1], 0 }
  0x53   :  { %88 = vsyncpa [#allocation22], 0 }
  0x54   :  { %90 = vsyncpa [#allocation22 + $0x1], 0  ;;  %s7150_s28 = smov 0   ;;  %s7152_s1 = smov 0  }
  0x55   :  { %s7154_s2 = smov 0   ;;  %s7156_s7 = smov 0  }
  0x56 LB: > { %s8592_s8 = sld [smem:[#allocation62_spill]]  ;;  %s7171_s0 = sadd.s32 4294967295, %s6898_s7   ;;  %s6886_s28 = sphi %s7150_s28, %s8655_s28   ;;  %s6898_s7 = sphi %s7156_s7, %s8652_s7   ;;  %s6894_s2 = sphi %s7154_s2, %s8654_s2   ;;  %s6890_s1 = sphi %s7152_s1, %s8656_s1  }
  0x57   : > { %s8593_s3 = sld [smem:[#allocation37_spill]]  ;;  %s5751_s10 = sadd.s32 4294967294, %s6898_s7  }
  0x58   : > { %s8594_s29 = sld [smem:[#allocation63_spill]]  ;;  %s7175_s11 = sadd.s32 1, %s6898_s7  }
  0x59   : > { %s8595_s20 = sld [smem:[#allocation58_spill]]  ;;  %s858_s15 = sadd.s32 1, %s6894_s2 }
  0x5a   : > { %s8596_s19 = sld [smem:[#allocation57_spill]]  ;;  %s855_s16 = ssub.s32 %s6898_s7, %s7175_s11 }
  0x5b   : > { %s8597_s17 = sld [smem:[#allocation34_spill]]  ;;  %p868_p0 = scmp.ne.s32.totalorder %s6894_s2, %s6890_s1 }
  0x5c   : > { %s8598_s14 = sld [smem:[#allocation61_spill]]  ;;  %p856_p1 = scmp.eq.s32.totalorder %s855_s16, 0 }
  0x5d   : > { %s8599_s13 = sld [smem:[#allocation59_spill]]  ;;  %p869_p2 = scmp.eq.s32.totalorder %s7171_s0, 1 }
  0x5e   : > { %s8600_s12 = sld [smem:[#allocation48_spill]]  ;;  %p874_p3 = scmp.ne.s32.totalorder %s6890_s1, %s6886_s28 }
  0x5f   : > { %s8601_s9 = sld [smem:[#allocation52_spill]]  ;;  %p875_p4 = scmp.eq.s32.totalorder %s5751_s10, 1 }
  0x60   : > { %s8602_s6 = sld [smem:[#allocation53_spill]]  ;;  %p7188_p5 = por %p869_p2, %p868_p0 }
  0x61   : > { %s8603_s4 = sld [smem:[#allocation54_spill]]  ;;  %p7192_p6 = por %p875_p4, %p874_p3 }
  0x62   : > { %s8604_s27 = sld [smem:[#allocation50_spill]]  ;;  %p5752_p7 = scmp.ge.s32.totalorder %s6898_s7, 1 }
  0x63   : > { %8605 = sst [smem:[#allocation66_spill]] %s6886_s28  ;;  %p908_p8 = scmp.lt.s32.totalorder %s6898_s7, 3 }
  0x64   : > { %8606 = sst [smem:[#allocation67_spill]] %s6894_s2  ;;  %p6213_p9 = scmp.eq.s32.totalorder %s7171_s0, 0 }
  0x65   : > { %8607 = sst [smem:[#allocation68_spill]] %s6898_s7  ;;  %p7199_p10 = pnand %p5752_p7, %p908_p8 }
  0x66   : > { %8608 = sst [smem:[#allocation69_spill]] %s7175_s11  ;;  %s1009_s10 = sshll.u32 %s8602_s6, 4  ;;  %s7213_s10 = int_to_ptr.hbm [resolvable:$true] %s1009_s10 }
  0x67   : > { %s7186_s18 = scalar_select %p856_p1, %s6894_s2, %s858_s15  }
  0x68   : > { %s8610_s22 = scalar_select %p7188_p5, 1, 0 }
  0x69   : > { %8609 = sst [smem:[#allocation70_spill]] %s7186_s18  ;;  %s978_s16 = sshll.u32 %s8604_s27, 4  ;;  %s979_s16 = int_to_ptr.hbm [resolvable:$true] %s978_s16 }
  0x6a   : > { %8611 = sst [smem:[#allocation71_spill]] %s8610_s22  ;;  %p6172_p11 = pneg %p7199_p10 }
  0x6b   : > { %s8612_s23 = scalar_select %p7192_p6, 1, 0 }
  0x6c   : > { %p7209_p12 = pnand %p6213_p9, %p6172_p11  ;;  %s6936_s18 = smov [#allocation5]  }
  0x6d   : > { %8613 = sst [smem:[#allocation72_spill]] %s8612_s23  ;;  %s980_s2 = sshll.u32 %s6936_s18, 4  ;;  %s981_s2 = int_to_ptr.vmem [resolvable:$true] %s980_s2 }
  0x6e   : > { %s6450_s11 = sshra.s32 %s979_s16, 4  ;;  %p7217_p0 = pneg %p7209_p12  ;;  %s6451_s11 = int_to_ptr.hbm [resolvable:$true] %s6450_s11 }
  0x6f   : > { %s6452_s23 = scalar_lea.hbm %s6451_s11, 2  ;;  %s6457_s7 = scalar_lea.hbm %s8604_s27, 2 }
  0x70   : > { %p6453_p13 = scmp.ne.s32.totalorder %s6451_s11, %s6452_s23  ;;  %p6458_p3 = scmp.lt.s32.totalorder %s6451_s11, %s8604_s27 }
  0x71   : > { %p6459_p4 = scmp.lt.s32.totalorder %s6457_s7, %s6452_s23 }
  0x72   : > { %p6455_p1 = pnand %p7217_p0, %p6453_p13 }
  0x73   : > { %p6460_p7 = por %p6459_p4, %p6458_p3 }
  0x74   : > { %p6456_p2 = pneg %p6455_p1 }
  0x76   : > { %p6461_p8 = pnand %p6460_p7, %p6456_p2 }
  0x78   : > { %6464 = shalt.err (!%p6461_p8)
}
  0x79   : > { %s6937_s18 = smov 16   ;;  %s6938_s24 = smov 1  }
  0x7a   : > { %6178 = dma.hbm_to_vmem [thread:$0]  (!%p7209_p12), %s979_s16, 32, %s981_s2, [#allocation6], %s6937_s18, %s6937_s18, %s6938_s24  }
  0x7b   : > { %s6939_s22 = smov [#allocation8]   ;;  %s1040_s11 = sshll.u32 %s7098_s30, 4  ;;  %s7231_s11 = int_to_ptr.hbm [resolvable:$true] %s1040_s11 }
  0x7c   : > { %s1011_s21 = sshll.u32 %s6939_s22, 4  ;;  %s6480_s7 = sshra.s32 %s7213_s10, 4  ;;  %s1012_s21 = int_to_ptr.vmem [resolvable:$true] %s1011_s21  ;;  %s6481_s7 = int_to_ptr.hbm [resolvable:$true] %s6480_s7 }
  0x7d   : > { %s6482_s23 = scalar_lea.hbm %s6481_s7, 2  ;;  %s6487_s27 = scalar_lea.hbm %s8602_s6, 2 }
  0x7e   : > { %p6483_p11 = scmp.ne.s32.totalorder %s6481_s7, %s6482_s23  ;;  %p6488_p2 = scmp.lt.s32.totalorder %s6481_s7, %s8602_s6 }
  0x7f   : > { %p6489_p3 = scmp.lt.s32.totalorder %s6487_s27, %s6482_s23 }
  0x80   : > { %p6485_p13 = pnand %p6483_p11, %p7217_p0 }
  0x81   : > { %p6490_p4 = por %p6489_p3, %p6488_p2 }
  0x82   : > { %p6486_p1 = pneg %p6485_p13 }
  0x84   : > { %p6491_p7 = pnand %p6490_p4, %p6486_p1 }
  0x86   : > { %6494 = shalt.err (!%p6491_p7)
}
  0x87   : > { %6184 = dma.hbm_to_vmem [thread:$0]  (!%p7209_p12), %s7213_s10, 32, %s1012_s21, [#allocation9], %s6937_s18, %s6937_s18, %s6938_s24  }
  0x88   : > { %s1071_s2 = sshll.u32 %s8595_s20, 4  ;;  %s6940_s22 = smov [#allocation11]   ;;  %s7245_s2 = int_to_ptr.hbm [resolvable:$true] %s1071_s2 }
  0x89   : > { %s1042_s16 = sshll.u32 %s6940_s22, 4  ;;  %s6510_s27 = sshra.s32 %s7231_s11, 4  ;;  %s1043_s16 = int_to_ptr.vmem [resolvable:$true] %s1042_s16  ;;  %s6511_s27 = int_to_ptr.hbm [resolvable:$true] %s6510_s27 }
  0x8a   : > { %s6512_s7 = scalar_lea.hbm %s6511_s27, 2  ;;  %s6517_s23 = scalar_lea.hbm %s7098_s30, 2 }
  0x8b   : > { %p6513_p8 = scmp.ne.s32.totalorder %s6511_s27, %s6512_s7  ;;  %p6518_p1 = scmp.lt.s32.totalorder %s6511_s27, %s7098_s30 }
  0x8c   : > { %p6519_p2 = scmp.lt.s32.totalorder %s6517_s23, %s6512_s7 }
  0x8d   : > { %p6515_p11 = pnand %p6513_p8, %p7217_p0 }
  0x8e   : > { %p6520_p3 = por %p6519_p2, %p6518_p1 }
  0x8f   : > { %p6516_p13 = pneg %p6515_p11 }
  0x91   : > { %p6521_p4 = pnand %p6520_p3, %p6516_p13 }
  0x93   : > { %6524 = shalt.err (!%p6521_p4)
}
  0x94   : > { %6190 = dma.hbm_to_vmem [thread:$0]  (!%p7209_p12), %s7231_s11, 32, %s1043_s16, [#allocation12], %s6937_s18, %s6937_s18, %s6938_s24  }
  0x95   : > { %s6941_s21 = smov [#allocation14]   ;;  %s1103_s22 = sshll.u32 %s8598_s14, 4  ;;  %s7259_s22 = int_to_ptr.hbm [resolvable:$true] %s1103_s22 }
  0x96   : > { %s1073_s10 = sshll.u32 %s6941_s21, 4  ;;  %s6540_s27 = sshra.s32 %s7245_s2, 4  ;;  %s1074_s10 = int_to_ptr.vmem [resolvable:$true] %s1073_s10  ;;  %s6541_s27 = int_to_ptr.hbm [resolvable:$true] %s6540_s27 }
  0x97   : > { %s6542_s7 = scalar_lea.hbm %s6541_s27, 2  ;;  %s6547_s23 = scalar_lea.hbm %s8595_s20, 2 }
  0x98   : > { %p6543_p7 = scmp.ne.s32.totalorder %s6541_s27, %s6542_s7  ;;  %p6548_p13 = scmp.lt.s32.totalorder %s6541_s27, %s8595_s20 }
  0x99   : > { %p6549_p1 = scmp.lt.s32.totalorder %s6547_s23, %s6542_s7 }
  0x9a   : > { %p6545_p8 = pnand %p6543_p7, %p7217_p0 }
  0x9b   : > { %p6550_p2 = por %p6549_p1, %p6548_p13 }
  0x9c   : > { %p6546_p11 = pneg %p6545_p8 }
  0x9e   : > { %p6551_p3 = pnand %p6550_p2, %p6546_p11 }
  0xa0   : > { %6554 = shalt.err (!%p6551_p3)
}
  0xa1   : > { %6196 = dma.hbm_to_vmem [thread:$0]  (!%p7209_p12), %s7245_s2, 32, %s1074_s10, [#allocation15], %s6937_s18, %s6937_s18, %s6938_s24  }
  0xa2   : > { %s961_s11 = sshll.u32 %s8600_s12, 4  ;;  %s6942_s16 = smov [#allocation17]   ;;  %s7273_s11 = int_to_ptr.hbm [resolvable:$true] %s961_s11 }
  0xa3   : > { %s1105_s21 = sshll.u32 %s6942_s16, 4  ;;  %s6570_s27 = sshra.s32 %s7259_s22, 4  ;;  %s1106_s21 = int_to_ptr.vmem [resolvable:$true] %s1105_s21  ;;  %s6571_s27 = int_to_ptr.hbm [resolvable:$true] %s6570_s27 }
  0xa4   : > { %s6572_s7 = scalar_lea.hbm %s6571_s27, 1  ;;  %s6577_s23 = scalar_lea.hbm %s8598_s14, 1 }
  0xa5   : > { %p6573_p4 = scmp.ne.s32.totalorder %s6571_s27, %s6572_s7  ;;  %p6578_p11 = scmp.lt.s32.totalorder %s6571_s27, %s8598_s14 }
  0xa6   : > { %p6579_p13 = scmp.lt.s32.totalorder %s6577_s23, %s6572_s7 }
  0xa7   : > { %p6575_p7 = pnand %p6573_p4, %p7217_p0 }
  0xa8   : > { %p6580_p1 = por %p6579_p13, %p6578_p11 }
  0xa9   : > { %p6576_p8 = pneg %p6575_p7 }
  0xab   : > { %p6581_p2 = pnand %p6580_p1, %p6576_p8 }
  0xad   : > { %6584 = shalt.err (!%p6581_p2)
}
  0xae   : > { %6202 = dma.hbm_to_vmem [thread:$0]  (!%p7209_p12), %s7259_s22, 16, %s1106_s21, [#allocation18]  }
  0xaf   : > { %s6943_s2 = smov [#allocation2]   ;;  %s995_s16 = sshll.u32 %s8601_s9, 4  ;;  %s7284_s16 = int_to_ptr.hbm [resolvable:$true] %s995_s16 }
  0xb0   : > { %s963_s10 = sshll.u32 %s6943_s2, 4  ;;  %s6600_s27 = sshra.s32 %s7273_s11, 4  ;;  %s964_s10 = int_to_ptr.vmem [resolvable:$true] %s963_s10  ;;  %s6601_s27 = int_to_ptr.hbm [resolvable:$true] %s6600_s27 }
  0xb1   : > { %s6602_s7 = scalar_lea.hbm %s6601_s27, 2  ;;  %s6607_s23 = scalar_lea.hbm %s8600_s12, 2 }
  0xb2   : > { %p6603_p3 = scmp.ne.s32.totalorder %s6601_s27, %s6602_s7  ;;  %p6608_p8 = scmp.lt.s32.totalorder %s6601_s27, %s8600_s12 }
  0xb3   : > { %p6609_p11 = scmp.lt.s32.totalorder %s6607_s23, %s6602_s7 }
  0xb4   : > { %p6605_p4 = pnand %p6603_p3, %p7217_p0 }
  0xb5   : > { %p6610_p13 = por %p6609_p11, %p6608_p8 }
  0xb6   : > { %p6606_p7 = pneg %p6605_p4 }
  0xb8   : > { %p6611_p1 = pnand %p6610_p13, %p6606_p7 }
  0xba   : > { %6614 = shalt.err (!%p6611_p1)
}
  0xbb   : > { %6175 = dma.hbm_to_vmem [thread:$0]  (!%p7209_p12), %s7273_s11, 32, %s964_s10, [#allocation3], %s6937_s18, %s6937_s18, %s6938_s24  }
  0xbc   : > { %s1023_s22 = sshll.u32 %s8603_s4, 4  ;;  %s6944_s21 = smov [#allocation7]   ;;  %s7298_s22 = int_to_ptr.hbm [resolvable:$true] %s1023_s22 }
  0xbd   : > { %s997_s2 = sshll.u32 %s6944_s21, 4  ;;  %s6630_s27 = sshra.s32 %s7284_s16, 4  ;;  %s998_s2 = int_to_ptr.vmem [resolvable:$true] %s997_s2  ;;  %s6631_s27 = int_to_ptr.hbm [resolvable:$true] %s6630_s27 }
  0xbe   : > { %s6632_s7 = scalar_lea.hbm %s6631_s27, 2  ;;  %s6637_s23 = scalar_lea.hbm %s8601_s9, 2 }
  0xbf   : > { %p6633_p2 = scmp.ne.s32.totalorder %s6631_s27, %s6632_s7  ;;  %p6638_p7 = scmp.lt.s32.totalorder %s6631_s27, %s8601_s9 }
  0xc0   : > { %p6639_p8 = scmp.lt.s32.totalorder %s6637_s23, %s6632_s7 }
  0xc1   : > { %p6635_p3 = pnand %p6633_p2, %p7217_p0 }
  0xc2   : > { %p6640_p11 = por %p6639_p8, %p6638_p7 }
  0xc3   : > { %p6636_p4 = pneg %p6635_p3 }
  0xc5   : > { %p6641_p13 = pnand %p6640_p11, %p6636_p4 }
  0xc7   : > { %6644 = shalt.err (!%p6641_p13)
}
  0xc8   : > { %6181 = dma.hbm_to_vmem [thread:$0]  (!%p7209_p12), %s7284_s16, 32, %s998_s2, [#allocation6], %s6937_s18, %s6937_s18, %s6938_s24  }
  0xc9   : > { %s6945_s11 = smov [#allocation10]   ;;  %s1057_s21 = sshll.u32 %s8596_s19, 4  ;;  %s7312_s21 = int_to_ptr.hbm [resolvable:$true] %s1057_s21 }
  0xca   : > { %s1025_s10 = sshll.u32 %s6945_s11, 4  ;;  %s6660_s27 = sshra.s32 %s7298_s22, 4  ;;  %s1026_s10 = int_to_ptr.vmem [resolvable:$true] %s1025_s10  ;;  %s6661_s27 = int_to_ptr.hbm [resolvable:$true] %s6660_s27 }
  0xcb   : > { %s6662_s7 = scalar_lea.hbm %s6661_s27, 2  ;;  %s6667_s23 = scalar_lea.hbm %s8603_s4, 2 }
  0xcc   : > { %p6663_p1 = scmp.ne.s32.totalorder %s6661_s27, %s6662_s7  ;;  %p6668_p4 = scmp.lt.s32.totalorder %s6661_s27, %s8603_s4 }
  0xcd   : > { %p6669_p7 = scmp.lt.s32.totalorder %s6667_s23, %s6662_s7 }
  0xce   : > { %p6665_p2 = pnand %p6663_p1, %p7217_p0 }
  0xcf   : > { %p6670_p8 = por %p6669_p7, %p6668_p4 }
  0xd0   : > { %p6666_p3 = pneg %p6665_p2 }
  0xd2   : > { %p6671_p11 = pnand %p6670_p8, %p6666_p3 }
  0xd4   : > { %6674 = shalt.err (!%p6671_p11)
}
  0xd5   : > { %6187 = dma.hbm_to_vmem [thread:$0]  (!%p7209_p12), %s7298_s22, 32, %s1026_s10, [#allocation9], %s6937_s18, %s6937_s18, %s6938_s24  }
  0xd6   : > { %s1085_s16 = sshll.u32 %s8599_s13, 4  ;;  %s6946_s2 = smov [#allocation13]   ;;  %s7326_s16 = int_to_ptr.hbm [resolvable:$true] %s1085_s16 }
  0xd7   : > { %s1059_s11 = sshll.u32 %s6946_s2, 4  ;;  %s6690_s27 = sshra.s32 %s7312_s21, 4  ;;  %s1060_s11 = int_to_ptr.vmem [resolvable:$true] %s1059_s11  ;;  %s6691_s27 = int_to_ptr.hbm [resolvable:$true] %s6690_s27 }
  0xd8   : > { %s6692_s7 = scalar_lea.hbm %s6691_s27, 2  ;;  %s6697_s23 = scalar_lea.hbm %s8596_s19, 2 }
  0xd9   : > { %p6693_p13 = scmp.ne.s32.totalorder %s6691_s27, %s6692_s7  ;;  %p6698_p3 = scmp.lt.s32.totalorder %s6691_s27, %s8596_s19 }
  0xda   : > { %p6699_p4 = scmp.lt.s32.totalorder %s6697_s23, %s6692_s7 }
  0xdb   : > { %p6695_p1 = pnand %p6693_p13, %p7217_p0 }
  0xdc   : > { %p6700_p7 = por %p6699_p4, %p6698_p3 }
  0xdd   : > { %p6696_p2 = pneg %p6695_p1 }
  0xdf   : > { %p6701_p8 = pnand %p6700_p7, %p6696_p2 }
  0xe1   : > { %6704 = shalt.err (!%p6701_p8)
}
  0xe2   : > { %6193 = dma.hbm_to_vmem [thread:$0]  (!%p7209_p12), %s7312_s21, 32, %s1060_s11, [#allocation12], %s6937_s18, %s6937_s18, %s6938_s24  }
  0xe3   : > { %s6947_s22 = smov [#allocation16]   ;;  %s1118_s2 = sshll.u32 %s8594_s29, 4  ;;  %s1119_s2 = int_to_ptr.hbm [resolvable:$true] %s1118_s2 }
  0xe4   : > { %s1087_s10 = sshll.u32 %s6947_s22, 4  ;;  %s6720_s27 = sshra.s32 %s7326_s16, 4  ;;  %s1088_s10 = int_to_ptr.vmem [resolvable:$true] %s1087_s10  ;;  %s6721_s27 = int_to_ptr.hbm [resolvable:$true] %s6720_s27 }
  0xe5   : > { %s6722_s7 = scalar_lea.hbm %s6721_s27, 2  ;;  %s6727_s23 = scalar_lea.hbm %s8599_s13, 2 }
  0xe6   : > { %p6723_p11 = scmp.ne.s32.totalorder %s6721_s27, %s6722_s7  ;;  %p6728_p2 = scmp.lt.s32.totalorder %s6721_s27, %s8599_s13 }
  0xe7   : > { %p6729_p3 = scmp.lt.s32.totalorder %s6727_s23, %s6722_s7 }
  0xe8   : > { %p6725_p13 = pnand %p6723_p11, %p7217_p0 }
  0xe9   : > { %p6730_p4 = por %p6729_p3, %p6728_p2 }
  0xea   : > { %p6726_p1 = pneg %p6725_p13 }
  0xec   : > { %p6731_p7 = pnand %p6730_p4, %p6726_p1 }
  0xee   : > { %6734 = shalt.err (!%p6731_p7)
}
  0xef   : > { %6199 = dma.hbm_to_vmem [thread:$0]  (!%p7209_p12), %s7326_s16, 32, %s1088_s10, [#allocation15], %s6937_s18, %s6937_s18, %s6938_s24  }
  0xf0   : > { %s6948_s21 = smov [#allocation19]   ;;  %s6750_s22 = sshra.s32 %s1119_s2, 4  ;;  %s6751_s22 = int_to_ptr.hbm [resolvable:$true] %s6750_s22 }
  0xf1   : > { %s1120_s11 = sshll.u32 %s6948_s21, 4  ;;  %s6752_s27 = scalar_lea.hbm %s6751_s22, 1  ;;  %s1121_s11 = int_to_ptr.vmem [resolvable:$true] %s1120_s11 }
  0xf2   : > { %p6753_p8 = scmp.ne.s32.totalorder %s6751_s22, %s6752_s27  ;;  %s6757_s7 = scalar_lea.hbm %s8594_s29, 1 }
  0xf3   : > { %p6758_p1 = scmp.lt.s32.totalorder %s6751_s22, %s8594_s29  ;;  %p6759_p2 = scmp.lt.s32.totalorder %s6757_s7, %s6752_s27 }
  0xf4   : > { %p6755_p11 = pnand %p6753_p8, %p7217_p0 }
  0xf5   : > { %p6760_p3 = por %p6759_p2, %p6758_p1 }
  0xf6   : > { %p6756_p13 = pneg %p6755_p11 }
  0xf8   : > { %p6761_p4 = pnand %p6760_p3, %p6756_p13 }
  0xfa   : > { %6764 = shalt.err (!%p6761_p4)
}
  0xfb   : > { %6205 = dma.hbm_to_vmem [thread:$0]  (!%p7209_p12), %s1119_s2, 16, %s1121_s11, [#allocation18]  }
  0xfc   : > { %1159 = sbr.rel (%p7199_p10) target bundleno = 7217 (0x1c31), region = 160 }
 0x101   : > { %6853 = dma.done.wait (%p6213_p9), [#allocation3], 32  }
 0x102   : > { %6855 = vsyncadd (%p6213_p9), [#allocation3], 4294967264 }
 0x103   : > { %6857 = dma.done.wait (%p6213_p9), [#allocation6], 64  }
 0x104   : > { %6859 = vsyncadd (%p6213_p9), [#allocation6], 4294967232 }
 0x105   : > { %6861 = dma.done.wait (%p6213_p9), [#allocation9], 64  }
 0x106   : > { %6863 = vsyncadd (%p6213_p9), [#allocation9], 4294967232 }
 0x107   : > { %6865 = dma.done.wait (%p6213_p9), [#allocation12], 64  }
 0x108   : > { %6867 = vsyncadd (%p6213_p9), [#allocation12], 4294967232 }
 0x109   : > { %6869 = dma.done.wait (%p6213_p9), [#allocation15], 64  }
 0x10a   : > { %6871 = vsyncadd (%p6213_p9), [#allocation15], 4294967232 }
 0x10b   : > { %6873 = dma.done.wait (%p6213_p9), [#allocation18], 32  }
 0x10c   : > { %6875 = vsyncadd (%p6213_p9), [#allocation18], 4294967264  ;;  %s8617_s5 = sld [smem:[#allocation31_spill]]  ;;  %p1314_p10 = scmp.lt.s32.totalorder %s7171_s0, 1  ;;  %v6078_v0 = vld [vmem:[%s6993_s25 + $0x8] sm:$0xff]  ;;  %v6077_v2 = vld [vmem:[%s6993_s25] sm:$0xff] }
 0x10d   : > { %s8618_s24 = sld [smem:[#allocation35_spill]]  ;;  %v6080_v1 = vld [vmem:[%s8593_s3 + $0x8] sm:$0xff]  ;;  %1384 = vmatpush.bf16.msra.mxu0 %v6078_v0  ;;  %v6079_v3 = vld [vmem:[%s8593_s3] sm:$0xff]  ;;  %vm1374_vm0 = vcmask 261120   ;;  %s8527_s21 = smov 104   ;;  %vm1458_vm1 = vcmask 1047556  }
 0x10e   : > { %s7385_s28 = scalar_select %p1314_p10, %s7171_s0, 1  ;;  %1412 = vmatpush.bf16.msra.mxu1 %v6080_v1  ;;  %v6952_v16 = vmov 1983009808   ;;  %v6953_v29 = vmov 1934713408   ;;  %vm1816_vm2 = vcmask 64512  }
 0x10f   : > { %s8619_s15 = sld [smem:[#allocation36_spill]]  ;;  %s8537_s11 = smov 120   ;;  %v1463_v17 = vunpack.c.l.s4 %v6952_v16  ;;  %v1487_v30 = vunpack.c.l.s4 %v6953_v29  ;;  %vm2008_vm3 = vcmask 1043456  }
 0x110   : > { %s5779_s26 = sshll.u32 %s7385_s28, 2  ;;  %s8620_s18 = sld [smem:[#allocation38_spill]] }
 0x111   : > { %s1324_s16 = scalar_lea.vmem %s8597_s17, %s7385_s28  ;;  %1385 = vmatpush.bf16.msra.mxu0 %v6077_v2  ;;  %s8621_s23 = sld [smem:[#allocation39_spill]]  ;;  %v7418_v25 = vunpack.c.0.s8 %v1463_v17  ;;  %v7427_v38 = vunpack.c.0.s8 %v1487_v30 }
 0x112   : > { %s7396_s10 = scalar_lea.vmem %s8617_s5, %s5779_s26  ;;  %1413 = vmatpush.bf16.msra.mxu1 %v6079_v3  ;;  %s8529_s22 = smov 112  }
 0x113   : > { %s7400_s2 = scalar_lea.vmem %s8618_s24, %s7385_s28  ;;  %v1329_v4 = vld [vmem:[%s7396_s10] sm:$0xf]  ;;  %s8622_s27 = sld [smem:[#allocation33_spill]] }
 0x114   : > { %5789 = vmatmul.msk.bf16.vlgmr.msra.gmra.mxu0 %vm1374_vm0, %v1329_v4  ;;  %s8623_s7 = sld [smem:[#allocation40_spill]]  ;;  %s8634_s4 = smov 112  }
 0x115   : > { %5798 = vmatmul.msk.bf16.vlgmr.msra.gmra.mxu1 %vm1374_vm0, %v1329_v4  ;;  %v6330_v5 = vld [vmem:[%s8619_s15] ss:$0 sm:$0xff]  ;;  %s8630_s28 = sld [smem:[#allocation43_spill]]  ;;  %s8635_s5 = smov 104  }
 0x116   : > { %v6331_v6 = vld [vmem:[%s8620_s18] ss:$0 sm:$0xff]  ;;  %s8638_s9 = sld [smem:[#allocation46_spill]]  ;;  %s8640_s14 = smov 16  }
 0x117   : > { %v6082_v13 = vld [vmem:[%s8621_s23 + $0x8] sm:$0xff]  ;;  %v6081_v14 = vld [vmem:[%s8621_s23] sm:$0xff]  ;;  %s8641_s17 = smov 8   ;;  %s8642_s19 = smov 24  }
 0x118   : > { %1440 = vmatpush.bf16.msra.mxu2 %v6082_v13  ;;  %s8643_s20 = sld [smem:[#allocation55_spill]] }
 0x119   : > { %s8644_s29 = sld [smem:[#allocation56_spill]] }
 0x11a   : > { %s8624_s24 = smov %s8623_s7 }
 0x11c   : > { %1441 = vmatpush.bf16.msra.mxu2 %v6081_v14 }
 0x11f   : > { %5807 = vmatmul.msk.bf16.vlgmr.msra.gmra.mxu2 %vm1374_vm0, %v1329_v4 }
 0x191   : > { %v1387_v7 = vpop.f32.mrf.mxu0 }
 0x192   : > { %v1415_v8 = vpop.f32.mrf.mxu1  ;;  %v1388_v9 = vadd.f32 %v6330_v5, %v1387_v7 }
 0x193   : > { %v1416_v10 = vadd.f32 %v6331_v6, %v1415_v8 }
 0x194   : > { %1451 = vrot.lane.b32.xlu2 %v1388_v9, %s8529_s22  ;;  %v1460_v23 = vrot.slane %v1388_v9, 4 }
 0x195   : > { %1575 = vrot.lane.b32.xlu1 %v1416_v10, %s8527_s21  ;;  %1569 = vrot.lane.b32.xlu0 %v1416_v10, %s8537_s11  ;;  %v1580_v36 = vrot.slane %v1416_v10, 4 }
 0x199   : > { %v1389_v12 = vpop.f32.mrf.mxu0 }
 0x19a   : > { %v1417_v11 = vpop.f32.mrf.mxu1 }
 0x19c   : > { %1454 = vrot.lane.b32.xlu2 %v1388_v9, %s8527_s21 }
 0x19d   : > { %1572 = vrot.lane.b32.xlu0 %v1416_v10, %s8529_s22  ;;  %1448 = vrot.lane.b32.xlu1 %v1388_v9, %s8537_s11 }
 0x1ee   : > { %v1452_v15 = vpop.permute.xlu2 %1451 }
 0x1ef   : > { %v1457_v18 = vrot.slane %v1452_v15, 4  ;;  %v1461_v31 = vsel %vm1458_vm1, %v1452_v15, %v1460_v23 }
 0x1f0   : > { %v1469_v37 = vperm.slane %v1461_v31, %v7418_v25 }
 0x1f1   : > { %v1459_v26 = vsel %vm1458_vm1, %v1457_v18, %v1388_v9 }
 0x1f2   : > { %v1465_v33 = vperm.slane %v1459_v26, %v7418_v25  ;;  %v1496_v56 = vrot.slane %v1469_v37, 4 }
 0x1f4   : > { %v1484_v48 = vrot.slane %v1465_v33, 4 }
 0x1f6   : > { %v1455_v27 = vpop.permute.xlu2 %1454 }
 0x1f7   : > { %v1470_v34 = vrot.slane %v1455_v27, 4 }
 0x207   : > { %v1576_v19 = vpop.permute.xlu1 %1575  ;;  %v1570_v20 = vpop.permute.xlu0 %1569 }
 0x208   : > { %v1590_v21 = vrot.slane %v1576_v19, 4  ;;  %v1592_v22 = vrot.slane %v1570_v20, 4 }
 0x20a   : > { %v1593_v24 = vsel %vm1458_vm1, %v1576_v19, %v1592_v22  ;;  %v1591_v28 = vsel %vm1458_vm1, %v1590_v21, %v1570_v20 }
 0x20b   : > { %v1601_v32 = vperm.slane %v1593_v24, %v7418_v25  ;;  %v1597_v35 = vperm.slane %v1591_v28, %v7418_v25 }
 0x20d   : > { %v1614_v45 = vrot.slane %v1601_v32, 4  ;;  %v1602_v49 = vrot.slane %v1597_v35, 4 }
 0x20f   : > { %v1573_v39 = vpop.permute.xlu0 %1572  ;;  %v1449_v40 = vpop.permute.xlu1 %1448 }
 0x210   : > { %v1578_v41 = vrot.slane %v1573_v39, 4  ;;  %v1581_v42 = vsel %vm1458_vm1, %v1573_v39, %v1580_v36  ;;  %v1471_v43 = vsel %vm1458_vm1, %v1470_v34, %v1449_v40  ;;  %v1472_v44 = vrot.slane %v1449_v40, 4 }
 0x211   : > { %v1589_v46 = vperm.slane %v1581_v42, %v7418_v25  ;;  %v1477_v47 = vperm.slane %v1471_v43, %v7418_v25 }
 0x212   : > { %v1579_v50 = vsel %vm1458_vm1, %v1578_v41, %v1416_v10  ;;  %v1473_v51 = vsel %vm1458_vm1, %v1455_v27, %v1472_v44 }
 0x213   : > { %v1585_v52 = vperm.slane %v1579_v50, %v7418_v25  ;;  %v1615_v53 = vsel %vm1458_vm1, %v1614_v45, %v1589_v46  ;;  %v1616_v54 = vrot.slane %v1589_v46, 4  ;;  %v1481_v55 = vperm.slane %v1473_v51, %v7418_v25 }
 0x214   : > { %v1621_v57 = vperm.slane %v1615_v53, %v7427_v38  ;;  %v1482_v58 = vrot.slane %v1477_v47, 4  ;;  %v1485_v59 = vsel %vm1458_vm1, %v1477_v47, %v1484_v48 }
 0x215   : > { %v1603_v60 = vsel %vm1458_vm1, %v1602_v49, %v1585_v52  ;;  %v1604_v61 = vrot.slane %v1585_v52, 4  ;;  %v1617_v62 = vsel %vm1458_vm1, %v1601_v32, %v1616_v54  ;;  %v1493_v63 = vperm.slane %v1485_v59, %v7427_v38 }
 0x216   : > { %v1609_v0 = vperm.slane %v1603_v60, %v7427_v38  ;;  %v1625_v1 = vperm.slane %v1617_v62, %v7427_v38  ;;  %v1630_v2 = vrot.slane %v1621_v57, 4  ;;  %v1483_v3 = vsel %vm1458_vm1, %v1482_v58, %v1465_v33 }
 0x217   : > { %v1605_v4 = vsel %vm1458_vm1, %v1597_v35, %v1604_v61  ;;  %v1489_v5 = vperm.slane %v1483_v3, %v7427_v38  ;;  %v1494_v6 = vrot.slane %v1481_v55, 4  ;;  %v1497_v7 = vsel %vm1458_vm1, %v1481_v55, %v1496_v56 }
 0x218   : > { %v1613_v8 = vperm.slane %v1605_v4, %v7427_v38  ;;  %v1626_v9 = vrot.slane %v1609_v0, 4  ;;  %v1631_v10 = vsel %vm1458_vm1, 0.0, %v1630_v2  ;;  %v1632_v11 = vrot.slane %v1625_v1, 4 }
 0x219   : > { %v1495_v12 = vsel %vm1458_vm1, %v1494_v6, %v1469_v37  ;;  %v1505_v13 = vperm.slane %v1497_v7, %v7427_v38  ;;  %v1506_v14 = vrot.slane %v1489_v5, 4  ;;  %v1508_v15 = vrot.slane %v1493_v63, 4 }
 0x21a   : > { %v1628_v16 = vrot.slane %v1613_v8, 4  ;;  %v1633_v17 = vsel %vm1458_vm1, 0.0, %v1632_v11  ;;  %v1645_v18 = vsel %vm1458_vm1, %v1632_v11, %v1621_v57  ;;  %v1501_v19 = vperm.slane %v1495_v12, %v7427_v38 }
 0x21b   : > { %v1649_v20 = vperm.slane %v1645_v18, %v7418_v25  ;;  %v1650_v21 = vrot.slane %v1633_v17, 4  ;;  %v1507_v22 = vsel %vm1458_vm1, 0.0, %v1506_v14  ;;  %v1509_v23 = vsel %vm1458_vm1, 0.0, %v1508_v15 }
 0x21c   : > { %v1629_v24 = vsel %vm1458_vm1, 0.0, %v1628_v16  ;;  %v1510_v26 = vrot.slane %v1501_v19, 4  ;;  %v1512_v27 = vrot.slane %v1505_v13, 4  ;;  %v1514_v28 = vsel %vm1458_vm1, %v1508_v15, %v1489_v5 }
 0x21d   : > { %v1639_v29 = vrot.slane %v1629_v24, 4  ;;  %v1651_v30 = vsel %vm1458_vm1, %v1650_v21, %v1631_v10  ;;  %v1518_v31 = vperm.slane %v1514_v28, %v7418_v25  ;;  %v1519_v32 = vrot.slane %v1509_v23, 4 }
 0x21e   : > { %v1511_v33 = vsel %vm1458_vm1, 0.0, %v1510_v26  ;;  %v1513_v34 = vsel %vm1458_vm1, 0.0, %v1512_v27  ;;  %v1525_v35 = vsel %vm1458_vm1, %v1512_v27, %v1501_v19  ;;  %v1627_v36 = vsel %vm1458_vm1, 0.0, %v1626_v9 }
 0x21f   : > { %v1520_v37 = vsel %vm1458_vm1, %v1519_v32, %v1507_v22  ;;  %v1529_v39 = vperm.slane %v1525_v35, %v7418_v25  ;;  %v1530_v40 = vrot.slane %v1513_v34, 4  ;;  %v1538_v41 = vrot.slane %v1518_v31, 4 }
 0x220   : > { %v1524_v42 = vperm.slane %v1520_v37, %v7418_v25  ;;  %v1634_v43 = vsel %vm1458_vm1, %v1628_v16, %v1609_v0  ;;  %v1640_v44 = vsel %vm1458_vm1, %v1639_v29, %v1627_v36  ;;  %v1655_v45 = vperm.slane %v1651_v30, %v7418_v25 }
 0x221   : > { %v1531_v46 = vsel %vm1458_vm1, %v1530_v40, %v1511_v33  ;;  %v1638_v47 = vperm.slane %v1634_v43, %v7418_v25  ;;  %v1644_v48 = vperm.slane %v1640_v44, %v7418_v25  ;;  %v1670_v49 = vrot.slane %v1649_v20, 4 }
 0x222   : > { %v1668_v50 = vrot.slane %v1655_v45, 4  ;;  %v1535_v51 = vperm.slane %v1531_v46, %v7418_v25  ;;  %v1550_v52 = vrot.slane %v1529_v39, 4  ;;  %v1539_v56 = vsel %vm1458_vm1, %v1524_v42, %v1538_v41  ;;  %v6328_v41 = vld [vmem:[%s1324_s16] ss:$0 sm:$0xff]  ;;  %s8625_s16 = sld [smem:[#allocation41_spill]] }
 0x223   : > { %v1658_v53 = vrot.slane %v1638_v47, 4  ;;  %v1671_v54 = vsel %vm1458_vm1, %v1655_v45, %v1670_v49  ;;  %v1656_v55 = vrot.slane %v1644_v48, 4  ;;  %v1536_v60 = vrot.slane %v1524_v42, 4  ;;  %v1332_v42 = vld [vmem:[%s8622_s27] sm:$0xff]  ;;  %s8531_s27 = smov 24  }
 0x224   : > { %v1679_v57 = vperm.slane %v1671_v54, %v7427_v38  ;;  %v1669_v58 = vsel %vm1458_vm1, %v1668_v50, %v1649_v20  ;;  %v1551_v59 = vsel %vm1458_vm1, %v1535_v51, %v1550_v52  ;;  %v1547_v6 = vperm.slane %v1539_v56, %v7427_v38 }
 0x225   : > { %v1659_v61 = vsel %vm1458_vm1, %v1644_v48, %v1658_v53  ;;  %v1657_v62 = vsel %vm1458_vm1, %v1656_v55, %v1638_v47  ;;  %v1675_v63 = vperm.slane %v1669_v58, %v7427_v38  ;;  %v1559_v0 = vperm.slane %v1551_v59, %v7427_v38 }
 0x226   : > { %v1667_v1 = vperm.slane %v1659_v61, %v7427_v38  ;;  %v1684_v2 = vrot.slane %v1679_v57, 4  ;;  %v1663_v3 = vperm.slane %v1657_v62, %v7427_v38  ;;  %v1537_v4 = vsel %vm1458_vm1, %v1536_v60, %v1518_v31 }
 0x227   : > { %v1680_v5 = vrot.slane %v1675_v63, 4  ;;  %v1548_v7 = vrot.slane %v1535_v51, 4  ;;  %v1543_v11 = vperm.slane %v1537_v4, %v7427_v38  ;;  %v1564_v18 = vrot.slane %v1559_v0, 4 }
 0x228   : > { %v1685_v8 = vsel %vm1458_vm1, %v1684_v2, %v1667_v1  ;;  %v1686_v9 = vrot.slane %v1667_v1, 4  ;;  %v1682_v10 = vrot.slane %v1663_v3, 4  ;;  %v1566_v26 = vrot.slane %v1547_v6, 4 }
 0x229   : > { %v1814_v12 = vpack.c.bf16 %v1685_v8, %v1685_v8  ;;  %v1681_v13 = vsel %vm1458_vm1, %v1680_v5, %v1663_v3  ;;  %v1549_v14 = vsel %vm1458_vm1, %v1548_v7, %v1529_v39  ;;  %v1562_v24 = vrot.slane %v1543_v11, 4  ;;  %v1443_v39 = vpop.f32.mrf.mxu2 }
 0x22a   : > { %v1812_v15 = vpack.c.bf16 %v1681_v13, %v1681_v13  ;;  %v1687_v16 = vsel %vm1458_vm1, %v1679_v57, %v1686_v9  ;;  %v1683_v17 = vsel %vm1458_vm1, %v1675_v63, %v1682_v10  ;;  %v1555_v22 = vperm.slane %v1549_v14, %v7427_v38 }
 0x22b   : > { %v1859_v19 = vsel %vm1816_vm2, %v1814_v12, 0  ;;  %v1815_v20 = vpack.c.bf16 %v1687_v16, %v1687_v16  ;;  %v1813_v21 = vpack.c.bf16 %v1683_v17, %v1683_v17  ;;  %v1565_v30 = vsel %vm1458_vm1, %v1564_v18, %v1547_v6 }
 0x22c   : > { %1868 = vmatpush.bf16.xpose.msrb.mxu1 %v1859_v19  ;;  %v1821_v23 = vsel %vm1816_vm2, %v1812_v15, 0  ;;  %v1560_v29 = vrot.slane %v1555_v22, 4  ;;  %v1567_v32 = vsel %vm1458_vm1, %v1559_v0, %v1566_v26  ;;  %v1563_v33 = vsel %vm1458_vm1, %v1555_v22, %v1562_v24  ;;  %v6332_v0 = vld [vmem:[%s8623_s7] ss:$0 sm:$0xff]  ;;  %s8535_s7 = smov 16  }
 0x22d   : > { %1830 = vmatpush.bf16.xpose.msra.mxu3 %v1821_v23  ;;  %v1878_v27 = vsel %vm1816_vm2, %v1815_v20, 0  ;;  %v1840_v28 = vsel %vm1816_vm2, %v1813_v21, 0  ;;  %v1810_v34 = vpack.c.bf16 %v1565_v30, %v1565_v30  ;;  %v1811_v36 = vpack.c.bf16 %v1567_v32, %v1567_v32 }
 0x22e   : > { %1887 = vmatpush.bf16.xpose.msrb.mxu2 %v1878_v27  ;;  %1849 = vmatpush.bf16.xpose.msrb.mxu0 %v1840_v28  ;;  %v1561_v31 = vsel %vm1458_vm1, %v1560_v29, %v1543_v11  ;;  %v1809_v37 = vpack.c.bf16 %v1563_v33, %v1563_v33  ;;  %v7513_v43 = vadd.f32 %v6328_v41, %v1332_v42 }
 0x22f   : > { %v1808_v35 = vpack.c.bf16 %v1561_v31, %v1561_v31  ;;  %v1444_v1 = vadd.f32 %v6332_v0, %v1443_v39 }
 0x231   : > { %v1445_v40 = vpop.f32.mrf.mxu2  ;;  %v1700_v30 = vrot.slane %v1444_v1, 4 }
 0x233   : > { %5810 = vmatmul.msk.bf16.vlgmr.msrb.gmra.mxu1 %vm1816_vm2, %v1810_v34 }
 0x234   : > { %5808 = vmatmul.msk.bf16.vlgmr.msra.gmra.mxu3 %vm1816_vm2, %v1808_v35 }
 0x235   : > { %5811 = vmatmul.msk.bf16.vlgmr.msrb.gmra.mxu2 %vm1816_vm2, %v1811_v36  ;;  %5809 = vmatmul.msk.bf16.vlgmr.msrb.gmra.mxu0 %vm1816_vm2, %v1809_v37 }
 0x2b0   : > { %v1870_v44 = vpop.f32.mrf.mxu1 }
 0x2b1   : > { %v1895_v45 = vmul.f32 0.35355338, %v1870_v44 }
 0x2b2   : > { %v1851_v46 = vpop.f32.mrf.mxu0 }
 0x2b3   : > { %v1899_v47 = vadd.f32 %v1895_v45, %v7513_v43  ;;  %v1894_v48 = vmul.f32 0.35355338, %v1851_v46 }
 0x2b5   : > { %v1907_v49 = vsel %vm1816_vm2, %v1899_v47, -inf  ;;  %v1898_v55 = vadd.f32 %v1894_v48, %v7513_v43 }
 0x2b6   : > { %1908 = vmax.xlane.f32.xlu2 %v1907_v49 }
 0x2b7   : > { %v1832_v50 = vpop.f32.mrf.mxu3  ;;  %v1904_v61 = vsel %vm1816_vm2, %v1898_v55, -inf }
 0x2b8   : > { %v1893_v51 = vmul.f32 0.35355338, %v1832_v50  ;;  %v1872_v52 = vpop.f32.mrf.mxu1  ;;  %v1889_v53 = vpop.f32.mrf.mxu2 }
 0x2b9   : > { %v1896_v54 = vmul.f32 0.35355338, %v1889_v53 }
 0x2ba   : > { %v1853_v56 = vpop.f32.mrf.mxu0  ;;  %v1897_v57 = vadd.f32 %v1893_v51, %v7513_v43 }
 0x2bb   : > { %v1900_v58 = vadd.f32 %v1896_v54, %v7513_v43 }
 0x2bc   : > { %v1901_v59 = vsel %vm1816_vm2, %v1897_v57, -inf }
 0x2bd   : > { %v1910_v60 = vsel %vm1816_vm2, %v1900_v58, -inf  ;;  %1902 = vmax.xlane.f32.xlu0 %v1901_v59 }
 0x2be   : > { %1911 = vmax.xlane.f32.xlu1 %v1910_v60  ;;  %1905 = vmax.xlane.f32.xlu2 %v1904_v61 }
 0x2bf   : > { %v1834_v62 = vpop.f32.mrf.mxu3 }
 0x2c0   : > { %v1891_v63 = vpop.f32.mrf.mxu2 }
 0x2d1   : > { %1689 = vrot.lane.b32.xlu0 %v1444_v1, %s8537_s11  ;;  %s8629_s11 = sld [smem:[#allocation45_spill]] }
 0x2d6   : > { %1695 = vrot.lane.b32.xlu2 %v1444_v1, %s8527_s21  ;;  %s8533_s21 = smov 8  }
 0x2d7   : > { %1692 = vrot.lane.b32.xlu1 %v1444_v1, %s8529_s22  ;;  %s8626_s22 = sld [smem:[#allocation42_spill]] }
 0x329   : > { %v1909_v2 = vpop.xlane.xlu2 %1908 }
 0x32a   : > { %v1915_v3 = vsub.f32 %v1899_v47, %v1909_v2 }
 0x32c   : > { %v1921_v4 = vmul.f32 1.442695, %v1915_v3 }
 0x32e   : > { %6365 = vpow2.f32 %v1921_v4 }
 0x330   : > { %v1903_v5 = vpop.xlane.xlu0 %1902 }
 0x331   : > { %v1912_v6 = vpop.xlane.xlu1 %1911  ;;  %v1906_v7 = vpop.xlane.xlu2 %1905  ;;  %v1913_v8 = vsub.f32 %v1897_v57, %v1903_v5 }
 0x332   : > { %v1916_v9 = vsub.f32 %v1900_v58, %v1912_v6  ;;  %v1914_v10 = vsub.f32 %v1898_v55, %v1906_v7 }
 0x333   : > { %v1917_v11 = vmul.f32 1.442695, %v1913_v8 }
 0x334   : > { %v7527_v12 = vpop.eup %6365  ;;  %v1923_v13 = vmul.f32 1.442695, %v1916_v9  ;;  %v1919_v15 = vmul.f32 1.442695, %v1914_v10 }
 0x335   : > { %6367 = vpow2.f32 %v1917_v11  ;;  %v1931_v14 = vsel %vm1816_vm2, %v7527_v12, 0.0 }
 0x336   : > { %6369 = vpow2.f32 %v1923_v13  ;;  %1932 = vadd.xlane.f32.xlu2 %v1931_v14 }
 0x337   : > { %6371 = vpow2.f32 %v1919_v15 }
 0x339   : > { %v1696_v21 = vpop.permute.xlu2 %1695 }
 0x33a   : > { %v1710_v23 = vrot.slane %v1696_v21, 4 }
 0x33b   : > { %v7531_v16 = vpop.eup %6367 }
 0x33c   : > { %v7533_v17 = vpop.eup %6369  ;;  %v1925_v18 = vsel %vm1816_vm2, %v7531_v16, 0.0 }
 0x33d   : > { %v1934_v19 = vsel %vm1816_vm2, %v7533_v17, 0.0  ;;  %1926 = vadd.xlane.f32.xlu0 %v1925_v18  ;;  %v7539_v20 = vpop.eup %6371 }
 0x33e   : > { %1935 = vadd.xlane.f32.xlu1 %v1934_v19  ;;  %v1928_v26 = vsel %vm1816_vm2, %v7539_v20, 0.0 }
 0x343   : > { %v1690_v22 = vpop.permute.xlu0 %1689 }
 0x344   : > { %v1712_v24 = vrot.slane %v1690_v22, 4  ;;  %v1711_v27 = vsel %vm1458_vm1, %v1710_v23, %v1690_v22 }
 0x345   : > { %1929 = vadd.xlane.f32.xlu0 %v1928_v26  ;;  %v1717_v31 = vperm.slane %v1711_v27, %v7418_v25 }
 0x346   : > { %v1713_v28 = vsel %vm1458_vm1, %v1696_v21, %v1712_v24 }
 0x347   : > { %v1721_v29 = vperm.slane %v1713_v28, %v7418_v25  ;;  %v1722_v39 = vrot.slane %v1717_v31, 4 }
 0x349   : > { %v1734_v32 = vrot.slane %v1721_v29, 4  ;;  %v1693_v33 = vpop.permute.xlu1 %1692 }
 0x34a   : > { %v1698_v34 = vrot.slane %v1693_v33, 4  ;;  %v1701_v35 = vsel %vm1458_vm1, %v1693_v33, %v1700_v30 }
 0x34b   : > { %v1709_v36 = vperm.slane %v1701_v35, %v7418_v25 }
 0x34c   : > { %v1699_v37 = vsel %vm1458_vm1, %v1698_v34, %v1444_v1 }
 0x34d   : > { %v1705_v40 = vperm.slane %v1699_v37, %v7418_v25  ;;  %v1735_v41 = vsel %vm1458_vm1, %v1734_v32, %v1709_v36  ;;  %v1736_v42 = vrot.slane %v1709_v36, 4 }
 0x34e   : > { %v1741_v44 = vperm.slane %v1735_v41, %v7427_v38 }
 0x34f   : > { %v1723_v45 = vsel %vm1458_vm1, %v1722_v39, %v1705_v40  ;;  %v1724_v46 = vrot.slane %v1705_v40, 4  ;;  %v1737_v47 = vsel %vm1458_vm1, %v1721_v29, %v1736_v42 }
 0x350   : > { %v1729_v48 = vperm.slane %v1723_v45, %v7427_v38  ;;  %v1745_v49 = vperm.slane %v1737_v47, %v7427_v38  ;;  %v1750_v52 = vrot.slane %v1741_v44, 4 }
 0x351   : > { %v1725_v50 = vsel %vm1458_vm1, %v1717_v31, %v1724_v46 }
 0x352   : > { %v1733_v51 = vperm.slane %v1725_v50, %v7427_v38  ;;  %v1752_v53 = vrot.slane %v1745_v49, 4  ;;  %v1746_v54 = vrot.slane %v1729_v48, 4  ;;  %v1751_v61 = vsel %vm1458_vm1, 0.0, %v1750_v52 }
 0x354   : > { %v1748_v55 = vrot.slane %v1733_v51, 4  ;;  %v1753_v56 = vsel %vm1458_vm1, 0.0, %v1752_v53  ;;  %v1765_v57 = vsel %vm1458_vm1, %v1752_v53, %v1741_v44  ;;  %v1747_v3 = vsel %vm1458_vm1, 0.0, %v1746_v54 }
 0x355   : > { %v1769_v58 = vperm.slane %v1765_v57, %v7418_v25  ;;  %v1770_v59 = vrot.slane %v1753_v56, 4 }
 0x356   : > { %v1749_v60 = vsel %vm1458_vm1, 0.0, %v1748_v55  ;;  %v1754_v62 = vsel %vm1458_vm1, %v1748_v55, %v1729_v48 }
 0x357   : > { %v1759_v63 = vrot.slane %v1749_v60, 4  ;;  %v1771_v0 = vsel %vm1458_vm1, %v1770_v59, %v1751_v61  ;;  %v1790_v1 = vrot.slane %v1769_v58, 4  ;;  %v1758_v2 = vperm.slane %v1754_v62, %v7418_v25 }
 0x358   : > { %v1775_v4 = vperm.slane %v1771_v0, %v7418_v25 }
 0x359   : > { %v1760_v5 = vsel %vm1458_vm1, %v1759_v63, %v1747_v3  ;;  %v1778_v6 = vrot.slane %v1758_v2, 4 }
 0x35a   : > { %v1764_v7 = vperm.slane %v1760_v5, %v7418_v25  ;;  %v1791_v8 = vsel %vm1458_vm1, %v1775_v4, %v1790_v1  ;;  %v1788_v9 = vrot.slane %v1775_v4, 4 }
 0x35b   : > { %v1799_v10 = vperm.slane %v1791_v8, %v7427_v38 }
 0x35c   : > { %v1779_v11 = vsel %vm1458_vm1, %v1764_v7, %v1778_v6  ;;  %v1776_v13 = vrot.slane %v1764_v7, 4  ;;  %v1789_v14 = vsel %vm1458_vm1, %v1788_v9, %v1769_v58 }
 0x35d   : > { %v1787_v15 = vperm.slane %v1779_v11, %v7427_v38  ;;  %v1804_v18 = vrot.slane %v1799_v10, 4  ;;  %v1795_v19 = vperm.slane %v1789_v14, %v7427_v38 }
 0x35e   : > { %v1777_v21 = vsel %vm1458_vm1, %v1776_v13, %v1758_v2 }
 0x35f   : > { %v1805_v22 = vsel %vm1458_vm1, %v1804_v18, %v1787_v15  ;;  %v1783_v23 = vperm.slane %v1777_v21, %v7427_v38  ;;  %v1800_v24 = vrot.slane %v1795_v19, 4  ;;  %v1806_v26 = vrot.slane %v1787_v15, 4 }
 0x360   : > { %v2003_v27 = vpack.c.bf16 %v1805_v22, %v1805_v22 }
 0x361   : > { %v1801_v28 = vsel %vm1458_vm1, %v1800_v24, %v1783_v23  ;;  %v1802_v29 = vrot.slane %v1783_v23, 4  ;;  %v1807_v30 = vsel %vm1458_vm1, %v1799_v10, %v1806_v26 }
 0x362   : > { %v2048_v31 = vsel %vm2008_vm3, %v2003_v27, 0  ;;  %v2001_v32 = vpack.c.bf16 %v1801_v28, %v1801_v28  ;;  %v2004_v33 = vpack.c.bf16 %v1807_v30, %v1807_v30 }
 0x363   : > { %2057 = vmatpush.bf16.msra.mxu1 %v2048_v31  ;;  %v1803_v34 = vsel %vm1458_vm1, %v1795_v19, %v1802_v29 }
 0x364   : > { %v2010_v35 = vsel %vm2008_vm3, %v2001_v32, 0  ;;  %v2067_v36 = vsel %vm2008_vm3, %v2004_v33, 0  ;;  %v2002_v37 = vpack.c.bf16 %v1803_v34, %v1803_v34 }
 0x365   : > { %2019 = vmatpush.bf16.msrb.mxu3 %v2010_v35  ;;  %2076 = vmatpush.bf16.msra.mxu2 %v2067_v36 }
 0x366   : > { %v2029_v39 = vsel %vm2008_vm3, %v2002_v37, 0 }
 0x367   : > { %2038 = vmatpush.bf16.msra.mxu0 %v2029_v39 }
 0x3a9   : > { %v1933_v40 = vpop.xlane.xlu2 %1932 }
 0x3aa   : > { %6373 = vrcp.f32 %v1933_v40  ;;  %v1978_v47 = vand.u32 2147483648, %v1933_v40  ;;  %v1976_v49 = vand.u32 2147483647, %v1933_v40  ;;  %vm1972_vm5 = vweird.f32 %v1933_v40 }
 0x3ac   : > { %v1979_v53 = vor.u32 1.1754944e-38, %v1978_v47  ;;  %vm1977_vm7 = vcmp.eq.f32.partialorder %v1976_v49, 8.507059e+37 }
 0x3b0   : > { %v6374_v41 = vpop.eup %6373  ;;  %v1927_v42 = vpop.xlane.xlu0 %1926 }
 0x3b1   : > { %v1968_v44 = vmul.f32 %v6374_v41, %v1933_v40  ;;  %v1936_v45 = vpop.xlane.xlu1 %1935  ;;  %6375 = vrcp.f32 %v1927_v42  ;;  %vm1973_vm4 = vweird.f32 %v6374_v41  ;;  %v1948_v62 = vand.u32 2147483648, %v1927_v42 }
 0x3b2   : > { %6377 = vrcp.f32 %v1936_v45  ;;  %vm1974_vm6 = vmor %vm1972_vm5, %vm1973_vm4  ;;  %v1993_v63 = vand.u32 2147483648, %v1936_v45  ;;  %v1946_v1 = vand.u32 2147483647, %v1927_v42  ;;  %v1991_v3 = vand.u32 2147483647, %v1936_v45 }
 0x3b3   : > { %v1969_v46 = vsub.f32 1.0, %v1968_v44  ;;  %vm1942_vm10 = vweird.f32 %v1927_v42  ;;  %vm1987_vm11 = vweird.f32 %v1936_v45  ;;  %v1949_v8 = vor.u32 1.1754944e-38, %v1948_v62 }
 0x3b4   : > { %vm1947_vm14 = vcmp.eq.f32.partialorder %v1946_v1, 8.507059e+37  ;;  %vm1992_vm15 = vcmp.eq.f32.partialorder %v1991_v3, 8.507059e+37 }
 0x3b5   : > { %v1970_v48 = vmul.f32 %v6374_v41, %v1969_v46 }
 0x3b7   : > { %v6376_v50 = vpop.eup %6375  ;;  %v1971_v51 = vadd.f32 %v6374_v41, %v1970_v48 }
 0x3b8   : > { %v6378_v52 = vpop.eup %6377  ;;  %v1938_v54 = vmul.f32 %v6376_v50, %v1927_v42  ;;  %v1930_v55 = vpop.xlane.xlu0 %1929  ;;  %vm1943_vm8 = vweird.f32 %v6376_v50 }
 0x3b9   : > { %v1975_v56 = vsel %vm1974_vm6, %v6374_v41, %v1971_v51  ;;  %v1983_v57 = vmul.f32 %v6378_v52, %v1936_v45  ;;  %6379 = vrcp.f32 %v1930_v55  ;;  %vm1988_vm9 = vweird.f32 %v6378_v52  ;;  %vm1944_vm12 = vmor %vm1942_vm10, %vm1943_vm8 }
 0x3ba   : > { %v1980_v58 = vsel %vm1977_vm7, %v1979_v53, %v1975_v56  ;;  %v1939_v59 = vsub.f32 1.0, %v1938_v54  ;;  %vm1989_vm13 = vmor %vm1987_vm11, %vm1988_vm9  ;;  %v1963_v21 = vand.u32 2147483648, %v1930_v55  ;;  %v1961_v23 = vand.u32 2147483647, %v1930_v55 }
 0x3bb   : > { %v1981_v60 = vmul.f32 %v7527_v12, %v1980_v58  ;;  %v1984_v61 = vsub.f32 1.0, %v1983_v57  ;;  %v1994_v12 = vor.u32 1.1754944e-38, %v1993_v63  ;;  %vm1957_vm5 = vweird.f32 %v1930_v55 }
 0x3bc   : > { %v1940_v0 = vmul.f32 %v6376_v50, %v1939_v59  ;;  %v1964_v28 = vor.u32 1.1754944e-38, %v1963_v21  ;;  %vm1962_vm7 = vcmp.eq.f32.partialorder %v1961_v23, 8.507059e+37  ;;  %vm2205_vm8 = vcmask 130048  }
 0x3bd   : > { %v1985_v2 = vmul.f32 %v6378_v52, %v1984_v61  ;;  %v1999_v4 = vpack.c.bf16 %v1981_v60, %v1981_v60  ;;  %vm2207_vm9 = vcmask 195584  }
 0x3be   : > { %v1941_v5 = vadd.f32 %v6376_v50, %v1940_v0 }
 0x3bf   : > { %v6380_v6 = vpop.eup %6379  ;;  %v1986_v7 = vadd.f32 %v6378_v52, %v1985_v2  ;;  %5814 = vmatmul.msk.bf16.vlgmr.msra.gmra.mxu1 %vm1816_vm2, %v1999_v4 }
 0x3c0   : > { %v1953_v9 = vmul.f32 %v6380_v6, %v1930_v55  ;;  %v1945_v10 = vsel %vm1944_vm12, %v6376_v50, %v1941_v5  ;;  %vm1958_vm4 = vweird.f32 %v6380_v6 }
 0x3c1   : > { %v1990_v11 = vsel %vm1989_vm13, %v6378_v52, %v1986_v7  ;;  %v1950_v13 = vsel %vm1947_vm14, %v1949_v8, %v1945_v10  ;;  %vm1959_vm6 = vmor %vm1957_vm5, %vm1958_vm4 }
 0x3c2   : > { %v1995_v14 = vsel %vm1992_vm15, %v1994_v12, %v1990_v11  ;;  %v1954_v15 = vsub.f32 1.0, %v1953_v9  ;;  %v1951_v18 = vmul.f32 %v7531_v16, %v1950_v13 }
 0x3c3   : > { %v1996_v19 = vmul.f32 %v7533_v17, %v1995_v14 }
 0x3c4   : > { %v1955_v22 = vmul.f32 %v6380_v6, %v1954_v15  ;;  %v1997_v24 = vpack.c.bf16 %v1951_v18, %v1951_v18 }
 0x3c5   : > { %v2000_v26 = vpack.c.bf16 %v1996_v19, %v1996_v19 }
 0x3c6   : > { %v1956_v27 = vadd.f32 %v6380_v6, %v1955_v22  ;;  %5812 = vmatmul.msk.bf16.vlgmr.msrb.gmra.mxu3 %vm1816_vm2, %v1997_v24 }
 0x3c7   : > { %5815 = vmatmul.msk.bf16.vlgmr.msra.gmra.mxu2 %vm1816_vm2, %v2000_v26 }
 0x3c8   : > { %v1960_v29 = vsel %vm1959_vm6, %v6380_v6, %v1956_v27 }
 0x3c9   : > { %v1965_v30 = vsel %vm1962_vm7, %v1964_v28, %v1960_v29 }
 0x3ca   : > { %v1966_v16 = vmul.f32 %v7539_v20, %v1965_v30 }
 0x3cc   : > { %v1998_v17 = vpack.c.bf16 %v1966_v16, %v1966_v16 }
 0x3ce   : > { %5813 = vmatmul.msk.bf16.vlgmr.msra.gmra.mxu0 %vm1816_vm2, %v1998_v17 }
 0x43c   : > { %v2059_v31 = vpop.f32.mrf.mxu1 }
 0x43d   : > { %v2082_v33 = vrot.slane %v2059_v31, 4 }
 0x444   : > { %v2061_v32 = vpop.f32.mrf.mxu1 }
 0x449   : > { %v2021_v34 = vpop.f32.mrf.mxu3 }
 0x44a   : > { %v2083_v35 = vsel %vm1458_vm1, %v2082_v33, %v2021_v34  ;;  %v2084_v36 = vrot.slane %v2021_v34, 4  ;;  %v2078_v37 = vpop.f32.mrf.mxu2 }
 0x44b   : > { %v2089_v39 = vperm.slane %v2083_v35, %v7418_v25  ;;  %v2094_v40 = vrot.slane %v2078_v37, 4  ;;  %v2040_v41 = vpop.f32.mrf.mxu0 }
 0x44c   : > { %v2085_v42 = vsel %vm1458_vm1, %v2059_v31, %v2084_v36  ;;  %v2096_v44 = vrot.slane %v2040_v41, 4 }
 0x44d   : > { %v2093_v20 = vperm.slane %v2085_v42, %v7418_v25  ;;  %v2108_v45 = vrot.slane %v2089_v39, 4  ;;  %v2095_v46 = vsel %vm1458_vm1, %v2094_v40, %v2040_v41  ;;  %v6084_v41 = vld [vmem:[%s8625_s16 + $0x8] sm:$0xff]  ;;  %v6083_v42 = vld [vmem:[%s8625_s16] sm:$0xff] }
 0x44e   : > { %v2097_v47 = vsel %vm1458_vm1, %v2078_v37, %v2096_v44  ;;  %v2101_v48 = vperm.slane %v2095_v46, %v7418_v25  ;;  %2234 = vmatpush.bf16.msra.mxu3 %v6084_v41 }
 0x44f   : > { %v2120_v49 = vrot.slane %v2093_v20, 4  ;;  %v2105_v50 = vperm.slane %v2097_v47, %v7418_v25 }
 0x450   : > { %v2106_v51 = vrot.slane %v2101_v48, 4  ;;  %v2109_v52 = vsel %vm1458_vm1, %v2101_v48, %v2108_v45 }
 0x451   : > { %v2117_v53 = vperm.slane %v2109_v52, %v7427_v38  ;;  %v2118_v54 = vrot.slane %v2105_v50, 4  ;;  %v2121_v55 = vsel %vm1458_vm1, %v2105_v50, %v2120_v49  ;;  %v2023_v56 = vpop.f32.mrf.mxu3  ;;  %v6333_v50 = vld [vmem:[%s8626_s22] ss:$0 sm:$0xff] }
 0x452   : > { %v2107_v57 = vsel %vm1458_vm1, %v2106_v51, %v2089_v39  ;;  %v2129_v58 = vperm.slane %v2121_v55, %v7427_v38  ;;  %v2080_v59 = vpop.f32.mrf.mxu2  ;;  %2235 = vmatpush.bf16.msra.mxu3 %v6083_v42  ;;  %v6447_v51 = vld [vmem:[%s7396_s10] sm:$0xf]  ;;  %s8632_s10 = smov 120  }
 0x453   : > { %v2113_v60 = vperm.slane %v2107_v57, %v7427_v38  ;;  %v2119_v61 = vsel %vm1458_vm1, %v2118_v54, %v2093_v20  ;;  %v2132_v62 = vrot.slane %v2117_v53, 4  ;;  %v2042_v63 = vpop.f32.mrf.mxu0  ;;  %v1330_v52 = vunpack.c.l.bf16 %v6447_v51 }
 0x454   : > { %v2125_v0 = vperm.slane %v2119_v61, %v7427_v38  ;;  %v2136_v1 = vrot.slane %v2129_v58, 4  ;;  %v6957_v58 = vmov 32.0  }
 0x455   : > { %v2130_v2 = vrot.slane %v2113_v60, 4  ;;  %v2133_v3 = vsel %vm1458_vm1, 0.0, %v2132_v62  ;;  %v2138_v4 = vsel %vm1458_vm1, %v2132_v62, %v2113_v60  ;;  %6381 = vrcp.f32 %v6957_v58 }
 0x456   : > { %v2134_v5 = vrot.slane %v2125_v0, 4  ;;  %v2137_v6 = vsel %vm1458_vm1, 0.0, %v2136_v1  ;;  %v2142_v7 = vperm.slane %v2138_v4, %v7418_v25  ;;  %v2143_v8 = vrot.slane %v2133_v3, 4 }
 0x457   : > { %v2131_v12 = vsel %vm1458_vm1, 0.0, %v2130_v2  ;;  %v2154_v9 = vrot.slane %v2137_v6, 4  ;;  %v2149_v10 = vsel %vm1458_vm1, %v2136_v1, %v2125_v0 }
 0x458   : > { %v2135_v11 = vsel %vm1458_vm1, 0.0, %v2134_v5  ;;  %v2144_v13 = vsel %vm1458_vm1, %v2143_v8, %v2131_v12  ;;  %v2153_v14 = vperm.slane %v2149_v10, %v7418_v25  ;;  %v2162_v15 = vrot.slane %v2142_v7, 4  ;;  %v6086_v12 = vld [vmem:[%s8629_s11 + $0x8] sm:$0xff]  ;;  %v6336_v10 = vld [vmem:[#allocation2] ss:$0 sm:$0xff] }
 0x459   : > { %v2148_v18 = vperm.slane %v2144_v13, %v7418_v25  ;;  %v2155_v19 = vsel %vm1458_vm1, %v2154_v9, %v2135_v11  ;;  %2326 = vmatpush.bf16.msrb.mxu0 %v6086_v12  ;;  %v6085_v9 = vld [vmem:[%s8629_s11] sm:$0xff] }
 0x45a   : > { %v2159_v21 = vperm.slane %v2155_v19, %v7418_v25  ;;  %v2174_v22 = vrot.slane %v2153_v14, 4 }
 0x45b   : > { %v2163_v23 = vsel %vm1458_vm1, %v2148_v18, %v2162_v15  ;;  %v2160_v24 = vrot.slane %v2148_v18, 4  ;;  %v6382_v61 = vpop.eup %6381 }
 0x45c   : > { %v2171_v26 = vperm.slane %v2163_v23, %v7427_v38  ;;  %v2175_v27 = vsel %vm1458_vm1, %v2159_v21, %v2174_v22  ;;  %v2172_v28 = vrot.slane %v2159_v21, 4  ;;  %v2248_v62 = vmul.f32 32.0, %v6382_v61 }
 0x45d   : > { %v2183_v29 = vperm.slane %v2175_v27, %v7427_v38  ;;  %v2161_v30 = vsel %vm1458_vm1, %v2160_v24, %v2142_v7  ;;  %vm2252_vm10 = vweird.f32 %v6382_v61  ;;  %2327 = vmatpush.bf16.msrb.mxu0 %v6085_v9 }
 0x45e   : > { %v2190_v16 = vrot.slane %v2171_v26, 4  ;;  %v2167_v17 = vperm.slane %v2161_v30, %v7427_v38  ;;  %v2173_v31 = vsel %vm1458_vm1, %v2172_v28, %v2153_v14  ;;  %v2249_v0 = vsub.f32 1.0, %v2248_v62  ;;  %v6334_v28 = vld [vmem:[%s8630_s28] ss:$0 sm:$0xff] }
 0x45f   : > { %v2188_v32 = vrot.slane %v2183_v29, 4  ;;  %v2179_v33 = vperm.slane %v2173_v31, %v7427_v38 }
 0x460   : > { %v2191_v34 = vsel %vm1458_vm1, %v2183_v29, %v2190_v16  ;;  %v2186_v35 = vrot.slane %v2167_v17, 4  ;;  %v2250_v1 = vmul.f32 %v6382_v61, %v2249_v0 }
 0x461   : > { %2201 = vrot.lane.b32.xlu2 %v2191_v34, %s8531_s27  ;;  %v2189_v36 = vsel %vm1458_vm1, %v2188_v32, %v2171_v26  ;;  %v2184_v37 = vrot.slane %v2179_v33, 4  ;;  %s8627_s27 = sld [smem:[#allocation47_spill]] }
 0x462   : > { %2197 = vrot.lane.b32.xlu0 %v2189_v36, %s8535_s7  ;;  %v2187_v39 = vsel %vm1458_vm1, %v2179_v33, %v2186_v35  ;;  %v2251_v2 = vadd.f32 %v6382_v61, %v2250_v1 }
 0x463   : > { %2193 = vrot.lane.b32.xlu1 %v2187_v39, %s8533_s21  ;;  %v2185_v40 = vsel %vm1458_vm1, %v2184_v37, %v2167_v17  ;;  %s8628_s21 = sld [smem:[#allocation32_spill]] }
 0x464   : > { %v7659_v3 = vsel %vm2252_vm10, %v6382_v61, %v2251_v2 }
 0x467   : > { %v6088_v59 = vld [vmem:[%s8627_s27 + $0x8] sm:$0xff]  ;;  %v6087_v60 = vld [vmem:[%s8627_s27] sm:$0xff] }
 0x468   : > { %2357 = vmatpush.bf16.msrb.mxu1 %v6088_v59 }
 0x469   : > { %s7652_s7 = scalar_lea.vmem %s8628_s21, %s5779_s26  ;;  %s8631_s26 = smov %s8630_s28 }
 0x46a   : > { %v7655_v63 = vld [vmem:[%s7652_s7] sm:$0xf]  ;;  %s8633_s21 = sld [smem:[#allocation44_spill]] }
 0x46b   : > { %s8636_s28 = sld [smem:[#allocation49_spill]] }
 0x46c   : > { %2358 = vmatpush.bf16.msrb.mxu1 %v6087_v60 }
 0x46f   : > { %5842 = vmatmul.msk.bf16.vlgmr.msrb.gmra.mxu1 %vm1374_vm0, %v7655_v63 }
 0x470   : > { %v6335_v30 = vld [vmem:[%s8633_s21] ss:$0 sm:$0xff] }
 0x471   : > { %s8637_s6 = smov %s8636_s28 }
 0x4bb   : > { %v2202_v46 = vpop.permute.xlu2 %2201 }
 0x4d4   : > { %v2198_v44 = vpop.permute.xlu0 %2197 }
 0x4d5   : > { %v2194_v20 = vpop.permute.xlu1 %2193 }
 0x4d6   : > { %v2204_v45 = vsel %vm1816_vm2, %v2185_v40, %v2194_v20 }
 0x4d7   : > { %v2206_v47 = vsel %vm2205_vm8, %v2204_v45, %v2198_v44 }
 0x4d8   : > { %v2208_v48 = vsel %vm2207_vm9, %v2206_v47, %v2202_v46 }
 0x4d9   : > { %v2209_v49 = vpack.c.bf16 %v2208_v48, %v2208_v48 }
 0x4db   : > { %5824 = vmatmul.msk.bf16.vlgmr.msra.gmra.mxu3 %vm1374_vm0, %v2209_v49 }
 0x4ec   : > { %v2360_v11 = vpop.f32.mrf.mxu1 }
 0x4ed   : > { %v2361_v15 = vadd.f32 %v6336_v10, %v2360_v11 }
 0x4ef   : > { %2513 = vrot.lane.b32.xlu2 %v2361_v15, %s8632_s10  ;;  %v2524_v34 = vrot.slane %v2361_v15, 4 }
 0x4f4   : > { %v2362_v19 = vpop.f32.mrf.mxu1 }
 0x4f7   : > { %2516 = vrot.lane.b32.xlu2 %v2361_v15, %s8634_s4 }
 0x4ff   : > { %2519 = vrot.lane.b32.xlu2 %v2361_v15, %s8635_s5 }
 0x549   : > { %v2514_v33 = vpop.permute.xlu2 %2513 }
 0x54a   : > { %v2536_v41 = vrot.slane %v2514_v33, 4 }
 0x551   : > { %v2517_v35 = vpop.permute.xlu2 %2516 }
 0x552   : > { %v2522_v36 = vrot.slane %v2517_v35, 4  ;;  %v2525_v37 = vsel %vm1458_vm1, %v2517_v35, %v2524_v34 }
 0x553   : > { %v2533_v40 = vperm.slane %v2525_v37, %v7418_v25 }
 0x554   : > { %v2523_v39 = vsel %vm1458_vm1, %v2522_v36, %v2361_v15 }
 0x555   : > { %v2529_v42 = vperm.slane %v2523_v39, %v7418_v25  ;;  %v2560_v44 = vrot.slane %v2533_v40, 4 }
 0x557   : > { %v2548_v47 = vrot.slane %v2529_v42, 4 }
 0x559   : > { %v2520_v20 = vpop.permute.xlu2 %2519 }
 0x55a   : > { %v2534_v45 = vrot.slane %v2520_v20, 4  ;;  %v2537_v46 = vsel %vm1458_vm1, %v2520_v20, %v2536_v41 }
 0x55b   : > { %v2545_v48 = vperm.slane %v2537_v46, %v7418_v25 }
 0x55c   : > { %v2535_v49 = vsel %vm1458_vm1, %v2534_v45, %v2514_v33  ;;  %v6089_v45 = vld [vmem:[%s8637_s6] sm:$0xff] }
 0x55d   : > { %v2558_v51 = vrot.slane %v2545_v48, 4 }
 0x55e   : > { %v2237_v53 = vpop.f32.mrf.mxu3 }
 0x55f   : > { %v2238_v54 = vadd.f32 %v6333_v50, %v2237_v53  ;;  %v2541_v50 = vperm.slane %v2535_v49, %v7418_v25 }
 0x561   : > { %v2241_v55 = vadd.f32 %v2238_v54, %v1330_v52  ;;  %v2561_v52 = vsel %vm1458_vm1, %v2545_v48, %v2560_v44  ;;  %v2546_v54 = vrot.slane %v2541_v50, 4 }
 0x562   : > { %v2569_v53 = vperm.slane %v2561_v52, %v7427_v38 }
 0x563   : > { %v2244_v56 = vsel %vm1374_vm0, %v2241_v55, 0.0  ;;  %v2547_v60 = vsel %vm1458_vm1, %v2546_v54, %v2529_v42 }
 0x564   : > { %2245 = vadd.xlane.f32.xlu0 %v2244_v56  ;;  %v2559_v56 = vsel %vm1458_vm1, %v2558_v51, %v2533_v40  ;;  %v2576_v59 = vrot.slane %v2569_v53, 4  ;;  %v2553_v61 = vperm.slane %v2547_v60, %v7427_v38  ;;  %v6337_v51 = vld [vmem:[%s8638_s9] ss:$0 sm:$0xff] }
 0x565   : > { %v2565_v58 = vperm.slane %v2559_v56, %v7427_v38 }
 0x566   : > { %v2239_v57 = vpop.f32.mrf.mxu3  ;;  %v2577_v1 = vsel %vm1458_vm1, 0.0, %v2576_v59 }
 0x567   : > { %v2574_v0 = vrot.slane %v2565_v58, 4  ;;  %v2594_v2 = vrot.slane %v2577_v1, 4  ;;  %v6338_v1 = vld [vmem:[#allocation5] ss:$0 sm:$0xff] }
 0x5d7   : > { %v2246_v4 = vpop.xlane.xlu0 %2245 }
 0x5d8   : > { %v2254_v5 = vmul.f32 %v7659_v3, %v2246_v4  ;;  %v2570_v4 = vrot.slane %v2553_v61, 4 }
 0x5da   : > { %v2255_v6 = vsub.f32 %v2241_v55, %v2254_v5  ;;  %v2549_v55 = vsel %vm1458_vm1, %v2541_v50, %v2548_v47  ;;  %v2571_v9 = vsel %vm1458_vm1, 0.0, %v2570_v4 }
 0x5db   : > { %v2557_v57 = vperm.slane %v2549_v55, %v7427_v38 }
 0x5dc   : > { %v2256_v7 = vmul.f32 %v2255_v6, %v2255_v6 }
 0x5dd   : > { %v2572_v62 = vrot.slane %v2557_v57, 4 }
 0x5de   : > { %v2257_v8 = vsel %vm1374_vm0, %v2256_v7, 0.0  ;;  %v2589_v7 = vsel %vm1458_vm1, %v2576_v59, %v2565_v58 }
 0x5df   : > { %2258 = vadd.xlane.f32.xlu1 %v2257_v8  ;;  %v2573_v5 = vsel %vm1458_vm1, 0.0, %v2572_v62  ;;  %v2593_v10 = vperm.slane %v2589_v7, %v7418_v25  ;;  %v2578_v19 = vsel %vm1458_vm1, %v2572_v62, %v2553_v61 }
 0x5e0   : > { %v2583_v12 = vrot.slane %v2573_v5, 4 }
 0x652   : > { %v2259_v13 = vpop.xlane.xlu1 %2258 }
 0x653   : > { %v2260_v14 = vmul.f32 %v2259_v13, %v7659_v3  ;;  %v2584_v13 = vsel %vm1458_vm1, %v2583_v12, %v2571_v9 }
 0x654   : > { %v2588_v15 = vperm.slane %v2584_v13, %v7418_v25 }
 0x655   : > { %v2261_v18 = vadd.f32 1e-05, %v2260_v14  ;;  %v2614_v14 = vrot.slane %v2593_v10, 4 }
 0x657   : > { %6383 = vrsqrt.f32 %v2261_v18  ;;  %vm2268_vm12 = vweird.f32 %v2261_v18 }
 0x65d   : > { %v6384_v21 = vpop.eup %6383 }
 0x65e   : > { %v2263_v22 = vmul.f32 %v6384_v21, %v2261_v18  ;;  %vm2269_vm11 = vweird.f32 %v6384_v21 }
 0x65f   : > { %vm2270_vm13 = vmor %vm2268_vm12, %vm2269_vm11 }
 0x660   : > { %v2264_v23 = vmul.f32 %v6384_v21, %v2263_v22  ;;  %v2600_v22 = vrot.slane %v2588_v15, 4 }
 0x662   : > { %v2265_v24 = vmul.f32 0.5, %v2264_v23 }
 0x664   : > { %v2266_v26 = vsub.f32 1.5, %v2265_v24 }
 0x666   : > { %v2267_v27 = vmul.f32 %v6384_v21, %v2266_v26 }
 0x668   : > { %v2271_v29 = vsel %vm2270_vm13, %v6384_v21, %v2267_v27  ;;  %v2582_v21 = vperm.slane %v2578_v19, %v7418_v25 }
 0x669   : > { %v2272_v16 = vmul.f32 %v2271_v29, %v2255_v6  ;;  %v2575_v6 = vsel %vm1458_vm1, 0.0, %v2574_v0 }
 0x66a   : > { %v2595_v8 = vsel %vm1458_vm1, %v2594_v2, %v2575_v6  ;;  %v2601_v26 = vsel %vm1458_vm1, %v2600_v22, %v2582_v21  ;;  %v2602_v27 = vrot.slane %v2582_v21, 4 }
 0x66b   : > { %v2276_v17 = vmul.f32 %v6334_v28, %v2272_v16  ;;  %v2599_v11 = vperm.slane %v2595_v8, %v7418_v25  ;;  %v2607_v29 = vperm.slane %v2601_v26, %v7427_v38 }
 0x66d   : > { %v7671_v31 = vadd.f32 %v6335_v30, %v2276_v17  ;;  %v2612_v18 = vrot.slane %v2599_v11, 4  ;;  %v2615_v28 = vsel %vm1458_vm1, %v2599_v11, %v2614_v14  ;;  %v2603_v17 = vsel %vm1458_vm1, %v2588_v15, %v2602_v27 }
 0x66e   : > { %v2623_v16 = vperm.slane %v2615_v28, %v7427_v38  ;;  %v2626_v34 = vrot.slane %v2607_v29, 4  ;;  %v2611_v35 = vperm.slane %v2603_v17, %v7427_v38 }
 0x66f   : > { %v2301_v32 = vpack.c.bf16 %v7671_v31, %v7671_v31  ;;  %v2613_v23 = vsel %vm1458_vm1, %v2612_v18, %v2593_v10 }
 0x670   : > { %v2619_v24 = vperm.slane %v2613_v23, %v7427_v38  ;;  %v2628_v36 = vrot.slane %v2623_v16, 4  ;;  %v2630_v41 = vrot.slane %v2611_v35, 4 }
 0x671   : > { %5833 = vmatmul.msk.bf16.vlgmr.msrb.gmra.mxu0 %vm1374_vm0, %v2301_v32  ;;  %v6090_v32 = vld [vmem:[%s8636_s28 + $0x8] sm:$0xff]  ;;  %s7857_s28 = sand.u32 1, %s6890_s1  }
 0x672   : > { %v2624_v30 = vrot.slane %v2619_v24, 4  ;;  %2385 = vmatpush.bf16.msrb.mxu2 %v6090_v32  ;;  %v2627_v39 = vsel %vm1458_vm1, %v2619_v24, %v2626_v34  ;;  %v2629_v40 = vsel %vm1458_vm1, %v2628_v36, %v2611_v35  ;;  %v2631_v46 = vsel %vm1458_vm1, %v2623_v16, %v2630_v41  ;;  %s5778_s12 = sshll.u32 %s7857_s28, 4 }
 0x673   : > { %v2757_v44 = vpack.c.bf16 %v2627_v39, %v2627_v39  ;;  %v2758_v20 = vpack.c.bf16 %v2629_v40, %v2629_v40  ;;  %v2759_v49 = vpack.c.bf16 %v2631_v46, %v2631_v46  ;;  %s7866_s13 = scalar_lea.vmem [#allocation21], %s5778_s12  ;;  %s8639_s12 = sld [smem:[#allocation51_spill]] }
 0x674   : > { %v2625_v33 = vsel %vm1458_vm1, %v2624_v30, %v2607_v29 }
 0x675   : > { %v2756_v37 = vpack.c.bf16 %v2625_v33, %v2625_v33  ;;  %v2783_v47 = vsel %vm1816_vm2, %v2757_v44, 0  ;;  %v2802_v48 = vsel %vm1816_vm2, %v2758_v20, 0  ;;  %v2821_v50 = vsel %vm1816_vm2, %v2759_v49, 0 }
 0x676   : > { %2792 = vmatpush.bf16.xpose.msra.mxu0 %v2783_v47  ;;  %2811 = vmatpush.bf16.xpose.msra.mxu1 %v2802_v48 }
 0x677   : > { %v2764_v42 = vsel %vm1816_vm2, %v2756_v37, 0  ;;  %2386 = vmatpush.bf16.msrb.mxu2 %v6089_v45 }
 0x678   : > { %2773 = vmatpush.bf16.xpose.msrb.mxu3 %v2764_v42 }
 0x67a   : > { %5851 = vmatmul.msk.bf16.vlgmr.msrb.gmra.mxu2 %vm1374_vm0, %v7655_v63 }
 0x67b   : > { %2830 = vmatpush.bf16.xpose.msra.mxu2 %v2821_v50 }
 0x6ee   : > { %v2329_v52 = vpop.f32.mrf.mxu0 }
 0x6ef   : > { %v2330_v53 = vadd.f32 %v6337_v51, %v2329_v52 }
 0x6f1   : > { %2399 = vrot.lane.b32.xlu0 %v2330_v53, %s8635_s5  ;;  %2393 = vrot.lane.b32.xlu2 %v2330_v53, %s8632_s10  ;;  %v2404_v58 = vrot.slane %v2330_v53, 4 }
 0x6f6   : > { %v2331_v54 = vpop.f32.mrf.mxu0 }
 0x6f9   : > { %2396 = vrot.lane.b32.xlu2 %v2330_v53, %s8634_s4 }
 0x6fd   : > { %v2388_v12 = vpop.f32.mrf.mxu2 }
 0x6fe   : > { %v7737_v13 = vadd.f32 %v6338_v1, %v2388_v12 }
 0x700   : > { %2633 = vrot.lane.b32.xlu0 %v7737_v13, %s8632_s10 }
 0x705   : > { %v2390_v35 = vpop.f32.mrf.mxu2 }
 0x708   : > { %2639 = vrot.lane.b32.xlu0 %v7737_v13, %s8635_s5 }
 0x74b   : > { %v2394_v55 = vpop.permute.xlu2 %2393 }
 0x74c   : > { %v2416_v61 = vrot.slane %v2394_v55, 4 }
 0x753   : > { %v2397_v56 = vpop.permute.xlu2 %2396 }
 0x754   : > { %v2402_v57 = vrot.slane %v2397_v56, 4  ;;  %v2405_v59 = vsel %vm1458_vm1, %v2397_v56, %v2404_v58 }
 0x755   : > { %v2413_v63 = vperm.slane %v2405_v59, %v7418_v25 }
 0x756   : > { %v2403_v60 = vsel %vm1458_vm1, %v2402_v57, %v2330_v53 }
 0x757   : > { %v2409_v62 = vperm.slane %v2403_v60, %v7418_v25  ;;  %v2440_v5 = vrot.slane %v2413_v63, 4 }
 0x759   : > { %v2428_v7 = vrot.slane %v2409_v62, 4 }
 0x763   : > { %v2400_v0 = vpop.permute.xlu0 %2399 }
 0x764   : > { %v2414_v2 = vrot.slane %v2400_v0, 4  ;;  %v2417_v4 = vsel %vm1458_vm1, %v2400_v0, %v2416_v61 }
 0x765   : > { %v2425_v6 = vperm.slane %v2417_v4, %v7418_v25 }
 0x766   : > { %v2415_v8 = vsel %vm1458_vm1, %v2414_v2, %v2394_v55 }
 0x767   : > { %v2421_v9 = vperm.slane %v2415_v8, %v7418_v25  ;;  %v2438_v10 = vrot.slane %v2425_v6, 4  ;;  %v2441_v11 = vsel %vm1458_vm1, %v2425_v6, %v2440_v5 }
 0x768   : > { %v2449_v14 = vperm.slane %v2441_v11, %v7427_v38 }
 0x769   : > { %v2426_v15 = vrot.slane %v2421_v9, 4  ;;  %v2429_v18 = vsel %vm1458_vm1, %v2421_v9, %v2428_v7  ;;  %v2439_v19 = vsel %vm1458_vm1, %v2438_v10, %v2413_v63  ;;  %v6329_v9 = vld [vmem:[%s7400_s2] ss:$0 sm:$0xff] }
 0x76a   : > { %v2437_v21 = vperm.slane %v2429_v18, %v7427_v38  ;;  %v2445_v22 = vperm.slane %v2439_v19, %v7427_v38  ;;  %v2456_v23 = vrot.slane %v2449_v14, 4 }
 0x76b   : > { %v2427_v24 = vsel %vm1458_vm1, %v2426_v15, %v2409_v62 }
 0x76c   : > { %v2433_v26 = vperm.slane %v2427_v24, %v7427_v38  ;;  %v2452_v27 = vrot.slane %v2437_v21, 4  ;;  %v2454_v28 = vrot.slane %v2445_v22, 4  ;;  %v2457_v29 = vsel %vm1458_vm1, 0.0, %v2456_v23 }
 0x76d   : > { %v2469_v30 = vsel %vm1458_vm1, %v2456_v23, %v2445_v22  ;;  %v2474_v16 = vrot.slane %v2457_v29, 4 }
 0x76e   : > { %v2450_v17 = vrot.slane %v2433_v26, 4  ;;  %v2453_v32 = vsel %vm1458_vm1, 0.0, %v2452_v27  ;;  %v2455_v33 = vsel %vm1458_vm1, 0.0, %v2454_v28  ;;  %v2458_v34 = vsel %vm1458_vm1, %v2452_v27, %v2433_v26 }
 0x76f   : > { %v2462_v36 = vperm.slane %v2458_v34, %v7418_v25  ;;  %v2463_v37 = vrot.slane %v2453_v32, 4  ;;  %v2473_v39 = vperm.slane %v2469_v30, %v7418_v25  ;;  %v2475_v40 = vsel %vm1458_vm1, %v2474_v16, %v2455_v33 }
 0x770   : > { %v2451_v41 = vsel %vm1458_vm1, 0.0, %v2450_v17  ;;  %v2479_v42 = vperm.slane %v2475_v40, %v7418_v25 }
 0x771   : > { %v2464_v44 = vsel %vm1458_vm1, %v2463_v37, %v2451_v41  ;;  %v2482_v20 = vrot.slane %v2462_v36, 4  ;;  %v2494_v45 = vrot.slane %v2473_v39, 4 }
 0x772   : > { %v2468_v46 = vperm.slane %v2464_v44, %v7418_v25  ;;  %v2492_v47 = vrot.slane %v2479_v42, 4 }
 0x773   : > { %v2495_v48 = vsel %vm1458_vm1, %v2479_v42, %v2494_v45 }
 0x774   : > { %v2493_v49 = vsel %vm1458_vm1, %v2492_v47, %v2473_v39  ;;  %v2483_v50 = vsel %vm1458_vm1, %v2468_v46, %v2482_v20  ;;  %v2503_v51 = vperm.slane %v2495_v48, %v7427_v38  ;;  %v2480_v52 = vrot.slane %v2468_v46, 4 }
 0x775   : > { %v2491_v53 = vperm.slane %v2483_v50, %v7427_v38  ;;  %v2499_v54 = vperm.slane %v2493_v49, %v7427_v38  ;;  %v2634_v49 = vpop.permute.xlu0 %2633 }
 0x776   : > { %v2508_v55 = vrot.slane %v2503_v51, 4  ;;  %v2481_v56 = vsel %vm1458_vm1, %v2480_v52, %v2462_v36 }
 0x777   : > { %v2487_v57 = vperm.slane %v2481_v56, %v7427_v38  ;;  %v2504_v58 = vrot.slane %v2499_v54, 4  ;;  %v2510_v59 = vrot.slane %v2491_v53, 4 }
 0x778   : > { %v2509_v60 = vsel %vm1458_vm1, %v2508_v55, %v2491_v53 }
 0x779   : > { %v2754_v63 = vpack.c.bf16 %v2509_v60, %v2509_v60  ;;  %v2505_v61 = vsel %vm1458_vm1, %v2504_v58, %v2487_v57  ;;  %v2511_v62 = vsel %vm1458_vm1, %v2503_v51, %v2510_v59  ;;  %v2506_v0 = vrot.slane %v2487_v57, 4 }
 0x77a   : > { %v2752_v1 = vpack.c.bf16 %v2505_v61, %v2505_v61  ;;  %v2755_v2 = vpack.c.bf16 %v2511_v62, %v2511_v62  ;;  %v2644_v59 = vrot.slane %v7737_v13, 4 }
 0x77b   : > { %5854 = vmatmul.msk.bf16.vlgmr.msra.gmra.mxu1 %vm1816_vm2, %v2754_v63  ;;  %v2507_v4 = vsel %vm1458_vm1, %v2499_v54, %v2506_v0  ;;  %v2656_v54 = vrot.slane %v2634_v49, 4 }
 0x77c   : > { %5852 = vmatmul.msk.bf16.vlgmr.msrb.gmra.mxu3 %vm1816_vm2, %v2752_v1  ;;  %5855 = vmatmul.msk.bf16.vlgmr.msra.gmra.mxu2 %vm1816_vm2, %v2755_v2  ;;  %v2753_v5 = vpack.c.bf16 %v2507_v4, %v2507_v4 }
 0x77d   : > { %v2640_v53 = vpop.permute.xlu0 %2639 }
 0x77e   : > { %5853 = vmatmul.msk.bf16.vlgmr.msra.gmra.mxu0 %vm1816_vm2, %v2753_v5  ;;  %v2654_v55 = vrot.slane %v2640_v53, 4  ;;  %v2657_v56 = vsel %vm1458_vm1, %v2640_v53, %v2656_v54 }
 0x77f   : > { %v2665_v58 = vperm.slane %v2657_v56, %v7418_v25 }
 0x780   : > { %v2655_v57 = vsel %vm1458_vm1, %v2654_v55, %v2634_v49 }
 0x781   : > { %v2661_v60 = vperm.slane %v2655_v57, %v7418_v25  ;;  %v2678_v0 = vrot.slane %v2665_v58, 4 }
 0x783   : > { %v2666_v4 = vrot.slane %v2661_v60, 4 }
 0x7f8   : > { %v2813_v6 = vpop.f32.mrf.mxu1 }
 0x7f9   : > { %v2838_v21 = vmul.f32 0.35355338, %v2813_v6 }
 0x7fb   : > { %v2794_v7 = vpop.f32.mrf.mxu0  ;;  %v2845_v27 = vadd.f32 %v6329_v9, %v2838_v21 }
 0x7fc   : > { %v2837_v28 = vmul.f32 0.35355338, %v2794_v7 }
 0x7fd   : > { %v2853_v29 = vsel %vm1816_vm2, %v2845_v27, -inf }
 0x7fe   : > { %v2844_v30 = vadd.f32 %v6329_v9, %v2837_v28 }
 0x7ff   : > { %v2775_v8 = vpop.f32.mrf.mxu3  ;;  %v2832_v12 = vpop.f32.mrf.mxu2 }
 0x800   : > { %v2836_v10 = vmul.f32 0.35355338, %v2775_v8  ;;  %v2815_v11 = vpop.f32.mrf.mxu1  ;;  %v2839_v14 = vmul.f32 0.35355338, %v2832_v12  ;;  %v2850_v16 = vsel %vm1816_vm2, %v2844_v30, -inf }
 0x802   : > { %v2846_v15 = vadd.f32 %v6329_v9, %v2839_v14  ;;  %v2843_v18 = vadd.f32 %v6329_v9, %v2836_v10 }
 0x803   : > { %v2796_v19 = vpop.f32.mrf.mxu0 }
 0x804   : > { %v2856_v22 = vsel %vm1816_vm2, %v2846_v15, -inf  ;;  %v2847_v23 = vsel %vm1816_vm2, %v2843_v18, -inf }
 0x805   : > { %2857 = vmax.xlane.f32.xlu2 %v2856_v22  ;;  %2848 = vmax.xlane.f32.xlu1 %v2847_v23 }
 0x807   : > { %v2777_v24 = vpop.f32.mrf.mxu3  ;;  %v2834_v26 = vpop.f32.mrf.mxu2 }
 0x80d   : > { %2854 = vmax.xlane.f32.xlu1 %v2853_v29 }
 0x815   : > { %2851 = vmax.xlane.f32.xlu1 %v2850_v16 }
 0x82e   : > { %2636 = vrot.lane.b32.xlu1 %v7737_v13, %s8634_s4 }
 0x878   : > { %v2858_v17 = vpop.xlane.xlu2 %2857  ;;  %v2849_v32 = vpop.xlane.xlu1 %2848 }
 0x879   : > { %v2862_v33 = vsub.f32 %v2846_v15, %v2858_v17  ;;  %v2859_v34 = vsub.f32 %v2843_v18, %v2849_v32 }
 0x87b   : > { %v2869_v35 = vmul.f32 1.442695, %v2862_v33  ;;  %v2863_v36 = vmul.f32 1.442695, %v2859_v34 }
 0x87d   : > { %6385 = vpow2.f32 %v2869_v35 }
 0x87e   : > { %6387 = vpow2.f32 %v2863_v36 }
 0x880   : > { %v2855_v37 = vpop.xlane.xlu1 %2854 }
 0x881   : > { %v2861_v39 = vsub.f32 %v2845_v27, %v2855_v37 }
 0x883   : > { %v7785_v40 = vpop.eup %6385  ;;  %v2867_v41 = vmul.f32 1.442695, %v2861_v39 }
 0x884   : > { %v7787_v42 = vpop.eup %6387  ;;  %v2880_v44 = vsel %vm1816_vm2, %v7785_v40, 0.0 }
 0x885   : > { %6389 = vpow2.f32 %v2867_v41  ;;  %2881 = vadd.xlane.f32.xlu2 %v2880_v44  ;;  %v2871_v20 = vsel %vm1816_vm2, %v7787_v42, 0.0 }
 0x886   : > { %2872 = vadd.xlane.f32.xlu0 %v2871_v20 }
 0x888   : > { %v2852_v45 = vpop.xlane.xlu1 %2851 }
 0x889   : > { %v2860_v46 = vsub.f32 %v2844_v30, %v2852_v45 }
 0x88b   : > { %v7793_v47 = vpop.eup %6389  ;;  %v2865_v48 = vmul.f32 1.442695, %v2860_v46 }
 0x88c   : > { %v2877_v50 = vsel %vm1816_vm2, %v7793_v47, 0.0 }
 0x88d   : > { %6391 = vpow2.f32 %v2865_v48  ;;  %2878 = vadd.xlane.f32.xlu1 %v2877_v50 }
 0x893   : > { %v7797_v51 = vpop.eup %6391 }
 0x894   : > { %v2874_v52 = vsel %vm1816_vm2, %v7797_v51, 0.0 }
 0x895   : > { %2875 = vadd.xlane.f32.xlu2 %v2874_v52 }
 0x8a0   : > { %v2637_v63 = vpop.permute.xlu1 %2636 }
 0x8a1   : > { %v2642_v61 = vrot.slane %v2637_v63, 4  ;;  %v2645_v62 = vsel %vm1458_vm1, %v2637_v63, %v2644_v59 }
 0x8a2   : > { %v2653_v1 = vperm.slane %v2645_v62, %v7418_v25 }
 0x8a3   : > { %v2643_v2 = vsel %vm1458_vm1, %v2642_v61, %v7737_v13 }
 0x8a4   : > { %v2649_v5 = vperm.slane %v2643_v2, %v7418_v25  ;;  %v2679_v6 = vsel %vm1458_vm1, %v2678_v0, %v2653_v1  ;;  %v2680_v7 = vrot.slane %v2653_v1, 4 }
 0x8a5   : > { %v2685_v8 = vperm.slane %v2679_v6, %v7427_v38 }
 0x8a6   : > { %v2667_v12 = vsel %vm1458_vm1, %v2666_v4, %v2649_v5  ;;  %v2668_v9 = vrot.slane %v2649_v5, 4  ;;  %v2681_v10 = vsel %vm1458_vm1, %v2665_v58, %v2680_v7 }
 0x8a7   : > { %v2673_v11 = vperm.slane %v2667_v12, %v7427_v38  ;;  %v2689_v14 = vperm.slane %v2681_v10, %v7427_v38  ;;  %v2694_v18 = vrot.slane %v2685_v8, 4 }
 0x8a8   : > { %v2669_v15 = vsel %vm1458_vm1, %v2661_v60, %v2668_v9 }
 0x8a9   : > { %v2677_v13 = vperm.slane %v2669_v15, %v7427_v38  ;;  %v2696_v19 = vrot.slane %v2689_v14, 4  ;;  %v2690_v21 = vrot.slane %v2673_v11, 4  ;;  %v2695_v29 = vsel %vm1458_vm1, 0.0, %v2694_v18 }
 0x8ab   : > { %v2692_v22 = vrot.slane %v2677_v13, 4  ;;  %v2697_v23 = vsel %vm1458_vm1, 0.0, %v2696_v19  ;;  %v2709_v24 = vsel %vm1458_vm1, %v2696_v19, %v2685_v8  ;;  %v2691_v34 = vsel %vm1458_vm1, 0.0, %v2690_v21 }
 0x8ac   : > { %v2713_v26 = vperm.slane %v2709_v24, %v7418_v25  ;;  %v2714_v27 = vrot.slane %v2697_v23, 4 }
 0x8ad   : > { %v2693_v28 = vsel %vm1458_vm1, 0.0, %v2692_v22  ;;  %v2698_v30 = vsel %vm1458_vm1, %v2692_v22, %v2673_v11 }
 0x8ae   : > { %v2703_v16 = vrot.slane %v2693_v28, 4  ;;  %v2715_v17 = vsel %vm1458_vm1, %v2714_v27, %v2695_v29  ;;  %v2734_v32 = vrot.slane %v2713_v26, 4  ;;  %v2702_v33 = vperm.slane %v2698_v30, %v7418_v25 }
 0x8af   : > { %v2719_v35 = vperm.slane %v2715_v17, %v7418_v25  ;;  %v6958_v27 = vmov 4.0  }
 0x8b0   : > { %v2704_v36 = vsel %vm1458_vm1, %v2703_v16, %v2691_v34  ;;  %v2722_v37 = vrot.slane %v2702_v33, 4 }
 0x8b1   : > { %v2732_v39 = vrot.slane %v2719_v35, 4  ;;  %v2708_v41 = vperm.slane %v2704_v36, %v7418_v25  ;;  %v2735_v44 = vsel %vm1458_vm1, %v2719_v35, %v2734_v32 }
 0x8b2   : > { %v2743_v20 = vperm.slane %v2735_v44, %v7427_v38 }
 0x8b3   : > { %v2723_v45 = vsel %vm1458_vm1, %v2708_v41, %v2722_v37  ;;  %v2720_v46 = vrot.slane %v2708_v41, 4  ;;  %v2733_v48 = vsel %vm1458_vm1, %v2732_v39, %v2713_v26 }
 0x8b4   : > { %v2731_v49 = vperm.slane %v2723_v45, %v7427_v38  ;;  %v2748_v50 = vrot.slane %v2743_v20, 4  ;;  %v2739_v52 = vperm.slane %v2733_v48, %v7427_v38 }
 0x8b5   : > { %v2721_v53 = vsel %vm1458_vm1, %v2720_v46, %v2702_v33 }
 0x8b6   : > { %v2749_v54 = vsel %vm1458_vm1, %v2748_v50, %v2731_v49  ;;  %v2727_v55 = vperm.slane %v2721_v53, %v7427_v38  ;;  %v2744_v56 = vrot.slane %v2739_v52, 4  ;;  %v2750_v57 = vrot.slane %v2731_v49, 4 }
 0x8b7   : > { %v2949_v58 = vpack.c.bf16 %v2749_v54, %v2749_v54 }
 0x8b8   : > { %v2745_v59 = vsel %vm1458_vm1, %v2744_v56, %v2727_v55  ;;  %v2751_v60 = vsel %vm1458_vm1, %v2743_v20, %v2750_v57  ;;  %v2746_v63 = vrot.slane %v2727_v55, 4 }
 0x8b9   : > { %v2993_v61 = vsel %vm2008_vm3, %v2949_v58, 0  ;;  %v2947_v62 = vpack.c.bf16 %v2745_v59, %v2745_v59  ;;  %v2950_v0 = vpack.c.bf16 %v2751_v60, %v2751_v60 }
 0x8ba   : > { %3002 = vmatpush.bf16.msrb.mxu1 %v2993_v61  ;;  %v2747_v1 = vsel %vm1458_vm1, %v2739_v52, %v2746_v63 }
 0x8bb   : > { %v2955_v2 = vsel %vm2008_vm3, %v2947_v62, 0  ;;  %v3012_v4 = vsel %vm2008_vm3, %v2950_v0, 0  ;;  %v2948_v5 = vpack.c.bf16 %v2747_v1, %v2747_v1 }
 0x8bc   : > { %2964 = vmatpush.bf16.msra.mxu3 %v2955_v2  ;;  %3021 = vmatpush.bf16.msrb.mxu2 %v3012_v4 }
 0x8bd   : > { %v2974_v6 = vsel %vm2008_vm3, %v2948_v5, 0 }
 0x8be   : > { %2983 = vmatpush.bf16.msrb.mxu0 %v2974_v6 }
 0x8f8   : > { %v2882_v7 = vpop.xlane.xlu2 %2881 }
 0x8f9   : > { %6393 = vrcp.f32 %v2882_v7  ;;  %v2873_v8 = vpop.xlane.xlu0 %2872  ;;  %v2939_v13 = vand.u32 2147483648, %v2882_v7  ;;  %v2937_v21 = vand.u32 2147483647, %v2882_v7  ;;  %vm2933_vm4 = vweird.f32 %v2882_v7 }
 0x8fa   : > { %6395 = vrcp.f32 %v2873_v8  ;;  %v2894_v22 = vand.u32 2147483648, %v2873_v8  ;;  %v2892_v24 = vand.u32 2147483647, %v2873_v8  ;;  %vm2888_vm6 = vweird.f32 %v2873_v8 }
 0x8fb   : > { %v2940_v29 = vor.u32 1.1754944e-38, %v2939_v13  ;;  %vm2938_vm7 = vcmp.eq.f32.partialorder %v2937_v21, 8.507059e+37 }
 0x8fc   : > { %v2895_v17 = vor.u32 1.1754944e-38, %v2894_v22  ;;  %vm2893_vm11 = vcmp.eq.f32.partialorder %v2892_v24, 8.507059e+37 }
 0x8ff   : > { %v6394_v12 = vpop.eup %6393 }
 0x900   : > { %v6396_v9 = vpop.eup %6395  ;;  %v2929_v10 = vmul.f32 %v6394_v12, %v2882_v7  ;;  %v2879_v11 = vpop.xlane.xlu1 %2878  ;;  %vm2934_vm14 = vweird.f32 %v6394_v12 }
 0x901   : > { %v2884_v14 = vmul.f32 %v6396_v9, %v2873_v8  ;;  %6397 = vrcp.f32 %v2879_v11  ;;  %vm2889_vm15 = vweird.f32 %v6396_v9  ;;  %vm2935_vm5 = vmor %vm2933_vm4, %vm2934_vm14  ;;  %v2924_v44 = vand.u32 2147483648, %v2879_v11 }
 0x902   : > { %v2930_v15 = vsub.f32 1.0, %v2929_v10  ;;  %6399 = vrcp.f32 %v6958_v27  ;;  %vm2890_vm10 = vmor %vm2888_vm6, %vm2889_vm15  ;;  %v2922_v46 = vand.u32 2147483647, %v2879_v11  ;;  %vm2918_vm13 = vweird.f32 %v2879_v11 }
 0x903   : > { %v2885_v18 = vsub.f32 1.0, %v2884_v14  ;;  %v2925_v53 = vor.u32 1.1754944e-38, %v2924_v44 }
 0x904   : > { %v2931_v19 = vmul.f32 %v6394_v12, %v2930_v15  ;;  %vm2923_vm15 = vcmp.eq.f32.partialorder %v2922_v46, 8.507059e+37 }
 0x905   : > { %v2886_v23 = vmul.f32 %v6396_v9, %v2885_v18 }
 0x906   : > { %v2932_v26 = vadd.f32 %v6394_v12, %v2931_v19 }
 0x907   : > { %v6398_v28 = vpop.eup %6397  ;;  %v2887_v30 = vadd.f32 %v6396_v9, %v2886_v23 }
 0x908   : > { %v2936_v16 = vsel %vm2935_vm5, %v6394_v12, %v2932_v26  ;;  %v2914_v32 = vmul.f32 %v6398_v28, %v2879_v11  ;;  %v2876_v33 = vpop.xlane.xlu2 %2875  ;;  %v6400_v20 = vpop.eup %6399  ;;  %vm2919_vm12 = vweird.f32 %v6398_v28 }
 0x909   : > { %v2941_v34 = vsel %vm2938_vm7, %v2940_v29, %v2936_v16  ;;  %v2891_v35 = vsel %vm2890_vm10, %v6396_v9, %v2887_v30  ;;  %6401 = vrcp.f32 %v2876_v33  ;;  %vm2920_vm14 = vmor %vm2918_vm13, %vm2919_vm12  ;;  %v2909_v58 = vand.u32 2147483648, %v2876_v33 }
 0x90a   : > { %v2942_v36 = vmul.f32 %v7785_v40, %v2941_v34  ;;  %v2896_v37 = vsel %vm2893_vm11, %v2895_v17, %v2891_v35  ;;  %v2915_v39 = vsub.f32 1.0, %v2914_v32  ;;  %v3192_v40 = vmul.f32 4.0, %v6400_v20 }
 0x90b   : > { %v2897_v41 = vmul.f32 %v7787_v42, %v2896_v37  ;;  %v2907_v63 = vand.u32 2147483647, %v2876_v33  ;;  %vm2903_vm5 = vweird.f32 %v2876_v33  ;;  %v2910_v0 = vor.u32 1.1754944e-38, %v2909_v58 }
 0x90c   : > { %v2916_v45 = vmul.f32 %v6398_v28, %v2915_v39  ;;  %v2946_v48 = vpack.c.bf16 %v2942_v36, %v2942_v36  ;;  %v3193_v59 = vsub.f32 1.0, %v3192_v40  ;;  %vm3196_vm10 = vweird.f32 %v6400_v20 }
 0x90d   : > { %v2943_v49 = vpack.c.bf16 %v2897_v41, %v2897_v41  ;;  %vm2908_vm7 = vcmp.eq.f32.partialorder %v2907_v63, 8.507059e+37  ;;  %v3184_v5 = vsel %vm1816_vm2, %v2897_v41, 0.0  ;;  %v3189_v11 = vsel %vm1816_vm2, %v2942_v36, 0.0 }
 0x90e   : > { %v2917_v50 = vadd.f32 %v6398_v28, %v2916_v45  ;;  %5859 = vmatmul.msk.bf16.vlgmr.msrb.gmra.mxu2 %vm1816_vm2, %v2946_v48  ;;  %v3194_v2 = vmul.f32 %v6400_v20, %v3193_v59 }
 0x90f   : > { %v6402_v52 = vpop.eup %6401  ;;  %5856 = vmatmul.msk.bf16.vlgmr.msra.gmra.mxu3 %vm1816_vm2, %v2943_v49 }
 0x910   : > { %v2921_v54 = vsel %vm2920_vm14, %v6398_v28, %v2917_v50  ;;  %v2899_v42 = vmul.f32 %v6402_v52, %v2876_v33  ;;  %vm2904_vm4 = vweird.f32 %v6402_v52  ;;  %v3195_v8 = vadd.f32 %v6400_v20, %v3194_v2 }
 0x911   : > { %v2926_v55 = vsel %vm2923_vm15, %v2925_v53, %v2921_v54  ;;  %vm2905_vm6 = vmor %vm2903_vm5, %vm2904_vm4  ;;  %vm3308_vm14 = vcmask 523264  }
 0x912   : > { %v2927_v56 = vmul.f32 %v7793_v47, %v2926_v55  ;;  %v2900_v57 = vsub.f32 1.0, %v2899_v42 }
 0x914   : > { %v2901_v60 = vmul.f32 %v6402_v52, %v2900_v57  ;;  %v2945_v61 = vpack.c.bf16 %v2927_v56, %v2927_v56  ;;  %v3187_v9 = vsel %vm1816_vm2, %v2927_v56, 0.0 }
 0x916   : > { %v2902_v62 = vadd.f32 %v6402_v52, %v2901_v60  ;;  %5858 = vmatmul.msk.bf16.vlgmr.msrb.gmra.mxu1 %vm1816_vm2, %v2945_v61 }
 0x918   : > { %v2906_v1 = vsel %vm2905_vm6, %v6402_v52, %v2902_v62 }
 0x919   : > { %v2911_v4 = vsel %vm2908_vm7, %v2910_v0, %v2906_v1 }
 0x91a   : > { %v2912_v47 = vmul.f32 %v7797_v51, %v2911_v4  ;;  %v7863_v51 = vsel %vm3196_vm10, %v6400_v20, %v3195_v8 }
 0x91c   : > { %v3185_v6 = vsel %vm1816_vm2, %v2912_v47, 0.0  ;;  %v2944_v7 = vpack.c.bf16 %v2912_v47, %v2912_v47 }
 0x91d   : > { %v3186_v12 = vadd.f32 %v3185_v6, %v3184_v5 }
 0x91e   : > { %5857 = vmatmul.msk.bf16.vlgmr.msrb.gmra.mxu0 %vm1816_vm2, %v2944_v7 }
 0x91f   : > { %v3188_v10 = vadd.f32 %v3187_v9, %v3186_v12 }
 0x921   : > { %v3190_v14 = vadd.f32 %v3189_v11, %v3188_v10 }
 0x923   : > { %v3198_v15 = vmul.f32 %v7863_v51, %v3190_v14 }
 0x925   : > { %3199 = vst.msk [vmem:[%s7866_s13] sm:$0xff] %vm1816_vm2, %v3198_v15 }
 0x991   : > { %v3023_v13 = vpop.f32.mrf.mxu2 }
 0x992   : > { %v2966_v18 = vpop.f32.mrf.mxu3  ;;  %v3039_v28 = vrot.slane %v3023_v13, 4 }
 0x993   : > { %v3004_v19 = vpop.f32.mrf.mxu1  ;;  %v3029_v21 = vrot.slane %v2966_v18, 4 }
 0x994   : > { %v3027_v22 = vrot.slane %v3004_v19, 4 }
 0x995   : > { %v3030_v24 = vsel %vm1458_vm1, %v3004_v19, %v3029_v21 }
 0x996   : > { %v3028_v23 = vsel %vm1458_vm1, %v3027_v22, %v2966_v18  ;;  %v3038_v30 = vperm.slane %v3030_v24, %v7418_v25 }
 0x997   : > { %v3034_v26 = vperm.slane %v3028_v23, %v7418_v25 }
 0x998   : > { %v3065_v37 = vrot.slane %v3038_v30, 4 }
 0x999   : > { %v3025_v27 = vpop.f32.mrf.mxu2  ;;  %v3053_v34 = vrot.slane %v3034_v26, 4 }
 0x99a   : > { %v2968_v29 = vpop.f32.mrf.mxu3 }
 0x99b   : > { %v2985_v16 = vpop.f32.mrf.mxu0  ;;  %v3006_v17 = vpop.f32.mrf.mxu1 }
 0x99c   : > { %v3040_v32 = vsel %vm1458_vm1, %v3039_v28, %v2985_v16  ;;  %v3041_v33 = vrot.slane %v2985_v16, 4  ;;  %v6092_v16 = vld [vmem:[%s8639_s12 + $0x8] sm:$0xff]  ;;  %v6091_v17 = vld [vmem:[%s8639_s12] sm:$0xff] }
 0x99d   : > { %v3046_v35 = vperm.slane %v3040_v32, %v7418_v25  ;;  %3177 = vmatpush.bf16.msrb.mxu3 %v6092_v16  ;;  %v6100_v16 = vld [vmem:[%s6993_s25 + $0x18] sm:$0xff] }
 0x99e   : > { %v3042_v36 = vsel %vm1458_vm1, %v3023_v13, %v3041_v33  ;;  %3411 = vmatpush.bf16.msra.mxu2 %v6100_v16 }
 0x99f   : > { %v3050_v39 = vperm.slane %v3042_v36, %v7418_v25  ;;  %v3051_v41 = vrot.slane %v3046_v35, 4  ;;  %v3054_v44 = vsel %vm1458_vm1, %v3046_v35, %v3053_v34 }
 0x9a0   : > { %v3062_v20 = vperm.slane %v3054_v44, %v7427_v38 }
 0x9a1   : > { %v3052_v45 = vsel %vm1458_vm1, %v3051_v41, %v3034_v26  ;;  %v3063_v46 = vrot.slane %v3050_v39, 4  ;;  %v3066_v48 = vsel %vm1458_vm1, %v3050_v39, %v3065_v37  ;;  %3178 = vmatpush.bf16.msrb.mxu3 %v6091_v17  ;;  %v6339_v41 = vld [vmem:[#allocation7] ss:$0 sm:$0xff]  ;;  %v6102_v17 = vld [vmem:[%s8593_s3 + $0x18] sm:$0xff] }
 0x9a2   : > { %v3058_v49 = vperm.slane %v3052_v45, %v7427_v38  ;;  %v3074_v50 = vperm.slane %v3066_v48, %v7427_v38  ;;  %v3077_v52 = vrot.slane %v3062_v20, 4 }
 0x9a3   : > { %v3064_v53 = vsel %vm1458_vm1, %v3063_v46, %v3038_v30  ;;  %v2987_v40 = vpop.f32.mrf.mxu0 }
 0x9a4   : > { %v3070_v54 = vperm.slane %v3064_v53, %v7427_v38  ;;  %v3075_v42 = vrot.slane %v3058_v49, 4  ;;  %v3078_v55 = vsel %vm1458_vm1, 0.0, %v3077_v52  ;;  %v3081_v56 = vrot.slane %v3074_v50, 4 }
 0x9a5   : > { %v3083_v57 = vsel %vm1458_vm1, %v3077_v52, %v3058_v49  ;;  %v3088_v58 = vrot.slane %v3078_v55, 4  ;;  %v6098_v55 = vld [vmem:[%s8644_s29 + $0x18] sm:$0xff]  ;;  %3439 = vmatpush.bf16.msra.mxu3 %v6102_v17 }
 0x9a6   : > { %v3076_v59 = vsel %vm1458_vm1, 0.0, %v3075_v42  ;;  %v3079_v60 = vrot.slane %v3070_v54, 4  ;;  %v3082_v63 = vsel %vm1458_vm1, 0.0, %v3081_v56  ;;  %v3087_v61 = vperm.slane %v3083_v57, %v7418_v25  ;;  %v6093_v42 = vld [vmem:[%s8643_s20] sm:$0xff]  ;;  %3316 = vmatpush.bf16.msra.mxu1 %v6098_v55  ;;  %v6097_v57 = vld [vmem:[%s8644_s29 + $0x10] sm:$0xff] }
 0x9a7   : > { %v3099_v62 = vrot.slane %v3082_v63, 4  ;;  %v3089_v0 = vsel %vm1458_vm1, %v3088_v58, %v3076_v59  ;;  %v3094_v1 = vsel %vm1458_vm1, %v3081_v56, %v3070_v54  ;;  %v6094_v54 = vld [vmem:[%s8643_s20 + $0x8] sm:$0xff] }
 0x9a8   : > { %v3080_v2 = vsel %vm1458_vm1, 0.0, %v3079_v60  ;;  %v3093_v4 = vperm.slane %v3089_v0, %v7418_v25  ;;  %v3098_v47 = vperm.slane %v3094_v1, %v7418_v25  ;;  %v3107_v5 = vrot.slane %v3087_v61, 4  ;;  %3272 = vmatpush.bf16.msra.mxu0 %v6094_v54  ;;  %v6340_v1 = vld [vmem:[#allocation8] ss:$0 sm:$0xff] }
 0x9a9   : > { %v3100_v6 = vsel %vm1458_vm1, %v3099_v62, %v3080_v2 }
 0x9aa   : > { %v3104_v7 = vperm.slane %v3100_v6, %v7418_v25  ;;  %v3119_v8 = vrot.slane %v3098_v47, 4  ;;  %v3105_v12 = vrot.slane %v3093_v4, 4  ;;  %v3108_v9 = vsel %vm1458_vm1, %v3093_v4, %v3107_v5  ;;  %3317 = vmatpush.bf16.msra.mxu1 %v6097_v57  ;;  %v6341_v4 = vld [vmem:[#allocation10] ss:$0 sm:$0xff] }
 0x9ab   : > { %v3116_v19 = vperm.slane %v3108_v9, %v7427_v38  ;;  %v6342_v9 = vld [vmem:[#allocation11] ss:$0 sm:$0xff] }
 0x9ac   : > { %v3120_v10 = vsel %vm1458_vm1, %v3104_v7, %v3119_v8  ;;  %v3106_v11 = vsel %vm1458_vm1, %v3105_v12, %v3087_v61  ;;  %v3117_v14 = vrot.slane %v3104_v7, 4  ;;  %3273 = vmatpush.bf16.msra.mxu0 %v6093_v42  ;;  %v6096_v8 = vld [vmem:[%s8644_s29 + $0x8] sm:$0xff]  ;;  %v6095_v12 = vld [vmem:[%s8644_s29] sm:$0xff] }
 0x9ad   : > { %v3128_v15 = vperm.slane %v3120_v10, %v7427_v38  ;;  %v3112_v13 = vperm.slane %v3106_v11, %v7427_v38  ;;  %v3135_v29 = vrot.slane %v3116_v19, 4 }
 0x9ae   : > { %v3118_v18 = vsel %vm1458_vm1, %v3117_v14, %v3098_v47  ;;  %3318 = vmatpush.bf16.msra.mxu1 %v6096_v8 }
 0x9af   : > { %v3133_v21 = vrot.slane %v3128_v15, 4  ;;  %v3124_v22 = vperm.slane %v3118_v18, %v7427_v38  ;;  %v3131_v23 = vrot.slane %v3112_v13, 4  ;;  %v3136_v30 = vsel %vm1458_vm1, %v3128_v15, %v3135_v29  ;;  %v6343_v18 = vld [vmem:[#allocation13] ss:$0 sm:$0xff] }
 0x9b1   : > { %v3134_v24 = vsel %vm1458_vm1, %v3133_v21, %v3116_v19  ;;  %v3129_v26 = vrot.slane %v3124_v22, 4  ;;  %v3132_v27 = vsel %vm1458_vm1, %v3124_v22, %v3131_v23 }
 0x9b2   : > { %3142 = vrot.lane.b32.xlu0 %v3134_v24, %s8640_s14  ;;  %3138 = vrot.lane.b32.xlu2 %v3132_v27, %s8641_s17 }
 0x9b3   : > { %v3130_v28 = vsel %vm1458_vm1, %v3129_v26, %v3112_v13  ;;  %3319 = vmatpush.bf16.msra.mxu1 %v6095_v12 }
 0x9ba   : > { %3146 = vrot.lane.b32.xlu2 %v3136_v30, %s8642_s19 }
 0xa0c   : > { %v3139_v32 = vpop.permute.xlu2 %3138 }
 0xa0d   : > { %v3149_v33 = vsel %vm1816_vm2, %v3130_v28, %v3139_v32  ;;  %v6104_v32 = vld [vmem:[%s8621_s23 + $0x18] sm:$0xff] }
 0xa0e   : > { %3467 = vmatpush.bf16.msrb.mxu0 %v6104_v32 }
 0xa14   : > { %v3147_v35 = vpop.permute.xlu2 %3146 }
 0xa24   : > { %v3143_v34 = vpop.permute.xlu0 %3142 }
 0xa25   : > { %v3150_v36 = vsel %vm2205_vm8, %v3149_v33, %v3143_v34  ;;  %v6099_v33 = vld [vmem:[%s6993_s25 + $0x10] sm:$0xff] }
 0xa26   : > { %v3151_v37 = vsel %vm2207_vm9, %v3150_v36, %v3147_v35  ;;  %v6101_v34 = vld [vmem:[%s8593_s3 + $0x10] sm:$0xff]  ;;  %3412 = vmatpush.bf16.msra.mxu2 %v6099_v33  ;;  %s5454_s3 = scalar_lea.sflag [#allocation22], %s7857_s28 }
 0xa27   : > { %v3152_v39 = vpack.c.bf16 %v3151_v37, %v3151_v37  ;;  %v6103_v35 = vld [vmem:[%s8621_s23 + $0x10] sm:$0xff]  ;;  %3440 = vmatpush.bf16.msra.mxu3 %v6101_v34 }
 0xa28   : > { %3468 = vmatpush.bf16.msrb.mxu0 %v6103_v35 }
 0xa29   : > { %5868 = vmatmul.msk.bf16.vlgmr.msrb.gmra.mxu3 %vm1374_vm0, %v3152_v39 }
 0xaac   : > { %v3180_v44 = vpop.f32.mrf.mxu3 }
 0xaad   : > { %v3181_v20 = vadd.f32 %v6339_v41, %v3180_v44 }
 0xaaf   : > { %v3200_v45 = vadd.f32 %v3181_v20, %v7671_v31 }
 0xab1   : > { %v3203_v46 = vsel %vm1374_vm0, %v3200_v45, 0.0 }
 0xab2   : > { %3204 = vadd.xlane.f32.xlu1 %v3203_v46 }
 0xab4   : > { %v3182_v48 = vpop.f32.mrf.mxu3 }
 0xb25   : > { %v3205_v49 = vpop.xlane.xlu1 %3204 }
 0xb26   : > { %v3206_v50 = vmul.f32 %v3205_v49, %v7659_v3  ;;  %v6344_v49 = vld [vmem:[#allocation14] ss:$0 sm:$0xff] }
 0xb28   : > { %v3207_v52 = vsub.f32 %v3200_v45, %v3206_v50 }
 0xb2a   : > { %v3208_v53 = vmul.f32 %v3207_v52, %v3207_v52 }
 0xb2c   : > { %v3209_v40 = vsel %vm1374_vm0, %v3208_v53, 0.0 }
 0xb2d   : > { %3210 = vadd.xlane.f32.xlu2 %v3209_v40 }
 0xba0   : > { %v3211_v56 = vpop.xlane.xlu2 %3210 }
 0xba1   : > { %v3212_v31 = vmul.f32 %v3211_v56, %v7659_v3  ;;  %v6347_v56 = vld [vmem:[%s8619_s15 + $0x1] ss:$0 sm:$0xff] }
 0xba3   : > { %v3213_v58 = vadd.f32 1e-05, %v3212_v31  ;;  %v6348_v31 = vld [vmem:[%s8620_s18 + $0x1] ss:$0 sm:$0xff] }
 0xba5   : > { %6403 = vrsqrt.f32 %v3213_v58  ;;  %vm3220_vm12 = vweird.f32 %v3213_v58 }
 0xbab   : > { %v6404_v59 = vpop.eup %6403 }
 0xbac   : > { %v3215_v60 = vmul.f32 %v6404_v59, %v3213_v58  ;;  %vm3221_vm11 = vweird.f32 %v6404_v59 }
 0xbad   : > { %vm3222_vm13 = vmor %vm3220_vm12, %vm3221_vm11 }
 0xbae   : > { %v3216_v63 = vmul.f32 %v6404_v59, %v3215_v60 }
 0xbb0   : > { %v3217_v61 = vmul.f32 0.5, %v3216_v63 }
 0xbb2   : > { %v3218_v62 = vsub.f32 1.5, %v3217_v61 }
 0xbb4   : > { %v3219_v0 = vmul.f32 %v6404_v59, %v3218_v62 }
 0xbb6   : > { %v3223_v2 = vsel %vm3222_vm13, %v6404_v59, %v3219_v0 }
 0xbb7   : > { %v3224_v47 = vmul.f32 %v3223_v2, %v3207_v52  ;;  %v6345_v52 = vld [vmem:[#allocation16] ss:$0 sm:$0xff] }
 0xbb9   : > { %v3228_v5 = vmul.f32 %v6340_v1, %v3224_v47 }
 0xbbb   : > { %v3232_v6 = vadd.f32 %v6341_v4, %v3228_v5 }
 0xbbd   : > { %v3247_v7 = vpack.c.bf16 %v3232_v6, %v3232_v6 }
 0xbbf   : > { %5877 = vmatmul.msk.bf16.vlgmr.msra.gmra.mxu0 %vm1374_vm0, %v3247_v7 }
 0xc3c   : > { %v3275_v10 = vpop.f32.mrf.mxu0 }
 0xc3d   : > { %v3276_v11 = vadd.f32 %v6342_v9, %v3275_v10 }
 0xc3f   : > { %v3279_v14 = vmax.f32 %v3276_v11, 0.0 }
 0xc41   : > { %v3280_v15 = vpack.c.bf16 %v3279_v14, %v3279_v14 }
 0xc43   : > { %5894 = vmatmul.msk.bf16.vlgmr.msra.gmra.mxu1 %vm3308_vm14, %v3280_v15 }
 0xc44   : > { %v3277_v13 = vpop.f32.mrf.mxu0 }
 0xcc0   : > { %v3321_v19 = vpop.f32.mrf.mxu1 }
 0xcc1   : > { %v3322_v21 = vadd.f32 %v6343_v18, %v3321_v19 }
 0xcc3   : > { %v3325_v22 = vadd.f32 %v3322_v21, %v3232_v6 }
 0xcc5   : > { %v3328_v23 = vsel %vm1374_vm0, %v3325_v22, 0.0 }
 0xcc6   : > { %3329 = vadd.xlane.f32.xlu0 %v3328_v23 }
 0xcc8   : > { %v3323_v24 = vpop.f32.mrf.mxu1 }
 0xd39   : > { %v3330_v26 = vpop.xlane.xlu0 %3329 }
 0xd3a   : > { %v3331_v27 = vmul.f32 %v3330_v26, %v7659_v3 }
 0xd3c   : > { %v3332_v28 = vsub.f32 %v3325_v22, %v3331_v27 }
 0xd3e   : > { %v3333_v29 = vmul.f32 %v3332_v28, %v3332_v28 }
 0xd40   : > { %v3334_v30 = vsel %vm1374_vm0, %v3333_v29, 0.0 }
 0xd41   : > { %3335 = vadd.xlane.f32.xlu1 %v3334_v30 }
 0xdb4   : > { %v3336_v36 = vpop.xlane.xlu1 %3335 }
 0xdb5   : > { %v3337_v37 = vmul.f32 %v3336_v36, %v7659_v3 }
 0xdb7   : > { %v3338_v39 = vadd.f32 1e-05, %v3337_v37 }
 0xdb9   : > { %6405 = vrsqrt.f32 %v3338_v39  ;;  %vm3345_vm4 = vweird.f32 %v3338_v39 }
 0xdbf   : > { %v6406_v41 = vpop.eup %6405 }
 0xdc0   : > { %v3340_v44 = vmul.f32 %v6406_v41, %v3338_v39  ;;  %vm3346_vm15 = vweird.f32 %v6406_v41 }
 0xdc1   : > { %vm3347_vm5 = vmor %vm3345_vm4, %vm3346_vm15 }
 0xdc2   : > { %v3341_v20 = vmul.f32 %v6406_v41, %v3340_v44 }
 0xdc4   : > { %v3342_v45 = vmul.f32 0.5, %v3341_v20 }
 0xdc6   : > { %v3343_v46 = vsub.f32 1.5, %v3342_v45 }
 0xdc8   : > { %v3344_v48 = vmul.f32 %v6406_v41, %v3343_v46 }
 0xdca   : > { %v3348_v50 = vsel %vm3347_vm5, %v6406_v41, %v3344_v48 }
 0xdcb   : > { %v3349_v53 = vmul.f32 %v3348_v50, %v3332_v28 }
 0xdcd   : > { %v3353_v40 = vmul.f32 %v6344_v49, %v3349_v53 }
 0xdcf   : > { %v7942_v54 = vadd.f32 %v6345_v52, %v3353_v40 }
 0xdd1   : > { %v3386_v42 = vpack.c.bf16 %v7942_v54, %v7942_v54 }
 0xdd3   : > { %5923 = vmatmul.msk.bf16.vlgmr.msra.gmra.mxu2 %vm1374_vm0, %v3386_v42  ;;  %5932 = vmatmul.msk.bf16.vlgmr.msra.gmra.mxu3 %vm1374_vm0, %v3386_v42 }
 0xdd4   : > { %5941 = vmatmul.msk.bf16.vlgmr.msrb.gmra.mxu0 %vm1374_vm0, %v3386_v42 }
 0xe51   : > { %v7949_v55 = vpop.f32.mrf.mxu0 }
 0xe56   : > { %v3414_v57 = vpop.f32.mrf.mxu2  ;;  %v3442_v58 = vpop.f32.mrf.mxu3 }
 0xe57   : > { %v3415_v59 = vadd.f32 %v6347_v56, %v3414_v57  ;;  %v3443_v60 = vadd.f32 %v6348_v31, %v3442_v58 }
 0xe59   : > { %v3472_v63 = vpop.f32.mrf.mxu0  ;;  %3601 = vrot.lane.b32.xlu2 %v3443_v60, %s8635_s5  ;;  %3595 = vrot.lane.b32.xlu1 %v3443_v60, %s8632_s10  ;;  %v3606_v7 = vrot.slane %v3443_v60, 4  ;;  %v3486_v16 = vrot.slane %v3415_v59, 4 }
 0xe5a   : > { %3475 = vrot.lane.b32.xlu0 %v3415_v59, %s8632_s10 }
 0xe5e   : > { %v3416_v61 = vpop.f32.mrf.mxu2  ;;  %v3444_v62 = vpop.f32.mrf.mxu3 }
 0xe61   : > { %3598 = vrot.lane.b32.xlu1 %v3443_v60, %s8634_s4 }
 0xe69   : > { %3478 = vrot.lane.b32.xlu1 %v3415_v59, %s8634_s4 }
 0xe71   : > { %3481 = vrot.lane.b32.xlu1 %v3415_v59, %s8635_s5 }
 0xeb3   : > { %v3602_v0 = vpop.permute.xlu2 %3601 }
 0xeb4   : > { %v3616_v4 = vrot.slane %v3602_v0, 4 }
 0xecb   : > { %v3596_v1 = vpop.permute.xlu1 %3595 }
 0xecc   : > { %v3618_v2 = vrot.slane %v3596_v1, 4  ;;  %v3617_v5 = vsel %vm1458_vm1, %v3616_v4, %v3596_v1  ;;  %v3476_v44 = vpop.permute.xlu0 %3475 }
 0xecd   : > { %v3623_v8 = vperm.slane %v3617_v5, %v7418_v25  ;;  %v3498_v31 = vrot.slane %v3476_v44, 4 }
 0xece   : > { %v3619_v47 = vsel %vm1458_vm1, %v3602_v0, %v3618_v2 }
 0xecf   : > { %v3627_v6 = vperm.slane %v3619_v47, %v7418_v25  ;;  %v3628_v13 = vrot.slane %v3623_v8, 4 }
 0xed1   : > { %v3640_v11 = vrot.slane %v3627_v6, 4 }
 0xed3   : > { %v3599_v12 = vpop.permute.xlu1 %3598 }
 0xed4   : > { %v3604_v9 = vrot.slane %v3599_v12, 4  ;;  %v3607_v10 = vsel %vm1458_vm1, %v3599_v12, %v3606_v7 }
 0xed5   : > { %v3615_v14 = vperm.slane %v3607_v10, %v7418_v25 }
 0xed6   : > { %v3605_v15 = vsel %vm1458_vm1, %v3604_v9, %v3443_v60 }
 0xed7   : > { %v3611_v18 = vperm.slane %v3605_v15, %v7418_v25  ;;  %v3641_v19 = vsel %vm1458_vm1, %v3640_v11, %v3615_v14  ;;  %v3642_v21 = vrot.slane %v3615_v14, 4 }
 0xed8   : > { %v3647_v22 = vperm.slane %v3641_v19, %v7427_v38 }
 0xed9   : > { %v3629_v23 = vsel %vm1458_vm1, %v3628_v13, %v3611_v18  ;;  %v3630_v24 = vrot.slane %v3611_v18, 4  ;;  %v3643_v26 = vsel %vm1458_vm1, %v3627_v6, %v3642_v21 }
 0xeda   : > { %v3635_v27 = vperm.slane %v3629_v23, %v7427_v38  ;;  %v3651_v28 = vperm.slane %v3643_v26, %v7427_v38  ;;  %v3656_v32 = vrot.slane %v3647_v22, 4 }
 0xedb   : > { %v3631_v29 = vsel %vm1458_vm1, %v3623_v8, %v3630_v24  ;;  %v3479_v30 = vpop.permute.xlu1 %3478 }
 0xedc   : > { %v3639_v17 = vperm.slane %v3631_v29, %v7427_v38  ;;  %v3658_v33 = vrot.slane %v3651_v28, 4  ;;  %v3484_v34 = vrot.slane %v3479_v30, 4  ;;  %v3487_v35 = vsel %vm1458_vm1, %v3479_v30, %v3486_v16 }
 0xedd   : > { %v3652_v36 = vrot.slane %v3635_v27, 4  ;;  %v3495_v48 = vperm.slane %v3487_v35, %v7418_v25  ;;  %v3657_v50 = vsel %vm1458_vm1, 0.0, %v3656_v32 }
 0xede   : > { %v3654_v37 = vrot.slane %v3639_v17, 4  ;;  %v3659_v39 = vsel %vm1458_vm1, 0.0, %v3658_v33  ;;  %v3671_v41 = vsel %vm1458_vm1, %v3658_v33, %v3647_v22  ;;  %v3485_v46 = vsel %vm1458_vm1, %v3484_v34, %v3415_v59 }
 0xedf   : > { %v3675_v20 = vperm.slane %v3671_v41, %v7418_v25  ;;  %v3676_v45 = vrot.slane %v3659_v39, 4  ;;  %v3491_v56 = vperm.slane %v3485_v46, %v7418_v25  ;;  %v3653_v57 = vsel %vm1458_vm1, 0.0, %v3652_v36 }
 0xee0   : > { %v3655_v49 = vsel %vm1458_vm1, 0.0, %v3654_v37  ;;  %v3660_v52 = vsel %vm1458_vm1, %v3654_v37, %v3635_v27  ;;  %v3522_v60 = vrot.slane %v3495_v48, 4 }
 0xee1   : > { %v3665_v53 = vrot.slane %v3655_v49, 4  ;;  %v3677_v40 = vsel %vm1458_vm1, %v3676_v45, %v3657_v50  ;;  %v3696_v42 = vrot.slane %v3675_v20, 4  ;;  %v3664_v59 = vperm.slane %v3660_v52, %v7418_v25 }
 0xee2   : > { %v3681_v58 = vperm.slane %v3677_v40, %v7418_v25  ;;  %v3510_v4 = vrot.slane %v3491_v56, 4 }
 0xee3   : > { %v3482_v63 = vpop.permute.xlu1 %3481  ;;  %v3666_v61 = vsel %vm1458_vm1, %v3665_v53, %v3653_v57  ;;  %v3684_v5 = vrot.slane %v3664_v59, 4 }
 0xee4   : > { %v3694_v62 = vrot.slane %v3681_v58, 4  ;;  %v3496_v0 = vrot.slane %v3482_v63, 4  ;;  %v3499_v1 = vsel %vm1458_vm1, %v3482_v63, %v3498_v31  ;;  %v3670_v2 = vperm.slane %v3666_v61, %v7418_v25 }
 0xee5   : > { %v3507_v47 = vperm.slane %v3499_v1, %v7418_v25  ;;  %v3697_v6 = vsel %vm1458_vm1, %v3681_v58, %v3696_v42 }
 0xee6   : > { %v3497_v7 = vsel %vm1458_vm1, %v3496_v0, %v3476_v44  ;;  %v3705_v8 = vperm.slane %v3697_v6, %v7427_v38  ;;  %v3682_v12 = vrot.slane %v3670_v2, 4  ;;  %v3695_v9 = vsel %vm1458_vm1, %v3694_v62, %v3675_v20 }
 0xee7   : > { %v3503_v10 = vperm.slane %v3497_v7, %v7418_v25  ;;  %v3520_v11 = vrot.slane %v3507_v47, 4  ;;  %v3523_v14 = vsel %vm1458_vm1, %v3507_v47, %v3522_v60  ;;  %v3685_v15 = vsel %vm1458_vm1, %v3670_v2, %v3684_v5 }
 0xee8   : > { %v3531_v13 = vperm.slane %v3523_v14, %v7427_v38  ;;  %v3693_v18 = vperm.slane %v3685_v15, %v7427_v38  ;;  %v3710_v19 = vrot.slane %v3705_v8, 4  ;;  %v3683_v21 = vsel %vm1458_vm1, %v3682_v12, %v3664_v59 }
 0xee9   : > { %v3508_v22 = vrot.slane %v3503_v10, 4  ;;  %v3511_v23 = vsel %vm1458_vm1, %v3503_v10, %v3510_v4  ;;  %v3521_v24 = vsel %vm1458_vm1, %v3520_v11, %v3495_v48  ;;  %v3689_v26 = vperm.slane %v3683_v21, %v7427_v38 }
 0xeea   : > { %v3519_v27 = vperm.slane %v3511_v23, %v7427_v38  ;;  %v3527_v28 = vperm.slane %v3521_v24, %v7427_v38  ;;  %v3538_v29 = vrot.slane %v3531_v13, 4  ;;  %v3711_v30 = vsel %vm1458_vm1, %v3710_v19, %v3693_v18 }
 0xeeb   : > { %v3509_v16 = vsel %vm1458_vm1, %v3508_v22, %v3491_v56  ;;  %v3840_v17 = vpack.c.bf16 %v3711_v30, %v3711_v30  ;;  %v3701_v32 = vperm.slane %v3695_v9, %v7427_v38  ;;  %v3712_v33 = vrot.slane %v3693_v18, 4 }
 0xeec   : > { %v3515_v34 = vperm.slane %v3509_v16, %v7427_v38  ;;  %v3534_v35 = vrot.slane %v3519_v27, 4  ;;  %v3536_v36 = vrot.slane %v3527_v28, 4  ;;  %v3539_v37 = vsel %vm1458_vm1, 0.0, %v3538_v29 }
 0xeed   : > { %v3551_v39 = vsel %vm1458_vm1, %v3538_v29, %v3527_v28  ;;  %v3556_v41 = vrot.slane %v3539_v37, 4  ;;  %v3884_v44 = vsel %vm1816_vm2, %v3840_v17, 0  ;;  %v3706_v20 = vrot.slane %v3701_v32, 4 }
 0xeee   : > { %v3532_v45 = vrot.slane %v3515_v34, 4  ;;  %v3535_v46 = vsel %vm1458_vm1, 0.0, %v3534_v35  ;;  %v3537_v48 = vsel %vm1458_vm1, 0.0, %v3536_v36  ;;  %v3540_v49 = vsel %vm1458_vm1, %v3534_v35, %v3515_v34  ;;  %3893 = vmatpush.bf16.xpose.msrb.mxu3 %v3884_v44 }
 0xeef   : > { %v3544_v50 = vperm.slane %v3540_v49, %v7418_v25  ;;  %v3545_v52 = vrot.slane %v3535_v46, 4  ;;  %v3555_v53 = vperm.slane %v3551_v39, %v7418_v25  ;;  %v3557_v40 = vsel %vm1458_vm1, %v3556_v41, %v3537_v48 }
 0xef0   : > { %v3533_v42 = vsel %vm1458_vm1, 0.0, %v3532_v45  ;;  %v3561_v56 = vperm.slane %v3557_v40, %v7418_v25  ;;  %v3707_v31 = vsel %vm1458_vm1, %v3706_v20, %v3689_v26  ;;  %v3713_v57 = vsel %vm1458_vm1, %v3705_v8, %v3712_v33 }
 0xef1   : > { %v3546_v58 = vsel %vm1458_vm1, %v3545_v52, %v3533_v42  ;;  %v3564_v59 = vrot.slane %v3544_v50, 4  ;;  %v3576_v60 = vrot.slane %v3555_v53, 4  ;;  %v3838_v63 = vpack.c.bf16 %v3707_v31, %v3707_v31 }
 0xef2   : > { %v3550_v61 = vperm.slane %v3546_v58, %v7418_v25  ;;  %v3574_v62 = vrot.slane %v3561_v56, 4  ;;  %v3841_v0 = vpack.c.bf16 %v3713_v57, %v3713_v57  ;;  %v3708_v1 = vrot.slane %v3689_v26, 4 }
 0xef3   : > { %v3846_v2 = vsel %vm1816_vm2, %v3838_v63, 0  ;;  %v3577_v4 = vsel %vm1458_vm1, %v3561_v56, %v3576_v60  ;;  %v6346_v56 = vld [vmem:[%s8624_s24 + $0x1] ss:$0 sm:$0xff] }
 0xef4   : > { %v3575_v47 = vsel %vm1458_vm1, %v3574_v62, %v3555_v53  ;;  %3855 = vmatpush.bf16.xpose.msrb.mxu1 %v3846_v2  ;;  %v3903_v5 = vsel %vm1816_vm2, %v3841_v0, 0  ;;  %v3709_v6 = vsel %vm1458_vm1, %v3701_v32, %v3708_v1  ;;  %v3565_v7 = vsel %vm1458_vm1, %v3550_v61, %v3564_v59 }
 0xef5   : > { %3912 = vmatpush.bf16.xpose.msra.mxu0 %v3903_v5  ;;  %v3839_v8 = vpack.c.bf16 %v3709_v6, %v3709_v6  ;;  %v3573_v12 = vperm.slane %v3565_v7, %v7427_v38  ;;  %v3585_v9 = vperm.slane %v3577_v4, %v7427_v38  ;;  %v3562_v10 = vrot.slane %v3550_v61, 4 }
 0xef6   : > { %v3581_v11 = vperm.slane %v3575_v47, %v7427_v38  ;;  %v3471_v31 = vadd.f32 %v6346_v56, %v7949_v55 }
 0xef7   : > { %v3865_v14 = vsel %vm1816_vm2, %v3839_v8, 0  ;;  %v3590_v15 = vrot.slane %v3585_v9, 4  ;;  %v3563_v13 = vsel %vm1458_vm1, %v3562_v10, %v3544_v50  ;;  %v3592_v18 = vrot.slane %v3573_v12, 4 }
 0xef8   : > { %3874 = vmatpush.bf16.xpose.msrb.mxu2 %v3865_v14  ;;  %v3569_v19 = vperm.slane %v3563_v13, %v7427_v38  ;;  %v3586_v21 = vrot.slane %v3581_v11, 4 }
 0xef9   : > { %v3591_v22 = vsel %vm1458_vm1, %v3590_v15, %v3573_v12  ;;  %v3593_v23 = vsel %vm1458_vm1, %v3585_v9, %v3592_v18 }
 0xefa   : > { %v3836_v24 = vpack.c.bf16 %v3591_v22, %v3591_v22  ;;  %v3587_v26 = vsel %vm1458_vm1, %v3586_v21, %v3569_v19  ;;  %v3837_v27 = vpack.c.bf16 %v3593_v23, %v3593_v23  ;;  %v3588_v28 = vrot.slane %v3569_v19, 4 }
 0xefb   : > { %v3834_v29 = vpack.c.bf16 %v3587_v26, %v3587_v26 }
 0xefc   : > { %5944 = vmatmul.msk.bf16.vlgmr.msrb.gmra.mxu3 %vm1816_vm2, %v3836_v24  ;;  %5945 = vmatmul.msk.bf16.vlgmr.msra.gmra.mxu0 %vm1816_vm2, %v3837_v27  ;;  %v3589_v30 = vsel %vm1458_vm1, %v3581_v11, %v3588_v28  ;;  %v3726_v11 = vrot.slane %v3471_v31, 4 }
 0xefd   : > { %5942 = vmatmul.msk.bf16.vlgmr.msrb.gmra.mxu1 %vm1816_vm2, %v3834_v29  ;;  %v3835_v16 = vpack.c.bf16 %v3589_v30, %v3589_v30 }
 0xeff   : > { %5943 = vmatmul.msk.bf16.vlgmr.msrb.gmra.mxu2 %vm1816_vm2, %v3835_v16 }
 0xf79   : > { %v3914_v17 = vpop.f32.mrf.mxu0 }
 0xf7a   : > { %v3857_v32 = vpop.f32.mrf.mxu1  ;;  %v3921_v33 = vmul.f32 0.35355338, %v3914_v17 }
 0xf7b   : > { %v3918_v34 = vmul.f32 0.35355338, %v3857_v32 }
 0xf7c   : > { %v3925_v35 = vadd.f32 %v3921_v33, %v7513_v43 }
 0xf7d   : > { %v3922_v36 = vadd.f32 %v3918_v34, %v7513_v43 }
 0xf7e   : > { %v3935_v37 = vsel %vm1816_vm2, %v3925_v35, -inf }
 0xf7f   : > { %v3895_v39 = vpop.f32.mrf.mxu3  ;;  %3936 = vmax.xlane.f32.xlu2 %v3935_v37  ;;  %v3926_v41 = vsel %vm1816_vm2, %v3922_v36, -inf }
 0xf80   : > { %v3920_v44 = vmul.f32 0.35355338, %v3895_v39  ;;  %3927 = vmax.xlane.f32.xlu0 %v3926_v41 }
 0xf81   : > { %v3916_v20 = vpop.f32.mrf.mxu0 }
 0xf82   : > { %v3859_v45 = vpop.f32.mrf.mxu1  ;;  %v3876_v46 = vpop.f32.mrf.mxu2  ;;  %v3924_v48 = vadd.f32 %v3920_v44, %v7513_v43 }
 0xf83   : > { %v3919_v49 = vmul.f32 0.35355338, %v3876_v46 }
 0xf84   : > { %v3932_v50 = vsel %vm1816_vm2, %v3924_v48, -inf }
 0xf85   : > { %3933 = vmax.xlane.f32.xlu1 %v3932_v50  ;;  %v3923_v52 = vadd.f32 %v3919_v49, %v7513_v43 }
 0xf87   : > { %v3897_v53 = vpop.f32.mrf.mxu3  ;;  %v3929_v40 = vsel %vm1816_vm2, %v3923_v52, -inf }
 0xf88   : > { %3930 = vmax.xlane.f32.xlu2 %v3929_v40 }
 0xf8a   : > { %v3878_v42 = vpop.f32.mrf.mxu2 }
 0xf94   : > { %3718 = vrot.lane.b32.xlu0 %v3471_v31, %s8634_s4 }
 0xf9e   : > { %3715 = vrot.lane.b32.xlu1 %v3471_v31, %s8632_s10 }
 0xfa0   : > { %3721 = vrot.lane.b32.xlu2 %v3471_v31, %s8635_s5 }
 0xff2   : > { %v3937_v57 = vpop.xlane.xlu2 %3936 }
 0xff3   : > { %v3928_v58 = vpop.xlane.xlu0 %3927  ;;  %v3941_v61 = vsub.f32 %v3925_v35, %v3937_v57 }
 0xff4   : > { %v3938_v59 = vsub.f32 %v3922_v36, %v3928_v58 }
 0xff5   : > { %v3948_v4 = vmul.f32 1.442695, %v3941_v61 }
 0xff6   : > { %v3942_v60 = vmul.f32 1.442695, %v3938_v59 }
 0xff8   : > { %6407 = vpow2.f32 %v3942_v60  ;;  %v3934_v43 = vpop.xlane.xlu1 %3933 }
 0xff9   : > { %v3940_v63 = vsub.f32 %v3924_v48, %v3934_v43 }
 0xffb   : > { %v3946_v62 = vmul.f32 1.442695, %v3940_v63  ;;  %v3931_v0 = vpop.xlane.xlu2 %3930 }
 0xffc   : > { %v3939_v1 = vsub.f32 %v3923_v52, %v3931_v0 }
 0xffd   : > { %6409 = vpow2.f32 %v3946_v62 }
 0xffe   : > { %v8060_v2 = vpop.eup %6407  ;;  %v3944_v55 = vmul.f32 1.442695, %v3939_v1 }
 0xfff   : > { %v3950_v47 = vsel %vm1816_vm2, %v8060_v2, 0.0 }
0x1000   : > { %6411 = vpow2.f32 %v3944_v55  ;;  %3951 = vadd.xlane.f32.xlu2 %v3950_v47 }
0x1001   : > { %6413 = vpow2.f32 %v3948_v4 }
0x1003   : > { %v8064_v5 = vpop.eup %6409  ;;  %v3722_v15 = vpop.permute.xlu2 %3721 }
0x1004   : > { %v3956_v6 = vsel %vm1816_vm2, %v8064_v5, 0.0  ;;  %v3736_v21 = vrot.slane %v3722_v15, 4 }
0x1005   : > { %3957 = vadd.xlane.f32.xlu0 %v3956_v6 }
0x1006   : > { %v8068_v7 = vpop.eup %6411  ;;  %v3719_v8 = vpop.permute.xlu0 %3718 }
0x1007   : > { %v3724_v12 = vrot.slane %v3719_v8, 4  ;;  %v3953_v9 = vsel %vm1816_vm2, %v8068_v7, 0.0  ;;  %v8072_v10 = vpop.eup %6413  ;;  %v3727_v18 = vsel %vm1458_vm1, %v3719_v8, %v3726_v11 }
0x1008   : > { %3954 = vadd.xlane.f32.xlu1 %v3953_v9  ;;  %v3959_v13 = vsel %vm1816_vm2, %v8072_v10, 0.0  ;;  %v3735_v22 = vperm.slane %v3727_v18, %v7418_v25 }
0x1009   : > { %v3725_v14 = vsel %vm1458_vm1, %v3724_v12, %v3471_v31 }
0x100a   : > { %v3731_v19 = vperm.slane %v3725_v14, %v7418_v25  ;;  %v3762_v30 = vrot.slane %v3735_v22, 4 }
0x100c   : > { %v3750_v27 = vrot.slane %v3731_v19, 4 }
0x100d   : > { %3960 = vadd.xlane.f32.xlu0 %v3959_v13 }
0x1010   : > { %v3716_v23 = vpop.permute.xlu1 %3715 }
0x1011   : > { %v3737_v24 = vsel %vm1458_vm1, %v3736_v21, %v3716_v23  ;;  %v3738_v26 = vrot.slane %v3716_v23, 4 }
0x1012   : > { %v3743_v28 = vperm.slane %v3737_v24, %v7418_v25 }
0x1013   : > { %v3739_v29 = vsel %vm1458_vm1, %v3722_v15, %v3738_v26 }
0x1014   : > { %v3747_v16 = vperm.slane %v3739_v29, %v7418_v25  ;;  %v3748_v17 = vrot.slane %v3743_v28, 4  ;;  %v3751_v32 = vsel %vm1458_vm1, %v3743_v28, %v3750_v27 }
0x1015   : > { %v3759_v33 = vperm.slane %v3751_v32, %v7427_v38 }
0x1016   : > { %v3749_v34 = vsel %vm1458_vm1, %v3748_v17, %v3731_v19  ;;  %v3760_v35 = vrot.slane %v3747_v16, 4  ;;  %v3763_v36 = vsel %vm1458_vm1, %v3747_v16, %v3762_v30 }
0x1017   : > { %v3755_v37 = vperm.slane %v3749_v34, %v7427_v38  ;;  %v3771_v39 = vperm.slane %v3763_v36, %v7427_v38  ;;  %v3774_v41 = vrot.slane %v3759_v33, 4 }
0x1018   : > { %v3761_v44 = vsel %vm1458_vm1, %v3760_v35, %v3735_v22 }
0x1019   : > { %v3767_v20 = vperm.slane %v3761_v44, %v7427_v38  ;;  %v3772_v45 = vrot.slane %v3755_v37, 4  ;;  %v3775_v46 = vsel %vm1458_vm1, 0.0, %v3774_v41  ;;  %v3778_v48 = vrot.slane %v3771_v39, 4 }
0x101a   : > { %v3780_v49 = vsel %vm1458_vm1, %v3774_v41, %v3755_v37  ;;  %v3785_v50 = vrot.slane %v3775_v46, 4 }
0x101b   : > { %v3773_v52 = vsel %vm1458_vm1, 0.0, %v3772_v45  ;;  %v3776_v53 = vrot.slane %v3767_v20, 4  ;;  %v3779_v40 = vsel %vm1458_vm1, 0.0, %v3778_v48  ;;  %v3784_v42 = vperm.slane %v3780_v49, %v7418_v25 }
0x101c   : > { %v3786_v56 = vsel %vm1458_vm1, %v3785_v50, %v3773_v52  ;;  %v3791_v31 = vsel %vm1458_vm1, %v3778_v48, %v3767_v20  ;;  %v3796_v57 = vrot.slane %v3779_v40, 4 }
0x101d   : > { %v3777_v58 = vsel %vm1458_vm1, 0.0, %v3776_v53  ;;  %v3790_v59 = vperm.slane %v3786_v56, %v7418_v25  ;;  %v3804_v60 = vrot.slane %v3784_v42, 4  ;;  %v3795_v43 = vperm.slane %v3791_v31, %v7418_v25 }
0x101e   : > { %v3797_v63 = vsel %vm1458_vm1, %v3796_v57, %v3777_v58 }
0x101f   : > { %v3801_v61 = vperm.slane %v3797_v63, %v7418_v25  ;;  %v3805_v62 = vsel %vm1458_vm1, %v3790_v59, %v3804_v60  ;;  %v3816_v0 = vrot.slane %v3795_v43, 4  ;;  %v3802_v1 = vrot.slane %v3790_v59, 4 }
0x1020   : > { %v3813_v55 = vperm.slane %v3805_v62, %v7427_v38 }
0x1021   : > { %v3817_v4 = vsel %vm1458_vm1, %v3801_v61, %v3816_v0  ;;  %v3803_v47 = vsel %vm1458_vm1, %v3802_v1, %v3784_v42  ;;  %v3814_v6 = vrot.slane %v3801_v61, 4 }
0x1022   : > { %v3825_v8 = vperm.slane %v3817_v4, %v7427_v38  ;;  %v3832_v12 = vrot.slane %v3813_v55, 4  ;;  %v3809_v9 = vperm.slane %v3803_v47, %v7427_v38 }
0x1023   : > { %v3815_v11 = vsel %vm1458_vm1, %v3814_v6, %v3795_v43 }
0x1024   : > { %v3833_v14 = vsel %vm1458_vm1, %v3825_v8, %v3832_v12  ;;  %v3821_v15 = vperm.slane %v3815_v11, %v7427_v38  ;;  %v3828_v13 = vrot.slane %v3809_v9, 4  ;;  %v3830_v18 = vrot.slane %v3825_v8, 4 }
0x1025   : > { %v4029_v19 = vpack.c.bf16 %v3833_v14, %v3833_v14 }
0x1026   : > { %v3829_v21 = vsel %vm1458_vm1, %v3821_v15, %v3828_v13  ;;  %v3831_v22 = vsel %vm1458_vm1, %v3830_v18, %v3813_v55  ;;  %v3826_v23 = vrot.slane %v3821_v15, 4 }
0x1027   : > { %v4091_v24 = vsel %vm2008_vm3, %v4029_v19, 0  ;;  %v4027_v26 = vpack.c.bf16 %v3829_v21, %v3829_v21  ;;  %v4028_v27 = vpack.c.bf16 %v3831_v22, %v3831_v22 }
0x1028   : > { %4100 = vmatpush.bf16.msrb.mxu0 %v4091_v24  ;;  %v3827_v28 = vsel %vm1458_vm1, %v3826_v23, %v3809_v9 }
0x1029   : > { %v4053_v29 = vsel %vm2008_vm3, %v4027_v26, 0  ;;  %v4072_v30 = vsel %vm2008_vm3, %v4028_v27, 0  ;;  %v4026_v16 = vpack.c.bf16 %v3827_v28, %v3827_v28 }
0x102a   : > { %4062 = vmatpush.bf16.msra.mxu2 %v4053_v29  ;;  %4081 = vmatpush.bf16.msra.mxu3 %v4072_v30 }
0x102b   : > { %v4034_v17 = vsel %vm2008_vm3, %v4026_v16, 0 }
0x102c   : > { %4043 = vmatpush.bf16.msra.mxu1 %v4034_v17 }
0x1073   : > { %v3952_v32 = vpop.xlane.xlu2 %3951 }
0x1074   : > { %6415 = vrcp.f32 %v3952_v32  ;;  %v3973_v39 = vand.u32 2147483648, %v3952_v32  ;;  %v3971_v20 = vand.u32 2147483647, %v3952_v32  ;;  %vm3967_vm7 = vweird.f32 %v3952_v32 }
0x1076   : > { %v3974_v50 = vor.u32 1.1754944e-38, %v3973_v39  ;;  %vm3972_vm11 = vcmp.eq.f32.partialorder %v3971_v20, 8.507059e+37 }
0x1078   : > { %v3958_v33 = vpop.xlane.xlu0 %3957 }
0x1079   : > { %6417 = vrcp.f32 %v3958_v33  ;;  %v4003_v53 = vand.u32 2147483648, %v3958_v33  ;;  %v4001_v57 = vand.u32 2147483647, %v3958_v33  ;;  %vm3997_vm13 = vweird.f32 %v3958_v33 }
0x107a   : > { %v6416_v34 = vpop.eup %6415 }
0x107b   : > { %v3963_v35 = vmul.f32 %v6416_v34, %v3952_v32  ;;  %v3955_v36 = vpop.xlane.xlu1 %3954  ;;  %vm3968_vm6 = vweird.f32 %v6416_v34  ;;  %v4004_v43 = vor.u32 1.1754944e-38, %v4003_v53  ;;  %vm4002_vm5 = vcmp.eq.f32.partialorder %v4001_v57, 8.507059e+37 }
0x107c   : > { %6419 = vrcp.f32 %v3955_v36  ;;  %vm3969_vm10 = vmor %vm3967_vm7, %vm3968_vm6  ;;  %v3988_v63 = vand.u32 2147483648, %v3955_v36  ;;  %v3986_v0 = vand.u32 2147483647, %v3955_v36  ;;  %vm3982_vm6 = vweird.f32 %v3955_v36 }
0x107d   : > { %v3964_v37 = vsub.f32 1.0, %v3963_v35 }
0x107e   : > { %v3989_v8 = vor.u32 1.1754944e-38, %v3988_v63 }
0x107f   : > { %v6418_v41 = vpop.eup %6417  ;;  %v3965_v44 = vmul.f32 %v6416_v34, %v3964_v37 }
0x1080   : > { %v3993_v45 = vmul.f32 %v6418_v41, %v3958_v33  ;;  %v3961_v46 = vpop.xlane.xlu0 %3960  ;;  %vm3998_vm12 = vweird.f32 %v6418_v41 }
0x1081   : > { %v3966_v48 = vadd.f32 %v6416_v34, %v3965_v44  ;;  %6421 = vrcp.f32 %v3961_v46  ;;  %vm3999_vm15 = vmor %vm3997_vm13, %vm3998_vm12  ;;  %v4016_v11 = vand.u32 2147483647, %v3961_v46  ;;  %v4018_v14 = vand.u32 2147483648, %v3961_v46 }
0x1082   : > { %v6420_v49 = vpop.eup %6419  ;;  %v3994_v52 = vsub.f32 1.0, %v3993_v45  ;;  %vm4012_vm12 = vweird.f32 %v3961_v46 }
0x1083   : > { %v3970_v40 = vsel %vm3969_vm10, %v6416_v34, %v3966_v48  ;;  %v3978_v42 = vmul.f32 %v6420_v49, %v3955_v36  ;;  %vm3983_vm4 = vweird.f32 %v6420_v49  ;;  %vm3987_vm10 = vcmp.eq.f32.partialorder %v3986_v0, 8.507059e+37 }
0x1084   : > { %v3975_v56 = vsel %vm3972_vm11, %v3974_v50, %v3970_v40  ;;  %v3995_v31 = vmul.f32 %v6418_v41, %v3994_v52  ;;  %vm3984_vm7 = vmor %vm3982_vm6, %vm3983_vm4  ;;  %v4019_v22 = vor.u32 1.1754944e-38, %v4018_v14 }
0x1085   : > { %v3976_v58 = vmul.f32 %v8060_v2, %v3975_v56  ;;  %v3979_v59 = vsub.f32 1.0, %v3978_v42 }
0x1086   : > { %v3996_v60 = vadd.f32 %v6418_v41, %v3995_v31 }
0x1087   : > { %v6422_v61 = vpop.eup %6421  ;;  %v3980_v62 = vmul.f32 %v6420_v49, %v3979_v59  ;;  %v4022_v1 = vpack.c.bf16 %v3976_v58, %v3976_v58 }
0x1088   : > { %v4000_v55 = vsel %vm3999_vm15, %v6418_v41, %v3996_v60  ;;  %v4008_v4 = vmul.f32 %v6422_v61, %v3961_v46  ;;  %vm4013_vm11 = vweird.f32 %v6422_v61  ;;  %vm4017_vm15 = vcmp.eq.f32.partialorder %v4016_v11, 8.507059e+37 }
0x1089   : > { %v4005_v47 = vsel %vm4002_vm5, %v4004_v43, %v4000_v55  ;;  %v3981_v6 = vadd.f32 %v6420_v49, %v3980_v62  ;;  %5946 = vmatmul.msk.bf16.vlgmr.msra.gmra.mxu1 %vm1816_vm2, %v4022_v1  ;;  %vm4014_vm13 = vmor %vm4012_vm12, %vm4013_vm11 }
0x108a   : > { %v4006_v2 = vmul.f32 %v8064_v5, %v4005_v47  ;;  %v4009_v12 = vsub.f32 1.0, %v4008_v4 }
0x108b   : > { %v3985_v9 = vsel %vm3984_vm7, %v6420_v49, %v3981_v6 }
0x108c   : > { %v3990_v15 = vsel %vm3987_vm10, %v3989_v8, %v3985_v9  ;;  %v4010_v13 = vmul.f32 %v6422_v61, %v4009_v12  ;;  %v4024_v18 = vpack.c.bf16 %v4006_v2, %v4006_v2 }
0x108d   : > { %v3991_v19 = vmul.f32 %v8068_v7, %v3990_v15 }
0x108e   : > { %v4011_v21 = vadd.f32 %v6422_v61, %v4010_v13  ;;  %5948 = vmatmul.msk.bf16.vlgmr.msra.gmra.mxu3 %vm1816_vm2, %v4024_v18 }
0x108f   : > { %v4023_v5 = vpack.c.bf16 %v3991_v19, %v3991_v19 }
0x1090   : > { %v4015_v23 = vsel %vm4014_vm13, %v6422_v61, %v4011_v21 }
0x1091   : > { %v4020_v24 = vsel %vm4017_vm15, %v4019_v22, %v4015_v23  ;;  %5947 = vmatmul.msk.bf16.vlgmr.msra.gmra.mxu2 %vm1816_vm2, %v4023_v5 }
0x1092   : > { %v4021_v26 = vmul.f32 %v8072_v10, %v4020_v24 }
0x1094   : > { %v4025_v27 = vpack.c.bf16 %v4021_v26, %v4021_v26 }
0x1096   : > { %5949 = vmatmul.msk.bf16.vlgmr.msrb.gmra.mxu0 %vm1816_vm2, %v4025_v27 }
0x1106   : > { %v4045_v28 = vpop.f32.mrf.mxu1 }
0x1107   : > { %v4108_v7 = vrot.slane %v4045_v28, 4 }
0x110e   : > { %v4047_v29 = vpop.f32.mrf.mxu1 }
0x1111   : > { %v4083_v30 = vpop.f32.mrf.mxu3 }
0x1112   : > { %v4106_v16 = vrot.slane %v4083_v30, 4  ;;  %v4109_v17 = vsel %vm1458_vm1, %v4083_v30, %v4108_v7 }
0x1113   : > { %v4102_v32 = vpop.f32.mrf.mxu0  ;;  %v4117_v34 = vperm.slane %v4109_v17, %v7418_v25 }
0x1114   : > { %v4107_v33 = vsel %vm1458_vm1, %v4106_v16, %v4045_v28  ;;  %v4118_v35 = vrot.slane %v4102_v32, 4  ;;  %v4064_v36 = vpop.f32.mrf.mxu2 }
0x1115   : > { %v4113_v37 = vperm.slane %v4107_v33, %v7418_v25  ;;  %v4120_v10 = vrot.slane %v4064_v36, 4  ;;  %v4144_v45 = vrot.slane %v4117_v34, 4 }
0x1116   : > { %v4119_v39 = vsel %vm1458_vm1, %v4118_v35, %v4064_v36 }
0x1117   : > { %v4132_v41 = vrot.slane %v4113_v37, 4  ;;  %v4121_v44 = vsel %vm1458_vm1, %v4102_v32, %v4120_v10  ;;  %v4125_v20 = vperm.slane %v4119_v39, %v7418_v25  ;;  %v6105_v10 = vld [vmem:[%s8625_s16 + $0x10] sm:$0xff] }
0x1118   : > { %v4129_v46 = vperm.slane %v4121_v44, %v7418_v25 }
0x1119   : > { %v4130_v48 = vrot.slane %v4125_v20, 4  ;;  %v4133_v49 = vsel %vm1458_vm1, %v4125_v20, %v4132_v41  ;;  %v4085_v50 = vpop.f32.mrf.mxu3 }
0x111a   : > { %v4141_v52 = vperm.slane %v4133_v49, %v7427_v38  ;;  %v4142_v53 = vrot.slane %v4129_v46, 4  ;;  %v4145_v40 = vsel %vm1458_vm1, %v4129_v46, %v4144_v45  ;;  %v6349_v49 = vld [vmem:[%s8626_s22 + $0x1] ss:$0 sm:$0xff] }
0x111b   : > { %v4131_v42 = vsel %vm1458_vm1, %v4130_v48, %v4113_v37  ;;  %v4153_v56 = vperm.slane %v4145_v40, %v7427_v38  ;;  %v4104_v31 = vpop.f32.mrf.mxu0  ;;  %v6106_v37 = vld [vmem:[%s8625_s16 + $0x18] sm:$0xff] }
0x111c   : > { %v4137_v57 = vperm.slane %v4131_v42, %v7427_v38  ;;  %v4143_v58 = vsel %vm1458_vm1, %v4142_v53, %v4117_v34  ;;  %v4156_v59 = vrot.slane %v4141_v52, 4  ;;  %v4066_v60 = vpop.f32.mrf.mxu2  ;;  %4256 = vmatpush.bf16.msrb.mxu1 %v6106_v37  ;;  %v6109_v31 = vld [vmem:[%s8627_s27 + $0x10] sm:$0xff] }
0x111d   : > { %v4149_v43 = vperm.slane %v4143_v58, %v7427_v38  ;;  %v4160_v63 = vrot.slane %v4153_v56, 4  ;;  %v6110_v56 = vld [vmem:[%s8627_s27 + $0x18] sm:$0xff] }
0x111e   : > { %v4154_v61 = vrot.slane %v4137_v57, 4  ;;  %v4157_v62 = vsel %vm1458_vm1, 0.0, %v4156_v59  ;;  %v4162_v0 = vsel %vm1458_vm1, %v4156_v59, %v4137_v57  ;;  %4379 = vmatpush.bf16.msrb.mxu3 %v6110_v56  ;;  %v8183_v57 = vld [vmem:[%s7652_s7] sm:$0xf] }
0x111f   : > { %v4158_v1 = vrot.slane %v4149_v43, 4  ;;  %v4161_v55 = vsel %vm1458_vm1, 0.0, %v4160_v63  ;;  %v4166_v4 = vperm.slane %v4162_v0, %v7418_v25  ;;  %v4167_v47 = vrot.slane %v4157_v62, 4  ;;  %v6352_v62 = vld [vmem:[#allocation2 + $0x1] ss:$0 sm:$0xff] }
0x1120   : > { %v4155_v6 = vsel %vm1458_vm1, 0.0, %v4154_v61  ;;  %v4178_v2 = vrot.slane %v4161_v55, 4  ;;  %v4173_v8 = vsel %vm1458_vm1, %v4160_v63, %v4149_v43  ;;  %4257 = vmatpush.bf16.msrb.mxu1 %v6105_v10  ;;  %v6108_v63 = vld [vmem:[%s8629_s11 + $0x18] sm:$0xff]  ;;  %v6107_v61 = vld [vmem:[%s8629_s11 + $0x10] sm:$0xff] }
0x1121   : > { %v4159_v12 = vsel %vm1458_vm1, 0.0, %v4158_v1  ;;  %v4168_v9 = vsel %vm1458_vm1, %v4167_v47, %v4155_v6  ;;  %v4177_v11 = vperm.slane %v4173_v8, %v7418_v25  ;;  %v4186_v14 = vrot.slane %v4166_v4, 4  ;;  %4351 = vmatpush.bf16.msrb.mxu2 %v6108_v63 }
0x1122   : > { %v4172_v15 = vperm.slane %v4168_v9, %v7418_v25  ;;  %v4179_v13 = vsel %vm1458_vm1, %v4178_v2, %v4159_v12  ;;  %4380 = vmatpush.bf16.msrb.mxu3 %v6109_v31 }
0x1123   : > { %v4183_v18 = vperm.slane %v4179_v13, %v7418_v25  ;;  %v4198_v19 = vrot.slane %v4177_v11, 4 }
0x1124   : > { %v4187_v21 = vsel %vm1458_vm1, %v4172_v15, %v4186_v14  ;;  %v4184_v22 = vrot.slane %v4172_v15, 4  ;;  %v6350_v15 = vld [vmem:[%s8631_s26 + $0x1] ss:$0 sm:$0xff] }
0x1125   : > { %v4195_v5 = vperm.slane %v4187_v21, %v7427_v38  ;;  %v4199_v23 = vsel %vm1458_vm1, %v4183_v18, %v4198_v19  ;;  %v4196_v24 = vrot.slane %v4183_v18, 4  ;;  %5995 = vmatmul.msk.bf16.vlgmr.msrb.gmra.mxu3 %vm1374_vm0, %v8183_v57  ;;  %4352 = vmatpush.bf16.msrb.mxu2 %v6107_v61  ;;  %v6351_v18 = vld [vmem:[%s8633_s21 + $0x1] ss:$0 sm:$0xff] }
0x1126   : > { %v4207_v26 = vperm.slane %v4199_v23, %v7427_v38  ;;  %v4185_v27 = vsel %vm1458_vm1, %v4184_v22, %v4166_v4 }
0x1127   : > { %v4214_v28 = vrot.slane %v4195_v5, 4  ;;  %v4191_v29 = vperm.slane %v4185_v27, %v7427_v38  ;;  %v4197_v7 = vsel %vm1458_vm1, %v4196_v24, %v4177_v11 }
0x1128   : > { %v4212_v30 = vrot.slane %v4207_v26, 4  ;;  %v4203_v16 = vperm.slane %v4197_v7, %v7427_v38 }
0x1129   : > { %v4215_v17 = vsel %vm1458_vm1, %v4207_v26, %v4214_v28  ;;  %v4210_v32 = vrot.slane %v4191_v29, 4 }
0x112a   : > { %4225 = vrot.lane.b32.xlu2 %v4215_v17, %s8642_s19  ;;  %v4213_v33 = vsel %vm1458_vm1, %v4212_v30, %v4195_v5  ;;  %v4208_v34 = vrot.slane %v4203_v16, 4 }
0x112b   : > { %4221 = vrot.lane.b32.xlu0 %v4213_v33, %s8640_s14  ;;  %v4211_v35 = vsel %vm1458_vm1, %v4203_v16, %v4210_v32 }
0x112c   : > { %4217 = vrot.lane.b32.xlu1 %v4211_v35, %s8641_s17  ;;  %v4209_v36 = vsel %vm1458_vm1, %v4208_v34, %v4191_v29 }
0x1184   : > { %v4226_v20 = vpop.permute.xlu2 %4225 }
0x119d   : > { %v4222_v39 = vpop.permute.xlu0 %4221 }
0x119e   : > { %v4218_v41 = vpop.permute.xlu1 %4217 }
0x119f   : > { %v4228_v44 = vsel %vm1816_vm2, %v4209_v36, %v4218_v41 }
0x11a0   : > { %v4229_v45 = vsel %vm2205_vm8, %v4228_v44, %v4222_v39 }
0x11a1   : > { %v4230_v46 = vsel %vm2207_vm9, %v4229_v45, %v4226_v20 }
0x11a2   : > { %v4231_v48 = vpack.c.bf16 %v4230_v46, %v4230_v46 }
0x11a4   : > { %5958 = vmatmul.msk.bf16.vlgmr.msrb.gmra.mxu1 %vm1374_vm0, %v4231_v48 }
0x11a8   : > { %v4382_v0 = vpop.f32.mrf.mxu3 }
0x11a9   : > { %v4383_v4 = vadd.f32 %v6352_v62, %v4382_v0 }
0x11ab   : > { %4535 = vrot.lane.b32.xlu2 %v4383_v4, %s8632_s10  ;;  %v4546_v24 = vrot.slane %v4383_v4, 4 }
0x11b0   : > { %v4384_v6 = vpop.f32.mrf.mxu3 }
0x11b3   : > { %4538 = vrot.lane.b32.xlu2 %v4383_v4, %s8634_s4 }
0x11bb   : > { %4541 = vrot.lane.b32.xlu2 %v4383_v4, %s8635_s5 }
0x1205   : > { %v4536_v23 = vpop.permute.xlu2 %4535 }
0x1206   : > { %v4558_v30 = vrot.slane %v4536_v23, 4 }
0x120d   : > { %v4539_v26 = vpop.permute.xlu2 %4538 }
0x120e   : > { %v4544_v27 = vrot.slane %v4539_v26, 4  ;;  %v4547_v28 = vsel %vm1458_vm1, %v4539_v26, %v4546_v24 }
0x120f   : > { %v4555_v7 = vperm.slane %v4547_v28, %v7418_v25 }
0x1210   : > { %v4545_v29 = vsel %vm1458_vm1, %v4544_v27, %v4383_v4  ;;  %v6112_v27 = vld [vmem:[%s8637_s6 + $0x18] sm:$0xff] }
0x1211   : > { %v4551_v16 = vperm.slane %v4545_v29, %v7418_v25  ;;  %v4582_v17 = vrot.slane %v4555_v7, 4  ;;  %4407 = vmatpush.bf16.msra.mxu0 %v6112_v27 }
0x1213   : > { %v4570_v35 = vrot.slane %v4551_v16, 4 }
0x1215   : > { %v4542_v32 = vpop.permute.xlu2 %4541 }
0x1216   : > { %v4556_v33 = vrot.slane %v4542_v32, 4  ;;  %v4559_v34 = vsel %vm1458_vm1, %v4542_v32, %v4558_v30 }
0x1217   : > { %v4567_v36 = vperm.slane %v4559_v34, %v7418_v25 }
0x1218   : > { %v4557_v37 = vsel %vm1458_vm1, %v4556_v33, %v4536_v23  ;;  %v6111_v33 = vld [vmem:[%s8637_s6 + $0x10] sm:$0xff] }
0x1219   : > { %v4563_v10 = vperm.slane %v4557_v37, %v7418_v25  ;;  %v4580_v39 = vrot.slane %v4567_v36, 4  ;;  %v4583_v41 = vsel %vm1458_vm1, %v4567_v36, %v4582_v17  ;;  %4408 = vmatpush.bf16.msra.mxu0 %v6111_v33 }
0x121a   : > { %v4591_v44 = vperm.slane %v4583_v41, %v7427_v38 }
0x121b   : > { %v4568_v20 = vrot.slane %v4563_v10, 4  ;;  %v4571_v45 = vsel %vm1458_vm1, %v4563_v10, %v4570_v35  ;;  %v4581_v46 = vsel %vm1458_vm1, %v4580_v39, %v4555_v7  ;;  %v6353_v39 = vld [vmem:[%s8638_s9 + $0x1] ss:$0 sm:$0xff] }
0x121c   : > { %v4587_v48 = vperm.slane %v4581_v46, %v7427_v38  ;;  %6004 = vmatmul.msk.bf16.vlgmr.msra.gmra.mxu0 %vm1374_vm0, %v8183_v57 }
0x1221   : > { %v4259_v50 = vpop.f32.mrf.mxu1 }
0x1222   : > { %v4260_v52 = vadd.f32 %v6349_v49, %v4259_v50  ;;  %v4598_v49 = vrot.slane %v4591_v44, 4  ;;  %v4579_v50 = vperm.slane %v4571_v45, %v7427_v38 }
0x1224   : > { %v4263_v53 = vadd.f32 %v4260_v52, %v7942_v54  ;;  %v4569_v52 = vsel %vm1458_vm1, %v4568_v20, %v4551_v16  ;;  %v4594_v56 = vrot.slane %v4579_v50, 4 }
0x1226   : > { %v4268_v40 = vsel %vm1374_vm0, %v4263_v53, 0.0 }
0x1227   : > { %4269 = vadd.xlane.f32.xlu0 %v4268_v40  ;;  %v4599_v40 = vsel %vm1458_vm1, 0.0, %v4598_v49 }
0x1228   : > { %v4616_v31 = vrot.slane %v4599_v40, 4 }
0x1229   : > { %v4261_v42 = vpop.f32.mrf.mxu1 }
0x122a   : > { %v4575_v42 = vperm.slane %v4569_v52, %v7427_v38  ;;  %v6354_v52 = vld [vmem:[#allocation5 + $0x1] ss:$0 sm:$0xff] }
0x122c   : > { %v4600_v6 = vsel %vm1458_vm1, %v4594_v56, %v4575_v42 }
0x129a   : > { %v4270_v58 = vpop.xlane.xlu0 %4269 }
0x129b   : > { %v4271_v59 = vmul.f32 %v4270_v58, %v7659_v3 }
0x129d   : > { %v4272_v60 = vsub.f32 %v4263_v53, %v4271_v59  ;;  %v4596_v53 = vrot.slane %v4587_v48, 4  ;;  %v4592_v59 = vrot.slane %v4575_v42, 4 }
0x129f   : > { %v4273_v54 = vmul.f32 %v4272_v60, %v4272_v60  ;;  %v4597_v58 = vsel %vm1458_vm1, 0.0, %v4596_v53  ;;  %v4593_v61 = vsel %vm1458_vm1, 0.0, %v4592_v59  ;;  %v4410_v53 = vpop.f32.mrf.mxu0 }
0x12a0   : > { %v8256_v40 = vadd.f32 %v6354_v52, %v4410_v53 }
0x12a1   : > { %v4274_v43 = vsel %vm1374_vm0, %v4273_v54, 0.0  ;;  %v4611_v54 = vsel %vm1458_vm1, %v4598_v49, %v4587_v48 }
0x12a2   : > { %4275 = vadd.xlane.f32.xlu1 %v4274_v43  ;;  %v4617_v43 = vsel %vm1458_vm1, %v4616_v31, %v4597_v58  ;;  %v4615_v62 = vperm.slane %v4611_v54, %v7418_v25 }
0x12a3   : > { %v4621_v0 = vperm.slane %v4617_v43, %v7418_v25 }
0x1315   : > { %v4276_v1 = vpop.xlane.xlu1 %4275 }
0x1316   : > { %v4277_v55 = vmul.f32 %v4276_v1, %v7659_v3 }
0x1318   : > { %v4278_v47 = vadd.f32 1e-05, %v4277_v55  ;;  %v4636_v55 = vrot.slane %v4615_v62, 4 }
0x131a   : > { %6423 = vrsqrt.f32 %v4278_v47  ;;  %vm4285_vm5 = vweird.f32 %v4278_v47 }
0x1320   : > { %v6424_v2 = vpop.eup %6423 }
0x1321   : > { %v4280_v8 = vmul.f32 %v6424_v2, %v4278_v47  ;;  %vm4286_vm4 = vweird.f32 %v6424_v2  ;;  %v4634_v47 = vrot.slane %v4621_v0, 4 }
0x1322   : > { %vm4287_vm6 = vmor %vm4285_vm5, %vm4286_vm4 }
0x1323   : > { %v4281_v12 = vmul.f32 %v6424_v2, %v4280_v8 }
0x1325   : > { %v4282_v9 = vmul.f32 0.5, %v4281_v12  ;;  %v4635_v12 = vsel %vm1458_vm1, %v4634_v47, %v4615_v62 }
0x1327   : > { %v4283_v11 = vsub.f32 1.5, %v4282_v9  ;;  %v4641_v9 = vperm.slane %v4635_v12, %v7427_v38 }
0x1329   : > { %v4284_v14 = vmul.f32 %v6424_v2, %v4283_v11 }
0x132b   : > { %v4288_v13 = vsel %vm4287_vm6, %v6424_v2, %v4284_v14  ;;  %v4604_v2 = vperm.slane %v4600_v6, %v7418_v25 }
0x132c   : > { %v4289_v19 = vmul.f32 %v4288_v13, %v4272_v60  ;;  %v4595_v60 = vsel %vm1458_vm1, 0.0, %v4594_v56 }
0x132d   : > { %v4605_v63 = vrot.slane %v4595_v60, 4  ;;  %v4624_v14 = vrot.slane %v4604_v2, 4 }
0x132e   : > { %v4293_v21 = vmul.f32 %v6350_v15, %v4289_v19  ;;  %v4637_v15 = vsel %vm1458_vm1, %v4621_v0, %v4636_v55  ;;  %v4412_v55 = vpop.f32.mrf.mxu0 }
0x132f   : > { %v4606_v1 = vsel %vm1458_vm1, %v4605_v63, %v4593_v61  ;;  %v4645_v19 = vperm.slane %v4637_v15, %v7427_v38 }
0x1330   : > { %v8197_v22 = vadd.f32 %v6351_v18, %v4293_v21  ;;  %v4610_v4 = vperm.slane %v4606_v1, %v7418_v25  ;;  %v4646_v18 = vrot.slane %v4641_v9, 4 }
0x1331   : > { %v4650_v26 = vrot.slane %v4645_v19, 4 }
0x1332   : > { %v4326_v5 = vpack.c.bf16 %v8197_v22, %v8197_v22  ;;  %v4622_v8 = vrot.slane %v4610_v4, 4  ;;  %v4625_v21 = vsel %vm1458_vm1, %v4610_v4, %v4624_v14 }
0x1333   : > { %v4633_v24 = vperm.slane %v4625_v21, %v7427_v38 }
0x1334   : > { %5986 = vmatmul.msk.bf16.vlgmr.msrb.gmra.mxu2 %vm1374_vm0, %v4326_v5  ;;  %v4623_v11 = vsel %vm1458_vm1, %v4622_v8, %v4604_v2 }
0x1335   : > { %v4629_v13 = vperm.slane %v4623_v11, %v7427_v38  ;;  %v4651_v7 = vsel %vm1458_vm1, %v4650_v26, %v4633_v24  ;;  %v4652_v30 = vrot.slane %v4633_v24, 4 }
0x1336   : > { %v4780_v32 = vpack.c.bf16 %v4651_v7, %v4651_v7 }
0x1337   : > { %v4647_v5 = vsel %vm1458_vm1, %v4646_v18, %v4629_v13  ;;  %v4648_v23 = vrot.slane %v4629_v13, 4  ;;  %v4653_v34 = vsel %vm1458_vm1, %v4645_v19, %v4652_v30 }
0x1338   : > { %v4778_v28 = vpack.c.bf16 %v4647_v5, %v4647_v5  ;;  %v4824_v36 = vsel %vm1816_vm2, %v4780_v32, 0  ;;  %v4781_v37 = vpack.c.bf16 %v4653_v34, %v4653_v34 }
0x1339   : > { %v4649_v29 = vsel %vm1458_vm1, %v4641_v9, %v4648_v23  ;;  %4833 = vmatpush.bf16.xpose.msra.mxu3 %v4824_v36 }
0x133a   : > { %v4786_v16 = vsel %vm1816_vm2, %v4778_v28, 0  ;;  %v4779_v17 = vpack.c.bf16 %v4649_v29, %v4649_v29  ;;  %v4843_v10 = vsel %vm1816_vm2, %v4781_v37, 0 }
0x133b   : > { %4795 = vmatpush.bf16.xpose.msra.mxu1 %v4786_v16  ;;  %4852 = vmatpush.bf16.xpose.msrb.mxu0 %v4843_v10 }
0x133c   : > { %v4805_v35 = vsel %vm1816_vm2, %v4779_v17, 0 }
0x133d   : > { %4814 = vmatpush.bf16.xpose.msra.mxu2 %v4805_v35 }
0x13b7   : > { %v4354_v41 = vpop.f32.mrf.mxu2 }
0x13b8   : > { %v4355_v44 = vadd.f32 %v6353_v39, %v4354_v41 }
0x13ba   : > { %4421 = vrot.lane.b32.xlu0 %v4355_v44, %s8635_s5  ;;  %4415 = vrot.lane.b32.xlu2 %v4355_v44, %s8632_s10  ;;  %v4426_v49 = vrot.slane %v4355_v44, 4 }
0x13bf   : > { %v4356_v20 = vpop.f32.mrf.mxu2 }
0x13c2   : > { %4418 = vrot.lane.b32.xlu2 %v4355_v44, %s8634_s4  ;;  %4655 = vrot.lane.b32.xlu0 %v8256_v40, %s8632_s10 }
0x13ca   : > { %4661 = vrot.lane.b32.xlu0 %v8256_v40, %s8635_s5  ;;  %s8645_s5 = sld [smem:[#allocation60_spill]] }
0x1414   : > { %v4416_v45 = vpop.permute.xlu2 %4415 }
0x1415   : > { %v4438_v56 = vrot.slane %v4416_v45, 4 }
0x141c   : > { %v4419_v46 = vpop.permute.xlu2 %4418 }
0x141d   : > { %v4424_v48 = vrot.slane %v4419_v46, 4  ;;  %v4427_v50 = vsel %vm1458_vm1, %v4419_v46, %v4426_v49 }
0x141e   : > { %v4435_v42 = vperm.slane %v4427_v50, %v7418_v25 }
0x141f   : > { %v4425_v57 = vsel %vm1458_vm1, %v4424_v48, %v4355_v44 }
0x1420   : > { %v4431_v31 = vperm.slane %v4425_v57, %v7418_v25  ;;  %v4462_v54 = vrot.slane %v4435_v42, 4 }
0x1422   : > { %v4450_v61 = vrot.slane %v4431_v31, 4 }
0x142c   : > { %v4422_v58 = vpop.permute.xlu0 %4421 }
0x142d   : > { %v4436_v59 = vrot.slane %v4422_v58, 4  ;;  %v4439_v60 = vsel %vm1458_vm1, %v4422_v58, %v4438_v56 }
0x142e   : > { %v4447_v43 = vperm.slane %v4439_v60, %v7418_v25 }
0x142f   : > { %v4437_v63 = vsel %vm1458_vm1, %v4436_v59, %v4416_v45 }
0x1430   : > { %v4443_v62 = vperm.slane %v4437_v63, %v7418_v25  ;;  %v4460_v0 = vrot.slane %v4447_v43, 4  ;;  %v4463_v1 = vsel %vm1458_vm1, %v4447_v43, %v4462_v54 }
0x1431   : > { %v4471_v4 = vperm.slane %v4463_v1, %v7427_v38  ;;  %v6449_v1 = vld [vmem:[%s7400_s2] ss:$0 sm:$0xff]  ;;  %s5480_s2 = sshll.u32 %s7866_s13, 4  ;;  %s5481_s2 = int_to_ptr.vmem [resolvable:$true] %s5480_s2 }
0x1432   : > { %v4448_v47 = vrot.slane %v4443_v62, 4  ;;  %v4451_v6 = vsel %vm1458_vm1, %v4443_v62, %v4450_v61  ;;  %v4461_v2 = vsel %vm1458_vm1, %v4460_v0, %v4435_v42 }
0x1433   : > { %v4459_v8 = vperm.slane %v4451_v6, %v7427_v38  ;;  %v4467_v12 = vperm.slane %v4461_v2, %v7427_v38  ;;  %v4478_v9 = vrot.slane %v4471_v4, 4 }
0x1434   : > { %v4449_v11 = vsel %vm1458_vm1, %v4448_v47, %v4431_v31 }
0x1435   : > { %v4455_v14 = vperm.slane %v4449_v11, %v7427_v38  ;;  %v4474_v15 = vrot.slane %v4459_v8, 4  ;;  %v4476_v13 = vrot.slane %v4467_v12, 4  ;;  %v4479_v18 = vsel %vm1458_vm1, 0.0, %v4478_v9 }
0x1436   : > { %v4491_v19 = vsel %vm1458_vm1, %v4478_v9, %v4467_v12  ;;  %v4496_v21 = vrot.slane %v4479_v18, 4 }
0x1437   : > { %v4472_v5 = vrot.slane %v4455_v14, 4  ;;  %v4475_v23 = vsel %vm1458_vm1, 0.0, %v4474_v15  ;;  %v4477_v24 = vsel %vm1458_vm1, 0.0, %v4476_v13  ;;  %v4480_v26 = vsel %vm1458_vm1, %v4474_v15, %v4455_v14 }
0x1438   : > { %v4484_v27 = vperm.slane %v4480_v26, %v7418_v25  ;;  %v4485_v28 = vrot.slane %v4475_v23, 4  ;;  %v4495_v29 = vperm.slane %v4491_v19, %v7418_v25  ;;  %v4497_v7 = vsel %vm1458_vm1, %v4496_v21, %v4477_v24 }
0x1439   : > { %v4473_v30 = vsel %vm1458_vm1, 0.0, %v4472_v5  ;;  %v4501_v16 = vperm.slane %v4497_v7, %v7418_v25 }
0x143a   : > { %v4486_v17 = vsel %vm1458_vm1, %v4485_v28, %v4473_v30  ;;  %v4504_v32 = vrot.slane %v4484_v27, 4  ;;  %v4516_v33 = vrot.slane %v4495_v29, 4 }
0x143b   : > { %v4490_v34 = vperm.slane %v4486_v17, %v7418_v25  ;;  %v4514_v35 = vrot.slane %v4501_v16, 4 }
0x143c   : > { %v4517_v36 = vsel %vm1458_vm1, %v4501_v16, %v4516_v33 }
0x143d   : > { %v4515_v37 = vsel %vm1458_vm1, %v4514_v35, %v4495_v29  ;;  %v4505_v10 = vsel %vm1458_vm1, %v4490_v34, %v4504_v32  ;;  %v4525_v39 = vperm.slane %v4517_v36, %v7427_v38  ;;  %v4502_v41 = vrot.slane %v4490_v34, 4 }
0x143e   : > { %v4513_v44 = vperm.slane %v4505_v10, %v7427_v38  ;;  %v4521_v20 = vperm.slane %v4515_v37, %v7427_v38  ;;  %v4656_v37 = vpop.permute.xlu0 %4655 }
0x143f   : > { %v4530_v45 = vrot.slane %v4525_v39, 4  ;;  %v4503_v46 = vsel %vm1458_vm1, %v4502_v41, %v4484_v27 }
0x1440   : > { %v4509_v48 = vperm.slane %v4503_v46, %v7427_v38  ;;  %v4526_v49 = vrot.slane %v4521_v20, 4  ;;  %v4532_v50 = vrot.slane %v4513_v44, 4 }
0x1441   : > { %v4531_v52 = vsel %vm1458_vm1, %v4530_v45, %v4513_v44 }
0x1442   : > { %v4776_v53 = vpack.c.bf16 %v4531_v52, %v4531_v52  ;;  %v4527_v57 = vsel %vm1458_vm1, %v4526_v49, %v4509_v48  ;;  %v4533_v42 = vsel %vm1458_vm1, %v4525_v39, %v4532_v50  ;;  %v4528_v56 = vrot.slane %v4509_v48, 4 }
0x1443   : > { %v4774_v31 = vpack.c.bf16 %v4527_v57, %v4527_v57  ;;  %v4777_v58 = vpack.c.bf16 %v4533_v42, %v4533_v42  ;;  %v4666_v50 = vrot.slane %v8256_v40, 4 }
0x1444   : > { %6007 = vmatmul.msk.bf16.vlgmr.msra.gmra.mxu3 %vm1816_vm2, %v4776_v53  ;;  %v4529_v59 = vsel %vm1458_vm1, %v4521_v20, %v4528_v56  ;;  %v4678_v20 = vrot.slane %v4656_v37, 4 }
0x1445   : > { %6005 = vmatmul.msk.bf16.vlgmr.msra.gmra.mxu1 %vm1816_vm2, %v4774_v31  ;;  %6008 = vmatmul.msk.bf16.vlgmr.msrb.gmra.mxu0 %vm1816_vm2, %v4777_v58  ;;  %v4775_v60 = vpack.c.bf16 %v4529_v59, %v4529_v59 }
0x1446   : > { %v4662_v44 = vpop.permute.xlu0 %4661 }
0x1447   : > { %6006 = vmatmul.msk.bf16.vlgmr.msra.gmra.mxu2 %vm1816_vm2, %v4775_v60  ;;  %v4676_v45 = vrot.slane %v4662_v44, 4  ;;  %v4679_v46 = vsel %vm1458_vm1, %v4662_v44, %v4678_v20 }
0x1448   : > { %v4687_v49 = vperm.slane %v4679_v46, %v7418_v25 }
0x1449   : > { %v4677_v48 = vsel %vm1458_vm1, %v4676_v45, %v4656_v37 }
0x144a   : > { %v4683_v52 = vperm.slane %v4677_v48, %v7418_v25  ;;  %v4700_v56 = vrot.slane %v4687_v49, 4 }
0x144c   : > { %v4688_v59 = vrot.slane %v4683_v52, 4 }
0x14c2   : > { %v4797_v54 = vpop.f32.mrf.mxu1  ;;  %v4854_v43 = vpop.f32.mrf.mxu0 }
0x14c3   : > { %v4858_v6 = vmul.f32 0.35355338, %v4797_v54  ;;  %v4861_v15 = vmul.f32 0.35355338, %v4854_v43 }
0x14c5   : > { %v4862_v11 = vadd.f32 %v6449_v1, %v4858_v6  ;;  %v4865_v18 = vadd.f32 %v6449_v1, %v4861_v15 }
0x14c7   : > { %v4835_v63 = vpop.f32.mrf.mxu3  ;;  %v4866_v13 = vsel %vm1816_vm2, %v4862_v11, -inf  ;;  %v4875_v19 = vsel %vm1816_vm2, %v4865_v18, -inf }
0x14c8   : > { %v4860_v61 = vmul.f32 0.35355338, %v4835_v63 }
0x14ca   : > { %v4799_v62 = vpop.f32.mrf.mxu1  ;;  %v4816_v0 = vpop.f32.mrf.mxu2  ;;  %v4864_v55 = vadd.f32 %v6449_v1, %v4860_v61 }
0x14cb   : > { %v4859_v4 = vmul.f32 0.35355338, %v4816_v0  ;;  %v4856_v47 = vpop.f32.mrf.mxu0 }
0x14cc   : > { %v4872_v2 = vsel %vm1816_vm2, %v4864_v55, -inf }
0x14cd   : > { %4873 = vmax.xlane.f32.xlu1 %v4872_v2  ;;  %v4863_v8 = vadd.f32 %v6449_v1, %v4859_v4 }
0x14cf   : > { %v4837_v12 = vpop.f32.mrf.mxu3  ;;  %v4869_v9 = vsel %vm1816_vm2, %v4863_v8, -inf }
0x14d0   : > { %4870 = vmax.xlane.f32.xlu2 %v4869_v9 }
0x14d2   : > { %v4818_v14 = vpop.f32.mrf.mxu2 }
0x14d5   : > { %4867 = vmax.xlane.f32.xlu1 %v4866_v13 }
0x14dd   : > { %4876 = vmax.xlane.f32.xlu1 %v4875_v19 }
0x14f6   : > { %4658 = vrot.lane.b32.xlu1 %v8256_v40, %s8634_s4  ;;  %s6123_s4 = sshll.u32 %s7171_s0, 4 }
0x1540   : > { %v4874_v21 = vpop.xlane.xlu1 %4873 }
0x1541   : > { %v4880_v5 = vsub.f32 %v4864_v55, %v4874_v21 }
0x1543   : > { %v4886_v23 = vmul.f32 1.442695, %v4880_v5  ;;  %v4871_v24 = vpop.xlane.xlu2 %4870 }
0x1544   : > { %v4879_v26 = vsub.f32 %v4863_v8, %v4871_v24 }
0x1545   : > { %6425 = vpow2.f32 %v4886_v23 }
0x1546   : > { %v4884_v27 = vmul.f32 1.442695, %v4879_v26 }
0x1548   : > { %6427 = vpow2.f32 %v4884_v27  ;;  %v4868_v28 = vpop.xlane.xlu1 %4867 }
0x1549   : > { %v4878_v29 = vsub.f32 %v4862_v11, %v4868_v28 }
0x154b   : > { %v8311_v7 = vpop.eup %6425  ;;  %v4882_v30 = vmul.f32 1.442695, %v4878_v29 }
0x154c   : > { %v4896_v16 = vsel %vm1816_vm2, %v8311_v7, 0.0 }
0x154d   : > { %6429 = vpow2.f32 %v4882_v30  ;;  %4897 = vadd.xlane.f32.xlu0 %v4896_v16 }
0x154e   : > { %v8315_v17 = vpop.eup %6427 }
0x154f   : > { %v4893_v32 = vsel %vm1816_vm2, %v8315_v17, 0.0 }
0x1550   : > { %v4877_v33 = vpop.xlane.xlu1 %4876  ;;  %4894 = vadd.xlane.f32.xlu2 %v4893_v32 }
0x1551   : > { %v4881_v34 = vsub.f32 %v4865_v18, %v4877_v33 }
0x1553   : > { %v8319_v35 = vpop.eup %6429  ;;  %v4888_v36 = vmul.f32 1.442695, %v4881_v34 }
0x1554   : > { %v4890_v10 = vsel %vm1816_vm2, %v8319_v35, 0.0 }
0x1555   : > { %6431 = vpow2.f32 %v4888_v36  ;;  %4891 = vadd.xlane.f32.xlu1 %v4890_v10 }
0x155b   : > { %v8323_v39 = vpop.eup %6431 }
0x155c   : > { %v4899_v41 = vsel %vm1816_vm2, %v8323_v39, 0.0 }
0x155d   : > { %4900 = vadd.xlane.f32.xlu2 %v4899_v41 }
0x1568   : > { %v4659_v53 = vpop.permute.xlu1 %4658 }
0x1569   : > { %v4664_v57 = vrot.slane %v4659_v53, 4  ;;  %v4667_v42 = vsel %vm1458_vm1, %v4659_v53, %v4666_v50 }
0x156a   : > { %v4675_v31 = vperm.slane %v4667_v42, %v7418_v25 }
0x156b   : > { %v4665_v58 = vsel %vm1458_vm1, %v4664_v57, %v8256_v40 }
0x156c   : > { %v4671_v60 = vperm.slane %v4665_v58, %v7418_v25  ;;  %v4701_v54 = vsel %vm1458_vm1, %v4700_v56, %v4675_v31  ;;  %v4702_v43 = vrot.slane %v4675_v31, 4 }
0x156d   : > { %v4707_v63 = vperm.slane %v4701_v54, %v7427_v38 }
0x156e   : > { %v4689_v61 = vsel %vm1458_vm1, %v4688_v59, %v4671_v60  ;;  %v4690_v62 = vrot.slane %v4671_v60, 4  ;;  %v4703_v0 = vsel %vm1458_vm1, %v4687_v49, %v4702_v43 }
0x156f   : > { %v4695_v1 = vperm.slane %v4689_v61, %v7427_v38  ;;  %v4711_v55 = vperm.slane %v4703_v0, %v7427_v38  ;;  %v4716_v47 = vrot.slane %v4707_v63, 4 }
0x1570   : > { %v4691_v4 = vsel %vm1458_vm1, %v4683_v52, %v4690_v62 }
0x1571   : > { %v4699_v40 = vperm.slane %v4691_v4, %v7427_v38  ;;  %v4718_v6 = vrot.slane %v4711_v55, 4  ;;  %v4712_v2 = vrot.slane %v4695_v1, 4  ;;  %v4717_v13 = vsel %vm1458_vm1, 0.0, %v4716_v47 }
0x1573   : > { %v4714_v8 = vrot.slane %v4699_v40, 4  ;;  %v4719_v12 = vsel %vm1458_vm1, 0.0, %v4718_v6  ;;  %v4731_v9 = vsel %vm1458_vm1, %v4718_v6, %v4707_v63  ;;  %v4713_v24 = vsel %vm1458_vm1, 0.0, %v4712_v2 }
0x1574   : > { %v4735_v11 = vperm.slane %v4731_v9, %v7418_v25  ;;  %v4736_v14 = vrot.slane %v4719_v12, 4 }
0x1575   : > { %v4715_v15 = vsel %vm1458_vm1, 0.0, %v4714_v8  ;;  %v4720_v18 = vsel %vm1458_vm1, %v4714_v8, %v4695_v1 }
0x1576   : > { %v4725_v19 = vrot.slane %v4715_v15, 4  ;;  %v4737_v21 = vsel %vm1458_vm1, %v4736_v14, %v4717_v13  ;;  %v4756_v5 = vrot.slane %v4735_v11, 4  ;;  %v4724_v23 = vperm.slane %v4720_v18, %v7418_v25 }
0x1577   : > { %v4741_v26 = vperm.slane %v4737_v21, %v7418_v25 }
0x1578   : > { %v4726_v27 = vsel %vm1458_vm1, %v4725_v19, %v4713_v24  ;;  %v4744_v28 = vrot.slane %v4724_v23, 4 }
0x1579   : > { %v4754_v29 = vrot.slane %v4741_v26, 4  ;;  %v4730_v30 = vperm.slane %v4726_v27, %v7418_v25  ;;  %v4757_v16 = vsel %vm1458_vm1, %v4741_v26, %v4756_v5 }
0x157a   : > { %v4765_v32 = vperm.slane %v4757_v16, %v7427_v38 }
0x157b   : > { %v4745_v33 = vsel %vm1458_vm1, %v4730_v30, %v4744_v28  ;;  %v4742_v34 = vrot.slane %v4730_v30, 4  ;;  %v4755_v36 = vsel %vm1458_vm1, %v4754_v29, %v4735_v11 }
0x157c   : > { %v4753_v37 = vperm.slane %v4745_v33, %v7427_v38  ;;  %v4770_v10 = vrot.slane %v4765_v32, 4  ;;  %v4761_v41 = vperm.slane %v4755_v36, %v7427_v38 }
0x157d   : > { %v4743_v44 = vsel %vm1458_vm1, %v4742_v34, %v4724_v23 }
0x157e   : > { %v4771_v20 = vsel %vm1458_vm1, %v4770_v10, %v4753_v37  ;;  %v4749_v45 = vperm.slane %v4743_v44, %v7427_v38  ;;  %v4766_v46 = vrot.slane %v4761_v41, 4  ;;  %v4772_v48 = vrot.slane %v4753_v37, 4 }
0x157f   : > { %v4968_v49 = vpack.c.bf16 %v4771_v20, %v4771_v20 }
0x1580   : > { %v4767_v50 = vsel %vm1458_vm1, %v4766_v46, %v4749_v45  ;;  %v4773_v52 = vsel %vm1458_vm1, %v4765_v32, %v4772_v48  ;;  %v4768_v53 = vrot.slane %v4749_v45, 4 }
0x1581   : > { %v5012_v57 = vsel %vm2008_vm3, %v4968_v49, 0  ;;  %v4966_v42 = vpack.c.bf16 %v4767_v50, %v4767_v50  ;;  %v4969_v56 = vpack.c.bf16 %v4773_v52, %v4773_v52 }
0x1582   : > { %5021 = vmatpush.bf16.msrb.mxu3 %v5012_v57  ;;  %v4769_v31 = vsel %vm1458_vm1, %v4761_v41, %v4768_v53 }
0x1583   : > { %v4974_v58 = vsel %vm2008_vm3, %v4966_v42, 0  ;;  %v5031_v59 = vsel %vm2008_vm3, %v4969_v56, 0  ;;  %v4967_v60 = vpack.c.bf16 %v4769_v31, %v4769_v31 }
0x1584   : > { %4983 = vmatpush.bf16.msrb.mxu1 %v4974_v58  ;;  %5040 = vmatpush.bf16.msra.mxu0 %v5031_v59 }
0x1585   : > { %v4993_v54 = vsel %vm2008_vm3, %v4967_v60, 0 }
0x1586   : > { %5002 = vmatpush.bf16.msrb.mxu2 %v4993_v54 }
0x15c0   : > { %v4898_v43 = vpop.xlane.xlu0 %4897 }
0x15c1   : > { %6433 = vrcp.f32 %v4898_v43  ;;  %v4943_v4 = vand.u32 2147483648, %v4898_v43  ;;  %v4941_v6 = vand.u32 2147483647, %v4898_v43  ;;  %vm4937_vm10 = vweird.f32 %v4898_v43 }
0x15c3   : > { %v4895_v63 = vpop.xlane.xlu2 %4894  ;;  %v4944_v11 = vor.u32 1.1754944e-38, %v4943_v4  ;;  %vm4942_vm12 = vcmp.eq.f32.partialorder %v4941_v6, 8.507059e+37 }
0x15c4   : > { %6435 = vrcp.f32 %v4895_v63  ;;  %v4928_v12 = vand.u32 2147483648, %v4895_v63  ;;  %v4926_v15 = vand.u32 2147483647, %v4895_v63  ;;  %vm4922_vm13 = vweird.f32 %v4895_v63 }
0x15c6   : > { %v4929_v24 = vor.u32 1.1754944e-38, %v4928_v12  ;;  %vm4927_vm4 = vcmp.eq.f32.partialorder %v4926_v15, 8.507059e+37 }
0x15c7   : > { %v6434_v61 = vpop.eup %6433 }
0x15c8   : > { %v4933_v62 = vmul.f32 %v6434_v61, %v4898_v43  ;;  %v4892_v0 = vpop.xlane.xlu1 %4891  ;;  %vm4938_vm7 = vweird.f32 %v6434_v61 }
0x15c9   : > { %6437 = vrcp.f32 %v4892_v0  ;;  %vm4939_vm3 = vmor %vm4937_vm10, %vm4938_vm7  ;;  %v4913_v28 = vand.u32 2147483648, %v4892_v0  ;;  %v4911_v16 = vand.u32 2147483647, %v4892_v0  ;;  %vm4907_vm6 = vweird.f32 %v4892_v0 }
0x15ca   : > { %v6436_v1 = vpop.eup %6435  ;;  %v4934_v55 = vsub.f32 1.0, %v4933_v62 }
0x15cb   : > { %v4918_v40 = vmul.f32 %v6436_v1, %v4895_v63  ;;  %vm4923_vm11 = vweird.f32 %v6436_v1  ;;  %v4914_v37 = vor.u32 1.1754944e-38, %v4913_v28  ;;  %vm4912_vm10 = vcmp.eq.f32.partialorder %v4911_v16, 8.507059e+37 }
0x15cc   : > { %v4935_v47 = vmul.f32 %v6434_v61, %v4934_v55  ;;  %vm4924_vm15 = vmor %vm4922_vm13, %vm4923_vm11 }
0x15cd   : > { %v4919_v2 = vsub.f32 1.0, %v4918_v40 }
0x15ce   : > { %v4936_v8 = vadd.f32 %v6434_v61, %v4935_v47 }
0x15cf   : > { %v6438_v9 = vpop.eup %6437  ;;  %v4920_v14 = vmul.f32 %v6436_v1, %v4919_v2 }
0x15d0   : > { %v4940_v13 = vsel %vm4939_vm3, %v6434_v61, %v4936_v8  ;;  %v4903_v18 = vmul.f32 %v6438_v9, %v4892_v0  ;;  %v4901_v19 = vpop.xlane.xlu2 %4900  ;;  %vm4908_vm5 = vweird.f32 %v6438_v9 }
0x15d1   : > { %v4945_v21 = vsel %vm4942_vm12, %v4944_v11, %v4940_v13  ;;  %v4921_v5 = vadd.f32 %v6436_v1, %v4920_v14  ;;  %6439 = vrcp.f32 %v4901_v19  ;;  %vm4909_vm7 = vmor %vm4907_vm6, %vm4908_vm5  ;;  %v4956_v46 = vand.u32 2147483647, %v4901_v19 }
0x15d2   : > { %v4946_v23 = vmul.f32 %v8311_v7, %v4945_v21  ;;  %v4904_v26 = vsub.f32 1.0, %v4903_v18  ;;  %vm4952_vm11 = vweird.f32 %v4901_v19 }
0x15d3   : > { %v4925_v27 = vsel %vm4924_vm15, %v6436_v1, %v4921_v5  ;;  %vm4957_vm13 = vcmp.eq.f32.partialorder %v4956_v46, 8.507059e+37 }
0x15d4   : > { %v4930_v29 = vsel %vm4927_vm4, %v4929_v24, %v4925_v27  ;;  %v4905_v30 = vmul.f32 %v6438_v9, %v4904_v26  ;;  %v4964_v33 = vpack.c.bf16 %v4946_v23, %v4946_v23  ;;  %v5206_v31 = vsel %vm1816_vm2, %v4946_v23, 0.0 }
0x15d5   : > { %v4931_v32 = vmul.f32 %v8315_v17, %v4930_v29  ;;  %v4958_v17 = vand.u32 2147483648, %v4901_v19 }
0x15d6   : > { %v4906_v34 = vadd.f32 %v6438_v9, %v4905_v30  ;;  %6011 = vmatmul.msk.bf16.vlgmr.msrb.gmra.mxu3 %vm1816_vm2, %v4964_v33 }
0x15d7   : > { %v6440_v36 = vpop.eup %6439  ;;  %v4963_v7 = vpack.c.bf16 %v4931_v32, %v4931_v32  ;;  %v5204_v52 = vsel %vm1816_vm2, %v4931_v32, 0.0  ;;  %v4959_v42 = vor.u32 1.1754944e-38, %v4958_v17 }
0x15d8   : > { %v4910_v10 = vsel %vm4909_vm7, %v6438_v9, %v4906_v34  ;;  %v4948_v41 = vmul.f32 %v6440_v36, %v4901_v19  ;;  %vm4953_vm3 = vweird.f32 %v6440_v36 }
0x15d9   : > { %v4915_v44 = vsel %vm4912_vm10, %v4914_v37, %v4910_v10  ;;  %6010 = vmatmul.msk.bf16.vlgmr.msrb.gmra.mxu2 %vm1816_vm2, %v4963_v7  ;;  %vm4954_vm12 = vmor %vm4952_vm11, %vm4953_vm3 }
0x15da   : > { %v4916_v20 = vmul.f32 %v8319_v35, %v4915_v44  ;;  %v4949_v45 = vsub.f32 1.0, %v4948_v41 }
0x15dc   : > { %v5203_v48 = vsel %vm1816_vm2, %v4916_v20, 0.0  ;;  %v4950_v49 = vmul.f32 %v6440_v36, %v4949_v45  ;;  %v4962_v50 = vpack.c.bf16 %v4916_v20, %v4916_v20 }
0x15dd   : > { %v5205_v57 = vadd.f32 %v5204_v52, %v5203_v48 }
0x15de   : > { %v4951_v53 = vadd.f32 %v6440_v36, %v4950_v49  ;;  %6009 = vmatmul.msk.bf16.vlgmr.msrb.gmra.mxu1 %vm1816_vm2, %v4962_v50 }
0x15df   : > { %v5207_v59 = vadd.f32 %v5206_v31, %v5205_v57 }
0x15e0   : > { %v4955_v56 = vsel %vm4954_vm12, %v6440_v36, %v4951_v53 }
0x15e1   : > { %v4960_v35 = vsel %vm4957_vm13, %v4959_v42, %v4955_v56 }
0x15e2   : > { %v4961_v58 = vmul.f32 %v8323_v39, %v4960_v35 }
0x15e4   : > { %v4965_v60 = vpack.c.bf16 %v4961_v58, %v4961_v58  ;;  %v5208_v54 = vsel %vm1816_vm2, %v4961_v58, 0.0 }
0x15e5   : > { %v5209_v43 = vadd.f32 %v5208_v54, %v5207_v59 }
0x15e6   : > { %6012 = vmatmul.msk.bf16.vlgmr.msra.gmra.mxu0 %vm1816_vm2, %v4965_v60 }
0x15e7   : > { %v5210_v63 = vmul.f32 %v5209_v43, %v7863_v51 }
0x15e9   : > { %6022 = vst.msk [vmem:[%s7866_s13 + $0x8] sm:$0xff] %vm1816_vm2, %v5210_v63 }
0x1659   : > { %v5023_v61 = vpop.f32.mrf.mxu3 }
0x165a   : > { %v5046_v0 = vrot.slane %v5023_v61, 4 }
0x165b   : > { %v4985_v62 = vpop.f32.mrf.mxu1 }
0x165c   : > { %v5048_v1 = vrot.slane %v4985_v62, 4  ;;  %v5004_v55 = vpop.f32.mrf.mxu2  ;;  %v5047_v39 = vsel %vm1458_vm1, %v5046_v0, %v4985_v62 }
0x165d   : > { %v5060_v47 = vrot.slane %v5004_v55, 4  ;;  %v5053_v2 = vperm.slane %v5047_v39, %v7418_v25 }
0x165e   : > { %v5049_v4 = vsel %vm1458_vm1, %v5023_v61, %v5048_v1 }
0x165f   : > { %v5057_v40 = vperm.slane %v5049_v4, %v7418_v25  ;;  %v5072_v18 = vrot.slane %v5053_v2, 4 }
0x1661   : > { %v5025_v6 = vpop.f32.mrf.mxu3  ;;  %v5084_v14 = vrot.slane %v5057_v40, 4 }
0x1662   : > { %v6114_v6 = vld [vmem:[%s8639_s12 + $0x18] sm:$0xff] }
0x1663   : > { %v4987_v8 = vpop.f32.mrf.mxu1  ;;  %v5042_v12 = vpop.f32.mrf.mxu0  ;;  %5196 = vmatpush.bf16.msra.mxu1 %v6114_v6 }
0x1664   : > { %v5058_v51 = vrot.slane %v5042_v12, 4  ;;  %v5061_v9 = vsel %vm1458_vm1, %v5042_v12, %v5060_v47  ;;  %v5006_v11 = vpop.f32.mrf.mxu2 }
0x1665   : > { %v5069_v15 = vperm.slane %v5061_v9, %v7418_v25 }
0x1666   : > { %v5059_v13 = vsel %vm1458_vm1, %v5058_v51, %v5004_v55 }
0x1667   : > { %v5065_v19 = vperm.slane %v5059_v13, %v7418_v25  ;;  %v5082_v21 = vrot.slane %v5069_v15, 4  ;;  %v5085_v5 = vsel %vm1458_vm1, %v5069_v15, %v5084_v14  ;;  %v6355_v15 = vld [vmem:[#allocation7 + $0x1] ss:$0 sm:$0xff] }
0x1668   : > { %v5093_v23 = vperm.slane %v5085_v5, %v7427_v38 }
0x1669   : > { %v5070_v24 = vrot.slane %v5065_v19, 4  ;;  %v5073_v26 = vsel %vm1458_vm1, %v5065_v19, %v5072_v18  ;;  %v5083_v27 = vsel %vm1458_vm1, %v5082_v21, %v5057_v40 }
0x166a   : > { %v5081_v28 = vperm.slane %v5073_v26, %v7427_v38  ;;  %v5089_v29 = vperm.slane %v5083_v27, %v7427_v38  ;;  %v5100_v30 = vrot.slane %v5093_v23, 4 }
0x166b   : > { %v5071_v16 = vsel %vm1458_vm1, %v5070_v24, %v5053_v2  ;;  %v5044_v32 = vpop.f32.mrf.mxu0  ;;  %v6113_v2 = vld [vmem:[%s8639_s12 + $0x10] sm:$0xff] }
0x166c   : > { %v5077_v33 = vperm.slane %v5071_v16, %v7427_v38  ;;  %v5096_v34 = vrot.slane %v5081_v28, 4  ;;  %v5098_v36 = vrot.slane %v5089_v29, 4  ;;  %v5101_v37 = vsel %vm1458_vm1, 0.0, %v5100_v30  ;;  %5197 = vmatpush.bf16.msra.mxu1 %v6113_v2  ;;  %v6120_v16 = vld [vmem:[%s8644_s29 + $0x38] sm:$0xff] }
0x166d   : > { %v5113_v7 = vsel %vm1458_vm1, %v5100_v30, %v5089_v29  ;;  %v5118_v10 = vrot.slane %v5101_v37, 4  ;;  %v6116_v29 = vld [vmem:[%s8643_s20 + $0x18] sm:$0xff]  ;;  %v6115_v30 = vld [vmem:[%s8643_s20 + $0x10] sm:$0xff]  ;;  %5334 = vmatpush.bf16.msra.mxu3 %v6120_v16 }
0x166e   : > { %v5094_v41 = vrot.slane %v5077_v33, 4  ;;  %v5097_v44 = vsel %vm1458_vm1, 0.0, %v5096_v34  ;;  %v5099_v20 = vsel %vm1458_vm1, 0.0, %v5098_v36  ;;  %v5117_v45 = vperm.slane %v5113_v7, %v7418_v25  ;;  %5291 = vmatpush.bf16.msra.mxu2 %v6116_v29 }
0x166f   : > { %v5107_v46 = vrot.slane %v5097_v44, 4  ;;  %v5102_v17 = vsel %vm1458_vm1, %v5096_v34, %v5077_v33  ;;  %v5119_v48 = vsel %vm1458_vm1, %v5118_v10, %v5099_v20  ;;  %v6119_v33 = vld [vmem:[%s8644_s29 + $0x30] sm:$0xff]  ;;  %v6356_v20 = vld [vmem:[#allocation8 + $0x1] ss:$0 sm:$0xff] }
0x1670   : > { %v5095_v49 = vsel %vm1458_vm1, 0.0, %v5094_v41  ;;  %v5106_v50 = vperm.slane %v5102_v17, %v7418_v25  ;;  %v5123_v52 = vperm.slane %v5119_v48, %v7418_v25  ;;  %v5138_v53 = vrot.slane %v5117_v45, 4 }
0x1671   : > { %v5108_v57 = vsel %vm1458_vm1, %v5107_v46, %v5095_v49  ;;  %5335 = vmatpush.bf16.msra.mxu3 %v6119_v33  ;;  %v6357_v46 = vld [vmem:[#allocation10 + $0x1] ss:$0 sm:$0xff] }
0x1672   : > { %v5112_v42 = vperm.slane %v5108_v57, %v7418_v25  ;;  %v5126_v56 = vrot.slane %v5106_v50, 4  ;;  %v5139_v35 = vsel %vm1458_vm1, %v5123_v52, %v5138_v53  ;;  %v5136_v31 = vrot.slane %v5123_v52, 4  ;;  %5292 = vmatpush.bf16.msra.mxu2 %v6115_v30  ;;  %v6118_v52 = vld [vmem:[%s8644_s29 + $0x28] sm:$0xff]  ;;  %v6117_v53 = vld [vmem:[%s8644_s29 + $0x20] sm:$0xff] }
0x1673   : > { %v5147_v58 = vperm.slane %v5139_v35, %v7427_v38  ;;  %v6358_v57 = vld [vmem:[#allocation11 + $0x1] ss:$0 sm:$0xff] }
0x1674   : > { %v5127_v59 = vsel %vm1458_vm1, %v5112_v42, %v5126_v56  ;;  %v5124_v60 = vrot.slane %v5112_v42, 4  ;;  %v5137_v54 = vsel %vm1458_vm1, %v5136_v31, %v5117_v45 }
0x1675   : > { %v5135_v43 = vperm.slane %v5127_v59, %v7427_v38  ;;  %v5152_v63 = vrot.slane %v5147_v58, 4  ;;  %v5143_v61 = vperm.slane %v5137_v54, %v7427_v38  ;;  %5336 = vmatpush.bf16.msra.mxu3 %v6118_v52  ;;  %v6359_v59 = vld [vmem:[#allocation13 + $0x1] ss:$0 sm:$0xff] }
0x1676   : > { %v5125_v25 = vsel %vm1458_vm1, %v5124_v60, %v5106_v50 }
0x1677   : > { %v5153_v62 = vsel %vm1458_vm1, %v5152_v63, %v5135_v43  ;;  %v5131_v0 = vperm.slane %v5125_v25, %v7427_v38  ;;  %v5148_v1 = vrot.slane %v5143_v61, 4  ;;  %v5154_v40 = vrot.slane %v5135_v43, 4 }
0x1678   : > { %5161 = vrot.lane.b32.xlu0 %v5153_v62, %s8640_s14  ;;  %s8646_s14 = sld [smem:[#allocation65_spill]] }
0x1679   : > { %v5150_v55 = vrot.slane %v5131_v0, 4  ;;  %v5149_v4 = vsel %vm1458_vm1, %v5148_v1, %v5131_v0  ;;  %v5155_v47 = vsel %vm1458_vm1, %v5147_v58, %v5154_v40  ;;  %5337 = vmatpush.bf16.msra.mxu3 %v6117_v53 }
0x167b   : > { %v5151_v39 = vsel %vm1458_vm1, %v5143_v61, %v5150_v55 }
0x167c   : > { %5157 = vrot.lane.b32.xlu2 %v5151_v39, %s8641_s17 }
0x167e   : > { %s5479_s7 = scalar_lea.hbm %s8646_s14, %s6123_s4 }
0x167f   : > { %s5482_s10 = sshll.u32 %s5479_s7, 4  ;;  %s5483_s10 = int_to_ptr.hbm [resolvable:$true] %s5482_s10 }
0x1684   : > { %5165 = vrot.lane.b32.xlu2 %v5155_v47, %s8642_s19 }
0x16d6   : > { %v5158_v38 = vpop.permute.xlu2 %5157 }
0x16d7   : > { %v5168_v8 = vsel %vm1816_vm2, %v5149_v4, %v5158_v38 }
0x16de   : > { %v5166_v51 = vpop.permute.xlu2 %5165 }
0x16ea   : > { %v5162_v12 = vpop.permute.xlu0 %5161 }
0x16eb   : > { %v5169_v9 = vsel %vm2205_vm8, %v5168_v8, %v5162_v12 }
0x16ec   : > { %v5170_v11 = vsel %vm2207_vm9, %v5169_v9, %v5166_v51  ;;  %v6360_v51 = vld [vmem:[#allocation14 + $0x1] ss:$0 sm:$0xff] }
0x16ed   : > { %v5171_v14 = vpack.c.bf16 %v5170_v11, %v5170_v11 }
0x16ef   : > { %6021 = vmatmul.msk.bf16.vlgmr.msra.gmra.mxu1 %vm1374_vm0, %v5171_v14  ;;  %v6361_v14 = vld [vmem:[#allocation16 + $0x1] ss:$0 sm:$0xff] }
0x176c   : > { %v5199_v13 = vpop.f32.mrf.mxu1 }
0x176d   : > { %v5200_v18 = vadd.f32 %v6355_v15, %v5199_v13 }
0x176f   : > { %v5213_v19 = vadd.f32 %v5200_v18, %v8197_v22 }
0x1771   : > { %v5218_v21 = vsel %vm1374_vm0, %v5213_v19, 0.0 }
0x1772   : > { %5219 = vadd.xlane.f32.xlu1 %v5218_v21 }
0x1774   : > { %v5201_v5 = vpop.f32.mrf.mxu1 }
0x17e5   : > { %v5220_v23 = vpop.xlane.xlu1 %5219 }
0x17e6   : > { %v5221_v24 = vmul.f32 %v5220_v23, %v7659_v3 }
0x17e8   : > { %v5222_v26 = vsub.f32 %v5213_v19, %v5221_v24 }
0x17ea   : > { %v5223_v27 = vmul.f32 %v5222_v26, %v5222_v26 }
0x17ec   : > { %v5224_v28 = vsel %vm1374_vm0, %v5223_v27, 0.0  ;;  %v6121_v27 = vld [vmem:[%s8592_s8] sm:$0xff] }
0x17ed   : > { %5225 = vadd.xlane.f32.xlu2 %v5224_v28 }
0x1860   : > { %v5226_v32 = vpop.xlane.xlu2 %5225 }
0x1861   : > { %v5227_v22 = vmul.f32 %v5226_v32, %v7659_v3 }
0x1863   : > { %v5228_v34 = vadd.f32 1e-05, %v5227_v22 }
0x1865   : > { %6441 = vrsqrt.f32 %v5228_v34  ;;  %vm5235_vm2 = vweird.f32 %v5228_v34 }
0x186b   : > { %v6442_v36 = vpop.eup %6441 }
0x186c   : > { %v5230_v37 = vmul.f32 %v6442_v36, %v5228_v34  ;;  %vm5236_vm1 = vweird.f32 %v6442_v36 }
0x186d   : > { %vm5237_vm8 = vmor %vm5235_vm2, %vm5236_vm1 }
0x186e   : > { %v5231_v7 = vmul.f32 %v6442_v36, %v5230_v37  ;;  %v6362_v37 = vld [vmem:[%s8645_s5] ss:$0 sm:$0xff]  ;;  %s6794_s5 = sshra.s32 %s5483_s10, 4  ;;  %s6795_s5 = int_to_ptr.hbm [resolvable:$true] %s6794_s5 }
0x186f   : > { %s6796_s6 = scalar_lea.hbm %s6795_s5, 16  ;;  %p6801_p7 = scmp.lt.s32.totalorder %s6795_s5, %s8646_s14 }
0x1870   : > { %v5232_v10 = vmul.f32 0.5, %v5231_v7  ;;  %p6797_p9 = scmp.ne.s32.totalorder %s6795_s5, %s6796_s6 }
0x1872   : > { %v5233_v41 = vsub.f32 1.5, %v5232_v10  ;;  %v6363_v10 = vld [vmem:[#allocation17] ss:$0 sm:$0xff]  ;;  %p6798_p12 = pnand %p6797_p9, %p7188_p5 }
0x1874   : > { %v5234_v44 = vmul.f32 %v6442_v36, %v5233_v41  ;;  %p6799_p0 = pneg %p6798_p12 }
0x1876   : > { %v5238_v45 = vsel %vm5237_vm8, %v6442_v36, %v5234_v44 }
0x1877   : > { %v5239_v17 = vmul.f32 %v5238_v45, %v5222_v26  ;;  %v6122_v26 = vld [vmem:[%s8592_s8 + $0x8] sm:$0xff]  ;;  %s6800_s8 = scalar_lea.hbm %s8646_s14, 32 }
0x1878   : > { %5440 = vmatpush.bf16.msrb.mxu0 %v6122_v26  ;;  %p6802_p8 = scmp.lt.s32.totalorder %s6800_s8, %s6796_s6 }
0x1879   : > { %v5243_v48 = vmul.f32 %v6356_v20, %v5239_v17 }
0x187a   : > { %p6803_p11 = por %p6802_p8, %p6801_p7 }
0x187b   : > { %v5247_v49 = vadd.f32 %v6357_v46, %v5243_v48 }
0x187c   : > { %5441 = vmatpush.bf16.msrb.mxu0 %v6121_v27  ;;  %p6804_p13 = pnand %p6803_p11, %p6799_p0 }
0x187d   : > { %v5266_v50 = vpack.c.bf16 %v5247_v49, %v5247_v49 }
0x187f   : > { %6043 = vmatmul.msk.bf16.vlgmr.msra.gmra.mxu2 %vm1374_vm0, %v5266_v50 }
0x1902   : > { %v5294_v42 = vpop.f32.mrf.mxu2 }
0x1903   : > { %v5295_v56 = vadd.f32 %v6358_v57, %v5294_v42 }
0x1905   : > { %v5298_v35 = vmax.f32 %v5295_v56, 0.0 }
0x1907   : > { %v5299_v31 = vpack.c.bf16 %v5298_v35, %v5298_v35 }
0x1909   : > { %6060 = vmatmul.msk.bf16.vlgmr.msra.gmra.mxu3 %vm3308_vm14, %v5299_v31 }
0x190a   : > { %v5296_v58 = vpop.f32.mrf.mxu2 }
0x198c   : > { %v5339_v60 = vpop.f32.mrf.mxu3 }
0x198d   : > { %v5340_v54 = vadd.f32 %v6359_v59, %v5339_v60 }
0x198f   : > { %v5343_v43 = vadd.f32 %v5340_v54, %v5247_v49 }
0x1991   : > { %v5348_v63 = vsel %vm1374_vm0, %v5343_v43, 0.0 }
0x1992   : > { %5349 = vadd.xlane.f32.xlu0 %v5348_v63 }
0x1994   : > { %v5341_v61 = vpop.f32.mrf.mxu3 }
0x1a05   : > { %v5350_v25 = vpop.xlane.xlu0 %5349 }
0x1a06   : > { %v5351_v62 = vmul.f32 %v5350_v25, %v7659_v3 }
0x1a08   : > { %v5352_v0 = vsub.f32 %v5343_v43, %v5351_v62 }
0x1a0a   : > { %v5353_v1 = vmul.f32 %v5352_v0, %v5352_v0 }
0x1a0c   : > { %v5354_v55 = vsel %vm1374_vm0, %v5353_v1, 0.0 }
0x1a0d   : > { %5355 = vadd.xlane.f32.xlu1 %v5354_v55 }
0x1a80   : > { %v5356_v4 = vpop.xlane.xlu1 %5355 }
0x1a81   : > { %v5357_v39 = vmul.f32 %v5356_v4, %v7659_v3 }
0x1a83   : > { %v5358_v40 = vadd.f32 1e-05, %v5357_v39 }
0x1a85   : > { %6443 = vrsqrt.f32 %v5358_v40  ;;  %vm5365_vm14 = vweird.f32 %v5358_v40 }
0x1a8b   : > { %v6444_v47 = vpop.eup %6443 }
0x1a8c   : > { %v5360_v6 = vmul.f32 %v6444_v47, %v5358_v40  ;;  %vm5366_vm9 = vweird.f32 %v6444_v47 }
0x1a8d   : > { %vm5367_vm15 = vmor %vm5365_vm14, %vm5366_vm9 }
0x1a8e   : > { %v5361_v2 = vmul.f32 %v6444_v47, %v5360_v6 }
0x1a90   : > { %v5362_v38 = vmul.f32 0.5, %v5361_v2 }
0x1a92   : > { %v5363_v8 = vsub.f32 1.5, %v5362_v38 }
0x1a94   : > { %v5364_v12 = vmul.f32 %v6444_v47, %v5363_v8 }
0x1a96   : > { %v5368_v9 = vsel %vm5367_vm15, %v6444_v47, %v5364_v12 }
0x1a97   : > { %v5369_v11 = vmul.f32 %v5368_v9, %v5352_v0 }
0x1a99   : > { %v5373_v15 = vmul.f32 %v6360_v51, %v5369_v11 }
0x1a9b   : > { %v5377_v13 = vadd.f32 %v6361_v14, %v5373_v15 }
0x1a9d   : > { %v5380_v18 = vsel %vm1374_vm0, %v5377_v13, 0.0 }
0x1a9e   : > { %5381 = vadd.xlane.f32.xlu1 %v5380_v18 }
0x1b11   : > { %v5382_v19 = vpop.xlane.xlu1 %5381 }
0x1b12   : > { %v5383_v21 = vmul.f32 %v5382_v19, %v7659_v3 }
0x1b14   : > { %v5384_v5 = vsub.f32 %v5377_v13, %v5383_v21 }
0x1b16   : > { %v5385_v23 = vmul.f32 %v5384_v5, %v5384_v5 }
0x1b18   : > { %v5386_v24 = vsel %vm1374_vm0, %v5385_v23, 0.0 }
0x1b19   : > { %5387 = vadd.xlane.f32.xlu1 %v5386_v24 }
0x1b8c   : > { %v5388_v28 = vpop.xlane.xlu1 %5387 }
0x1b8d   : > { %v5389_v29 = vmul.f32 %v5388_v28, %v7659_v3 }
0x1b8f   : > { %v5390_v30 = vadd.f32 1e-05, %v5389_v29 }
0x1b91   : > { %6445 = vrsqrt.f32 %v5390_v30  ;;  %vm5397_vm5 = vweird.f32 %v5390_v30 }
0x1b97   : > { %v6446_v16 = vpop.eup %6445 }
0x1b98   : > { %v5392_v32 = vmul.f32 %v6446_v16, %v5390_v30  ;;  %vm5398_vm4 = vweird.f32 %v6446_v16 }
0x1b99   : > { %vm5399_vm6 = vmor %vm5397_vm5, %vm5398_vm4 }
0x1b9a   : > { %v5393_v22 = vmul.f32 %v6446_v16, %v5392_v32 }
0x1b9c   : > { %v5394_v33 = vmul.f32 0.5, %v5393_v22 }
0x1b9e   : > { %v5395_v34 = vsub.f32 1.5, %v5394_v33 }
0x1ba0   : > { %v5396_v36 = vmul.f32 %v6446_v16, %v5395_v34 }
0x1ba2   : > { %v5400_v7 = vsel %vm5399_vm6, %v6446_v16, %v5396_v36 }
0x1ba3   : > { %v5401_v41 = vmul.f32 %v5400_v7, %v5384_v5 }
0x1ba5   : > { %v5405_v3 = vmul.f32 %v6362_v37, %v5401_v41 }
0x1ba7   : > { %v5409_v44 = vadd.f32 %v6363_v10, %v5405_v3 }
0x1ba9   : > { %v5410_v20 = vpack.c.bf16 %v5409_v44, %v5409_v44 }
0x1bab   : > { %6069 = vmatmul.msk.bf16.vlgmr.msrb.gmra.mxu0 %vm1374_vm0, %v5410_v20 }
0x1bac   : > { %6807 = shalt.err (!%p6804_p13)
}
0x1bad   : > { %s6959_s9 = smov 128   ;;  %s8648_s13 = sld [smem:[#allocation64_spill]]  ;;  %v6364_v45 = vld [vmem:[#allocation19] ss:$0 sm:$0xff] }
0x1bae   : > { %6169 = dma.vmem_to_hbm [thread:$0]  (%p7188_p5), %s5481_s2, 256, %s5483_s10, %s5454_s3, %s6959_s9, %s6959_s9, %s8641_s17  }
0x1baf   : > { %s6072_s4 = sshll.u32 %s7171_s0, 3  ;;  %s5777_s7 = sshll.u32 %s7857_s28, 3 }
0x1bb0   : > { %s1306_s5 = scalar_lea.vmem [#allocation20], %s5777_s7  ;;  %s5449_s12 = scalar_lea.sflag [#allocation4], %s7857_s28 }
0x1bb1   : > { %s5466_s8 = sshll.u32 %s1306_s5, 4  ;;  %s5467_s8 = int_to_ptr.vmem [resolvable:$true] %s5466_s8 }
0x1bb3   : > { %s5464_s11 = scalar_lea.hbm %s8648_s13, %s6072_s4  ;;  %s6828_s9 = scalar_lea.hbm %s8648_s13, 16 }
0x1bb4   : > { %s5468_s6 = sshll.u32 %s5464_s11, 4  ;;  %s5469_s6 = int_to_ptr.hbm [resolvable:$true] %s5468_s6 }
0x1bb5   : > { %s6822_s14 = sshra.s32 %s5469_s6, 4  ;;  %s6823_s14 = int_to_ptr.hbm [resolvable:$true] %s6822_s14 }
0x1bb6   : > { %s6824_s15 = scalar_lea.hbm %s6823_s14, 8  ;;  %p6829_p4 = scmp.lt.s32.totalorder %s6823_s14, %s8648_s13 }
0x1bb7   : > { %p6825_p1 = scmp.ne.s32.totalorder %s6823_s14, %s6824_s15  ;;  %p6830_p10 = scmp.lt.s32.totalorder %s6828_s9, %s6824_s15 }
0x1bb9   : > { %p6826_p2 = pnand %p6825_p1, %p7188_p5  ;;  %p6831_p9 = por %p6830_p10, %p6829_p4 }
0x1bbb   : > { %p6827_p3 = pneg %p6826_p2 }
0x1bbd   : > { %p6832_p12 = pnand %p6831_p9, %p6827_p3 }
0x1c28   : > { %v5443_v46 = vpop.f32.mrf.mxu0 }
0x1c29   : > { %v5444_v17 = vadd.f32 %v6364_v45, %v5443_v46 }
0x1c2b   : > { %5447 = vst [vmem:[%s1306_s5] sm:$0xff] %v5444_v17 }
0x1c2c   : > { %6835 = shalt.err (!%p6832_p12)
}
0x1c2d   : > { %6168 = dma.vmem_to_hbm [thread:$0]  (%p7188_p5), %s5467_s8, 128, %s5469_s6, %s5449_s12  }
0x1c30   : > { %v5445_v48 = vpop.f32.mrf.mxu0 }
0x1c31 PF: > { %s8649_s17 = sld [smem:[#allocation68_spill]] }
0x1c32   : > { %s8650_s3 = sld [smem:[#allocation66_spill]] }
0x1c37   : > { %p6235_p0 = scmp.ge.s32.totalorder %s8649_s17, 2 }
0x1c38   : > { %s5497_s11 = sand.u32 1, %s8650_s3  }
0x1c39   : > { %p6207_p7 = pnand %p6235_p0, %p7192_p6  ;;  %s5498_s28 = scalar_lea.sflag [#allocation4], %s5497_s11 }
0x1c3b   : > { %p6208_p8 = pneg %p6207_p7 }
0x1c3d   : > { %6877 = dma.done.wait (%p6208_p8), %s5498_s28, 128  }
0x1c3e   : > { %6879 = vsyncadd (%p6208_p8), %s5498_s28, 4294967168  ;;  %s5508_s15 = scalar_lea.sflag [#allocation22], %s5497_s11 }
0x1c3f   : > { %6881 = dma.done.wait (%p6208_p8), %s5508_s15, 256  }
0x1c40   : > { %6883 = vsyncadd (%p6208_p8), %s5508_s15, 4294967040  ;;  %s8652_s7 = sld [smem:[#allocation69_spill]]  ;;  %s8655_s28 = smov %s6890_s1 }
0x1c41   : > { %s8653_s14 = sld [smem:[#allocation67_spill]] }
0x1c42   : > { %s8654_s2 = sld [smem:[#allocation70_spill]] }
0x1c46   : > { %p93_p5 = scmp.ge.s32.totalorder %s8652_s7, 4  }
0x1c47   : > { %s8656_s1 = smov %s8653_s14 }
0x1c48   :  { %95 = sbr.rel (!%p93_p5) target bundleno = 86 (0x56), region = 329 }
0x1c4d   :  { %5514 = vsyncpa [#allocation3], 1 }
0x1c4e   :  { %5516 = vsyncpa [#allocation3 + $0x1], 1 }
0x1c4f   :  { %5517 = vsyncpa [#allocation6], 1 }
0x1c50   :  { %5518 = vsyncpa [#allocation9], 1 }
0x1c51   :  { %5519 = vsyncpa [#allocation12], 1 }
0x1c52   :  { %5520 = vsyncpa [#allocation15], 1 }
0x1c53   :  { %5521 = vsyncpa [#allocation18], 1 }
0x1c54   :  { %5522 = vsyncpa [#allocation4], 1 }
0x1c55   :  { %5524 = vsyncpa [#allocation4 + $0x1], 1 }
0x1c56   :  { %5525 = vsyncpa [#allocation22], 1 }
0x1c57   :  { %5527 = vsyncpa [#allocation22 + $0x1], 1 }

</bundles_post_ra>
